<compile_context>
chip_gen: v6e
topology: v6e:2x2x1
jax: 0.10.0
libtpu: 0.0.40
codegen_flags: <defaults>
</compile_context>

<pallas_src>
import functools

import jax
import jax.numpy as jnp
from jax.experimental import pallas as pl
from jax.experimental.pallas import tpu as pltpu

PAD = 3      # SpatialGate 7x7 conv padding; kept as a spatial halo on the grid
LANE = 128


def _round_up(v, m):
    return (v + m - 1) // m * m


# ---------------------------------------------------------------------------
# Fused kernel.  x_ref is (Cin, nb*spp): channels on sublanes, the zero-padded
# per-sample (H+6)x(W+6) grid (flattened, lane-padded to `spp`) on lanes.
# ---------------------------------------------------------------------------
def _addressnet_kernel(x_ref, sgw_ref, sgb_ref,
                       w1_ref, b1_ref, w2_ref, b2_ref,
                       w3_ref, b3_ref, w4_ref, b4_ref,
                       w0_ref, b0_ref, wfc1_ref, bfc1_ref, wfc2_ref, bfc2_ref,
                       out_ref, *, wp, spp, nb, pos_offsets):
    f32 = jnp.float32
    x = x_ref[...]                       # (Cin, M), M = nb * spp
    mb = x.shape[1]

    def roll(a, delta):
        # roll(a, delta)[:, m] == a[:, (m + delta) % M]   (XLU lane rotate)
        s = (-delta) % mb
        return a if s == 0 else pltpu.roll(a, shift=s, axis=1)

    # ---------------- SpatialGate: VPU FMAs with scalar weights from SMEM ---
    cmax = jnp.max(x, axis=0, keepdims=True)          # (1, M)
    cmean = jnp.mean(x, axis=0, keepdims=True)        # (1, M)
    logit = jnp.zeros((1, mb), f32)
    for t in range(49):                               # 7x7 taps, zero pad = 3
        delta = (t // 7 - PAD) * wp + (t % 7 - PAD)
        logit = (logit + sgw_ref[0, t] * roll(cmax, delta)
                       + sgw_ref[1, t] * roll(cmean, delta))
    attn = jax.nn.sigmoid(logit + sgb_ref[0, 0])      # (1, M), EUP sigmoid
    xg = x * attn                                     # (Cin, M)

    # ---------------- conv tower: one K-stacked MXU matmul per conv ---------
    def conv3x3_relu(inp, w_ref, b_ref, stride):
        taps = [roll(inp, stride * ((t // 3) * wp + t % 3)) for t in range(9)]
        stacked = jnp.concatenate(taps, axis=0)       # (9*Cin, M)
        out = jnp.dot(w_ref[...], stacked, preferred_element_type=f32)
        return jnp.maximum(out + b_ref[...], 0.0)

    def maxpool2x2(inp, stride):
        out = inp
        for di, dj in ((0, 1), (1, 0), (1, 1)):
            out = jnp.maximum(out, roll(inp, stride * (di * wp + dj)))
        return out

    f1 = conv3x3_relu(xg, w1_ref, b1_ref, 1)                 # conv + relu
    f2 = maxpool2x2(conv3x3_relu(f1, w2_ref, b2_ref, 1), 1)  # conv+relu+pool
    f3 = conv3x3_relu(f2, w3_ref, b3_ref, 2)                 # stride-2 grid
    f4 = maxpool2x2(conv3x3_relu(f3, w4_ref, b4_ref, 2), 2)  # conv+relu+pool

    # -------- flatten (torch NCHW view order) + batched classifier ----------
    cols = []
    for s in range(nb):
        base = s * spp
        parts = [f4[:, base + off:base + off + 1] for off in pos_offsets]
        cols.append(parts[0] if len(parts) == 1
                    else jnp.concatenate(parts, axis=0))       # (n_pos*nch, 1)
    z = cols[0] if nb == 1 else jnp.concatenate(cols, axis=1)  # (n_pos*nch, nb)

    h = jnp.maximum(jnp.dot(w0_ref[...], z, preferred_element_type=f32)
                    + b0_ref[...], 0.0)
    h = jnp.maximum(jnp.dot(wfc1_ref[...], h, preferred_element_type=f32)
                    + bfc1_ref[...], 0.0)
    o = jnp.dot(wfc2_ref[...], h, preferred_element_type=f32) + bfc2_ref[...]

    ob = out_ref.shape[1]                              # single lane-dense store
    if ob == nb:
        out_ref[...] = o
    else:
        out_ref[...] = jnp.concatenate(
            [o, jnp.zeros((o.shape[0], ob - nb), f32)], axis=1)


# ---------------------------------------------------------------------------
# Wrapper: layout prep in XLA (cheap), all compute in one pallas_call.
# ---------------------------------------------------------------------------
def address_net_forward(x_nchw, p):
    """AddressNet forward pass; x in torch NCHW layout -> (N, Ndigits*10)."""
    n, c, h, w = x_nchw.shape
    nch = p['w1'].shape[0]
    hidden = p['fc0_w'].shape[1]
    hidden2 = p['fc1_w'].shape[1]
    n_out = p['fc2_w'].shape[1]

    hp, wp = h + 2 * PAD, w + 2 * PAD
    sp = hp * wp
    spp = _round_up(sp, LANE)               # per-sample flat size, lane aligned

    # conv tower geometry (same arithmetic as calc_output_size in the spec)
    h1, w1_ = h - 2, w - 2
    h2, w2_ = (h1 - 2) // 2, (w1_ - 2) // 2
    h3, w3_ = h2 - 2, w2_ - 2
    h4, w4_ = (h3 - 2) // 2, (w3_ - 2) // 2
    pos_offsets = tuple((PAD + 4 * qh) * wp + (PAD + 4 * qw)
                        for qh in range(h4) for qw in range(w4_))
    n_pos = len(pos_offsets)
    assert n_pos >= 1 and p['fc0_w'].shape[0] == nch * n_pos

    # Circular rolls wrap around the sample-major flat lane axis; they are only
    # correct while everything transitively read from the classifier-consumed
    # f4 positions stays inside the sample's own padded grid.  Assert it.
    gate_reach = PAD * wp + PAD
    conv_reach = 6 * (2 * wp + 2) + 3 * (wp + 1)     # conv-tower forward reach
    assert min(pos_offsets) - gate_reach >= 0
    assert max(pos_offsets) + conv_reach + gate_reach < sp, \
        "roll-shift receptive field would cross a sample boundary"

    # batch tiling: >=2 grid steps whenever batch >= 2 (v7x megacore); cap the
    # per-step sample count so the working set fits v7x's 64 MiB VMEM.
    nb = 1 if n <= 1 else min(16, -(-n // 2))
    n_pad = -(-n // nb) * nb
    nblocks = n_pad // nb
    m_blk = nb * spp

    # ---------------- layout prep (glue) ----------------
    xf = x_nchw.astype(jnp.float32)
    if n_pad != n:
        xf = jnp.concatenate(
            [xf, jnp.zeros((n_pad - n, c, h, w), jnp.float32)], axis=0)
    xf = jnp.pad(xf, ((0, 0), (0, 0), (PAD, PAD), (PAD, PAD)))       # zero halo
    xf = jnp.pad(xf.reshape(n_pad, c, sp), ((0, 0), (0, 0), (0, spp - sp)))
    x_cm = jnp.transpose(xf, (1, 0, 2)).reshape(c, n_pad * spp)      # (C, M)

    def conv_k(wt):          # (Cout, Cin, 3, 3) -> (Cout, 9*Cin), tap-major K
        co, ci = wt.shape[0], wt.shape[1]
        return jnp.transpose(wt, (0, 2, 3, 1)).reshape(co, 9 * ci)

    w0 = jnp.transpose(p['fc0_w'].reshape(nch, n_pos, hidden),
                       (2, 1, 0)).reshape(hidden, n_pos * nch)

    operands = (
        x_cm,
        p['sg_w'].reshape(2, 49),               # SMEM: row 0 = max, row 1 = mean
        p['sg_b'].reshape(1, 1),                # SMEM scalar bias
        conv_k(p['w1']), p['b1'].reshape(nch, 1),
        conv_k(p['w2']), p['b2'].reshape(nch, 1),
        conv_k(p['w3']), p['b3'].reshape(nch, 1),
        conv_k(p['w4']), p['b4'].reshape(nch, 1),
        w0, p['fc0_b'].reshape(hidden, 1),
        p['fc1_w'].T, p['fc1_b'].reshape(hidden2, 1),
        p['fc2_w'].T, p['fc2_b'].reshape(n_out, 1),
    )

    def full_spec(shape):
        return pl.BlockSpec(shape, lambda i: (0,) * len(shape))

    smem_spec = pl.BlockSpec(memory_space=pltpu.MemorySpace.SMEM)
    in_specs = [pl.BlockSpec((c, m_blk), lambda i: (0, i)), smem_spec, smem_spec]
    in_specs += [full_spec(op.shape) for op in operands[3:]]

    # output: one lane-dense block per grid step (width nb when there is a
    # single block, else 128 lanes with the first nb live)
    out_lanes = nb if nblocks == 1 else LANE
    out_specs = pl.BlockSpec((n_out, out_lanes), lambda i: (0, i))

    # working-set-derived VMEM hint (stacked-K operand + activations + input)
    live_rows = 9 * nch + 6 * nch + c + 8
    est_vmem = 4 * (live_rows * m_blk + 2 * 2 * c * m_blk)
    vmem_limit = int(min(100 * 2 ** 20, max(32 * 2 ** 20, 3 * est_vmem)))

    m_total = n_pad * spp
    flops = int(2 * m_total * (49 * 2 + 9 * nch * c + 3 * 9 * nch * nch)
                + 2 * n_pad * (nch * n_pos * hidden + hidden * hidden2
                               + hidden2 * n_out))
    bytes_accessed = int(4 * (sum(int(op.size) for op in operands)
                              + n_out * nblocks * out_lanes))

    kernel = functools.partial(_addressnet_kernel, wp=wp, spp=spp, nb=nb,
                               pos_offsets=pos_offsets)

    out_buf = pl.pallas_call(
        kernel,
        out_shape=jax.ShapeDtypeStruct((n_out, nblocks * out_lanes), jnp.float32),
        grid=(nblocks,),
        in_specs=in_specs,
        out_specs=out_specs,
        compiler_params=pltpu.CompilerParams(
            dimension_semantics=("parallel",),
            vmem_limit_bytes=vmem_limit),
        cost_estimate=pl.CostEstimate(flops=flops,
                                      transcendentals=m_total,
                                      bytes_accessed=bytes_accessed),
    )(*operands)

    out_t = out_buf.reshape(n_out, nblocks, out_lanes)[:, :, :nb]
    out_t = out_t.reshape(n_out, n_pad)[:, :n]
    return jnp.transpose(out_t)


# ---------------- deterministic parameter init ----------------
def init_params(key, C=4, H=16, W=16, Nchannels=16, hidden=32, Ndigits=1):
    def conv_out(hw, k):
        return (hw[0] - k + 1, hw[1] - k + 1)

    s1 = conv_out((H, W), 3)
    s2 = (conv_out(s1, 3)[0] // 2, conv_out(s1, 3)[1] // 2)
    s3 = conv_out(s2, 3)
    s4 = (conv_out(s3, 3)[0] // 2, conv_out(s3, 3)[1] // 2)
    feat = Nchannels * s4[0] * s4[1]

    ks = jax.random.split(key, 16)
    rnd = lambda k, shape: 0.1 * jax.random.normal(k, shape, dtype=jnp.float32)
    return {
        'sg_w': rnd(ks[0], (1, 2, 7, 7)), 'sg_b': rnd(ks[1], (1,)),
        'w1': rnd(ks[2], (Nchannels, C, 3, 3)), 'b1': rnd(ks[3], (Nchannels,)),
        'w2': rnd(ks[4], (Nchannels, Nchannels, 3, 3)), 'b2': rnd(ks[5], (Nchannels,)),
        'w3': rnd(ks[6], (Nchannels, Nchannels, 3, 3)), 'b3': rnd(ks[7], (Nchannels,)),
        'w4': rnd(ks[8], (Nchannels, Nchannels, 3, 3)), 'b4': rnd(ks[9], (Nchannels,)),
        'fc0_w': rnd(ks[10], (feat, hidden)), 'fc0_b': rnd(ks[11], (hidden,)),
        'fc1_w': rnd(ks[12], (hidden, hidden // 2)), 'fc1_b': rnd(ks[13], (hidden // 2,)),
        'fc2_w': rnd(ks[14], (hidden // 2, Ndigits * 10)), 'fc2_b': rnd(ks[15], (Ndigits * 10,)),
    }


# ---------------- pure-JAX reference (for verification only) ----------------
def _conv_ref(x, w, b, padding):
    w_hwio = jnp.transpose(w, (2, 3, 1, 0))
    y = jax.lax.conv_general_dilated(
        x, w_hwio, window_strides=(1, 1),
        padding=[(padding, padding), (padding, padding)],
        dimension_numbers=('NHWC', 'HWIO', 'NHWC'))
    return y + b.reshape(1, 1, 1, -1)


def _maxpool_ref(x):
    n, h, w, c = x.shape
    return x.reshape(n, h // 2, 2, w // 2, 2, c).max(axis=(2, 4))


def reference_forward(x_nchw, p):
    x = jnp.transpose(x_nchw, (0, 2, 3, 1)).astype(jnp.float32)
    mx = jnp.max(x, axis=-1, keepdims=True)
    mn = jnp.mean(x, axis=-1, keepdims=True)
    attn = jax.nn.sigmoid(_conv_ref(jnp.concatenate([mx, mn], -1), p['sg_w'], p['sg_b'], 3))
    x = x * attn
    f1 = jax.nn.relu(_conv_ref(x, p['w1'], p['b1'], 0))
    f2 = _maxpool_ref(jax.nn.relu(_conv_ref(f1, p['w2'], p['b2'], 0)))
    f3 = jax.nn.relu(_conv_ref(f2, p['w3'], p['b3'], 0))
    f4 = _maxpool_ref(jax.nn.relu(_conv_ref(f3, p['w4'], p['b4'], 0)))
    flat = jnp.transpose(f4, (0, 3, 1, 2)).reshape(f4.shape[0], -1)
    h = jax.nn.relu(flat @ p['fc0_w'] + p['fc0_b'])
    h = jax.nn.relu(h @ p['fc1_w'] + p['fc1_b'])
    return h @ p['fc2_w'] + p['fc2_b']


if __name__ == "__main__":
    key = jax.random.PRNGKey(0)
    kx, kp = jax.random.split(key)
    # imshape = (C=4, H=16, W=16), batch = 2  ->  f4 spatial = 1x1, flatten = 16
    x = jax.random.normal(kx, (2, 4, 16, 16), dtype=jnp.float32)
    params = init_params(kp, C=4, H=16, W=16, Nchannels=16, hidden=32, Ndigits=1)

    fwd = jax.jit(address_net_forward)
    out = jax.block_until_ready(fwd(x, params))
    assert out.shape == (2, 10), out.shape

    ref = reference_forward(x, params)
    err = float(jnp.max(jnp.abs(out - ref)))
    if err > 1e-3:
        raise AssertionError(f"Pallas output mismatches JAX reference, max abs err={err}")

    print("KERNEL_OK")
</pallas_src>

<mosaic_0001>
module attributes {stable_mosaic.version = 11 : i64} {
  func.func @_addressnet_kernel(%arg0: i32, %arg1: memref<4x512xf32, #tpu.memory_space<vmem>>, %arg2: memref<2x49xf32, #tpu.memory_space<smem>>, %arg3: memref<1x1xf32, #tpu.memory_space<smem>>, %arg4: memref<16x36xf32, #tpu.memory_space<vmem>>, %arg5: memref<16x1xf32, #tpu.memory_space<vmem>>, %arg6: memref<16x144xf32, #tpu.memory_space<vmem>>, %arg7: memref<16x1xf32, #tpu.memory_space<vmem>>, %arg8: memref<16x144xf32, #tpu.memory_space<vmem>>, %arg9: memref<16x1xf32, #tpu.memory_space<vmem>>, %arg10: memref<16x144xf32, #tpu.memory_space<vmem>>, %arg11: memref<16x1xf32, #tpu.memory_space<vmem>>, %arg12: memref<32x16xf32, #tpu.memory_space<vmem>>, %arg13: memref<32x1xf32, #tpu.memory_space<vmem>>, %arg14: memref<16x32xf32, #tpu.memory_space<vmem>>, %arg15: memref<16x1xf32, #tpu.memory_space<vmem>>, %arg16: memref<10x16xf32, #tpu.memory_space<vmem>>, %arg17: memref<10x1xf32, #tpu.memory_space<vmem>>, %arg18: memref<10x128xf32, #tpu.memory_space<vmem>>) attributes {dimension_semantics = [#tpu.dimension_semantics<parallel>], iteration_bounds = array<i64: 2>, scalar_prefetch = 0 : i64, scratch_operands = 0 : i64, tpu.core_type = #tpu.core_type<tc>, window_params = [{transform_indices = @transform_0, window_bounds = array<i64: 4, 512>}, {transform_indices = @transform_1, window_bounds = array<i64: 2, 49>}, {transform_indices = @transform_2, window_bounds = array<i64: 1, 1>}, {pipeline_mode = #tpu.pipeline_mode<synchronous>, transform_indices = @transform_3, window_bounds = array<i64: 16, 36>}, {pipeline_mode = #tpu.pipeline_mode<synchronous>, transform_indices = @transform_4, window_bounds = array<i64: 16, 1>}, {pipeline_mode = #tpu.pipeline_mode<synchronous>, transform_indices = @transform_5, window_bounds = array<i64: 16, 144>}, {pipeline_mode = #tpu.pipeline_mode<synchronous>, transform_indices = @transform_6, window_bounds = array<i64: 16, 1>}, {pipeline_mode = #tpu.pipeline_mode<synchronous>, transform_indices = @transform_7, window_bounds = array<i64: 16, 144>}, {pipeline_mode = #tpu.pipeline_mode<synchronous>, transform_indices = @transform_8, window_bounds = array<i64: 16, 1>}, {pipeline_mode = #tpu.pipeline_mode<synchronous>, transform_indices = @transform_9, window_bounds = array<i64: 16, 144>}, {pipeline_mode = #tpu.pipeline_mode<synchronous>, transform_indices = @transform_10, window_bounds = array<i64: 16, 1>}, {pipeline_mode = #tpu.pipeline_mode<synchronous>, transform_indices = @transform_11, window_bounds = array<i64: 32, 16>}, {pipeline_mode = #tpu.pipeline_mode<synchronous>, transform_indices = @transform_12, window_bounds = array<i64: 32, 1>}, {pipeline_mode = #tpu.pipeline_mode<synchronous>, transform_indices = @transform_13, window_bounds = array<i64: 16, 32>}, {pipeline_mode = #tpu.pipeline_mode<synchronous>, transform_indices = @transform_14, window_bounds = array<i64: 16, 1>}, {pipeline_mode = #tpu.pipeline_mode<synchronous>, transform_indices = @transform_15, window_bounds = array<i64: 10, 16>}, {pipeline_mode = #tpu.pipeline_mode<synchronous>, transform_indices = @transform_16, window_bounds = array<i64: 10, 1>}, {transform_indices = @transform_17, window_bounds = array<i64: 10, 128>}]} {
    %c0 = arith.constant 0 : index
    %c0_0 = arith.constant 0 : index
    %0 = vector.load %arg1[%c0, %c0_0] : memref<4x512xf32, #tpu.memory_space<vmem>>, vector<4x512xf32>
    %cst = arith.constant dense<0xFF800000> : vector<512xf32>
    %1 = vector.multi_reduction <maximumf>, %0, %cst [0] : vector<4x512xf32> to vector<512xf32>
    %2 = vector.shape_cast %1 : vector<512xf32> to vector<1x512xf32>
    %cst_1 = arith.constant dense<0.000000e+00> : vector<512xf32>
    %3 = vector.multi_reduction <add>, %0, %cst_1 [0] : vector<4x512xf32> to vector<512xf32>
    %4 = vector.shape_cast %3 : vector<512xf32> to vector<1x512xf32>
    %cst_2 = arith.constant 4.000000e+00 : f32
    %5 = vector.broadcast %cst_2 : f32 to vector<1x512xf32>
    %6 = arith.divf %4, %5 : vector<1x512xf32>
    %cst_3 = arith.constant 0.000000e+00 : f32
    %7 = vector.broadcast %cst_3 : f32 to vector<1x512xf32>
    %c0_4 = arith.constant 0 : index
    %c0_5 = arith.constant 0 : index
    %8 = memref.load %arg2[%c0_4, %c0_5] : memref<2x49xf32, #tpu.memory_space<smem>>
    %c69_i32 = arith.constant 69 : i32
    %9 = tpu.dynamic_rotate %2 by %c69_i32 dim 1 : vector<1x512xf32>, i32 -> vector<1x512xf32>
    %10 = vector.broadcast %8 : f32 to vector<1x512xf32>
    %11 = arith.mulf %10, %9 : vector<1x512xf32>
    %12 = arith.addf %7, %11 : vector<1x512xf32>
    %c1 = arith.constant 1 : index
    %c0_6 = arith.constant 0 : index
    %13 = memref.load %arg2[%c1, %c0_6] : memref<2x49xf32, #tpu.memory_space<smem>>
    %c69_i32_7 = arith.constant 69 : i32
    %14 = tpu.dynamic_rotate %6 by %c69_i32_7 dim 1 : vector<1x512xf32>, i32 -> vector<1x512xf32>
    %15 = vector.broadcast %13 : f32 to vector<1x512xf32>
    %16 = arith.mulf %15, %14 : vector<1x512xf32>
    %17 = arith.addf %12, %16 : vector<1x512xf32>
    %c0_8 = arith.constant 0 : index
    %c1_9 = arith.constant 1 : index
    %18 = memref.load %arg2[%c0_8, %c1_9] : memref<2x49xf32, #tpu.memory_space<smem>>
    %c68_i32 = arith.constant 68 : i32
    %19 = tpu.dynamic_rotate %2 by %c68_i32 dim 1 : vector<1x512xf32>, i32 -> vector<1x512xf32>
    %20 = vector.broadcast %18 : f32 to vector<1x512xf32>
    %21 = arith.mulf %20, %19 : vector<1x512xf32>
    %22 = arith.addf %17, %21 : vector<1x512xf32>
    %c1_10 = arith.constant 1 : index
    %c1_11 = arith.constant 1 : index
    %23 = memref.load %arg2[%c1_10, %c1_11] : memref<2x49xf32, #tpu.memory_space<smem>>
    %c68_i32_12 = arith.constant 68 : i32
    %24 = tpu.dynamic_rotate %6 by %c68_i32_12 dim 1 : vector<1x512xf32>, i32 -> vector<1x512xf32>
    %25 = vector.broadcast %23 : f32 to vector<1x512xf32>
    %26 = arith.mulf %25, %24 : vector<1x512xf32>
    %27 = arith.addf %22, %26 : vector<1x512xf32>
    %c0_13 = arith.constant 0 : index
    %c2 = arith.constant 2 : index
    %28 = memref.load %arg2[%c0_13, %c2] : memref<2x49xf32, #tpu.memory_space<smem>>
    %c67_i32 = arith.constant 67 : i32
    %29 = tpu.dynamic_rotate %2 by %c67_i32 dim 1 : vector<1x512xf32>, i32 -> vector<1x512xf32>
    %30 = vector.broadcast %28 : f32 to vector<1x512xf32>
    %31 = arith.mulf %30, %29 : vector<1x512xf32>
    %32 = arith.addf %27, %31 : vector<1x512xf32>
    %c1_14 = arith.constant 1 : index
    %c2_15 = arith.constant 2 : index
    %33 = memref.load %arg2[%c1_14, %c2_15] : memref<2x49xf32, #tpu.memory_space<smem>>
    %c67_i32_16 = arith.constant 67 : i32
    %34 = tpu.dynamic_rotate %6 by %c67_i32_16 dim 1 : vector<1x512xf32>, i32 -> vector<1x512xf32>
    %35 = vector.broadcast %33 : f32 to vector<1x512xf32>
    %36 = arith.mulf %35, %34 : vector<1x512xf32>
    %37 = arith.addf %32, %36 : vector<1x512xf32>
    %c0_17 = arith.constant 0 : index
    %c3 = arith.constant 3 : index
    %38 = memref.load %arg2[%c0_17, %c3] : memref<2x49xf32, #tpu.memory_space<smem>>
    %c66_i32 = arith.constant 66 : i32
    %39 = tpu.dynamic_rotate %2 by %c66_i32 dim 1 : vector<1x512xf32>, i32 -> vector<1x512xf32>
    %40 = vector.broadcast %38 : f32 to vector<1x512xf32>
    %41 = arith.mulf %40, %39 : vector<1x512xf32>
    %42 = arith.addf %37, %41 : vector<1x512xf32>
    %c1_18 = arith.constant 1 : index
    %c3_19 = arith.constant 3 : index
    %43 = memref.load %arg2[%c1_18, %c3_19] : memref<2x49xf32, #tpu.memory_space<smem>>
    %c66_i32_20 = arith.constant 66 : i32
    %44 = tpu.dynamic_rotate %6 by %c66_i32_20 dim 1 : vector<1x512xf32>, i32 -> vector<1x512xf32>
    %45 = vector.broadcast %43 : f32 to vector<1x512xf32>
    %46 = arith.mulf %45, %44 : vector<1x512xf32>
    %47 = arith.addf %42, %46 : vector<1x512xf32>
    %c0_21 = arith.constant 0 : index
    %c4 = arith.constant 4 : index
    %48 = memref.load %arg2[%c0_21, %c4] : memref<2x49xf32, #tpu.memory_space<smem>>
    %c65_i32 = arith.constant 65 : i32
    %49 = tpu.dynamic_rotate %2 by %c65_i32 dim 1 : vector<1x512xf32>, i32 -> vector<1x512xf32>
    %50 = vector.broadcast %48 : f32 to vector<1x512xf32>
    %51 = arith.mulf %50, %49 : vector<1x512xf32>
    %52 = arith.addf %47, %51 : vector<1x512xf32>
    %c1_22 = arith.constant 1 : index
    %c4_23 = arith.constant 4 : index
    %53 = memref.load %arg2[%c1_22, %c4_23] : memref<2x49xf32, #tpu.memory_space<smem>>
    %c65_i32_24 = arith.constant 65 : i32
    %54 = tpu.dynamic_rotate %6 by %c65_i32_24 dim 1 : vector<1x512xf32>, i32 -> vector<1x512xf32>
    %55 = vector.broadcast %53 : f32 to vector<1x512xf32>
    %56 = arith.mulf %55, %54 : vector<1x512xf32>
    %57 = arith.addf %52, %56 : vector<1x512xf32>
    %c0_25 = arith.constant 0 : index
    %c5 = arith.constant 5 : index
    %58 = memref.load %arg2[%c0_25, %c5] : memref<2x49xf32, #tpu.memory_space<smem>>
    %c64_i32 = arith.constant 64 : i32
    %59 = tpu.dynamic_rotate %2 by %c64_i32 dim 1 : vector<1x512xf32>, i32 -> vector<1x512xf32>
    %60 = vector.broadcast %58 : f32 to vector<1x512xf32>
    %61 = arith.mulf %60, %59 : vector<1x512xf32>
    %62 = arith.addf %57, %61 : vector<1x512xf32>
    %c1_26 = arith.constant 1 : index
    %c5_27 = arith.constant 5 : index
    %63 = memref.load %arg2[%c1_26, %c5_27] : memref<2x49xf32, #tpu.memory_space<smem>>
    %c64_i32_28 = arith.constant 64 : i32
    %64 = tpu.dynamic_rotate %6 by %c64_i32_28 dim 1 : vector<1x512xf32>, i32 -> vector<1x512xf32>
    %65 = vector.broadcast %63 : f32 to vector<1x512xf32>
    %66 = arith.mulf %65, %64 : vector<1x512xf32>
    %67 = arith.addf %62, %66 : vector<1x512xf32>
    %c0_29 = arith.constant 0 : index
    %c6 = arith.constant 6 : index
    %68 = memref.load %arg2[%c0_29, %c6] : memref<2x49xf32, #tpu.memory_space<smem>>
    %c63_i32 = arith.constant 63 : i32
    %69 = tpu.dynamic_rotate %2 by %c63_i32 dim 1 : vector<1x512xf32>, i32 -> vector<1x512xf32>
    %70 = vector.broadcast %68 : f32 to vector<1x512xf32>
    %71 = arith.mulf %70, %69 : vector<1x512xf32>
    %72 = arith.addf %67, %71 : vector<1x512xf32>
    %c1_30 = arith.constant 1 : index
    %c6_31 = arith.constant 6 : index
    %73 = memref.load %arg2[%c1_30, %c6_31] : memref<2x49xf32, #tpu.memory_space<smem>>
    %c63_i32_32 = arith.constant 63 : i32
    %74 = tpu.dynamic_rotate %6 by %c63_i32_32 dim 1 : vector<1x512xf32>, i32 -> vector<1x512xf32>
    %75 = vector.broadcast %73 : f32 to vector<1x512xf32>
    %76 = arith.mulf %75, %74 : vector<1x512xf32>
    %77 = arith.addf %72, %76 : vector<1x512xf32>
    %c0_33 = arith.constant 0 : index
    %c7 = arith.constant 7 : index
    %78 = memref.load %arg2[%c0_33, %c7] : memref<2x49xf32, #tpu.memory_space<smem>>
    %c47_i32 = arith.constant 47 : i32
    %79 = tpu.dynamic_rotate %2 by %c47_i32 dim 1 : vector<1x512xf32>, i32 -> vector<1x512xf32>
    %80 = vector.broadcast %78 : f32 to vector<1x512xf32>
    %81 = arith.mulf %80, %79 : vector<1x512xf32>
    %82 = arith.addf %77, %81 : vector<1x512xf32>
    %c1_34 = arith.constant 1 : index
    %c7_35 = arith.constant 7 : index
    %83 = memref.load %arg2[%c1_34, %c7_35] : memref<2x49xf32, #tpu.memory_space<smem>>
    %c47_i32_36 = arith.constant 47 : i32
    %84 = tpu.dynamic_rotate %6 by %c47_i32_36 dim 1 : vector<1x512xf32>, i32 -> vector<1x512xf32>
    %85 = vector.broadcast %83 : f32 to vector<1x512xf32>
    %86 = arith.mulf %85, %84 : vector<1x512xf32>
    %87 = arith.addf %82, %86 : vector<1x512xf32>
    %c0_37 = arith.constant 0 : index
    %c8 = arith.constant 8 : index
    %88 = memref.load %arg2[%c0_37, %c8] : memref<2x49xf32, #tpu.memory_space<smem>>
    %c46_i32 = arith.constant 46 : i32
    %89 = tpu.dynamic_rotate %2 by %c46_i32 dim 1 : vector<1x512xf32>, i32 -> vector<1x512xf32>
    %90 = vector.broadcast %88 : f32 to vector<1x512xf32>
    %91 = arith.mulf %90, %89 : vector<1x512xf32>
    %92 = arith.addf %87, %91 : vector<1x512xf32>
    %c1_38 = arith.constant 1 : index
    %c8_39 = arith.constant 8 : index
    %93 = memref.load %arg2[%c1_38, %c8_39] : memref<2x49xf32, #tpu.memory_space<smem>>
    %c46_i32_40 = arith.constant 46 : i32
    %94 = tpu.dynamic_rotate %6 by %c46_i32_40 dim 1 : vector<1x512xf32>, i32 -> vector<1x512xf32>
    %95 = vector.broadcast %93 : f32 to vector<1x512xf32>
    %96 = arith.mulf %95, %94 : vector<1x512xf32>
    %97 = arith.addf %92, %96 : vector<1x512xf32>
    %c0_41 = arith.constant 0 : index
    %c9 = arith.constant 9 : index
    %98 = memref.load %arg2[%c0_41, %c9] : memref<2x49xf32, #tpu.memory_space<smem>>
    %c45_i32 = arith.constant 45 : i32
    %99 = tpu.dynamic_rotate %2 by %c45_i32 dim 1 : vector<1x512xf32>, i32 -> vector<1x512xf32>
    %100 = vector.broadcast %98 : f32 to vector<1x512xf32>
    %101 = arith.mulf %100, %99 : vector<1x512xf32>
    %102 = arith.addf %97, %101 : vector<1x512xf32>
    %c1_42 = arith.constant 1 : index
    %c9_43 = arith.constant 9 : index
    %103 = memref.load %arg2[%c1_42, %c9_43] : memref<2x49xf32, #tpu.memory_space<smem>>
    %c45_i32_44 = arith.constant 45 : i32
    %104 = tpu.dynamic_rotate %6 by %c45_i32_44 dim 1 : vector<1x512xf32>, i32 -> vector<1x512xf32>
    %105 = vector.broadcast %103 : f32 to vector<1x512xf32>
    %106 = arith.mulf %105, %104 : vector<1x512xf32>
    %107 = arith.addf %102, %106 : vector<1x512xf32>
    %c0_45 = arith.constant 0 : index
    %c10 = arith.constant 10 : index
    %108 = memref.load %arg2[%c0_45, %c10] : memref<2x49xf32, #tpu.memory_space<smem>>
    %c44_i32 = arith.constant 44 : i32
    %109 = tpu.dynamic_rotate %2 by %c44_i32 dim 1 : vector<1x512xf32>, i32 -> vector<1x512xf32>
    %110 = vector.broadcast %108 : f32 to vector<1x512xf32>
    %111 = arith.mulf %110, %109 : vector<1x512xf32>
    %112 = arith.addf %107, %111 : vector<1x512xf32>
    %c1_46 = arith.constant 1 : index
    %c10_47 = arith.constant 10 : index
    %113 = memref.load %arg2[%c1_46, %c10_47] : memref<2x49xf32, #tpu.memory_space<smem>>
    %c44_i32_48 = arith.constant 44 : i32
    %114 = tpu.dynamic_rotate %6 by %c44_i32_48 dim 1 : vector<1x512xf32>, i32 -> vector<1x512xf32>
    %115 = vector.broadcast %113 : f32 to vector<1x512xf32>
    %116 = arith.mulf %115, %114 : vector<1x512xf32>
    %117 = arith.addf %112, %116 : vector<1x512xf32>
    %c0_49 = arith.constant 0 : index
    %c11 = arith.constant 11 : index
    %118 = memref.load %arg2[%c0_49, %c11] : memref<2x49xf32, #tpu.memory_space<smem>>
    %c43_i32 = arith.constant 43 : i32
    %119 = tpu.dynamic_rotate %2 by %c43_i32 dim 1 : vector<1x512xf32>, i32 -> vector<1x512xf32>
    %120 = vector.broadcast %118 : f32 to vector<1x512xf32>
    %121 = arith.mulf %120, %119 : vector<1x512xf32>
    %122 = arith.addf %117, %121 : vector<1x512xf32>
    %c1_50 = arith.constant 1 : index
    %c11_51 = arith.constant 11 : index
    %123 = memref.load %arg2[%c1_50, %c11_51] : memref<2x49xf32, #tpu.memory_space<smem>>
    %c43_i32_52 = arith.constant 43 : i32
    %124 = tpu.dynamic_rotate %6 by %c43_i32_52 dim 1 : vector<1x512xf32>, i32 -> vector<1x512xf32>
    %125 = vector.broadcast %123 : f32 to vector<1x512xf32>
    %126 = arith.mulf %125, %124 : vector<1x512xf32>
    %127 = arith.addf %122, %126 : vector<1x512xf32>
    %c0_53 = arith.constant 0 : index
    %c12 = arith.constant 12 : index
    %128 = memref.load %arg2[%c0_53, %c12] : memref<2x49xf32, #tpu.memory_space<smem>>
    %c42_i32 = arith.constant 42 : i32
    %129 = tpu.dynamic_rotate %2 by %c42_i32 dim 1 : vector<1x512xf32>, i32 -> vector<1x512xf32>
    %130 = vector.broadcast %128 : f32 to vector<1x512xf32>
    %131 = arith.mulf %130, %129 : vector<1x512xf32>
    %132 = arith.addf %127, %131 : vector<1x512xf32>
    %c1_54 = arith.constant 1 : index
    %c12_55 = arith.constant 12 : index
    %133 = memref.load %arg2[%c1_54, %c12_55] : memref<2x49xf32, #tpu.memory_space<smem>>
    %c42_i32_56 = arith.constant 42 : i32
    %134 = tpu.dynamic_rotate %6 by %c42_i32_56 dim 1 : vector<1x512xf32>, i32 -> vector<1x512xf32>
    %135 = vector.broadcast %133 : f32 to vector<1x512xf32>
    %136 = arith.mulf %135, %134 : vector<1x512xf32>
    %137 = arith.addf %132, %136 : vector<1x512xf32>
    %c0_57 = arith.constant 0 : index
    %c13 = arith.constant 13 : index
    %138 = memref.load %arg2[%c0_57, %c13] : memref<2x49xf32, #tpu.memory_space<smem>>
    %c41_i32 = arith.constant 41 : i32
    %139 = tpu.dynamic_rotate %2 by %c41_i32 dim 1 : vector<1x512xf32>, i32 -> vector<1x512xf32>
    %140 = vector.broadcast %138 : f32 to vector<1x512xf32>
    %141 = arith.mulf %140, %139 : vector<1x512xf32>
    %142 = arith.addf %137, %141 : vector<1x512xf32>
    %c1_58 = arith.constant 1 : index
    %c13_59 = arith.constant 13 : index
    %143 = memref.load %arg2[%c1_58, %c13_59] : memref<2x49xf32, #tpu.memory_space<smem>>
    %c41_i32_60 = arith.constant 41 : i32
    %144 = tpu.dynamic_rotate %6 by %c41_i32_60 dim 1 : vector<1x512xf32>, i32 -> vector<1x512xf32>
    %145 = vector.broadcast %143 : f32 to vector<1x512xf32>
    %146 = arith.mulf %145, %144 : vector<1x512xf32>
    %147 = arith.addf %142, %146 : vector<1x512xf32>
    %c0_61 = arith.constant 0 : index
    %c14 = arith.constant 14 : index
    %148 = memref.load %arg2[%c0_61, %c14] : memref<2x49xf32, #tpu.memory_space<smem>>
    %c25_i32 = arith.constant 25 : i32
    %149 = tpu.dynamic_rotate %2 by %c25_i32 dim 1 : vector<1x512xf32>, i32 -> vector<1x512xf32>
    %150 = vector.broadcast %148 : f32 to vector<1x512xf32>
    %151 = arith.mulf %150, %149 : vector<1x512xf32>
    %152 = arith.addf %147, %151 : vector<1x512xf32>
    %c1_62 = arith.constant 1 : index
    %c14_63 = arith.constant 14 : index
    %153 = memref.load %arg2[%c1_62, %c14_63] : memref<2x49xf32, #tpu.memory_space<smem>>
    %c25_i32_64 = arith.constant 25 : i32
    %154 = tpu.dynamic_rotate %6 by %c25_i32_64 dim 1 : vector<1x512xf32>, i32 -> vector<1x512xf32>
    %155 = vector.broadcast %153 : f32 to vector<1x512xf32>
    %156 = arith.mulf %155, %154 : vector<1x512xf32>
    %157 = arith.addf %152, %156 : vector<1x512xf32>
    %c0_65 = arith.constant 0 : index
    %c15 = arith.constant 15 : index
    %158 = memref.load %arg2[%c0_65, %c15] : memref<2x49xf32, #tpu.memory_space<smem>>
    %c24_i32 = arith.constant 24 : i32
    %159 = tpu.dynamic_rotate %2 by %c24_i32 dim 1 : vector<1x512xf32>, i32 -> vector<1x512xf32>
    %160 = vector.broadcast %158 : f32 to vector<1x512xf32>
    %161 = arith.mulf %160, %159 : vector<1x512xf32>
    %162 = arith.addf %157, %161 : vector<1x512xf32>
    %c1_66 = arith.constant 1 : index
    %c15_67 = arith.constant 15 : index
    %163 = memref.load %arg2[%c1_66, %c15_67] : memref<2x49xf32, #tpu.memory_space<smem>>
    %c24_i32_68 = arith.constant 24 : i32
    %164 = tpu.dynamic_rotate %6 by %c24_i32_68 dim 1 : vector<1x512xf32>, i32 -> vector<1x512xf32>
    %165 = vector.broadcast %163 : f32 to vector<1x512xf32>
    %166 = arith.mulf %165, %164 : vector<1x512xf32>
    %167 = arith.addf %162, %166 : vector<1x512xf32>
    %c0_69 = arith.constant 0 : index
    %c16 = arith.constant 16 : index
    %168 = memref.load %arg2[%c0_69, %c16] : memref<2x49xf32, #tpu.memory_space<smem>>
    %c23_i32 = arith.constant 23 : i32
    %169 = tpu.dynamic_rotate %2 by %c23_i32 dim 1 : vector<1x512xf32>, i32 -> vector<1x512xf32>
    %170 = vector.broadcast %168 : f32 to vector<1x512xf32>
    %171 = arith.mulf %170, %169 : vector<1x512xf32>
    %172 = arith.addf %167, %171 : vector<1x512xf32>
    %c1_70 = arith.constant 1 : index
    %c16_71 = arith.constant 16 : index
    %173 = memref.load %arg2[%c1_70, %c16_71] : memref<2x49xf32, #tpu.memory_space<smem>>
    %c23_i32_72 = arith.constant 23 : i32
    %174 = tpu.dynamic_rotate %6 by %c23_i32_72 dim 1 : vector<1x512xf32>, i32 -> vector<1x512xf32>
    %175 = vector.broadcast %173 : f32 to vector<1x512xf32>
    %176 = arith.mulf %175, %174 : vector<1x512xf32>
    %177 = arith.addf %172, %176 : vector<1x512xf32>
    %c0_73 = arith.constant 0 : index
    %c17 = arith.constant 17 : index
    %178 = memref.load %arg2[%c0_73, %c17] : memref<2x49xf32, #tpu.memory_space<smem>>
    %c22_i32 = arith.constant 22 : i32
    %179 = tpu.dynamic_rotate %2 by %c22_i32 dim 1 : vector<1x512xf32>, i32 -> vector<1x512xf32>
    %180 = vector.broadcast %178 : f32 to vector<1x512xf32>
    %181 = arith.mulf %180, %179 : vector<1x512xf32>
    %182 = arith.addf %177, %181 : vector<1x512xf32>
    %c1_74 = arith.constant 1 : index
    %c17_75 = arith.constant 17 : index
    %183 = memref.load %arg2[%c1_74, %c17_75] : memref<2x49xf32, #tpu.memory_space<smem>>
    %c22_i32_76 = arith.constant 22 : i32
    %184 = tpu.dynamic_rotate %6 by %c22_i32_76 dim 1 : vector<1x512xf32>, i32 -> vector<1x512xf32>
    %185 = vector.broadcast %183 : f32 to vector<1x512xf32>
    %186 = arith.mulf %185, %184 : vector<1x512xf32>
    %187 = arith.addf %182, %186 : vector<1x512xf32>
    %c0_77 = arith.constant 0 : index
    %c18 = arith.constant 18 : index
    %188 = memref.load %arg2[%c0_77, %c18] : memref<2x49xf32, #tpu.memory_space<smem>>
    %c21_i32 = arith.constant 21 : i32
    %189 = tpu.dynamic_rotate %2 by %c21_i32 dim 1 : vector<1x512xf32>, i32 -> vector<1x512xf32>
    %190 = vector.broadcast %188 : f32 to vector<1x512xf32>
    %191 = arith.mulf %190, %189 : vector<1x512xf32>
    %192 = arith.addf %187, %191 : vector<1x512xf32>
    %c1_78 = arith.constant 1 : index
    %c18_79 = arith.constant 18 : index
    %193 = memref.load %arg2[%c1_78, %c18_79] : memref<2x49xf32, #tpu.memory_space<smem>>
    %c21_i32_80 = arith.constant 21 : i32
    %194 = tpu.dynamic_rotate %6 by %c21_i32_80 dim 1 : vector<1x512xf32>, i32 -> vector<1x512xf32>
    %195 = vector.broadcast %193 : f32 to vector<1x512xf32>
    %196 = arith.mulf %195, %194 : vector<1x512xf32>
    %197 = arith.addf %192, %196 : vector<1x512xf32>
    %c0_81 = arith.constant 0 : index
    %c19 = arith.constant 19 : index
    %198 = memref.load %arg2[%c0_81, %c19] : memref<2x49xf32, #tpu.memory_space<smem>>
    %c20_i32 = arith.constant 20 : i32
    %199 = tpu.dynamic_rotate %2 by %c20_i32 dim 1 : vector<1x512xf32>, i32 -> vector<1x512xf32>
    %200 = vector.broadcast %198 : f32 to vector<1x512xf32>
    %201 = arith.mulf %200, %199 : vector<1x512xf32>
    %202 = arith.addf %197, %201 : vector<1x512xf32>
    %c1_82 = arith.constant 1 : index
    %c19_83 = arith.constant 19 : index
    %203 = memref.load %arg2[%c1_82, %c19_83] : memref<2x49xf32, #tpu.memory_space<smem>>
    %c20_i32_84 = arith.constant 20 : i32
    %204 = tpu.dynamic_rotate %6 by %c20_i32_84 dim 1 : vector<1x512xf32>, i32 -> vector<1x512xf32>
    %205 = vector.broadcast %203 : f32 to vector<1x512xf32>
    %206 = arith.mulf %205, %204 : vector<1x512xf32>
    %207 = arith.addf %202, %206 : vector<1x512xf32>
    %c0_85 = arith.constant 0 : index
    %c20 = arith.constant 20 : index
    %208 = memref.load %arg2[%c0_85, %c20] : memref<2x49xf32, #tpu.memory_space<smem>>
    %c19_i32 = arith.constant 19 : i32
    %209 = tpu.dynamic_rotate %2 by %c19_i32 dim 1 : vector<1x512xf32>, i32 -> vector<1x512xf32>
    %210 = vector.broadcast %208 : f32 to vector<1x512xf32>
    %211 = arith.mulf %210, %209 : vector<1x512xf32>
    %212 = arith.addf %207, %211 : vector<1x512xf32>
    %c1_86 = arith.constant 1 : index
    %c20_87 = arith.constant 20 : index
    %213 = memref.load %arg2[%c1_86, %c20_87] : memref<2x49xf32, #tpu.memory_space<smem>>
    %c19_i32_88 = arith.constant 19 : i32
    %214 = tpu.dynamic_rotate %6 by %c19_i32_88 dim 1 : vector<1x512xf32>, i32 -> vector<1x512xf32>
    %215 = vector.broadcast %213 : f32 to vector<1x512xf32>
    %216 = arith.mulf %215, %214 : vector<1x512xf32>
    %217 = arith.addf %212, %216 : vector<1x512xf32>
    %c0_89 = arith.constant 0 : index
    %c21 = arith.constant 21 : index
    %218 = memref.load %arg2[%c0_89, %c21] : memref<2x49xf32, #tpu.memory_space<smem>>
    %c3_i32 = arith.constant 3 : i32
    %219 = tpu.dynamic_rotate %2 by %c3_i32 dim 1 : vector<1x512xf32>, i32 -> vector<1x512xf32>
    %220 = vector.broadcast %218 : f32 to vector<1x512xf32>
    %221 = arith.mulf %220, %219 : vector<1x512xf32>
    %222 = arith.addf %217, %221 : vector<1x512xf32>
    %c1_90 = arith.constant 1 : index
    %c21_91 = arith.constant 21 : index
    %223 = memref.load %arg2[%c1_90, %c21_91] : memref<2x49xf32, #tpu.memory_space<smem>>
    %c3_i32_92 = arith.constant 3 : i32
    %224 = tpu.dynamic_rotate %6 by %c3_i32_92 dim 1 : vector<1x512xf32>, i32 -> vector<1x512xf32>
    %225 = vector.broadcast %223 : f32 to vector<1x512xf32>
    %226 = arith.mulf %225, %224 : vector<1x512xf32>
    %227 = arith.addf %222, %226 : vector<1x512xf32>
    %c0_93 = arith.constant 0 : index
    %c22 = arith.constant 22 : index
    %228 = memref.load %arg2[%c0_93, %c22] : memref<2x49xf32, #tpu.memory_space<smem>>
    %c2_i32 = arith.constant 2 : i32
    %229 = tpu.dynamic_rotate %2 by %c2_i32 dim 1 : vector<1x512xf32>, i32 -> vector<1x512xf32>
    %230 = vector.broadcast %228 : f32 to vector<1x512xf32>
    %231 = arith.mulf %230, %229 : vector<1x512xf32>
    %232 = arith.addf %227, %231 : vector<1x512xf32>
    %c1_94 = arith.constant 1 : index
    %c22_95 = arith.constant 22 : index
    %233 = memref.load %arg2[%c1_94, %c22_95] : memref<2x49xf32, #tpu.memory_space<smem>>
    %c2_i32_96 = arith.constant 2 : i32
    %234 = tpu.dynamic_rotate %6 by %c2_i32_96 dim 1 : vector<1x512xf32>, i32 -> vector<1x512xf32>
    %235 = vector.broadcast %233 : f32 to vector<1x512xf32>
    %236 = arith.mulf %235, %234 : vector<1x512xf32>
    %237 = arith.addf %232, %236 : vector<1x512xf32>
    %c0_97 = arith.constant 0 : index
    %c23 = arith.constant 23 : index
    %238 = memref.load %arg2[%c0_97, %c23] : memref<2x49xf32, #tpu.memory_space<smem>>
    %c1_i32 = arith.constant 1 : i32
    %239 = tpu.dynamic_rotate %2 by %c1_i32 dim 1 : vector<1x512xf32>, i32 -> vector<1x512xf32>
    %240 = vector.broadcast %238 : f32 to vector<1x512xf32>
    %241 = arith.mulf %240, %239 : vector<1x512xf32>
    %242 = arith.addf %237, %241 : vector<1x512xf32>
    %c1_98 = arith.constant 1 : index
    %c23_99 = arith.constant 23 : index
    %243 = memref.load %arg2[%c1_98, %c23_99] : memref<2x49xf32, #tpu.memory_space<smem>>
    %c1_i32_100 = arith.constant 1 : i32
    %244 = tpu.dynamic_rotate %6 by %c1_i32_100 dim 1 : vector<1x512xf32>, i32 -> vector<1x512xf32>
    %245 = vector.broadcast %243 : f32 to vector<1x512xf32>
    %246 = arith.mulf %245, %244 : vector<1x512xf32>
    %247 = arith.addf %242, %246 : vector<1x512xf32>
    %c0_101 = arith.constant 0 : index
    %c24 = arith.constant 24 : index
    %248 = memref.load %arg2[%c0_101, %c24] : memref<2x49xf32, #tpu.memory_space<smem>>
    %249 = vector.broadcast %248 : f32 to vector<1x512xf32>
    %250 = arith.mulf %249, %2 : vector<1x512xf32>
    %251 = arith.addf %247, %250 : vector<1x512xf32>
    %c1_102 = arith.constant 1 : index
    %c24_103 = arith.constant 24 : index
    %252 = memref.load %arg2[%c1_102, %c24_103] : memref<2x49xf32, #tpu.memory_space<smem>>
    %253 = vector.broadcast %252 : f32 to vector<1x512xf32>
    %254 = arith.mulf %253, %6 : vector<1x512xf32>
    %255 = arith.addf %251, %254 : vector<1x512xf32>
    %c0_104 = arith.constant 0 : index
    %c25 = arith.constant 25 : index
    %256 = memref.load %arg2[%c0_104, %c25] : memref<2x49xf32, #tpu.memory_space<smem>>
    %c511_i32 = arith.constant 511 : i32
    %257 = tpu.dynamic_rotate %2 by %c511_i32 dim 1 : vector<1x512xf32>, i32 -> vector<1x512xf32>
    %258 = vector.broadcast %256 : f32 to vector<1x512xf32>
    %259 = arith.mulf %258, %257 : vector<1x512xf32>
    %260 = arith.addf %255, %259 : vector<1x512xf32>
    %c1_105 = arith.constant 1 : index
    %c25_106 = arith.constant 25 : index
    %261 = memref.load %arg2[%c1_105, %c25_106] : memref<2x49xf32, #tpu.memory_space<smem>>
    %c511_i32_107 = arith.constant 511 : i32
    %262 = tpu.dynamic_rotate %6 by %c511_i32_107 dim 1 : vector<1x512xf32>, i32 -> vector<1x512xf32>
    %263 = vector.broadcast %261 : f32 to vector<1x512xf32>
    %264 = arith.mulf %263, %262 : vector<1x512xf32>
    %265 = arith.addf %260, %264 : vector<1x512xf32>
    %c0_108 = arith.constant 0 : index
    %c26 = arith.constant 26 : index
    %266 = memref.load %arg2[%c0_108, %c26] : memref<2x49xf32, #tpu.memory_space<smem>>
    %c510_i32 = arith.constant 510 : i32
    %267 = tpu.dynamic_rotate %2 by %c510_i32 dim 1 : vector<1x512xf32>, i32 -> vector<1x512xf32>
    %268 = vector.broadcast %266 : f32 to vector<1x512xf32>
    %269 = arith.mulf %268, %267 : vector<1x512xf32>
    %270 = arith.addf %265, %269 : vector<1x512xf32>
    %c1_109 = arith.constant 1 : index
    %c26_110 = arith.constant 26 : index
    %271 = memref.load %arg2[%c1_109, %c26_110] : memref<2x49xf32, #tpu.memory_space<smem>>
    %c510_i32_111 = arith.constant 510 : i32
    %272 = tpu.dynamic_rotate %6 by %c510_i32_111 dim 1 : vector<1x512xf32>, i32 -> vector<1x512xf32>
    %273 = vector.broadcast %271 : f32 to vector<1x512xf32>
    %274 = arith.mulf %273, %272 : vector<1x512xf32>
    %275 = arith.addf %270, %274 : vector<1x512xf32>
    %c0_112 = arith.constant 0 : index
    %c27 = arith.constant 27 : index
    %276 = memref.load %arg2[%c0_112, %c27] : memref<2x49xf32, #tpu.memory_space<smem>>
    %c509_i32 = arith.constant 509 : i32
    %277 = tpu.dynamic_rotate %2 by %c509_i32 dim 1 : vector<1x512xf32>, i32 -> vector<1x512xf32>
    %278 = vector.broadcast %276 : f32 to vector<1x512xf32>
    %279 = arith.mulf %278, %277 : vector<1x512xf32>
    %280 = arith.addf %275, %279 : vector<1x512xf32>
    %c1_113 = arith.constant 1 : index
    %c27_114 = arith.constant 27 : index
    %281 = memref.load %arg2[%c1_113, %c27_114] : memref<2x49xf32, #tpu.memory_space<smem>>
    %c509_i32_115 = arith.constant 509 : i32
    %282 = tpu.dynamic_rotate %6 by %c509_i32_115 dim 1 : vector<1x512xf32>, i32 -> vector<1x512xf32>
    %283 = vector.broadcast %281 : f32 to vector<1x512xf32>
    %284 = arith.mulf %283, %282 : vector<1x512xf32>
    %285 = arith.addf %280, %284 : vector<1x512xf32>
    %c0_116 = arith.constant 0 : index
    %c28 = arith.constant 28 : index
    %286 = memref.load %arg2[%c0_116, %c28] : memref<2x49xf32, #tpu.memory_space<smem>>
    %c493_i32 = arith.constant 493 : i32
    %287 = tpu.dynamic_rotate %2 by %c493_i32 dim 1 : vector<1x512xf32>, i32 -> vector<1x512xf32>
    %288 = vector.broadcast %286 : f32 to vector<1x512xf32>
    %289 = arith.mulf %288, %287 : vector<1x512xf32>
    %290 = arith.addf %285, %289 : vector<1x512xf32>
    %c1_117 = arith.constant 1 : index
    %c28_118 = arith.constant 28 : index
    %291 = memref.load %arg2[%c1_117, %c28_118] : memref<2x49xf32, #tpu.memory_space<smem>>
    %c493_i32_119 = arith.constant 493 : i32
    %292 = tpu.dynamic_rotate %6 by %c493_i32_119 dim 1 : vector<1x512xf32>, i32 -> vector<1x512xf32>
    %293 = vector.broadcast %291 : f32 to vector<1x512xf32>
    %294 = arith.mulf %293, %292 : vector<1x512xf32>
    %295 = arith.addf %290, %294 : vector<1x512xf32>
    %c0_120 = arith.constant 0 : index
    %c29 = arith.constant 29 : index
    %296 = memref.load %arg2[%c0_120, %c29] : memref<2x49xf32, #tpu.memory_space<smem>>
    %c492_i32 = arith.constant 492 : i32
    %297 = tpu.dynamic_rotate %2 by %c492_i32 dim 1 : vector<1x512xf32>, i32 -> vector<1x512xf32>
    %298 = vector.broadcast %296 : f32 to vector<1x512xf32>
    %299 = arith.mulf %298, %297 : vector<1x512xf32>
    %300 = arith.addf %295, %299 : vector<1x512xf32>
    %c1_121 = arith.constant 1 : index
    %c29_122 = arith.constant 29 : index
    %301 = memref.load %arg2[%c1_121, %c29_122] : memref<2x49xf32, #tpu.memory_space<smem>>
    %c492_i32_123 = arith.constant 492 : i32
    %302 = tpu.dynamic_rotate %6 by %c492_i32_123 dim 1 : vector<1x512xf32>, i32 -> vector<1x512xf32>
    %303 = vector.broadcast %301 : f32 to vector<1x512xf32>
    %304 = arith.mulf %303, %302 : vector<1x512xf32>
    %305 = arith.addf %300, %304 : vector<1x512xf32>
    %c0_124 = arith.constant 0 : index
    %c30 = arith.constant 30 : index
    %306 = memref.load %arg2[%c0_124, %c30] : memref<2x49xf32, #tpu.memory_space<smem>>
    %c491_i32 = arith.constant 491 : i32
    %307 = tpu.dynamic_rotate %2 by %c491_i32 dim 1 : vector<1x512xf32>, i32 -> vector<1x512xf32>
    %308 = vector.broadcast %306 : f32 to vector<1x512xf32>
    %309 = arith.mulf %308, %307 : vector<1x512xf32>
    %310 = arith.addf %305, %309 : vector<1x512xf32>
    %c1_125 = arith.constant 1 : index
    %c30_126 = arith.constant 30 : index
    %311 = memref.load %arg2[%c1_125, %c30_126] : memref<2x49xf32, #tpu.memory_space<smem>>
    %c491_i32_127 = arith.constant 491 : i32
    %312 = tpu.dynamic_rotate %6 by %c491_i32_127 dim 1 : vector<1x512xf32>, i32 -> vector<1x512xf32>
    %313 = vector.broadcast %311 : f32 to vector<1x512xf32>
    %314 = arith.mulf %313, %312 : vector<1x512xf32>
    %315 = arith.addf %310, %314 : vector<1x512xf32>
    %c0_128 = arith.constant 0 : index
    %c31 = arith.constant 31 : index
    %316 = memref.load %arg2[%c0_128, %c31] : memref<2x49xf32, #tpu.memory_space<smem>>
    %c490_i32 = arith.constant 490 : i32
    %317 = tpu.dynamic_rotate %2 by %c490_i32 dim 1 : vector<1x512xf32>, i32 -> vector<1x512xf32>
    %318 = vector.broadcast %316 : f32 to vector<1x512xf32>
    %319 = arith.mulf %318, %317 : vector<1x512xf32>
    %320 = arith.addf %315, %319 : vector<1x512xf32>
    %c1_129 = arith.constant 1 : index
    %c31_130 = arith.constant 31 : index
    %321 = memref.load %arg2[%c1_129, %c31_130] : memref<2x49xf32, #tpu.memory_space<smem>>
    %c490_i32_131 = arith.constant 490 : i32
    %322 = tpu.dynamic_rotate %6 by %c490_i32_131 dim 1 : vector<1x512xf32>, i32 -> vector<1x512xf32>
    %323 = vector.broadcast %321 : f32 to vector<1x512xf32>
    %324 = arith.mulf %323, %322 : vector<1x512xf32>
    %325 = arith.addf %320, %324 : vector<1x512xf32>
    %c0_132 = arith.constant 0 : index
    %c32 = arith.constant 32 : index
    %326 = memref.load %arg2[%c0_132, %c32] : memref<2x49xf32, #tpu.memory_space<smem>>
    %c489_i32 = arith.constant 489 : i32
    %327 = tpu.dynamic_rotate %2 by %c489_i32 dim 1 : vector<1x512xf32>, i32 -> vector<1x512xf32>
    %328 = vector.broadcast %326 : f32 to vector<1x512xf32>
    %329 = arith.mulf %328, %327 : vector<1x512xf32>
    %330 = arith.addf %325, %329 : vector<1x512xf32>
    %c1_133 = arith.constant 1 : index
    %c32_134 = arith.constant 32 : index
    %331 = memref.load %arg2[%c1_133, %c32_134] : memref<2x49xf32, #tpu.memory_space<smem>>
    %c489_i32_135 = arith.constant 489 : i32
    %332 = tpu.dynamic_rotate %6 by %c489_i32_135 dim 1 : vector<1x512xf32>, i32 -> vector<1x512xf32>
    %333 = vector.broadcast %331 : f32 to vector<1x512xf32>
    %334 = arith.mulf %333, %332 : vector<1x512xf32>
    %335 = arith.addf %330, %334 : vector<1x512xf32>
    %c0_136 = arith.constant 0 : index
    %c33 = arith.constant 33 : index
    %336 = memref.load %arg2[%c0_136, %c33] : memref<2x49xf32, #tpu.memory_space<smem>>
    %c488_i32 = arith.constant 488 : i32
    %337 = tpu.dynamic_rotate %2 by %c488_i32 dim 1 : vector<1x512xf32>, i32 -> vector<1x512xf32>
    %338 = vector.broadcast %336 : f32 to vector<1x512xf32>
    %339 = arith.mulf %338, %337 : vector<1x512xf32>
    %340 = arith.addf %335, %339 : vector<1x512xf32>
    %c1_137 = arith.constant 1 : index
    %c33_138 = arith.constant 33 : index
    %341 = memref.load %arg2[%c1_137, %c33_138] : memref<2x49xf32, #tpu.memory_space<smem>>
    %c488_i32_139 = arith.constant 488 : i32
    %342 = tpu.dynamic_rotate %6 by %c488_i32_139 dim 1 : vector<1x512xf32>, i32 -> vector<1x512xf32>
    %343 = vector.broadcast %341 : f32 to vector<1x512xf32>
    %344 = arith.mulf %343, %342 : vector<1x512xf32>
    %345 = arith.addf %340, %344 : vector<1x512xf32>
    %c0_140 = arith.constant 0 : index
    %c34 = arith.constant 34 : index
    %346 = memref.load %arg2[%c0_140, %c34] : memref<2x49xf32, #tpu.memory_space<smem>>
    %c487_i32 = arith.constant 487 : i32
    %347 = tpu.dynamic_rotate %2 by %c487_i32 dim 1 : vector<1x512xf32>, i32 -> vector<1x512xf32>
    %348 = vector.broadcast %346 : f32 to vector<1x512xf32>
    %349 = arith.mulf %348, %347 : vector<1x512xf32>
    %350 = arith.addf %345, %349 : vector<1x512xf32>
    %c1_141 = arith.constant 1 : index
    %c34_142 = arith.constant 34 : index
    %351 = memref.load %arg2[%c1_141, %c34_142] : memref<2x49xf32, #tpu.memory_space<smem>>
    %c487_i32_143 = arith.constant 487 : i32
    %352 = tpu.dynamic_rotate %6 by %c487_i32_143 dim 1 : vector<1x512xf32>, i32 -> vector<1x512xf32>
    %353 = vector.broadcast %351 : f32 to vector<1x512xf32>
    %354 = arith.mulf %353, %352 : vector<1x512xf32>
    %355 = arith.addf %350, %354 : vector<1x512xf32>
    %c0_144 = arith.constant 0 : index
    %c35 = arith.constant 35 : index
    %356 = memref.load %arg2[%c0_144, %c35] : memref<2x49xf32, #tpu.memory_space<smem>>
    %c471_i32 = arith.constant 471 : i32
    %357 = tpu.dynamic_rotate %2 by %c471_i32 dim 1 : vector<1x512xf32>, i32 -> vector<1x512xf32>
    %358 = vector.broadcast %356 : f32 to vector<1x512xf32>
    %359 = arith.mulf %358, %357 : vector<1x512xf32>
    %360 = arith.addf %355, %359 : vector<1x512xf32>
    %c1_145 = arith.constant 1 : index
    %c35_146 = arith.constant 35 : index
    %361 = memref.load %arg2[%c1_145, %c35_146] : memref<2x49xf32, #tpu.memory_space<smem>>
    %c471_i32_147 = arith.constant 471 : i32
    %362 = tpu.dynamic_rotate %6 by %c471_i32_147 dim 1 : vector<1x512xf32>, i32 -> vector<1x512xf32>
    %363 = vector.broadcast %361 : f32 to vector<1x512xf32>
    %364 = arith.mulf %363, %362 : vector<1x512xf32>
    %365 = arith.addf %360, %364 : vector<1x512xf32>
    %c0_148 = arith.constant 0 : index
    %c36 = arith.constant 36 : index
    %366 = memref.load %arg2[%c0_148, %c36] : memref<2x49xf32, #tpu.memory_space<smem>>
    %c470_i32 = arith.constant 470 : i32
    %367 = tpu.dynamic_rotate %2 by %c470_i32 dim 1 : vector<1x512xf32>, i32 -> vector<1x512xf32>
    %368 = vector.broadcast %366 : f32 to vector<1x512xf32>
    %369 = arith.mulf %368, %367 : vector<1x512xf32>
    %370 = arith.addf %365, %369 : vector<1x512xf32>
    %c1_149 = arith.constant 1 : index
    %c36_150 = arith.constant 36 : index
    %371 = memref.load %arg2[%c1_149, %c36_150] : memref<2x49xf32, #tpu.memory_space<smem>>
    %c470_i32_151 = arith.constant 470 : i32
    %372 = tpu.dynamic_rotate %6 by %c470_i32_151 dim 1 : vector<1x512xf32>, i32 -> vector<1x512xf32>
    %373 = vector.broadcast %371 : f32 to vector<1x512xf32>
    %374 = arith.mulf %373, %372 : vector<1x512xf32>
    %375 = arith.addf %370, %374 : vector<1x512xf32>
    %c0_152 = arith.constant 0 : index
    %c37 = arith.constant 37 : index
    %376 = memref.load %arg2[%c0_152, %c37] : memref<2x49xf32, #tpu.memory_space<smem>>
    %c469_i32 = arith.constant 469 : i32
    %377 = tpu.dynamic_rotate %2 by %c469_i32 dim 1 : vector<1x512xf32>, i32 -> vector<1x512xf32>
    %378 = vector.broadcast %376 : f32 to vector<1x512xf32>
    %379 = arith.mulf %378, %377 : vector<1x512xf32>
    %380 = arith.addf %375, %379 : vector<1x512xf32>
    %c1_153 = arith.constant 1 : index
    %c37_154 = arith.constant 37 : index
    %381 = memref.load %arg2[%c1_153, %c37_154] : memref<2x49xf32, #tpu.memory_space<smem>>
    %c469_i32_155 = arith.constant 469 : i32
    %382 = tpu.dynamic_rotate %6 by %c469_i32_155 dim 1 : vector<1x512xf32>, i32 -> vector<1x512xf32>
    %383 = vector.broadcast %381 : f32 to vector<1x512xf32>
    %384 = arith.mulf %383, %382 : vector<1x512xf32>
    %385 = arith.addf %380, %384 : vector<1x512xf32>
    %c0_156 = arith.constant 0 : index
    %c38 = arith.constant 38 : index
    %386 = memref.load %arg2[%c0_156, %c38] : memref<2x49xf32, #tpu.memory_space<smem>>
    %c468_i32 = arith.constant 468 : i32
    %387 = tpu.dynamic_rotate %2 by %c468_i32 dim 1 : vector<1x512xf32>, i32 -> vector<1x512xf32>
    %388 = vector.broadcast %386 : f32 to vector<1x512xf32>
    %389 = arith.mulf %388, %387 : vector<1x512xf32>
    %390 = arith.addf %385, %389 : vector<1x512xf32>
    %c1_157 = arith.constant 1 : index
    %c38_158 = arith.constant 38 : index
    %391 = memref.load %arg2[%c1_157, %c38_158] : memref<2x49xf32, #tpu.memory_space<smem>>
    %c468_i32_159 = arith.constant 468 : i32
    %392 = tpu.dynamic_rotate %6 by %c468_i32_159 dim 1 : vector<1x512xf32>, i32 -> vector<1x512xf32>
    %393 = vector.broadcast %391 : f32 to vector<1x512xf32>
    %394 = arith.mulf %393, %392 : vector<1x512xf32>
    %395 = arith.addf %390, %394 : vector<1x512xf32>
    %c0_160 = arith.constant 0 : index
    %c39 = arith.constant 39 : index
    %396 = memref.load %arg2[%c0_160, %c39] : memref<2x49xf32, #tpu.memory_space<smem>>
    %c467_i32 = arith.constant 467 : i32
    %397 = tpu.dynamic_rotate %2 by %c467_i32 dim 1 : vector<1x512xf32>, i32 -> vector<1x512xf32>
    %398 = vector.broadcast %396 : f32 to vector<1x512xf32>
    %399 = arith.mulf %398, %397 : vector<1x512xf32>
    %400 = arith.addf %395, %399 : vector<1x512xf32>
    %c1_161 = arith.constant 1 : index
    %c39_162 = arith.constant 39 : index
    %401 = memref.load %arg2[%c1_161, %c39_162] : memref<2x49xf32, #tpu.memory_space<smem>>
    %c467_i32_163 = arith.constant 467 : i32
    %402 = tpu.dynamic_rotate %6 by %c467_i32_163 dim 1 : vector<1x512xf32>, i32 -> vector<1x512xf32>
    %403 = vector.broadcast %401 : f32 to vector<1x512xf32>
    %404 = arith.mulf %403, %402 : vector<1x512xf32>
    %405 = arith.addf %400, %404 : vector<1x512xf32>
    %c0_164 = arith.constant 0 : index
    %c40 = arith.constant 40 : index
    %406 = memref.load %arg2[%c0_164, %c40] : memref<2x49xf32, #tpu.memory_space<smem>>
    %c466_i32 = arith.constant 466 : i32
    %407 = tpu.dynamic_rotate %2 by %c466_i32 dim 1 : vector<1x512xf32>, i32 -> vector<1x512xf32>
    %408 = vector.broadcast %406 : f32 to vector<1x512xf32>
    %409 = arith.mulf %408, %407 : vector<1x512xf32>
    %410 = arith.addf %405, %409 : vector<1x512xf32>
    %c1_165 = arith.constant 1 : index
    %c40_166 = arith.constant 40 : index
    %411 = memref.load %arg2[%c1_165, %c40_166] : memref<2x49xf32, #tpu.memory_space<smem>>
    %c466_i32_167 = arith.constant 466 : i32
    %412 = tpu.dynamic_rotate %6 by %c466_i32_167 dim 1 : vector<1x512xf32>, i32 -> vector<1x512xf32>
    %413 = vector.broadcast %411 : f32 to vector<1x512xf32>
    %414 = arith.mulf %413, %412 : vector<1x512xf32>
    %415 = arith.addf %410, %414 : vector<1x512xf32>
    %c0_168 = arith.constant 0 : index
    %c41 = arith.constant 41 : index
    %416 = memref.load %arg2[%c0_168, %c41] : memref<2x49xf32, #tpu.memory_space<smem>>
    %c465_i32 = arith.constant 465 : i32
    %417 = tpu.dynamic_rotate %2 by %c465_i32 dim 1 : vector<1x512xf32>, i32 -> vector<1x512xf32>
    %418 = vector.broadcast %416 : f32 to vector<1x512xf32>
    %419 = arith.mulf %418, %417 : vector<1x512xf32>
    %420 = arith.addf %415, %419 : vector<1x512xf32>
    %c1_169 = arith.constant 1 : index
    %c41_170 = arith.constant 41 : index
    %421 = memref.load %arg2[%c1_169, %c41_170] : memref<2x49xf32, #tpu.memory_space<smem>>
    %c465_i32_171 = arith.constant 465 : i32
    %422 = tpu.dynamic_rotate %6 by %c465_i32_171 dim 1 : vector<1x512xf32>, i32 -> vector<1x512xf32>
    %423 = vector.broadcast %421 : f32 to vector<1x512xf32>
    %424 = arith.mulf %423, %422 : vector<1x512xf32>
    %425 = arith.addf %420, %424 : vector<1x512xf32>
    %c0_172 = arith.constant 0 : index
    %c42 = arith.constant 42 : index
    %426 = memref.load %arg2[%c0_172, %c42] : memref<2x49xf32, #tpu.memory_space<smem>>
    %c449_i32 = arith.constant 449 : i32
    %427 = tpu.dynamic_rotate %2 by %c449_i32 dim 1 : vector<1x512xf32>, i32 -> vector<1x512xf32>
    %428 = vector.broadcast %426 : f32 to vector<1x512xf32>
    %429 = arith.mulf %428, %427 : vector<1x512xf32>
    %430 = arith.addf %425, %429 : vector<1x512xf32>
    %c1_173 = arith.constant 1 : index
    %c42_174 = arith.constant 42 : index
    %431 = memref.load %arg2[%c1_173, %c42_174] : memref<2x49xf32, #tpu.memory_space<smem>>
    %c449_i32_175 = arith.constant 449 : i32
    %432 = tpu.dynamic_rotate %6 by %c449_i32_175 dim 1 : vector<1x512xf32>, i32 -> vector<1x512xf32>
    %433 = vector.broadcast %431 : f32 to vector<1x512xf32>
    %434 = arith.mulf %433, %432 : vector<1x512xf32>
    %435 = arith.addf %430, %434 : vector<1x512xf32>
    %c0_176 = arith.constant 0 : index
    %c43 = arith.constant 43 : index
    %436 = memref.load %arg2[%c0_176, %c43] : memref<2x49xf32, #tpu.memory_space<smem>>
    %c448_i32 = arith.constant 448 : i32
    %437 = tpu.dynamic_rotate %2 by %c448_i32 dim 1 : vector<1x512xf32>, i32 -> vector<1x512xf32>
    %438 = vector.broadcast %436 : f32 to vector<1x512xf32>
    %439 = arith.mulf %438, %437 : vector<1x512xf32>
    %440 = arith.addf %435, %439 : vector<1x512xf32>
    %c1_177 = arith.constant 1 : index
    %c43_178 = arith.constant 43 : index
    %441 = memref.load %arg2[%c1_177, %c43_178] : memref<2x49xf32, #tpu.memory_space<smem>>
    %c448_i32_179 = arith.constant 448 : i32
    %442 = tpu.dynamic_rotate %6 by %c448_i32_179 dim 1 : vector<1x512xf32>, i32 -> vector<1x512xf32>
    %443 = vector.broadcast %441 : f32 to vector<1x512xf32>
    %444 = arith.mulf %443, %442 : vector<1x512xf32>
    %445 = arith.addf %440, %444 : vector<1x512xf32>
    %c0_180 = arith.constant 0 : index
    %c44 = arith.constant 44 : index
    %446 = memref.load %arg2[%c0_180, %c44] : memref<2x49xf32, #tpu.memory_space<smem>>
    %c447_i32 = arith.constant 447 : i32
    %447 = tpu.dynamic_rotate %2 by %c447_i32 dim 1 : vector<1x512xf32>, i32 -> vector<1x512xf32>
    %448 = vector.broadcast %446 : f32 to vector<1x512xf32>
    %449 = arith.mulf %448, %447 : vector<1x512xf32>
    %450 = arith.addf %445, %449 : vector<1x512xf32>
    %c1_181 = arith.constant 1 : index
    %c44_182 = arith.constant 44 : index
    %451 = memref.load %arg2[%c1_181, %c44_182] : memref<2x49xf32, #tpu.memory_space<smem>>
    %c447_i32_183 = arith.constant 447 : i32
    %452 = tpu.dynamic_rotate %6 by %c447_i32_183 dim 1 : vector<1x512xf32>, i32 -> vector<1x512xf32>
    %453 = vector.broadcast %451 : f32 to vector<1x512xf32>
    %454 = arith.mulf %453, %452 : vector<1x512xf32>
    %455 = arith.addf %450, %454 : vector<1x512xf32>
    %c0_184 = arith.constant 0 : index
    %c45 = arith.constant 45 : index
    %456 = memref.load %arg2[%c0_184, %c45] : memref<2x49xf32, #tpu.memory_space<smem>>
    %c446_i32 = arith.constant 446 : i32
    %457 = tpu.dynamic_rotate %2 by %c446_i32 dim 1 : vector<1x512xf32>, i32 -> vector<1x512xf32>
    %458 = vector.broadcast %456 : f32 to vector<1x512xf32>
    %459 = arith.mulf %458, %457 : vector<1x512xf32>
    %460 = arith.addf %455, %459 : vector<1x512xf32>
    %c1_185 = arith.constant 1 : index
    %c45_186 = arith.constant 45 : index
    %461 = memref.load %arg2[%c1_185, %c45_186] : memref<2x49xf32, #tpu.memory_space<smem>>
    %c446_i32_187 = arith.constant 446 : i32
    %462 = tpu.dynamic_rotate %6 by %c446_i32_187 dim 1 : vector<1x512xf32>, i32 -> vector<1x512xf32>
    %463 = vector.broadcast %461 : f32 to vector<1x512xf32>
    %464 = arith.mulf %463, %462 : vector<1x512xf32>
    %465 = arith.addf %460, %464 : vector<1x512xf32>
    %c0_188 = arith.constant 0 : index
    %c46 = arith.constant 46 : index
    %466 = memref.load %arg2[%c0_188, %c46] : memref<2x49xf32, #tpu.memory_space<smem>>
    %c445_i32 = arith.constant 445 : i32
    %467 = tpu.dynamic_rotate %2 by %c445_i32 dim 1 : vector<1x512xf32>, i32 -> vector<1x512xf32>
    %468 = vector.broadcast %466 : f32 to vector<1x512xf32>
    %469 = arith.mulf %468, %467 : vector<1x512xf32>
    %470 = arith.addf %465, %469 : vector<1x512xf32>
    %c1_189 = arith.constant 1 : index
    %c46_190 = arith.constant 46 : index
    %471 = memref.load %arg2[%c1_189, %c46_190] : memref<2x49xf32, #tpu.memory_space<smem>>
    %c445_i32_191 = arith.constant 445 : i32
    %472 = tpu.dynamic_rotate %6 by %c445_i32_191 dim 1 : vector<1x512xf32>, i32 -> vector<1x512xf32>
    %473 = vector.broadcast %471 : f32 to vector<1x512xf32>
    %474 = arith.mulf %473, %472 : vector<1x512xf32>
    %475 = arith.addf %470, %474 : vector<1x512xf32>
    %c0_192 = arith.constant 0 : index
    %c47 = arith.constant 47 : index
    %476 = memref.load %arg2[%c0_192, %c47] : memref<2x49xf32, #tpu.memory_space<smem>>
    %c444_i32 = arith.constant 444 : i32
    %477 = tpu.dynamic_rotate %2 by %c444_i32 dim 1 : vector<1x512xf32>, i32 -> vector<1x512xf32>
    %478 = vector.broadcast %476 : f32 to vector<1x512xf32>
    %479 = arith.mulf %478, %477 : vector<1x512xf32>
    %480 = arith.addf %475, %479 : vector<1x512xf32>
    %c1_193 = arith.constant 1 : index
    %c47_194 = arith.constant 47 : index
    %481 = memref.load %arg2[%c1_193, %c47_194] : memref<2x49xf32, #tpu.memory_space<smem>>
    %c444_i32_195 = arith.constant 444 : i32
    %482 = tpu.dynamic_rotate %6 by %c444_i32_195 dim 1 : vector<1x512xf32>, i32 -> vector<1x512xf32>
    %483 = vector.broadcast %481 : f32 to vector<1x512xf32>
    %484 = arith.mulf %483, %482 : vector<1x512xf32>
    %485 = arith.addf %480, %484 : vector<1x512xf32>
    %c0_196 = arith.constant 0 : index
    %c48 = arith.constant 48 : index
    %486 = memref.load %arg2[%c0_196, %c48] : memref<2x49xf32, #tpu.memory_space<smem>>
    %c443_i32 = arith.constant 443 : i32
    %487 = tpu.dynamic_rotate %2 by %c443_i32 dim 1 : vector<1x512xf32>, i32 -> vector<1x512xf32>
    %488 = vector.broadcast %486 : f32 to vector<1x512xf32>
    %489 = arith.mulf %488, %487 : vector<1x512xf32>
    %490 = arith.addf %485, %489 : vector<1x512xf32>
    %c1_197 = arith.constant 1 : index
    %c48_198 = arith.constant 48 : index
    %491 = memref.load %arg2[%c1_197, %c48_198] : memref<2x49xf32, #tpu.memory_space<smem>>
    %c443_i32_199 = arith.constant 443 : i32
    %492 = tpu.dynamic_rotate %6 by %c443_i32_199 dim 1 : vector<1x512xf32>, i32 -> vector<1x512xf32>
    %493 = vector.broadcast %491 : f32 to vector<1x512xf32>
    %494 = arith.mulf %493, %492 : vector<1x512xf32>
    %495 = arith.addf %490, %494 : vector<1x512xf32>
    %c0_200 = arith.constant 0 : index
    %c0_201 = arith.constant 0 : index
    %496 = memref.load %arg3[%c0_200, %c0_201] : memref<1x1xf32, #tpu.memory_space<smem>>
    %497 = vector.broadcast %496 : f32 to vector<1x512xf32>
    %498 = arith.addf %495, %497 : vector<1x512xf32>
    %499 = arith.negf %498 : vector<1x512xf32>
    %500 = math.exp %499 : vector<1x512xf32>
    %cst_202 = arith.constant 1.000000e+00 : f32
    %501 = vector.broadcast %cst_202 : f32 to vector<1x512xf32>
    %502 = arith.addf %501, %500 : vector<1x512xf32>
    %503 = arith.divf %501, %502 : vector<1x512xf32>
    %504 = vector.broadcast %503 : vector<1x512xf32> to vector<4x512xf32>
    %505 = arith.mulf %0, %504 : vector<4x512xf32>
    %c511_i32_203 = arith.constant 511 : i32
    %506 = tpu.dynamic_rotate %505 by %c511_i32_203 dim 1 : vector<4x512xf32>, i32 -> vector<4x512xf32>
    %c510_i32_204 = arith.constant 510 : i32
    %507 = tpu.dynamic_rotate %505 by %c510_i32_204 dim 1 : vector<4x512xf32>, i32 -> vector<4x512xf32>
    %c490_i32_205 = arith.constant 490 : i32
    %508 = tpu.dynamic_rotate %505 by %c490_i32_205 dim 1 : vector<4x512xf32>, i32 -> vector<4x512xf32>
    %c489_i32_206 = arith.constant 489 : i32
    %509 = tpu.dynamic_rotate %505 by %c489_i32_206 dim 1 : vector<4x512xf32>, i32 -> vector<4x512xf32>
    %c488_i32_207 = arith.constant 488 : i32
    %510 = tpu.dynamic_rotate %505 by %c488_i32_207 dim 1 : vector<4x512xf32>, i32 -> vector<4x512xf32>
    %c468_i32_208 = arith.constant 468 : i32
    %511 = tpu.dynamic_rotate %505 by %c468_i32_208 dim 1 : vector<4x512xf32>, i32 -> vector<4x512xf32>
    %c467_i32_209 = arith.constant 467 : i32
    %512 = tpu.dynamic_rotate %505 by %c467_i32_209 dim 1 : vector<4x512xf32>, i32 -> vector<4x512xf32>
    %c466_i32_210 = arith.constant 466 : i32
    %513 = tpu.dynamic_rotate %505 by %c466_i32_210 dim 1 : vector<4x512xf32>, i32 -> vector<4x512xf32>
    %514 = tpu.concatenate %505, %506, %507, %508, %509, %510, %511, %512, %513 in 0 : vector<4x512xf32>, vector<4x512xf32>, vector<4x512xf32>, vector<4x512xf32>, vector<4x512xf32>, vector<4x512xf32>, vector<4x512xf32>, vector<4x512xf32>, vector<4x512xf32> -> vector<36x512xf32>
    %c0_211 = arith.constant 0 : index
    %c0_212 = arith.constant 0 : index
    %515 = vector.load %arg4[%c0_211, %c0_212] : memref<16x36xf32, #tpu.memory_space<vmem>>, vector<16x36xf32>
    %cst_213 = arith.constant dense<0.000000e+00> : vector<16x512xf32>
    %516 = tpu.matmul %515, %514, %cst_213 {dimension_numbers = #tpu.dot_dimension_numbers<[1], [0], [0], [1], [0, 0, 1, 1], [], []>} : vector<16x36xf32>, vector<36x512xf32>, vector<16x512xf32> -> vector<16x512xf32>
    %c0_214 = arith.constant 0 : index
    %c0_215 = arith.constant 0 : index
    %517 = vector.load %arg5[%c0_214, %c0_215] : memref<16x1xf32, #tpu.memory_space<vmem>>, vector<16x1xf32>
    %518 = vector.broadcast %517 : vector<16x1xf32> to vector<16x512xf32>
    %519 = arith.addf %516, %518 : vector<16x512xf32>
    %cst_216 = arith.constant 0.000000e+00 : f32
    %520 = vector.broadcast %cst_216 : f32 to vector<16x512xf32>
    %521 = arith.maximumf %519, %520 : vector<16x512xf32>
    %c511_i32_217 = arith.constant 511 : i32
    %522 = tpu.dynamic_rotate %521 by %c511_i32_217 dim 1 : vector<16x512xf32>, i32 -> vector<16x512xf32>
    %c510_i32_218 = arith.constant 510 : i32
    %523 = tpu.dynamic_rotate %521 by %c510_i32_218 dim 1 : vector<16x512xf32>, i32 -> vector<16x512xf32>
    %c490_i32_219 = arith.constant 490 : i32
    %524 = tpu.dynamic_rotate %521 by %c490_i32_219 dim 1 : vector<16x512xf32>, i32 -> vector<16x512xf32>
    %c489_i32_220 = arith.constant 489 : i32
    %525 = tpu.dynamic_rotate %521 by %c489_i32_220 dim 1 : vector<16x512xf32>, i32 -> vector<16x512xf32>
    %c488_i32_221 = arith.constant 488 : i32
    %526 = tpu.dynamic_rotate %521 by %c488_i32_221 dim 1 : vector<16x512xf32>, i32 -> vector<16x512xf32>
    %c468_i32_222 = arith.constant 468 : i32
    %527 = tpu.dynamic_rotate %521 by %c468_i32_222 dim 1 : vector<16x512xf32>, i32 -> vector<16x512xf32>
    %c467_i32_223 = arith.constant 467 : i32
    %528 = tpu.dynamic_rotate %521 by %c467_i32_223 dim 1 : vector<16x512xf32>, i32 -> vector<16x512xf32>
    %c466_i32_224 = arith.constant 466 : i32
    %529 = tpu.dynamic_rotate %521 by %c466_i32_224 dim 1 : vector<16x512xf32>, i32 -> vector<16x512xf32>
    %530 = tpu.concatenate %521, %522, %523, %524, %525, %526, %527, %528, %529 in 0 : vector<16x512xf32>, vector<16x512xf32>, vector<16x512xf32>, vector<16x512xf32>, vector<16x512xf32>, vector<16x512xf32>, vector<16x512xf32>, vector<16x512xf32>, vector<16x512xf32> -> vector<144x512xf32>
    %c0_225 = arith.constant 0 : index
    %c0_226 = arith.constant 0 : index
    %531 = vector.load %arg6[%c0_225, %c0_226] : memref<16x144xf32, #tpu.memory_space<vmem>>, vector<16x144xf32>
    %cst_227 = arith.constant dense<0.000000e+00> : vector<16x512xf32>
    %532 = tpu.matmul %531, %530, %cst_227 {dimension_numbers = #tpu.dot_dimension_numbers<[1], [0], [0], [1], [0, 0, 1, 1], [], []>} : vector<16x144xf32>, vector<144x512xf32>, vector<16x512xf32> -> vector<16x512xf32>
    %c0_228 = arith.constant 0 : index
    %c0_229 = arith.constant 0 : index
    %533 = vector.load %arg7[%c0_228, %c0_229] : memref<16x1xf32, #tpu.memory_space<vmem>>, vector<16x1xf32>
    %534 = vector.broadcast %533 : vector<16x1xf32> to vector<16x512xf32>
    %535 = arith.addf %532, %534 : vector<16x512xf32>
    %cst_230 = arith.constant 0.000000e+00 : f32
    %536 = vector.broadcast %cst_230 : f32 to vector<16x512xf32>
    %537 = arith.maximumf %535, %536 : vector<16x512xf32>
    %c511_i32_231 = arith.constant 511 : i32
    %538 = tpu.dynamic_rotate %537 by %c511_i32_231 dim 1 : vector<16x512xf32>, i32 -> vector<16x512xf32>
    %539 = arith.maximumf %537, %538 : vector<16x512xf32>
    %c490_i32_232 = arith.constant 490 : i32
    %540 = tpu.dynamic_rotate %537 by %c490_i32_232 dim 1 : vector<16x512xf32>, i32 -> vector<16x512xf32>
    %541 = arith.maximumf %539, %540 : vector<16x512xf32>
    %c489_i32_233 = arith.constant 489 : i32
    %542 = tpu.dynamic_rotate %537 by %c489_i32_233 dim 1 : vector<16x512xf32>, i32 -> vector<16x512xf32>
    %543 = arith.maximumf %541, %542 : vector<16x512xf32>
    %c510_i32_234 = arith.constant 510 : i32
    %544 = tpu.dynamic_rotate %543 by %c510_i32_234 dim 1 : vector<16x512xf32>, i32 -> vector<16x512xf32>
    %c508_i32 = arith.constant 508 : i32
    %545 = tpu.dynamic_rotate %543 by %c508_i32 dim 1 : vector<16x512xf32>, i32 -> vector<16x512xf32>
    %c468_i32_235 = arith.constant 468 : i32
    %546 = tpu.dynamic_rotate %543 by %c468_i32_235 dim 1 : vector<16x512xf32>, i32 -> vector<16x512xf32>
    %c466_i32_236 = arith.constant 466 : i32
    %547 = tpu.dynamic_rotate %543 by %c466_i32_236 dim 1 : vector<16x512xf32>, i32 -> vector<16x512xf32>
    %c464_i32 = arith.constant 464 : i32
    %548 = tpu.dynamic_rotate %543 by %c464_i32 dim 1 : vector<16x512xf32>, i32 -> vector<16x512xf32>
    %c424_i32 = arith.constant 424 : i32
    %549 = tpu.dynamic_rotate %543 by %c424_i32 dim 1 : vector<16x512xf32>, i32 -> vector<16x512xf32>
    %c422_i32 = arith.constant 422 : i32
    %550 = tpu.dynamic_rotate %543 by %c422_i32 dim 1 : vector<16x512xf32>, i32 -> vector<16x512xf32>
    %c420_i32 = arith.constant 420 : i32
    %551 = tpu.dynamic_rotate %543 by %c420_i32 dim 1 : vector<16x512xf32>, i32 -> vector<16x512xf32>
    %552 = tpu.concatenate %543, %544, %545, %546, %547, %548, %549, %550, %551 in 0 : vector<16x512xf32>, vector<16x512xf32>, vector<16x512xf32>, vector<16x512xf32>, vector<16x512xf32>, vector<16x512xf32>, vector<16x512xf32>, vector<16x512xf32>, vector<16x512xf32> -> vector<144x512xf32>
    %c0_237 = arith.constant 0 : index
    %c0_238 = arith.constant 0 : index
    %553 = vector.load %arg8[%c0_237, %c0_238] : memref<16x144xf32, #tpu.memory_space<vmem>>, vector<16x144xf32>
    %cst_239 = arith.constant dense<0.000000e+00> : vector<16x512xf32>
    %554 = tpu.matmul %553, %552, %cst_239 {dimension_numbers = #tpu.dot_dimension_numbers<[1], [0], [0], [1], [0, 0, 1, 1], [], []>} : vector<16x144xf32>, vector<144x512xf32>, vector<16x512xf32> -> vector<16x512xf32>
    %c0_240 = arith.constant 0 : index
    %c0_241 = arith.constant 0 : index
    %555 = vector.load %arg9[%c0_240, %c0_241] : memref<16x1xf32, #tpu.memory_space<vmem>>, vector<16x1xf32>
    %556 = vector.broadcast %555 : vector<16x1xf32> to vector<16x512xf32>
    %557 = arith.addf %554, %556 : vector<16x512xf32>
    %cst_242 = arith.constant 0.000000e+00 : f32
    %558 = vector.broadcast %cst_242 : f32 to vector<16x512xf32>
    %559 = arith.maximumf %557, %558 : vector<16x512xf32>
    %c510_i32_243 = arith.constant 510 : i32
    %560 = tpu.dynamic_rotate %559 by %c510_i32_243 dim 1 : vector<16x512xf32>, i32 -> vector<16x512xf32>
    %c508_i32_244 = arith.constant 508 : i32
    %561 = tpu.dynamic_rotate %559 by %c508_i32_244 dim 1 : vector<16x512xf32>, i32 -> vector<16x512xf32>
    %c468_i32_245 = arith.constant 468 : i32
    %562 = tpu.dynamic_rotate %559 by %c468_i32_245 dim 1 : vector<16x512xf32>, i32 -> vector<16x512xf32>
    %c466_i32_246 = arith.constant 466 : i32
    %563 = tpu.dynamic_rotate %559 by %c466_i32_246 dim 1 : vector<16x512xf32>, i32 -> vector<16x512xf32>
    %c464_i32_247 = arith.constant 464 : i32
    %564 = tpu.dynamic_rotate %559 by %c464_i32_247 dim 1 : vector<16x512xf32>, i32 -> vector<16x512xf32>
    %c424_i32_248 = arith.constant 424 : i32
    %565 = tpu.dynamic_rotate %559 by %c424_i32_248 dim 1 : vector<16x512xf32>, i32 -> vector<16x512xf32>
    %c422_i32_249 = arith.constant 422 : i32
    %566 = tpu.dynamic_rotate %559 by %c422_i32_249 dim 1 : vector<16x512xf32>, i32 -> vector<16x512xf32>
    %c420_i32_250 = arith.constant 420 : i32
    %567 = tpu.dynamic_rotate %559 by %c420_i32_250 dim 1 : vector<16x512xf32>, i32 -> vector<16x512xf32>
    %568 = tpu.concatenate %559, %560, %561, %562, %563, %564, %565, %566, %567 in 0 : vector<16x512xf32>, vector<16x512xf32>, vector<16x512xf32>, vector<16x512xf32>, vector<16x512xf32>, vector<16x512xf32>, vector<16x512xf32>, vector<16x512xf32>, vector<16x512xf32> -> vector<144x512xf32>
    %c0_251 = arith.constant 0 : index
    %c0_252 = arith.constant 0 : index
    %569 = vector.load %arg10[%c0_251, %c0_252] : memref<16x144xf32, #tpu.memory_space<vmem>>, vector<16x144xf32>
    %cst_253 = arith.constant dense<0.000000e+00> : vector<16x512xf32>
    %570 = tpu.matmul %569, %568, %cst_253 {dimension_numbers = #tpu.dot_dimension_numbers<[1], [0], [0], [1], [0, 0, 1, 1], [], []>} : vector<16x144xf32>, vector<144x512xf32>, vector<16x512xf32> -> vector<16x512xf32>
    %c0_254 = arith.constant 0 : index
    %c0_255 = arith.constant 0 : index
    %571 = vector.load %arg11[%c0_254, %c0_255] : memref<16x1xf32, #tpu.memory_space<vmem>>, vector<16x1xf32>
    %572 = vector.broadcast %571 : vector<16x1xf32> to vector<16x512xf32>
    %573 = arith.addf %570, %572 : vector<16x512xf32>
    %cst_256 = arith.constant 0.000000e+00 : f32
    %574 = vector.broadcast %cst_256 : f32 to vector<16x512xf32>
    %575 = arith.maximumf %573, %574 : vector<16x512xf32>
    %c510_i32_257 = arith.constant 510 : i32
    %576 = tpu.dynamic_rotate %575 by %c510_i32_257 dim 1 : vector<16x512xf32>, i32 -> vector<16x512xf32>
    %577 = arith.maximumf %575, %576 : vector<16x512xf32>
    %c468_i32_258 = arith.constant 468 : i32
    %578 = tpu.dynamic_rotate %575 by %c468_i32_258 dim 1 : vector<16x512xf32>, i32 -> vector<16x512xf32>
    %579 = arith.maximumf %577, %578 : vector<16x512xf32>
    %c466_i32_259 = arith.constant 466 : i32
    %580 = tpu.dynamic_rotate %575 by %c466_i32_259 dim 1 : vector<16x512xf32>, i32 -> vector<16x512xf32>
    %581 = arith.maximumf %579, %580 : vector<16x512xf32>
    %582 = vector.extract_strided_slice %581 {offsets = [0, 69], sizes = [16, 1], strides = [1, 1]} : vector<16x512xf32> to vector<16x1xf32>
    %c0_260 = arith.constant 0 : index
    %c0_261 = arith.constant 0 : index
    %583 = vector.load %arg12[%c0_260, %c0_261] : memref<32x16xf32, #tpu.memory_space<vmem>>, vector<32x16xf32>
    %cst_262 = arith.constant dense<0.000000e+00> : vector<32x1xf32>
    %584 = tpu.matmul %583, %582, %cst_262 {dimension_numbers = #tpu.dot_dimension_numbers<[1], [0], [0], [1], [0, 0, 1, 1], [], []>} : vector<32x16xf32>, vector<16x1xf32>, vector<32x1xf32> -> vector<32x1xf32>
    %c0_263 = arith.constant 0 : index
    %c0_264 = arith.constant 0 : index
    %585 = vector.load %arg13[%c0_263, %c0_264] : memref<32x1xf32, #tpu.memory_space<vmem>>, vector<32x1xf32>
    %586 = arith.addf %584, %585 : vector<32x1xf32>
    %cst_265 = arith.constant 0.000000e+00 : f32
    %587 = vector.broadcast %cst_265 : f32 to vector<32x1xf32>
    %588 = arith.maximumf %586, %587 : vector<32x1xf32>
    %c0_266 = arith.constant 0 : index
    %c0_267 = arith.constant 0 : index
    %589 = vector.load %arg14[%c0_266, %c0_267] : memref<16x32xf32, #tpu.memory_space<vmem>>, vector<16x32xf32>
    %cst_268 = arith.constant dense<0.000000e+00> : vector<16x1xf32>
    %590 = tpu.matmul %589, %588, %cst_268 {dimension_numbers = #tpu.dot_dimension_numbers<[1], [0], [0], [1], [0, 0, 1, 1], [], []>} : vector<16x32xf32>, vector<32x1xf32>, vector<16x1xf32> -> vector<16x1xf32>
    %c0_269 = arith.constant 0 : index
    %c0_270 = arith.constant 0 : index
    %591 = vector.load %arg15[%c0_269, %c0_270] : memref<16x1xf32, #tpu.memory_space<vmem>>, vector<16x1xf32>
    %592 = arith.addf %590, %591 : vector<16x1xf32>
    %cst_271 = arith.constant 0.000000e+00 : f32
    %593 = vector.broadcast %cst_271 : f32 to vector<16x1xf32>
    %594 = arith.maximumf %592, %593 : vector<16x1xf32>
    %c0_272 = arith.constant 0 : index
    %c0_273 = arith.constant 0 : index
    %595 = vector.load %arg16[%c0_272, %c0_273] : memref<10x16xf32, #tpu.memory_space<vmem>>, vector<10x16xf32>
    %cst_274 = arith.constant dense<0.000000e+00> : vector<10x1xf32>
    %596 = tpu.matmul %595, %594, %cst_274 {dimension_numbers = #tpu.dot_dimension_numbers<[1], [0], [0], [1], [0, 0, 1, 1], [], []>} : vector<10x16xf32>, vector<16x1xf32>, vector<10x1xf32> -> vector<10x1xf32>
    %c0_275 = arith.constant 0 : index
    %c0_276 = arith.constant 0 : index
    %597 = vector.load %arg17[%c0_275, %c0_276] : memref<10x1xf32, #tpu.memory_space<vmem>>, vector<10x1xf32>
    %598 = arith.addf %596, %597 : vector<10x1xf32>
    %cst_277 = arith.constant 0.000000e+00 : f32
    %599 = vector.broadcast %cst_277 : f32 to vector<10x127xf32>
    %600 = tpu.concatenate %598, %599 in 1 : vector<10x1xf32>, vector<10x127xf32> -> vector<10x128xf32>
    %c0_278 = arith.constant 0 : index
    %c0_279 = arith.constant 0 : index
    %601 = vector.load %arg18[%c0_278, %c0_279] : memref<10x128xf32, #tpu.memory_space<vmem>>, vector<10x128xf32>
    tpu.vector_store %arg18[%c0_278, %c0_279], %600 {strides = array<i32>} : memref<10x128xf32, #tpu.memory_space<vmem>>, vector<10x128xf32>,
    return
  }
  func.func @transform_0(%arg0: i32) -> (i32, i32) {
    %c0_i32 = arith.constant 0 : i32
    %c0_i32_0 = arith.constant 0 : i32
    return %c0_i32, %arg0 : i32, i32
  }
  func.func @transform_1(%arg0: i32) -> (i32, i32) {
    %c0_i32 = arith.constant 0 : i32
    %c0_i32_0 = arith.constant 0 : i32
    %c0_i32_1 = arith.constant 0 : i32
    return %c0_i32, %c0_i32_0 : i32, i32
  }
  func.func @transform_2(%arg0: i32) -> (i32, i32) {
    %c0_i32 = arith.constant 0 : i32
    %c0_i32_0 = arith.constant 0 : i32
    %c0_i32_1 = arith.constant 0 : i32
    return %c0_i32, %c0_i32_0 : i32, i32
  }
  func.func @transform_3(%arg0: i32) -> (i32, i32) {
    %c0_i32 = arith.constant 0 : i32
    %c0_i32_0 = arith.constant 0 : i32
    %c0_i32_1 = arith.constant 0 : i32
    return %c0_i32, %c0_i32_0 : i32, i32
  }
  func.func @transform_4(%arg0: i32) -> (i32, i32) {
    %c0_i32 = arith.constant 0 : i32
    %c0_i32_0 = arith.constant 0 : i32
    %c0_i32_1 = arith.constant 0 : i32
    return %c0_i32, %c0_i32_0 : i32, i32
  }
  func.func @transform_5(%arg0: i32) -> (i32, i32) {
    %c0_i32 = arith.constant 0 : i32
    %c0_i32_0 = arith.constant 0 : i32
    %c0_i32_1 = arith.constant 0 : i32
    return %c0_i32, %c0_i32_0 : i32, i32
  }
  func.func @transform_6(%arg0: i32) -> (i32, i32) {
    %c0_i32 = arith.constant 0 : i32
    %c0_i32_0 = arith.constant 0 : i32
    %c0_i32_1 = arith.constant 0 : i32
    return %c0_i32, %c0_i32_0 : i32, i32
  }
  func.func @transform_7(%arg0: i32) -> (i32, i32) {
    %c0_i32 = arith.constant 0 : i32
    %c0_i32_0 = arith.constant 0 : i32
    %c0_i32_1 = arith.constant 0 : i32
    return %c0_i32, %c0_i32_0 : i32, i32
  }
  func.func @transform_8(%arg0: i32) -> (i32, i32) {
    %c0_i32 = arith.constant 0 : i32
    %c0_i32_0 = arith.constant 0 : i32
    %c0_i32_1 = arith.constant 0 : i32
    return %c0_i32, %c0_i32_0 : i32, i32
  }
  func.func @transform_9(%arg0: i32) -> (i32, i32) {
    %c0_i32 = arith.constant 0 : i32
    %c0_i32_0 = arith.constant 0 : i32
    %c0_i32_1 = arith.constant 0 : i32
    return %c0_i32, %c0_i32_0 : i32, i32
  }
  func.func @transform_10(%arg0: i32) -> (i32, i32) {
    %c0_i32 = arith.constant 0 : i32
    %c0_i32_0 = arith.constant 0 : i32
    %c0_i32_1 = arith.constant 0 : i32
    return %c0_i32, %c0_i32_0 : i32, i32
  }
  func.func @transform_11(%arg0: i32) -> (i32, i32) {
    %c0_i32 = arith.constant 0 : i32
    %c0_i32_0 = arith.constant 0 : i32
    %c0_i32_1 = arith.constant 0 : i32
    return %c0_i32, %c0_i32_0 : i32, i32
  }
  func.func @transform_12(%arg0: i32) -> (i32, i32) {
    %c0_i32 = arith.constant 0 : i32
    %c0_i32_0 = arith.constant 0 : i32
    %c0_i32_1 = arith.constant 0 : i32
    return %c0_i32, %c0_i32_0 : i32, i32
  }
  func.func @transform_13(%arg0: i32) -> (i32, i32) {
    %c0_i32 = arith.constant 0 : i32
    %c0_i32_0 = arith.constant 0 : i32
    %c0_i32_1 = arith.constant 0 : i32
    return %c0_i32, %c0_i32_0 : i32, i32
  }
  func.func @transform_14(%arg0: i32) -> (i32, i32) {
    %c0_i32 = arith.constant 0 : i32
    %c0_i32_0 = arith.constant 0 : i32
    %c0_i32_1 = arith.constant 0 : i32
    return %c0_i32, %c0_i32_0 : i32, i32
  }
  func.func @transform_15(%arg0: i32) -> (i32, i32) {
    %c0_i32 = arith.constant 0 : i32
    %c0_i32_0 = arith.constant 0 : i32
    %c0_i32_1 = arith.constant 0 : i32
    return %c0_i32, %c0_i32_0 : i32, i32
  }
  func.func @transform_16(%arg0: i32) -> (i32, i32) {
    %c0_i32 = arith.constant 0 : i32
    %c0_i32_0 = arith.constant 0 : i32
    %c0_i32_1 = arith.constant 0 : i32
    return %c0_i32, %c0_i32_0 : i32, i32
  }
  func.func @transform_17(%arg0: i32) -> (i32, i32) {
    %c0_i32 = arith.constant 0 : i32
    %c0_i32_0 = arith.constant 0 : i32
    return %c0_i32, %arg0 : i32, i32
  }
}

</mosaic_0001>

<bundles_post_ra>
// kernel: address_net_forward.1
= control target key start
LH: loop header
LB: loop body
LE: loop exit
PB: predicated region body
PF: predicated region fallthrough
CT: control target
= control target key end

     0   :  { %s10135_s0 = inlined_call_operand.vmem [shape: f32[4,1024], index: 0, kind: input, shape index: {}]   ;;  %s10136_s1 = inlined_call_operand.vmem [shape: f32[2,49], index: 1, kind: input, shape index: {}]   ;;  %s10137_s2 = inlined_call_operand.<no memory space> [shape: f32[1,1], index: 2, kind: input, shape index: {}]   ;;  %s10138_s3 = inlined_call_operand.vmem [shape: f32[16,36], index: 3, kind: input, shape index: {}]   ;;  %s10139_s4 = inlined_call_operand.vmem [shape: f32[16,1], index: 4, kind: input, shape index: {}]   ;;  %s10140_s5 = inlined_call_operand.vmem [shape: f32[16,144], index: 5, kind: input, shape index: {}]   ;;  %s10141_s6 = inlined_call_operand.vmem [shape: f32[16,1], index: 6, kind: input, shape index: {}]   ;;  %s10142_s7 = inlined_call_operand.vmem [shape: f32[16,144], index: 7, kind: input, shape index: {}]   ;;  %s10143_s8 = inlined_call_operand.vmem [shape: f32[16,1], index: 8, kind: input, shape index: {}]   ;;  %s10144_s9 = inlined_call_operand.vmem [shape: f32[16,144], index: 9, kind: input, shape index: {}]   ;;  %s10145_s10 = inlined_call_operand.vmem [shape: f32[16,1], index: 10, kind: input, shape index: {}]   ;;  %s10146_s11 = inlined_call_operand.vmem [shape: f32[32,16], index: 11, kind: input, shape index: {}]   ;;  %s10147_s12 = inlined_call_operand.vmem [shape: f32[32,1], index: 12, kind: input, shape index: {}]   ;;  %s10148_s13 = inlined_call_operand.vmem [shape: f32[16,32], index: 13, kind: input, shape index: {}]   ;;  %s10149_s14 = inlined_call_operand.vmem [shape: f32[16,1], index: 14, kind: input, shape index: {}]   ;;  %s10150_s15 = inlined_call_operand.vmem [shape: f32[10,16], index: 15, kind: input, shape index: {}]   ;;  %s10151_s16 = inlined_call_operand.vmem [shape: f32[10,1], index: 16, kind: input, shape index: {}]   ;;  %s10152_s17 = inlined_call_operand.vmem [shape: f32[10,256], index: 17, kind: output, shape index: {}]  }
   0x1   :  { %10440 = sst [smem:[#allocation192_spill]] %s10135_s0 }
   0x2   :  { %10441 = sst [smem:[#allocation193_spill]] %s10136_s1 }
   0x3   :  { %10442 = sst [smem:[#allocation194_spill]] %s10146_s11 }
   0x4   :  { %10443 = sst [smem:[#allocation195_spill]] %s10147_s12 }
   0x5   :  { %10444 = sst [smem:[#allocation196_spill]] %s10148_s13 }
   0x6   :  { %10445 = sst [smem:[#allocation197_spill]] %s10149_s14 }
   0x7   :  { %10446 = sst [smem:[#allocation198_spill]] %s10150_s15 }
   0x8   :  { %10447 = sst [smem:[#allocation199_spill]] %s10151_s16 }
   0x9   :  { %10448 = sst [smem:[#allocation200_spill]] %s10152_s17 }
   0xa   :  { %22 = sst [smem:[#allocation2]] %s10137_s2 }
   0xb   :  { %23 = vsyncpa [#allocation4], 0  ;;  %s5157_s26 = smov 0   ;;  %s5159_s27 = smov 0  }
   0xc   :  { %s5161_s28 = smov 0  }
   0xd LB: > { %10449 = sst [smem:[#allocation7_spill]] %s5001_s26  ;;  %s5170_s2 = sadd.s32 4294967295, %s5009_s28   ;;  %s5009_s28 = sphi %s5161_s28, %s11009_s28   ;;  %s5005_s27 = sphi %s5159_s27, %s11011_s27   ;;  %s5001_s26 = sphi %s5157_s26, %s11010_s26  }
   0xe   : > { %10450 = sst [smem:[#allocation8_spill]] %s5005_s27  ;;  %s5172_s29 = sadd.s32 1, %s5009_s28  }
   0xf   : > { %10451 = sst [smem:[#allocation9_spill]] %s5170_s2  ;;  %s395_s0 = ssub.s32 %s5009_s28, %s5172_s29 }
  0x10   : > { %10452 = sst [smem:[#allocation10_spill]] %s5172_s29  ;;  %s398_s30 = sadd.s32 1, %s5005_s27 }
  0x11   : > { %p396_p0 = scmp.eq.s32.totalorder %s395_s0, 0  ;;  %p408_p1 = scmp.ne.s32.totalorder %s5005_s27, %s5001_s26 }
  0x12   : > { %p409_p2 = scmp.eq.s32.totalorder %s5170_s2, 1  ;;  %p4676_p3 = scmp.ge.s32.totalorder %s5009_s28, 1 }
  0x13   : > { %s5180_s18 = scalar_select %p396_p0, %s5005_s27, %s398_s30  }
  0x14   : > { %p5182_p4 = por %p409_p2, %p408_p1  ;;  %p422_p5 = scmp.lt.s32.totalorder %s5009_s28, 3 }
  0x15   : > { %10453 = sst [smem:[#allocation11_spill]] %s5180_s18  ;;  %p4867_p6 = scmp.eq.s32.totalorder %s5170_s2, 0 }
  0x16   : > { %s10454_s19 = scalar_select %p5182_p4, 1, 0 }
  0x17   : > { %p5187_p7 = pnand %p4676_p3, %p422_p5  ;;  %s10457_s22 = sld [smem:[#allocation193_spill]] }
  0x18   : > { %10455 = sst [smem:[#allocation12_spill]] %s10454_s19 }
  0x19   : > { %p4863_p8 = pneg %p5187_p7 }
  0x1b   : > { %p4864_p9 = pnand %p4867_p6, %p4863_p8 }
  0x1d   : > { %s435_s23 = sshll.u32 %s10457_s22, 4  ;;  %p4970_p11 = pneg %p4864_p9  ;;  %s436_s23 = int_to_ptr.vmem [resolvable:$true] %s435_s23 }
  0x1e   : > { %s4968_s24 = scalar_lea.vmem %s436_s23, 32  ;;  %p4976_p0 = scmp.lt.s32.totalorder %s436_s23, %s436_s23 }
  0x1f   : > { %p4969_p10 = scmp.ne.s32.totalorder %s436_s23, %s4968_s24  ;;  %p4977_p1 = scmp.lt.s32.totalorder %s4968_s24, %s4968_s24 }
  0x21   : > { %p4971_p12 = pnand %p4970_p11, %p4969_p10  ;;  %p4978_p2 = por %p4977_p1, %p4976_p0 }
  0x23   : > { %p4972_p13 = pneg %p4971_p12 }
  0x25   : > { %p4979_p3 = pnand %p4978_p2, %p4972_p13 }
  0x27   : > { %4982 = shalt.err (!%p4979_p3)
}
  0x28   : > { %s5011_s25 = smov [#allocation3]   ;;  %502 = sbr.rel (%p5187_p7) target bundleno = 3620 (0xe24), region = 88 }
  0x29   : > { %4866 = dma.vmem_to_smem (!%p4864_p9), %s436_s23, 32, %s5011_s25, [#allocation4]  }
  0x2d   : > { %4996 = dma.done.wait (%p4867_p6), [#allocation4], 32  }
  0x2e   : > { %4998 = vsyncadd (%p4867_p6), [#allocation4], 4294967264 }
  0x2f   : > { %508 = sfence }
  0x30   : > { %s4682_s28 = sshll.u32 %s5170_s2, 2  ;;  %vm568_vm0 = vcmask 1043456   ;;  %s10458_s21 = sld [smem:[#allocation192_spill]] }
  0x31   : > { %p555_p5 = scmp.lt.s32.totalorder %s4682_s28, 7  ;;  %s5012_s1 = smov 68  }
  0x32   : > { %s5013_s23 = smov 69   ;;  %s5014_s24 = smov 67  }
  0x33   : > { %s11013_s28 = smov (!%p555_p5, %s4682_s28), 7  ;;  %s5015_s25 = smov 66  }
  0x34   : > { %s4683_s0 = sshll.u32 %s11013_s28, 2  ;;  %s5016_s28 = smov 65  }
  0x35   : > { %s5018_s30 = smov 63   ;;  %s5019_s20 = smov 47  }
  0x36   : > { %s5208_s22 = scalar_lea.vmem %s10458_s21, %s4683_s0  ;;  %s5017_s0 = smov 64  }
  0x37   : > { %v561_v0 = vld [vmem:[%s5208_s22 + $0x8] sm:$0xff]  ;;  %v560_v1 = vld [vmem:[%s5208_s22] sm:$0xff]  ;;  %s5020_s21 = smov 46   ;;  %s5904_s18 = sld [smem:[#allocation3 + $0x4]] }
  0x38   : > { %v583_v2 = vsel %vm568_vm0, %v561_v0, -inf  ;;  %v569_v3 = vsel %vm568_vm0, %v560_v1, -inf  ;;  %v565_v4 = vcombine.high %v561_v0, %v561_v0  ;;  %v597_v5 = vsel %vm568_vm0, %v560_v1, 0.0  ;;  %s5908_s27 = sld [smem:[#allocation3 + $0x2a]]  ;;  %s5043_s13 = smov 105  }
  0x39   : > { %v584_v6 = vrot.slane %v583_v2, 4  ;;  %v570_v7 = vrot.slane %v569_v3, 4  ;;  %v598_v8 = vrot.slane %v597_v5, 4  ;;  %v611_v9 = vsel %vm568_vm0, %v561_v0, 0.0  ;;  %s5912_s29 = sld [smem:[#allocation3 + $0x84]] }
  0x3a   : > { %v590_v10 = vsel %vm568_vm0, %v565_v4, -inf  ;;  %v612_v11 = vrot.slane %v611_v9, 4  ;;  %v564_v12 = vcombine.high %v560_v1, %v560_v1  ;;  %v618_v13 = vsel %vm568_vm0, %v565_v4, 0.0  ;;  %s5916_s17 = sld [smem:[#allocation3 + $0xaa]] }
  0x3b   : > { %v585_v14 = vmax.f32 %v583_v2, %v584_v6  ;;  %v571_v15 = vmax.f32 %v569_v3, %v570_v7  ;;  %v591_v16 = vrot.slane %v590_v10, 4  ;;  %v599_v17 = vadd.f32 %v598_v8, %v597_v5  ;;  %s5920_s2 = sld [smem:[#allocation3 + $0x5]] }
  0x3c   : > { %v613_v18 = vadd.f32 %v612_v11, %v611_v9  ;;  %v576_v19 = vsel %vm568_vm0, %v564_v12, -inf  ;;  %v619_v20 = vrot.slane %v618_v13, 4  ;;  %v604_v21 = vsel %vm568_vm0, %v564_v12, 0.0  ;;  %s5924_s19 = sld [smem:[#allocation3 + $0x2b]] }
  0x3d   : > { %v586_v22 = vrot.slane %v585_v14, 2  ;;  %v572_v23 = vrot.slane %v571_v15, 2  ;;  %v592_v24 = vmax.f32 %v590_v10, %v591_v16  ;;  %v600_v25 = vrot.slane %v599_v17, 2  ;;  %s5928_s16 = sld [smem:[#allocation3 + $0x85]] }
  0x3e   : > { %v614_v26 = vrot.slane %v613_v18, 2  ;;  %v577_v27 = vrot.slane %v576_v19, 4  ;;  %v620_v34 = vadd.f32 %v619_v20, %v618_v13  ;;  %v605_v35 = vrot.slane %v604_v21, 4  ;;  %s5935_s14 = sld [smem:[#allocation3 + $0xab]] }
  0x3f   : > { %v587_v28 = vmax.f32 %v585_v14, %v586_v22  ;;  %v573_v29 = vmax.f32 %v571_v15, %v572_v23  ;;  %v593_v30 = vrot.slane %v592_v24, 2  ;;  %v601_v31 = vadd.f32 %v600_v25, %v599_v17  ;;  %s5939_s26 = sld [smem:[#allocation3 + $0x6]] }
  0x40   : > { %v615_v32 = vadd.f32 %v614_v26, %v613_v18  ;;  %v578_v33 = vmax.f32 %v576_v19, %v577_v27  ;;  %v621_v44 = vrot.slane %v620_v34, 2  ;;  %v606_v45 = vadd.f32 %v605_v35, %v604_v21  ;;  %s5943_s15 = sld [smem:[#allocation3 + $0x2c]] }
  0x41   : > { %v588_v36 = vrot.slane %v587_v28, 1  ;;  %v574_v37 = vrot.slane %v573_v29, 1  ;;  %v594_v38 = vmax.f32 %v592_v24, %v593_v30  ;;  %v602_v39 = vrot.slane %v601_v31, 1  ;;  %s5947_s12 = sld [smem:[#allocation3 + $0x86]] }
  0x42   : > { %v579_v40 = vrot.slane %v578_v33, 2  ;;  %v616_v48 = vrot.slane %v615_v32, 1  ;;  %v622_v50 = vadd.f32 %v621_v44, %v620_v34  ;;  %v607_v54 = vrot.slane %v606_v45, 2  ;;  %s5965_s11 = sld [smem:[#allocation3 + $0x87]] }
  0x43   : > { %v5220_v41 = vmax.f32 %v587_v28, %v588_v36  ;;  %v5222_v42 = vmax.f32 %v573_v29, %v574_v37  ;;  %v595_v43 = vrot.slane %v594_v38, 1  ;;  %v603_v47 = vadd.f32 %v602_v39, %v601_v31 }
  0x44   : > { %v580_v49 = vmax.f32 %v578_v33, %v579_v40  ;;  %v617_v52 = vadd.f32 %v616_v48, %v615_v32  ;;  %v623_v57 = vrot.slane %v622_v50, 1  ;;  %v608_v58 = vadd.f32 %v607_v54, %v606_v45 }
  0x45   : > { %682 = vrot.lane.b32.xlu1 %v5220_v41, %s5012_s1  ;;  %631 = vrot.lane.b32.xlu0 %v5222_v42, %s5013_s23  ;;  %v5228_v46 = vmax.f32 %v594_v38, %v595_v43  ;;  %v5234_v51 = vmul.f32 0.25, %v603_v47 }
  0x46   : > { %v581_v53 = vrot.slane %v580_v49, 1  ;;  %v5240_v55 = vmul.f32 0.25, %v617_v52  ;;  %v624_v59 = vadd.f32 %v623_v57, %v622_v50  ;;  %v609_v60 = vrot.slane %v608_v58, 1 }
  0x48   : > { %v5242_v56 = vmax.f32 %v580_v49, %v581_v53  ;;  %v5252_v61 = vmul.f32 0.25, %v624_v59  ;;  %v610_v62 = vadd.f32 %v609_v60, %v608_v58 }
  0x49   : > { %637 = vrot.lane.b32.xlu1 %v5228_v46, %s5013_s23  ;;  %635 = vrot.lane.b32.xlu0 %v5220_v41, %s5013_s23 }
  0x4a   : > { %v5258_v63 = vmul.f32 0.25, %v610_v62 }
  0x4d   : > { %656 = vrot.lane.b32.xlu1 %v5234_v51, %s5013_s23  ;;  %678 = vrot.lane.b32.xlu0 %v5222_v42, %s5012_s1 }
  0x51   : > { %660 = vrot.lane.b32.xlu1 %v5240_v55, %s5013_s23  ;;  %633 = vrot.lane.b32.xlu0 %v5242_v56, %s5013_s23 }
  0x55   : > { %680 = vrot.lane.b32.xlu1 %v5242_v56, %s5012_s1  ;;  %684 = vrot.lane.b32.xlu0 %v5228_v46, %s5012_s1 }
  0x59   : > { %662 = vrot.lane.b32.xlu1 %v5252_v61, %s5013_s23  ;;  %701 = vrot.lane.b32.xlu0 %v5234_v51, %s5012_s1 }
  0x5d   : > { %703 = vrot.lane.b32.xlu1 %v5258_v63, %s5012_s1  ;;  %658 = vrot.lane.b32.xlu0 %v5258_v63, %s5013_s23  ;;  %s5022_s23 = smov 44  }
  0x61   : > { %705 = vrot.lane.b32.xlu1 %v5240_v55, %s5012_s1  ;;  %707 = vrot.lane.b32.xlu0 %v5252_v61, %s5012_s1  ;;  %s5021_s1 = smov 45  }
  0x65   : > { %725 = vrot.lane.b32.xlu1 %v5242_v56, %s5014_s24  ;;  %723 = vrot.lane.b32.xlu0 %v5222_v42, %s5014_s24 }
  0x69   : > { %727 = vrot.lane.b32.xlu1 %v5220_v41, %s5014_s24  ;;  %729 = vrot.lane.b32.xlu0 %v5228_v46, %s5014_s24 }
  0x6d   : > { %748 = vrot.lane.b32.xlu1 %v5258_v63, %s5014_s24  ;;  %746 = vrot.lane.b32.xlu0 %v5234_v51, %s5014_s24 }
  0x71   : > { %750 = vrot.lane.b32.xlu1 %v5240_v55, %s5014_s24  ;;  %752 = vrot.lane.b32.xlu0 %v5252_v61, %s5014_s24  ;;  %s5023_s24 = smov 43  }
  0x75   : > { %770 = vrot.lane.b32.xlu1 %v5242_v56, %s5015_s25  ;;  %768 = vrot.lane.b32.xlu0 %v5222_v42, %s5015_s25 }
  0x79   : > { %772 = vrot.lane.b32.xlu1 %v5220_v41, %s5015_s25  ;;  %774 = vrot.lane.b32.xlu0 %v5228_v46, %s5015_s25 }
  0x7d   : > { %793 = vrot.lane.b32.xlu1 %v5258_v63, %s5015_s25  ;;  %791 = vrot.lane.b32.xlu0 %v5234_v51, %s5015_s25 }
  0x81   : > { %795 = vrot.lane.b32.xlu1 %v5240_v55, %s5015_s25  ;;  %797 = vrot.lane.b32.xlu0 %v5252_v61, %s5015_s25  ;;  %s5024_s25 = smov 42  }
  0x85   : > { %815 = vrot.lane.b32.xlu1 %v5242_v56, %s5016_s28  ;;  %813 = vrot.lane.b32.xlu0 %v5222_v42, %s5016_s28 }
  0x89   : > { %817 = vrot.lane.b32.xlu1 %v5220_v41, %s5016_s28  ;;  %819 = vrot.lane.b32.xlu0 %v5228_v46, %s5016_s28 }
  0x8d   : > { %838 = vrot.lane.b32.xlu1 %v5258_v63, %s5016_s28  ;;  %836 = vrot.lane.b32.xlu0 %v5234_v51, %s5016_s28 }
  0x91   : > { %840 = vrot.lane.b32.xlu1 %v5240_v55, %s5016_s28  ;;  %842 = vrot.lane.b32.xlu0 %v5252_v61, %s5016_s28  ;;  %s5025_s28 = smov 41  }
  0x95   : > { %860 = vrot.lane.b32.xlu1 %v5242_v56, %s5017_s0  ;;  %858 = vrot.lane.b32.xlu0 %v5222_v42, %s5017_s0 }
  0x99   : > { %862 = vrot.lane.b32.xlu1 %v5220_v41, %s5017_s0  ;;  %864 = vrot.lane.b32.xlu0 %v5228_v46, %s5017_s0 }
  0x9d   : > { %883 = vrot.lane.b32.xlu1 %v5258_v63, %s5017_s0  ;;  %881 = vrot.lane.b32.xlu0 %v5234_v51, %s5017_s0 }
  0xa1   : > { %885 = vrot.lane.b32.xlu1 %v5240_v55, %s5017_s0  ;;  %887 = vrot.lane.b32.xlu0 %v5252_v61, %s5017_s0  ;;  %s5026_s0 = smov 25  }
  0xa5   : > { %905 = vrot.lane.b32.xlu1 %v5242_v56, %s5018_s30  ;;  %903 = vrot.lane.b32.xlu0 %v5222_v42, %s5018_s30 }
  0xa9   : > { %907 = vrot.lane.b32.xlu1 %v5220_v41, %s5018_s30  ;;  %909 = vrot.lane.b32.xlu0 %v5228_v46, %s5018_s30 }
  0xad   : > { %928 = vrot.lane.b32.xlu1 %v5258_v63, %s5018_s30  ;;  %926 = vrot.lane.b32.xlu0 %v5234_v51, %s5018_s30 }
  0xb1   : > { %930 = vrot.lane.b32.xlu1 %v5240_v55, %s5018_s30  ;;  %932 = vrot.lane.b32.xlu0 %v5252_v61, %s5018_s30  ;;  %s5027_s30 = smov 24  }
  0xb5   : > { %950 = vrot.lane.b32.xlu1 %v5242_v56, %s5019_s20  ;;  %948 = vrot.lane.b32.xlu0 %v5222_v42, %s5019_s20 }
  0xb7   : > { %v5310_v0 = vpop.permute.xlu1 %682  ;;  %v5312_v1 = vpop.permute.xlu0 %631 }
  0xb9   : > { %952 = vrot.lane.b32.xlu1 %v5220_v41, %s5019_s20  ;;  %954 = vrot.lane.b32.xlu0 %v5228_v46, %s5019_s20 }
  0xbb   : > { %v5316_v2 = vpop.permute.xlu1 %637  ;;  %v5318_v3 = vpop.permute.xlu0 %635 }
  0xbd   : > { %973 = vrot.lane.b32.xlu1 %v5258_v63, %s5019_s20  ;;  %971 = vrot.lane.b32.xlu0 %v5234_v51, %s5019_s20 }
  0xbf   : > { %v5322_v4 = vpop.permute.xlu1 %656  ;;  %v5324_v5 = vpop.permute.xlu0 %678 }
  0xc1   : > { %975 = vrot.lane.b32.xlu1 %v5240_v55, %s5019_s20  ;;  %977 = vrot.lane.b32.xlu0 %v5252_v61, %s5019_s20  ;;  %s5028_s20 = smov 23  }
  0xc3   : > { %v5328_v6 = vpop.permute.xlu1 %660  ;;  %v5330_v7 = vpop.permute.xlu0 %633 }
  0xc5   : > { %995 = vrot.lane.b32.xlu1 %v5242_v56, %s5020_s21  ;;  %993 = vrot.lane.b32.xlu0 %v5222_v42, %s5020_s21 }
  0xc7   : > { %v5334_v8 = vpop.permute.xlu1 %680  ;;  %v5336_v9 = vpop.permute.xlu0 %684 }
  0xc9   : > { %997 = vrot.lane.b32.xlu1 %v5220_v41, %s5020_s21  ;;  %999 = vrot.lane.b32.xlu0 %v5228_v46, %s5020_s21 }
  0xcb   : > { %v5340_v10 = vpop.permute.xlu1 %662  ;;  %v5342_v11 = vpop.permute.xlu0 %701 }
  0xcd   : > { %1018 = vrot.lane.b32.xlu1 %v5258_v63, %s5020_s21  ;;  %1016 = vrot.lane.b32.xlu0 %v5234_v51, %s5020_s21 }
  0xcf   : > { %v5346_v12 = vpop.permute.xlu1 %703  ;;  %v5348_v13 = vpop.permute.xlu0 %658 }
  0xd1   : > { %1020 = vrot.lane.b32.xlu1 %v5240_v55, %s5020_s21  ;;  %1022 = vrot.lane.b32.xlu0 %v5252_v61, %s5020_s21  ;;  %s5029_s21 = smov 22  }
  0xd3   : > { %v5352_v14 = vpop.permute.xlu1 %705  ;;  %v5354_v15 = vpop.permute.xlu0 %707 }
  0xd5   : > { %1040 = vrot.lane.b32.xlu1 %v5242_v56, %s5021_s1  ;;  %1038 = vrot.lane.b32.xlu0 %v5222_v42, %s5021_s1 }
  0xd7   : > { %v5358_v16 = vpop.permute.xlu1 %725  ;;  %v5360_v17 = vpop.permute.xlu0 %723 }
  0xd9   : > { %1042 = vrot.lane.b32.xlu1 %v5220_v41, %s5021_s1  ;;  %1044 = vrot.lane.b32.xlu0 %v5228_v46, %s5021_s1 }
  0xdb   : > { %v5364_v18 = vpop.permute.xlu1 %727  ;;  %v5366_v19 = vpop.permute.xlu0 %729 }
  0xdd   : > { %1063 = vrot.lane.b32.xlu1 %v5258_v63, %s5021_s1  ;;  %1061 = vrot.lane.b32.xlu0 %v5234_v51, %s5021_s1 }
  0xdf   : > { %v5370_v20 = vpop.permute.xlu1 %748  ;;  %v5372_v21 = vpop.permute.xlu0 %746 }
  0xe1   : > { %1065 = vrot.lane.b32.xlu1 %v5240_v55, %s5021_s1  ;;  %1067 = vrot.lane.b32.xlu0 %v5252_v61, %s5021_s1  ;;  %s5030_s1 = smov 21  }
  0xe3   : > { %v5376_v22 = vpop.permute.xlu1 %750  ;;  %v5378_v23 = vpop.permute.xlu0 %752 }
  0xe5   : > { %1085 = vrot.lane.b32.xlu1 %v5242_v56, %s5022_s23  ;;  %1083 = vrot.lane.b32.xlu0 %v5222_v42, %s5022_s23 }
  0xe7   : > { %v5382_v24 = vpop.permute.xlu1 %770  ;;  %v5384_v25 = vpop.permute.xlu0 %768 }
  0xe9   : > { %1087 = vrot.lane.b32.xlu1 %v5220_v41, %s5022_s23  ;;  %1089 = vrot.lane.b32.xlu0 %v5228_v46, %s5022_s23 }
  0xeb   : > { %v5388_v26 = vpop.permute.xlu1 %772  ;;  %v5390_v27 = vpop.permute.xlu0 %774 }
  0xed   : > { %1108 = vrot.lane.b32.xlu1 %v5258_v63, %s5022_s23  ;;  %1106 = vrot.lane.b32.xlu0 %v5234_v51, %s5022_s23 }
  0xef   : > { %v5394_v28 = vpop.permute.xlu1 %793  ;;  %v5396_v29 = vpop.permute.xlu0 %791 }
  0xf1   : > { %1110 = vrot.lane.b32.xlu1 %v5240_v55, %s5022_s23  ;;  %1112 = vrot.lane.b32.xlu0 %v5252_v61, %s5022_s23  ;;  %s5031_s23 = smov 20  }
  0xf3   : > { %v5400_v30 = vpop.permute.xlu1 %795  ;;  %v5402_v31 = vpop.permute.xlu0 %797 }
  0xf5   : > { %1130 = vrot.lane.b32.xlu1 %v5242_v56, %s5023_s24  ;;  %1128 = vrot.lane.b32.xlu0 %v5222_v42, %s5023_s24 }
  0xf7   : > { %v5406_v32 = vpop.permute.xlu1 %815  ;;  %v5408_v33 = vpop.permute.xlu0 %813 }
  0xf9   : > { %1132 = vrot.lane.b32.xlu1 %v5220_v41, %s5023_s24  ;;  %1134 = vrot.lane.b32.xlu0 %v5228_v46, %s5023_s24 }
  0xfb   : > { %v5412_v34 = vpop.permute.xlu1 %817  ;;  %v5414_v35 = vpop.permute.xlu0 %819 }
  0xfd   : > { %1153 = vrot.lane.b32.xlu1 %v5258_v63, %s5023_s24  ;;  %1151 = vrot.lane.b32.xlu0 %v5234_v51, %s5023_s24 }
  0xff   : > { %v5418_v36 = vpop.permute.xlu1 %838  ;;  %v5420_v37 = vpop.permute.xlu0 %836 }
 0x100   : > { %10459 = vst [vmem:[#allocation13_spill] sm:$0xff] %v5418_v36  ;;  %10460 = vst [vmem:[#allocation14_spill] sm:$0xff] %v5420_v37  ;;  %v6041_v36 = vstv %s5939_s26  ;;  %s6196_s26 = sld [smem:[#allocation3 + $0xb]] }
 0x101   : > { %1155 = vrot.lane.b32.xlu1 %v5240_v55, %s5023_s24  ;;  %1157 = vrot.lane.b32.xlu0 %v5252_v61, %s5023_s24  ;;  %s5032_s24 = smov 19   ;;  %10625 = vst [vmem:[#allocation179_spill] sm:$0xff] %v6041_v36 }
 0x103   : > { %v5424_v38 = vpop.permute.xlu1 %840  ;;  %v5426_v39 = vpop.permute.xlu0 %842 }
 0x104   : > { %10461 = vst [vmem:[#allocation15_spill] sm:$0xff] %v5424_v38  ;;  %10462 = vst [vmem:[#allocation16_spill] sm:$0xff] %v5426_v39  ;;  %v6028_v39 = vstv %s5935_s14  ;;  %s6055_s14 = sld [smem:[#allocation3 + $0x88]] }
 0x105   : > { %1175 = vrot.lane.b32.xlu1 %v5242_v56, %s5024_s25  ;;  %1173 = vrot.lane.b32.xlu0 %v5222_v42, %s5024_s25  ;;  %10623 = vst [vmem:[#allocation177_spill] sm:$0xff] %v6028_v39 }
 0x107   : > { %v5430_v40 = vpop.permute.xlu1 %860  ;;  %v5432_v43 = vpop.permute.xlu0 %858 }
 0x108   : > { %10463 = vst [vmem:[#allocation17_spill] sm:$0xff] %v5430_v40  ;;  %10464 = vst [vmem:[#allocation18_spill] sm:$0xff] %v5432_v43  ;;  %v6006_v43 = vstv %s5916_s17  ;;  %v6009_v40 = vstv %s5920_s2  ;;  %s6146_s17 = sld [smem:[#allocation3 + $0x8a]] }
 0x109   : > { %1177 = vrot.lane.b32.xlu1 %v5220_v41, %s5024_s25  ;;  %1179 = vrot.lane.b32.xlu0 %v5228_v46, %s5024_s25  ;;  %10619 = vst [vmem:[#allocation173_spill] sm:$0xff] %v6006_v43  ;;  %10620 = vst [vmem:[#allocation174_spill] sm:$0xff] %v6009_v40  ;;  %v6025_v43 = vstv %s5928_s16  ;;  %s5044_s16 = smov 104   ;;  %s6250_s2 = sld [smem:[#allocation3 + $0xc]] }
 0x10a   : > { %10622 = vst [vmem:[#allocation176_spill] sm:$0xff] %v6025_v43  ;;  %v6050_v43 = vstv %s5943_s15  ;;  %s6087_s15 = sld [smem:[#allocation3 + $0x89]] }
 0x10b   : > { %v5436_v44 = vpop.permute.xlu1 %862  ;;  %v5438_v45 = vpop.permute.xlu0 %864  ;;  %10627 = vst [vmem:[#allocation181_spill] sm:$0xff] %v6050_v43  ;;  %v6073_v43 = vstv %s5965_s11  ;;  %s6122_s11 = sld [smem:[#allocation3 + $0xa]] }
 0x10c   : > { %10465 = vst [vmem:[#allocation19_spill] sm:$0xff] %v5436_v44  ;;  %10466 = vst [vmem:[#allocation20_spill] sm:$0xff] %v5438_v45  ;;  %v5992_v45 = vstv %s5908_s27  ;;  %v5995_v44 = vstv %s5912_s29  ;;  %s6223_s27 = sld [smem:[#allocation3 + $0x8b]] }
 0x10d   : > { %1198 = vrot.lane.b32.xlu1 %v5258_v63, %s5024_s25  ;;  %1196 = vrot.lane.b32.xlu0 %v5234_v51, %s5024_s25  ;;  %10617 = vst [vmem:[#allocation171_spill] sm:$0xff] %v5992_v45  ;;  %10618 = vst [vmem:[#allocation172_spill] sm:$0xff] %v5995_v44  ;;  %v6012_v45 = vstv %s5924_s19  ;;  %s6287_s29 = sld [smem:[#allocation3 + $0x8c]] }
 0x10e   : > { %10621 = vst [vmem:[#allocation175_spill] sm:$0xff] %v6012_v45  ;;  %10629 = vst [vmem:[#allocation183_spill] sm:$0xff] %v6073_v43  ;;  %s6381_s19 = sld [smem:[#allocation3 + $0xd]] }
 0x10f   : > { %v5442_v47 = vpop.permute.xlu1 %883  ;;  %v5444_v48 = vpop.permute.xlu0 %881 }
 0x110   : > { %10467 = vst [vmem:[#allocation21_spill] sm:$0xff] %v5442_v47  ;;  %10468 = vst [vmem:[#allocation22_spill] sm:$0xff] %v5444_v48 }
 0x111   : > { %1200 = vrot.lane.b32.xlu1 %v5240_v55, %s5024_s25  ;;  %1202 = vrot.lane.b32.xlu0 %v5252_v61, %s5024_s25  ;;  %s5033_s25 = smov 3  }
 0x113   : > { %v5448_v49 = vpop.permute.xlu1 %885  ;;  %v5450_v50 = vpop.permute.xlu0 %887 }
 0x114   : > { %10469 = vst [vmem:[#allocation23_spill] sm:$0xff] %v5448_v49  ;;  %10470 = vst [vmem:[#allocation24_spill] sm:$0xff] %v5450_v50 }
 0x115   : > { %1220 = vrot.lane.b32.xlu1 %v5242_v56, %s5025_s28  ;;  %1218 = vrot.lane.b32.xlu0 %v5222_v42, %s5025_s28 }
 0x117   : > { %v5454_v52 = vpop.permute.xlu1 %905  ;;  %v5456_v53 = vpop.permute.xlu0 %903 }
 0x118   : > { %10471 = vst [vmem:[#allocation25_spill] sm:$0xff] %v5454_v52  ;;  %10472 = vst [vmem:[#allocation26_spill] sm:$0xff] %v5456_v53 }
 0x119   : > { %1222 = vrot.lane.b32.xlu1 %v5220_v41, %s5025_s28  ;;  %1224 = vrot.lane.b32.xlu0 %v5228_v46, %s5025_s28 }
 0x11b   : > { %v5460_v54 = vpop.permute.xlu1 %907  ;;  %v5462_v57 = vpop.permute.xlu0 %909 }
 0x11c   : > { %10473 = vst [vmem:[#allocation27_spill] sm:$0xff] %v5460_v54  ;;  %10474 = vst [vmem:[#allocation28_spill] sm:$0xff] %v5462_v57 }
 0x11d   : > { %1243 = vrot.lane.b32.xlu1 %v5258_v63, %s5025_s28  ;;  %1241 = vrot.lane.b32.xlu0 %v5234_v51, %s5025_s28 }
 0x11f   : > { %v5466_v58 = vpop.permute.xlu1 %928  ;;  %v5468_v59 = vpop.permute.xlu0 %926 }
 0x120   : > { %10475 = vst [vmem:[#allocation29_spill] sm:$0xff] %v5466_v58  ;;  %10476 = vst [vmem:[#allocation30_spill] sm:$0xff] %v5468_v59 }
 0x121   : > { %1245 = vrot.lane.b32.xlu1 %v5240_v55, %s5025_s28  ;;  %1247 = vrot.lane.b32.xlu0 %v5252_v61, %s5025_s28  ;;  %s5034_s28 = smov 2  }
 0x123   : > { %v5472_v60 = vpop.permute.xlu1 %930  ;;  %v5474_v62 = vpop.permute.xlu0 %932 }
 0x124   : > { %10477 = vst [vmem:[#allocation31_spill] sm:$0xff] %v5472_v60  ;;  %10478 = vst [vmem:[#allocation32_spill] sm:$0xff] %v5474_v62 }
 0x125   : > { %1265 = vrot.lane.b32.xlu1 %v5242_v56, %s5026_s0  ;;  %1263 = vrot.lane.b32.xlu0 %v5222_v42, %s5026_s0 }
 0x127   : > { %v5478_v57 = vpop.permute.xlu1 %950  ;;  %v5480_v54 = vpop.permute.xlu0 %948 }
 0x128   : > { %10479 = vst [vmem:[#allocation33_spill] sm:$0xff] %v5478_v57  ;;  %10480 = vst [vmem:[#allocation34_spill] sm:$0xff] %v5480_v54 }
 0x129   : > { %1267 = vrot.lane.b32.xlu1 %v5220_v41, %s5026_s0  ;;  %1269 = vrot.lane.b32.xlu0 %v5228_v46, %s5026_s0 }
 0x12b   : > { %v5484_v59 = vpop.permute.xlu1 %952  ;;  %v5486_v58 = vpop.permute.xlu0 %954 }
 0x12c   : > { %10481 = vst [vmem:[#allocation35_spill] sm:$0xff] %v5484_v59  ;;  %10482 = vst [vmem:[#allocation36_spill] sm:$0xff] %v5486_v58 }
 0x12d   : > { %1288 = vrot.lane.b32.xlu1 %v5258_v63, %s5026_s0  ;;  %1286 = vrot.lane.b32.xlu0 %v5234_v51, %s5026_s0 }
 0x12f   : > { %v5490_v62 = vpop.permute.xlu1 %973  ;;  %v5492_v60 = vpop.permute.xlu0 %971 }
 0x130   : > { %10483 = vst [vmem:[#allocation37_spill] sm:$0xff] %v5490_v62  ;;  %10484 = vst [vmem:[#allocation38_spill] sm:$0xff] %v5492_v60 }
 0x131   : > { %1290 = vrot.lane.b32.xlu1 %v5240_v55, %s5026_s0  ;;  %1292 = vrot.lane.b32.xlu0 %v5252_v61, %s5026_s0  ;;  %s5035_s0 = smov 1  }
 0x133   : > { %v5496_v54 = vpop.permute.xlu1 %975  ;;  %v5498_v57 = vpop.permute.xlu0 %977 }
 0x134   : > { %10485 = vst [vmem:[#allocation39_spill] sm:$0xff] %v5496_v54  ;;  %10486 = vst [vmem:[#allocation40_spill] sm:$0xff] %v5498_v57 }
 0x135   : > { %1310 = vrot.lane.b32.xlu1 %v5242_v56, %s5027_s30  ;;  %1308 = vrot.lane.b32.xlu0 %v5222_v42, %s5027_s30 }
 0x137   : > { %v5502_v58 = vpop.permute.xlu1 %995  ;;  %v5504_v59 = vpop.permute.xlu0 %993 }
 0x138   : > { %10487 = vst [vmem:[#allocation41_spill] sm:$0xff] %v5502_v58  ;;  %10488 = vst [vmem:[#allocation42_spill] sm:$0xff] %v5504_v59 }
 0x139   : > { %1312 = vrot.lane.b32.xlu1 %v5220_v41, %s5027_s30  ;;  %1314 = vrot.lane.b32.xlu0 %v5228_v46, %s5027_s30 }
 0x13b   : > { %v5508_v60 = vpop.permute.xlu1 %997  ;;  %v5510_v62 = vpop.permute.xlu0 %999 }
 0x13c   : > { %10489 = vst [vmem:[#allocation43_spill] sm:$0xff] %v5508_v60  ;;  %10490 = vst [vmem:[#allocation44_spill] sm:$0xff] %v5510_v62 }
 0x13d   : > { %1333 = vrot.lane.b32.xlu1 %v5258_v63, %s5027_s30  ;;  %1331 = vrot.lane.b32.xlu0 %v5234_v51, %s5027_s30 }
 0x13f   : > { %v5514_v57 = vpop.permute.xlu1 %1018  ;;  %v5516_v54 = vpop.permute.xlu0 %1016 }
 0x140   : > { %10491 = vst [vmem:[#allocation45_spill] sm:$0xff] %v5514_v57  ;;  %10492 = vst [vmem:[#allocation46_spill] sm:$0xff] %v5516_v54 }
 0x141   : > { %1335 = vrot.lane.b32.xlu1 %v5240_v55, %s5027_s30  ;;  %1337 = vrot.lane.b32.xlu0 %v5252_v61, %s5027_s30  ;;  %s10285_s30 = smov 127  }
 0x143   : > { %v5520_v59 = vpop.permute.xlu1 %1020  ;;  %v5522_v58 = vpop.permute.xlu0 %1022 }
 0x144   : > { %10493 = vst [vmem:[#allocation47_spill] sm:$0xff] %v5520_v59  ;;  %10494 = vst [vmem:[#allocation48_spill] sm:$0xff] %v5522_v58 }
 0x145   : > { %1355 = vrot.lane.b32.xlu1 %v5242_v56, %s5028_s20  ;;  %1353 = vrot.lane.b32.xlu0 %v5222_v42, %s5028_s20 }
 0x147   : > { %v5526_v62 = vpop.permute.xlu1 %1040  ;;  %v5528_v60 = vpop.permute.xlu0 %1038 }
 0x148   : > { %10495 = vst [vmem:[#allocation49_spill] sm:$0xff] %v5526_v62  ;;  %10496 = vst [vmem:[#allocation50_spill] sm:$0xff] %v5528_v60 }
 0x149   : > { %1357 = vrot.lane.b32.xlu1 %v5220_v41, %s5028_s20  ;;  %1359 = vrot.lane.b32.xlu0 %v5228_v46, %s5028_s20 }
 0x14b   : > { %v5532_v54 = vpop.permute.xlu1 %1042  ;;  %v5534_v57 = vpop.permute.xlu0 %1044 }
 0x14c   : > { %10497 = vst [vmem:[#allocation51_spill] sm:$0xff] %v5532_v54  ;;  %10498 = vst [vmem:[#allocation52_spill] sm:$0xff] %v5534_v57 }
 0x14d   : > { %1378 = vrot.lane.b32.xlu1 %v5258_v63, %s5028_s20  ;;  %1376 = vrot.lane.b32.xlu0 %v5234_v51, %s5028_s20 }
 0x14f   : > { %v5538_v58 = vpop.permute.xlu1 %1063  ;;  %v5540_v59 = vpop.permute.xlu0 %1061 }
 0x150   : > { %10499 = vst [vmem:[#allocation53_spill] sm:$0xff] %v5538_v58  ;;  %10500 = vst [vmem:[#allocation54_spill] sm:$0xff] %v5540_v59 }
 0x151   : > { %1380 = vrot.lane.b32.xlu1 %v5240_v55, %s5028_s20  ;;  %1382 = vrot.lane.b32.xlu0 %v5252_v61, %s5028_s20  ;;  %s10283_s20 = smov 126  }
 0x153   : > { %v5544_v60 = vpop.permute.xlu1 %1065  ;;  %v5546_v62 = vpop.permute.xlu0 %1067 }
 0x154   : > { %10501 = vst [vmem:[#allocation55_spill] sm:$0xff] %v5544_v60  ;;  %10502 = vst [vmem:[#allocation56_spill] sm:$0xff] %v5546_v62 }
 0x155   : > { %1400 = vrot.lane.b32.xlu1 %v5242_v56, %s5029_s21  ;;  %1398 = vrot.lane.b32.xlu0 %v5222_v42, %s5029_s21 }
 0x157   : > { %v5550_v57 = vpop.permute.xlu1 %1085  ;;  %v5552_v54 = vpop.permute.xlu0 %1083 }
 0x158   : > { %10503 = vst [vmem:[#allocation57_spill] sm:$0xff] %v5550_v57  ;;  %10504 = vst [vmem:[#allocation58_spill] sm:$0xff] %v5552_v54 }
 0x159   : > { %1402 = vrot.lane.b32.xlu1 %v5220_v41, %s5029_s21  ;;  %1404 = vrot.lane.b32.xlu0 %v5228_v46, %s5029_s21 }
 0x15b   : > { %v5556_v59 = vpop.permute.xlu1 %1087  ;;  %v5558_v58 = vpop.permute.xlu0 %1089 }
 0x15c   : > { %10505 = vst [vmem:[#allocation59_spill] sm:$0xff] %v5556_v59  ;;  %10506 = vst [vmem:[#allocation60_spill] sm:$0xff] %v5558_v58 }
 0x15d   : > { %1423 = vrot.lane.b32.xlu1 %v5258_v63, %s5029_s21  ;;  %1421 = vrot.lane.b32.xlu0 %v5234_v51, %s5029_s21 }
 0x15f   : > { %v5562_v62 = vpop.permute.xlu1 %1108  ;;  %v5564_v60 = vpop.permute.xlu0 %1106 }
 0x160   : > { %10507 = vst [vmem:[#allocation61_spill] sm:$0xff] %v5562_v62  ;;  %10508 = vst [vmem:[#allocation62_spill] sm:$0xff] %v5564_v60 }
 0x161   : > { %1425 = vrot.lane.b32.xlu1 %v5240_v55, %s5029_s21  ;;  %1427 = vrot.lane.b32.xlu0 %v5252_v61, %s5029_s21  ;;  %s5038_s21 = smov 125  }
 0x163   : > { %v5568_v54 = vpop.permute.xlu1 %1110  ;;  %v5570_v57 = vpop.permute.xlu0 %1112 }
 0x164   : > { %10509 = vst [vmem:[#allocation63_spill] sm:$0xff] %v5568_v54  ;;  %10510 = vst [vmem:[#allocation64_spill] sm:$0xff] %v5570_v57 }
 0x165   : > { %1445 = vrot.lane.b32.xlu1 %v5242_v56, %s5030_s1  ;;  %1443 = vrot.lane.b32.xlu0 %v5222_v42, %s5030_s1 }
 0x167   : > { %v5574_v58 = vpop.permute.xlu1 %1130  ;;  %v5576_v59 = vpop.permute.xlu0 %1128 }
 0x168   : > { %10511 = vst [vmem:[#allocation65_spill] sm:$0xff] %v5574_v58  ;;  %10512 = vst [vmem:[#allocation66_spill] sm:$0xff] %v5576_v59 }
 0x169   : > { %1447 = vrot.lane.b32.xlu1 %v5220_v41, %s5030_s1  ;;  %1449 = vrot.lane.b32.xlu0 %v5228_v46, %s5030_s1 }
 0x16b   : > { %v5580_v60 = vpop.permute.xlu1 %1132  ;;  %v5582_v62 = vpop.permute.xlu0 %1134 }
 0x16c   : > { %10513 = vst [vmem:[#allocation67_spill] sm:$0xff] %v5580_v60  ;;  %10514 = vst [vmem:[#allocation68_spill] sm:$0xff] %v5582_v62 }
 0x16d   : > { %1468 = vrot.lane.b32.xlu1 %v5258_v63, %s5030_s1  ;;  %1466 = vrot.lane.b32.xlu0 %v5234_v51, %s5030_s1 }
 0x16f   : > { %v5586_v57 = vpop.permute.xlu1 %1153  ;;  %v5588_v54 = vpop.permute.xlu0 %1151 }
 0x170   : > { %10515 = vst [vmem:[#allocation69_spill] sm:$0xff] %v5586_v57  ;;  %10516 = vst [vmem:[#allocation70_spill] sm:$0xff] %v5588_v54 }
 0x171   : > { %1470 = vrot.lane.b32.xlu1 %v5240_v55, %s5030_s1  ;;  %1472 = vrot.lane.b32.xlu0 %v5252_v61, %s5030_s1  ;;  %s5039_s1 = smov 109  }
 0x173   : > { %v5592_v59 = vpop.permute.xlu1 %1155  ;;  %v5594_v58 = vpop.permute.xlu0 %1157 }
 0x174   : > { %10517 = vst [vmem:[#allocation71_spill] sm:$0xff] %v5592_v59  ;;  %10518 = vst [vmem:[#allocation72_spill] sm:$0xff] %v5594_v58 }
 0x175   : > { %1490 = vrot.lane.b32.xlu1 %v5242_v56, %s5031_s23  ;;  %1488 = vrot.lane.b32.xlu0 %v5222_v42, %s5031_s23 }
 0x177   : > { %v5598_v62 = vpop.permute.xlu1 %1175  ;;  %v5600_v60 = vpop.permute.xlu0 %1173 }
 0x178   : > { %10519 = vst [vmem:[#allocation73_spill] sm:$0xff] %v5598_v62  ;;  %10520 = vst [vmem:[#allocation74_spill] sm:$0xff] %v5600_v60 }
 0x179   : > { %1492 = vrot.lane.b32.xlu1 %v5220_v41, %s5031_s23  ;;  %1494 = vrot.lane.b32.xlu0 %v5228_v46, %s5031_s23 }
 0x17b   : > { %v5604_v54 = vpop.permute.xlu1 %1177  ;;  %v5606_v57 = vpop.permute.xlu0 %1179 }
 0x17c   : > { %10521 = vst [vmem:[#allocation75_spill] sm:$0xff] %v5604_v54  ;;  %10522 = vst [vmem:[#allocation76_spill] sm:$0xff] %v5606_v57 }
 0x17d   : > { %1513 = vrot.lane.b32.xlu1 %v5258_v63, %s5031_s23  ;;  %1511 = vrot.lane.b32.xlu0 %v5234_v51, %s5031_s23 }
 0x17f   : > { %v5610_v58 = vpop.permute.xlu1 %1198  ;;  %v5612_v59 = vpop.permute.xlu0 %1196 }
 0x180   : > { %10523 = vst [vmem:[#allocation77_spill] sm:$0xff] %v5610_v58  ;;  %10524 = vst [vmem:[#allocation78_spill] sm:$0xff] %v5612_v59 }
 0x181   : > { %1515 = vrot.lane.b32.xlu1 %v5240_v55, %s5031_s23  ;;  %1517 = vrot.lane.b32.xlu0 %v5252_v61, %s5031_s23  ;;  %s5040_s23 = smov 108  }
 0x183   : > { %v5616_v60 = vpop.permute.xlu1 %1200  ;;  %v5618_v62 = vpop.permute.xlu0 %1202 }
 0x184   : > { %10525 = vst [vmem:[#allocation79_spill] sm:$0xff] %v5616_v60  ;;  %10526 = vst [vmem:[#allocation80_spill] sm:$0xff] %v5618_v62 }
 0x185   : > { %1535 = vrot.lane.b32.xlu1 %v5242_v56, %s5032_s24  ;;  %1533 = vrot.lane.b32.xlu0 %v5222_v42, %s5032_s24 }
 0x187   : > { %v5622_v57 = vpop.permute.xlu1 %1220  ;;  %v5624_v54 = vpop.permute.xlu0 %1218 }
 0x188   : > { %10527 = vst [vmem:[#allocation81_spill] sm:$0xff] %v5622_v57  ;;  %10528 = vst [vmem:[#allocation82_spill] sm:$0xff] %v5624_v54 }
 0x189   : > { %1537 = vrot.lane.b32.xlu1 %v5220_v41, %s5032_s24  ;;  %1539 = vrot.lane.b32.xlu0 %v5228_v46, %s5032_s24 }
 0x18b   : > { %v5628_v59 = vpop.permute.xlu1 %1222  ;;  %v5630_v58 = vpop.permute.xlu0 %1224 }
 0x18c   : > { %10529 = vst [vmem:[#allocation83_spill] sm:$0xff] %v5628_v59  ;;  %10530 = vst [vmem:[#allocation84_spill] sm:$0xff] %v5630_v58 }
 0x18d   : > { %1558 = vrot.lane.b32.xlu1 %v5258_v63, %s5032_s24  ;;  %1556 = vrot.lane.b32.xlu0 %v5234_v51, %s5032_s24 }
 0x18f   : > { %v5634_v62 = vpop.permute.xlu1 %1243  ;;  %v5636_v60 = vpop.permute.xlu0 %1241 }
 0x190   : > { %10531 = vst [vmem:[#allocation85_spill] sm:$0xff] %v5634_v62  ;;  %10532 = vst [vmem:[#allocation86_spill] sm:$0xff] %v5636_v60 }
 0x191   : > { %1560 = vrot.lane.b32.xlu1 %v5240_v55, %s5032_s24  ;;  %1562 = vrot.lane.b32.xlu0 %v5252_v61, %s5032_s24  ;;  %s5041_s24 = smov 107  }
 0x193   : > { %v5640_v54 = vpop.permute.xlu1 %1245  ;;  %v5642_v57 = vpop.permute.xlu0 %1247 }
 0x194   : > { %10533 = vst [vmem:[#allocation87_spill] sm:$0xff] %v5640_v54  ;;  %10534 = vst [vmem:[#allocation88_spill] sm:$0xff] %v5642_v57 }
 0x195   : > { %1580 = vrot.lane.b32.xlu1 %v5242_v56, %s5033_s25  ;;  %1578 = vrot.lane.b32.xlu0 %v5222_v42, %s5033_s25 }
 0x197   : > { %v5646_v58 = vpop.permute.xlu1 %1265  ;;  %v5648_v59 = vpop.permute.xlu0 %1263 }
 0x198   : > { %10535 = vst [vmem:[#allocation89_spill] sm:$0xff] %v5646_v58  ;;  %10536 = vst [vmem:[#allocation90_spill] sm:$0xff] %v5648_v59 }
 0x199   : > { %1582 = vrot.lane.b32.xlu1 %v5220_v41, %s5033_s25  ;;  %1584 = vrot.lane.b32.xlu0 %v5228_v46, %s5033_s25 }
 0x19b   : > { %v5652_v60 = vpop.permute.xlu1 %1267  ;;  %v5654_v62 = vpop.permute.xlu0 %1269 }
 0x19c   : > { %10537 = vst [vmem:[#allocation91_spill] sm:$0xff] %v5652_v60  ;;  %10538 = vst [vmem:[#allocation92_spill] sm:$0xff] %v5654_v62 }
 0x19d   : > { %1603 = vrot.lane.b32.xlu1 %v5258_v63, %s5033_s25  ;;  %1601 = vrot.lane.b32.xlu0 %v5234_v51, %s5033_s25 }
 0x19f   : > { %v5658_v57 = vpop.permute.xlu1 %1288  ;;  %v5660_v54 = vpop.permute.xlu0 %1286 }
 0x1a0   : > { %10539 = vst [vmem:[#allocation93_spill] sm:$0xff] %v5658_v57  ;;  %10540 = vst [vmem:[#allocation94_spill] sm:$0xff] %v5660_v54 }
 0x1a1   : > { %1605 = vrot.lane.b32.xlu1 %v5240_v55, %s5033_s25  ;;  %1607 = vrot.lane.b32.xlu0 %v5252_v61, %s5033_s25  ;;  %s5872_s25 = sld [smem:[#allocation3]] }
 0x1a3   : > { %v5664_v59 = vpop.permute.xlu1 %1290  ;;  %v5666_v58 = vpop.permute.xlu0 %1292 }
 0x1a4   : > { %10541 = vst [vmem:[#allocation95_spill] sm:$0xff] %v5664_v59  ;;  %10542 = vst [vmem:[#allocation96_spill] sm:$0xff] %v5666_v58 }
 0x1a5   : > { %1625 = vrot.lane.b32.xlu1 %v5242_v56, %s5034_s28  ;;  %1623 = vrot.lane.b32.xlu0 %v5222_v42, %s5034_s28 }
 0x1a7   : > { %v5670_v62 = vpop.permute.xlu1 %1310  ;;  %v5672_v60 = vpop.permute.xlu0 %1308 }
 0x1a8   : > { %10543 = vst [vmem:[#allocation97_spill] sm:$0xff] %v5670_v62  ;;  %10544 = vst [vmem:[#allocation98_spill] sm:$0xff] %v5672_v60 }
 0x1a9   : > { %1627 = vrot.lane.b32.xlu1 %v5220_v41, %s5034_s28  ;;  %1629 = vrot.lane.b32.xlu0 %v5228_v46, %s5034_s28 }
 0x1ab   : > { %v5676_v54 = vpop.permute.xlu1 %1312  ;;  %v5678_v57 = vpop.permute.xlu0 %1314 }
 0x1ac   : > { %10545 = vst [vmem:[#allocation99_spill] sm:$0xff] %v5676_v54  ;;  %10546 = vst [vmem:[#allocation100_spill] sm:$0xff] %v5678_v57 }
 0x1ad   : > { %1648 = vrot.lane.b32.xlu1 %v5258_v63, %s5034_s28  ;;  %1646 = vrot.lane.b32.xlu0 %v5234_v51, %s5034_s28 }
 0x1af   : > { %v5682_v58 = vpop.permute.xlu1 %1333  ;;  %v5684_v59 = vpop.permute.xlu0 %1331 }
 0x1b0   : > { %10547 = vst [vmem:[#allocation101_spill] sm:$0xff] %v5682_v58  ;;  %10548 = vst [vmem:[#allocation102_spill] sm:$0xff] %v5684_v59 }
 0x1b1   : > { %1650 = vrot.lane.b32.xlu1 %v5240_v55, %s5034_s28  ;;  %1652 = vrot.lane.b32.xlu0 %v5252_v61, %s5034_s28  ;;  %s5876_s28 = sld [smem:[#allocation3 + $0x1]] }
 0x1b3   : > { %v5688_v60 = vpop.permute.xlu1 %1335  ;;  %v5690_v62 = vpop.permute.xlu0 %1337 }
 0x1b4   : > { %10549 = vst [vmem:[#allocation103_spill] sm:$0xff] %v5688_v60  ;;  %10550 = vst [vmem:[#allocation104_spill] sm:$0xff] %v5690_v62 }
 0x1b5   : > { %1670 = vrot.lane.b32.xlu1 %v5242_v56, %s5035_s0  ;;  %1668 = vrot.lane.b32.xlu0 %v5222_v42, %s5035_s0 }
 0x1b7   : > { %v5694_v57 = vpop.permute.xlu1 %1355  ;;  %v5696_v54 = vpop.permute.xlu0 %1353 }
 0x1b8   : > { %10551 = vst [vmem:[#allocation105_spill] sm:$0xff] %v5694_v57  ;;  %10552 = vst [vmem:[#allocation106_spill] sm:$0xff] %v5696_v54 }
 0x1b9   : > { %1672 = vrot.lane.b32.xlu1 %v5220_v41, %s5035_s0  ;;  %1674 = vrot.lane.b32.xlu0 %v5228_v46, %s5035_s0 }
 0x1bb   : > { %v5700_v59 = vpop.permute.xlu1 %1357  ;;  %v5702_v58 = vpop.permute.xlu0 %1359 }
 0x1bc   : > { %10553 = vst [vmem:[#allocation107_spill] sm:$0xff] %v5700_v59  ;;  %10554 = vst [vmem:[#allocation108_spill] sm:$0xff] %v5702_v58 }
 0x1bd   : > { %1693 = vrot.lane.b32.xlu1 %v5258_v63, %s5035_s0  ;;  %1691 = vrot.lane.b32.xlu0 %v5234_v51, %s5035_s0 }
 0x1bf   : > { %v5706_v62 = vpop.permute.xlu1 %1378  ;;  %v5708_v60 = vpop.permute.xlu0 %1376 }
 0x1c0   : > { %10555 = vst [vmem:[#allocation109_spill] sm:$0xff] %v5706_v62  ;;  %10556 = vst [vmem:[#allocation110_spill] sm:$0xff] %v5708_v60 }
 0x1c1   : > { %1695 = vrot.lane.b32.xlu1 %v5240_v55, %s5035_s0  ;;  %1697 = vrot.lane.b32.xlu0 %v5252_v61, %s5035_s0  ;;  %s5880_s0 = sld [smem:[#allocation3 + $0x80]] }
 0x1c3   : > { %v5712_v54 = vpop.permute.xlu1 %1380  ;;  %v5714_v57 = vpop.permute.xlu0 %1382 }
 0x1c4   : > { %10557 = vst [vmem:[#allocation111_spill] sm:$0xff] %v5712_v54  ;;  %10558 = vst [vmem:[#allocation112_spill] sm:$0xff] %v5714_v57 }
 0x1c5   : > { %1735 = vrot.lane.b32.xlu1 %v5242_v56, %s10285_s30  ;;  %1733 = vrot.lane.b32.xlu0 %v5222_v42, %s10285_s30 }
 0x1c7   : > { %v5720_v58 = vpop.permute.xlu1 %1400  ;;  %v5722_v62 = vpop.permute.xlu0 %1398 }
 0x1c8   : > { %10559 = vst [vmem:[#allocation113_spill] sm:$0xff] %v5720_v58  ;;  %10560 = vst [vmem:[#allocation114_spill] sm:$0xff] %v5722_v62 }
 0x1c9   : > { %1739 = vrot.lane.b32.xlu1 %v5228_v46, %s10285_s30  ;;  %1737 = vrot.lane.b32.xlu0 %v5220_v41, %s10285_s30 }
 0x1cb   : > { %v5728_v54 = vpop.permute.xlu1 %1402  ;;  %v5730_v57 = vpop.permute.xlu0 %1404 }
 0x1cc   : > { %10561 = vst [vmem:[#allocation115_spill] sm:$0xff] %v5728_v54  ;;  %10562 = vst [vmem:[#allocation116_spill] sm:$0xff] %v5730_v57 }
 0x1cd   : > { %1758 = vrot.lane.b32.xlu1 %v5258_v63, %s10285_s30  ;;  %1756 = vrot.lane.b32.xlu0 %v5234_v51, %s10285_s30 }
 0x1cf   : > { %v5736_v60 = vpop.permute.xlu1 %1423  ;;  %v5738_v58 = vpop.permute.xlu0 %1421 }
 0x1d0   : > { %10563 = vst [vmem:[#allocation117_spill] sm:$0xff] %v5736_v60  ;;  %10564 = vst [vmem:[#allocation118_spill] sm:$0xff] %v5738_v58 }
 0x1d1   : > { %1762 = vrot.lane.b32.xlu1 %v5252_v61, %s10285_s30  ;;  %1760 = vrot.lane.b32.xlu0 %v5240_v55, %s10285_s30  ;;  %s5900_s30 = sld [smem:[#allocation3 + $0x83]] }
 0x1d3   : > { %v5744_v62 = vpop.permute.xlu1 %1425  ;;  %v5746_v54 = vpop.permute.xlu0 %1427 }
 0x1d4   : > { %10565 = vst [vmem:[#allocation119_spill] sm:$0xff] %v5744_v62  ;;  %10566 = vst [vmem:[#allocation120_spill] sm:$0xff] %v5746_v54 }
 0x1d5   : > { %1780 = vrot.lane.b32.xlu1 %v5242_v56, %s10283_s20  ;;  %1778 = vrot.lane.b32.xlu0 %v5222_v42, %s10283_s20 }
 0x1d7   : > { %v5752_v60 = vpop.permute.xlu1 %1445  ;;  %v5754_v58 = vpop.permute.xlu0 %1443  ;;  %v5979_v49 = vstv %s5900_s30  ;;  %s5997_s30 = sld [smem:[#allocation3 + $0x8]] }
 0x1d8   : > { %10567 = vst [vmem:[#allocation121_spill] sm:$0xff] %v5752_v60  ;;  %10568 = vst [vmem:[#allocation122_spill] sm:$0xff] %v5754_v58 }
 0x1d9   : > { %1784 = vrot.lane.b32.xlu1 %v5228_v46, %s10283_s20  ;;  %1782 = vrot.lane.b32.xlu0 %v5220_v41, %s10283_s20 }
 0x1db   : > { %v5760_v62 = vpop.permute.xlu1 %1447  ;;  %v5762_v54 = vpop.permute.xlu0 %1449 }
 0x1dc   : > { %10569 = vst [vmem:[#allocation123_spill] sm:$0xff] %v5760_v62  ;;  %10570 = vst [vmem:[#allocation124_spill] sm:$0xff] %v5762_v54 }
 0x1dd   : > { %1803 = vrot.lane.b32.xlu1 %v5258_v63, %s10283_s20  ;;  %1801 = vrot.lane.b32.xlu0 %v5234_v51, %s10283_s20 }
 0x1df   : > { %v5768_v57 = vpop.permute.xlu1 %1468  ;;  %v5770_v60 = vpop.permute.xlu0 %1466 }
 0x1e0   : > { %10571 = vst [vmem:[#allocation125_spill] sm:$0xff] %v5768_v57  ;;  %10572 = vst [vmem:[#allocation126_spill] sm:$0xff] %v5770_v60 }
 0x1e1   : > { %1807 = vrot.lane.b32.xlu1 %v5252_v61, %s10283_s20  ;;  %1805 = vrot.lane.b32.xlu0 %v5240_v55, %s10283_s20  ;;  %s5896_s20 = sld [smem:[#allocation3 + $0x3]] }
 0x1e3   : > { %v5776_v58 = vpop.permute.xlu1 %1470  ;;  %v5778_v62 = vpop.permute.xlu0 %1472 }
 0x1e4   : > { %10573 = vst [vmem:[#allocation127_spill] sm:$0xff] %v5776_v58  ;;  %10574 = vst [vmem:[#allocation128_spill] sm:$0xff] %v5778_v62 }
 0x1e5   : > { %1825 = vrot.lane.b32.xlu1 %v5242_v56, %s5038_s21  ;;  %1823 = vrot.lane.b32.xlu0 %v5222_v42, %s5038_s21 }
 0x1e7   : > { %v5782_v54 = vpop.permute.xlu1 %1490  ;;  %v5784_v57 = vpop.permute.xlu0 %1488  ;;  %v5976_v50 = vstv %s5896_s20  ;;  %s6390_s20 = sld [smem:[#allocation3 + $0x8d]] }
 0x1e8   : > { %10575 = vst [vmem:[#allocation129_spill] sm:$0xff] %v5782_v54  ;;  %10576 = vst [vmem:[#allocation130_spill] sm:$0xff] %v5784_v57 }
 0x1e9   : > { %1829 = vrot.lane.b32.xlu1 %v5228_v46, %s5038_s21  ;;  %1827 = vrot.lane.b32.xlu0 %v5220_v41, %s5038_s21 }
 0x1eb   : > { %v5788_v60 = vpop.permute.xlu1 %1492  ;;  %v5790_v59 = vpop.permute.xlu0 %1494 }
 0x1ec   : > { %10577 = vst [vmem:[#allocation131_spill] sm:$0xff] %v5788_v60  ;;  %10578 = vst [vmem:[#allocation132_spill] sm:$0xff] %v5790_v59 }
 0x1ed   : > { %1848 = vrot.lane.b32.xlu1 %v5258_v63, %s5038_s21  ;;  %1846 = vrot.lane.b32.xlu0 %v5234_v51, %s5038_s21 }
 0x1ef   : > { %v5794_v62 = vpop.permute.xlu1 %1513  ;;  %v5796_v58 = vpop.permute.xlu0 %1511 }
 0x1f0   : > { %10579 = vst [vmem:[#allocation133_spill] sm:$0xff] %v5794_v62  ;;  %10580 = vst [vmem:[#allocation134_spill] sm:$0xff] %v5796_v58 }
 0x1f1   : > { %1852 = vrot.lane.b32.xlu1 %v5252_v61, %s5038_s21  ;;  %1850 = vrot.lane.b32.xlu0 %v5240_v55, %s5038_s21  ;;  %s10307_s21 = smov 106  }
 0x1f3   : > { %v5800_v57 = vpop.permute.xlu1 %1515  ;;  %v5802_v54 = vpop.permute.xlu0 %1517 }
 0x1f4   : > { %10581 = vst [vmem:[#allocation135_spill] sm:$0xff] %v5800_v57  ;;  %10582 = vst [vmem:[#allocation136_spill] sm:$0xff] %v5802_v54 }
 0x1f5   : > { %1870 = vrot.lane.b32.xlu1 %v5242_v56, %s5039_s1  ;;  %1868 = vrot.lane.b32.xlu0 %v5222_v42, %s5039_s1 }
 0x1f7   : > { %v5806_v59 = vpop.permute.xlu1 %1535  ;;  %v5808_v60 = vpop.permute.xlu0 %1533 }
 0x1f8   : > { %10583 = vst [vmem:[#allocation137_spill] sm:$0xff] %v5806_v59  ;;  %10584 = vst [vmem:[#allocation138_spill] sm:$0xff] %v5808_v60 }
 0x1f9   : > { %1874 = vrot.lane.b32.xlu1 %v5228_v46, %s5039_s1  ;;  %1872 = vrot.lane.b32.xlu0 %v5220_v41, %s5039_s1 }
 0x1fb   : > { %v5812_v58 = vpop.permute.xlu1 %1537  ;;  %v5814_v62 = vpop.permute.xlu0 %1539 }
 0x1fc   : > { %10585 = vst [vmem:[#allocation139_spill] sm:$0xff] %v5812_v58  ;;  %10586 = vst [vmem:[#allocation140_spill] sm:$0xff] %v5814_v62 }
 0x1fd   : > { %1893 = vrot.lane.b32.xlu1 %v5258_v63, %s5039_s1  ;;  %1891 = vrot.lane.b32.xlu0 %v5234_v51, %s5039_s1 }
 0x1ff   : > { %v5818_v54 = vpop.permute.xlu1 %1558  ;;  %v5820_v57 = vpop.permute.xlu0 %1556 }
 0x200   : > { %10587 = vst [vmem:[#allocation141_spill] sm:$0xff] %v5818_v54  ;;  %10588 = vst [vmem:[#allocation142_spill] sm:$0xff] %v5820_v57 }
 0x201   : > { %1897 = vrot.lane.b32.xlu1 %v5252_v61, %s5039_s1  ;;  %1895 = vrot.lane.b32.xlu0 %v5240_v55, %s5039_s1  ;;  %s5884_s1 = sld [smem:[#allocation3 + $0x81]] }
 0x203   : > { %v5824_v60 = vpop.permute.xlu1 %1560  ;;  %v5826_v59 = vpop.permute.xlu0 %1562 }
 0x204   : > { %10589 = vst [vmem:[#allocation143_spill] sm:$0xff] %v5824_v60  ;;  %10590 = vst [vmem:[#allocation144_spill] sm:$0xff] %v5826_v59 }
 0x205   : > { %1915 = vrot.lane.b32.xlu1 %v5242_v56, %s5040_s23  ;;  %1913 = vrot.lane.b32.xlu0 %v5222_v42, %s5040_s23 }
 0x207   : > { %v5830_v62 = vpop.permute.xlu1 %1580  ;;  %v5832_v58 = vpop.permute.xlu0 %1578 }
 0x208   : > { %10591 = vst [vmem:[#allocation145_spill] sm:$0xff] %v5830_v62  ;;  %10592 = vst [vmem:[#allocation146_spill] sm:$0xff] %v5832_v58 }
 0x209   : > { %1919 = vrot.lane.b32.xlu1 %v5228_v46, %s5040_s23  ;;  %1917 = vrot.lane.b32.xlu0 %v5220_v41, %s5040_s23 }
 0x20b   : > { %v5836_v57 = vpop.permute.xlu1 %1582  ;;  %v5838_v54 = vpop.permute.xlu0 %1584 }
 0x20c   : > { %10593 = vst [vmem:[#allocation147_spill] sm:$0xff] %v5836_v57  ;;  %10594 = vst [vmem:[#allocation148_spill] sm:$0xff] %v5838_v54 }
 0x20d   : > { %1938 = vrot.lane.b32.xlu1 %v5258_v63, %s5040_s23  ;;  %1936 = vrot.lane.b32.xlu0 %v5234_v51, %s5040_s23 }
 0x20f   : > { %v5842_v59 = vpop.permute.xlu1 %1603  ;;  %v5844_v60 = vpop.permute.xlu0 %1601 }
 0x210   : > { %10595 = vst [vmem:[#allocation149_spill] sm:$0xff] %v5842_v59  ;;  %10596 = vst [vmem:[#allocation150_spill] sm:$0xff] %v5844_v60 }
 0x211   : > { %1942 = vrot.lane.b32.xlu1 %v5252_v61, %s5040_s23  ;;  %1940 = vrot.lane.b32.xlu0 %v5240_v55, %s5040_s23  ;;  %s5888_s23 = sld [smem:[#allocation3 + $0x2]] }
 0x213   : > { %v5848_v58 = vpop.permute.xlu1 %1605  ;;  %v5850_v62 = vpop.permute.xlu0 %1607 }
 0x214   : > { %10597 = vst [vmem:[#allocation151_spill] sm:$0xff] %v5848_v58  ;;  %10598 = vst [vmem:[#allocation152_spill] sm:$0xff] %v5850_v62 }
 0x215   : > { %1960 = vrot.lane.b32.xlu1 %v5242_v56, %s5041_s24  ;;  %1958 = vrot.lane.b32.xlu0 %v5222_v42, %s5041_s24 }
 0x217   : > { %v5854_v54 = vpop.permute.xlu1 %1625  ;;  %v5856_v57 = vpop.permute.xlu0 %1623  ;;  %v5970_v53 = vstv %s5888_s23  ;;  %s6581_s23 = sld [smem:[#allocation3 + $0x10]] }
 0x218   : > { %10599 = vst [vmem:[#allocation153_spill] sm:$0xff] %v5854_v54  ;;  %10600 = vst [vmem:[#allocation154_spill] sm:$0xff] %v5856_v57 }
 0x219   : > { %1964 = vrot.lane.b32.xlu1 %v5228_v46, %s5041_s24  ;;  %1962 = vrot.lane.b32.xlu0 %v5220_v41, %s5041_s24 }
 0x21b   : > { %v5860_v60 = vpop.permute.xlu1 %1627  ;;  %v5862_v59 = vpop.permute.xlu0 %1629 }
 0x21c   : > { %10601 = vst [vmem:[#allocation155_spill] sm:$0xff] %v5860_v60  ;;  %10602 = vst [vmem:[#allocation156_spill] sm:$0xff] %v5862_v59  ;;  %v5963_v59 = vstv %s5884_s1  ;;  %s6545_s1 = sld [smem:[#allocation3 + $0x8f]] }
 0x21d   : > { %1983 = vrot.lane.b32.xlu1 %v5258_v63, %s5041_s24  ;;  %1981 = vrot.lane.b32.xlu0 %v5234_v51, %s5041_s24 }
 0x21f   : > { %v5866_v62 = vpop.permute.xlu1 %1648  ;;  %v5868_v58 = vpop.permute.xlu0 %1646 }
 0x220   : > { %10603 = vst [vmem:[#allocation157_spill] sm:$0xff] %v5866_v62  ;;  %10604 = vst [vmem:[#allocation158_spill] sm:$0xff] %v5868_v58 }
 0x221   : > { %1987 = vrot.lane.b32.xlu1 %v5252_v61, %s5041_s24  ;;  %1985 = vrot.lane.b32.xlu0 %v5240_v55, %s5041_s24  ;;  %s5892_s24 = sld [smem:[#allocation3 + $0x82]] }
 0x223   : > { %v5874_v57 = vpop.permute.xlu1 %1650  ;;  %v5878_v60 = vpop.permute.xlu0 %1652 }
 0x224   : > { %10605 = vst [vmem:[#allocation159_spill] sm:$0xff] %v5874_v57  ;;  %10606 = vst [vmem:[#allocation160_spill] sm:$0xff] %v5878_v60 }
 0x225   : > { %2005 = vrot.lane.b32.xlu1 %v5242_v56, %s10307_s21  ;;  %2003 = vrot.lane.b32.xlu0 %v5222_v42, %s10307_s21 }
 0x227   : > { %v5890_v58 = vpop.permute.xlu1 %1670  ;;  %v5894_v57 = vpop.permute.xlu0 %1668  ;;  %v5973_v52 = vstv %s5892_s24  ;;  %s6611_s24 = sld [smem:[#allocation3 + $0x90]] }
 0x228   : > { %10607 = vst [vmem:[#allocation161_spill] sm:$0xff] %v5890_v58  ;;  %10608 = vst [vmem:[#allocation162_spill] sm:$0xff] %v5894_v57  ;;  %v10306_v57 = vlaneseq }
 0x229   : > { %2009 = vrot.lane.b32.xlu1 %v5228_v46, %s10307_s21  ;;  %2007 = vrot.lane.b32.xlu0 %v5220_v41, %s10307_s21 }
 0x22b   : > { %v5906_v60 = vpop.permute.xlu1 %1672  ;;  %v5910_v58 = vpop.permute.xlu0 %1674 }
 0x22c   : > { %10609 = vst [vmem:[#allocation163_spill] sm:$0xff] %v5906_v60  ;;  %10610 = vst [vmem:[#allocation164_spill] sm:$0xff] %v5910_v58  ;;  %v5933_v58 = vand.u32 127, %v10306_v57  ;;  %v646_v57 = vstv %s5872_s25  ;;  %s6434_s25 = sld [smem:[#allocation3 + $0xe]] }
 0x22d   : > { %2028 = vrot.lane.b32.xlu1 %v5258_v63, %s10307_s21  ;;  %2026 = vrot.lane.b32.xlu0 %v5234_v51, %s10307_s21 }
 0x22e   : > { %vm641_vm1 = vcmp.lt.s32.totalorder %v5933_v58, 69  ;;  %vm686_vm2 = vcmp.lt.s32.totalorder %v5933_v58, 68  ;;  %vm731_vm3 = vcmp.lt.s32.totalorder %v5933_v58, 67  ;;  %vm776_vm4 = vcmp.lt.s32.totalorder %v5933_v58, 66 }
 0x22f   : > { %v5922_v62 = vpop.permute.xlu1 %1693  ;;  %v5926_v60 = vpop.permute.xlu0 %1691  ;;  %v666_v47 = vsel %vm641_vm1, %v5322_v4, %v5348_v13  ;;  %v644_v44 = vsel %vm641_vm1, %v5312_v1, %v5330_v7  ;;  %v645_v45 = vsel %vm641_vm1, %v5316_v2, %v5312_v1  ;;  %v643_v38 = vsel %vm641_vm1, %v5330_v7, %v5318_v3 }
 0x230   : > { %10611 = vst [vmem:[#allocation165_spill] sm:$0xff] %v5922_v62  ;;  %10612 = vst [vmem:[#allocation166_spill] sm:$0xff] %v5926_v60  ;;  %v664_v39 = vsel %vm641_vm1, %v5328_v6, %v5340_v10  ;;  %v6053_v1 = vstv %s5947_s12  ;;  %v642_v7 = vsel %vm641_vm1, %v5318_v3, %v5316_v2  ;;  %s6075_s12 = sld [smem:[#allocation3 + $0x9]]  ;;  %v688_v3 = vsel %vm686_vm2, %v5334_v8, %v5310_v0 }
 0x231   : > { %2032 = vrot.lane.b32.xlu1 %v5252_v61, %s10307_s21  ;;  %2030 = vrot.lane.b32.xlu0 %v5240_v55, %s10307_s21  ;;  %s5953_s21 = sld [smem:[#allocation3 + $0x7]]  ;;  %v650_v43 = vmul.f32 %v646_v57, %v642_v7  ;;  %vm821_vm5 = vcmp.lt.s32.totalorder %v5933_v58, 65  ;;  %vm866_vm6 = vcmp.lt.s32.totalorder %v5933_v58, 64  ;;  %vm911_vm7 = vcmp.lt.s32.totalorder %v5933_v58, 63 }
 0x232   : > { %vm956_vm8 = vcmp.lt.s32.totalorder %v5933_v58, 47  ;;  %vm1001_vm9 = vcmp.lt.s32.totalorder %v5933_v58, 46  ;;  %vm1046_vm10 = vcmp.lt.s32.totalorder %v5933_v58, 45  ;;  %vm1091_vm11 = vcmp.lt.s32.totalorder %v5933_v58, 44 }
 0x233   : > { %v5941_v62 = vpop.permute.xlu1 %1695  ;;  %v5945_v60 = vpop.permute.xlu0 %1697  ;;  %vm1136_vm12 = vcmp.lt.s32.totalorder %v5933_v58, 43  ;;  %vm1181_vm13 = vcmp.lt.s32.totalorder %v5933_v58, 42  ;;  %vm1226_vm14 = vcmp.lt.s32.totalorder %v5933_v58, 41  ;;  %vm1271_vm15 = vcmp.lt.s32.totalorder %v5933_v58, 25 }
 0x234   : > { %10613 = vst [vmem:[#allocation167_spill] sm:$0xff] %v5941_v62  ;;  %10614 = vst [vmem:[#allocation168_spill] sm:$0xff] %v5945_v60  ;;  %v5959_v62 = vstv %s5876_s28  ;;  %v668_v60 = vstv %s5880_s0  ;;  %s6471_s28 = sld [smem:[#allocation3 + $0x8e]]  ;;  %s5046_s0 = smov 87  }
 0x235   : > { %2050 = vrot.lane.b32.xlu1 %v5242_v56, %s5043_s13  ;;  %2048 = vrot.lane.b32.xlu0 %v5222_v42, %s5043_s13  ;;  %v670_v37 = vmul.f32 %v668_v60, %v666_v47  ;;  %v648_v47 = vmul.f32 %v646_v57, %v644_v44  ;;  %v672_v44 = vmul.f32 %v668_v60, %v664_v39 }
 0x236   : > { %v710_v39 = vsel %vm686_vm2, %v5346_v12, %v5352_v14 }
 0x237   : > { %v5967_v54 = vpop.permute.xlu1 %1735  ;;  %v5981_v48 = vpop.permute.xlu0 %1733  ;;  %v6064_v36 = vstv %s5953_s21  ;;  %v676_v7 = vadd.f32 %v672_v44, %v650_v43  ;;  %s6530_s21 = sld [smem:[#allocation3 + $0xf]] }
 0x238   : > { %10615 = vst [vmem:[#allocation169_spill] sm:$0xff] %v5967_v54  ;;  %10616 = vst [vmem:[#allocation170_spill] sm:$0xff] %v5981_v48  ;;  %v5989_v54 = vstv %s5904_s18  ;;  %v665_v48 = vsel %vm641_vm1, %v5348_v13, %v5328_v6  ;;  %v667_v13 = vsel %vm641_vm1, %v5340_v10, %v5322_v4  ;;  %v647_v6 = vmul.f32 %v646_v57, %v645_v45  ;;  %s5045_s18 = smov 103  }
 0x239   : > { %2054 = vrot.lane.b32.xlu1 %v5228_v46, %s5043_s13  ;;  %2052 = vrot.lane.b32.xlu0 %v5220_v41, %s5043_s13  ;;  %10628 = vst [vmem:[#allocation182_spill] sm:$0xff] %v6064_v36  ;;  %v649_v10 = vmul.f32 %v646_v57, %v643_v38  ;;  %v690_v38 = vsel %vm686_vm2, %v5336_v9, %v5324_v5  ;;  %vm1316_vm1 = vcmp.lt.s32.totalorder %v5933_v58, 24 }
 0x23a   : > { %v674_v45 = vadd.f32 %v670_v37, %v648_v47  ;;  %v711_v57 = vsel %vm686_vm2, %v5342_v11, %v5346_v12 }
 0x23b   : > { %v6030_v40 = vpop.permute.xlu1 %1739  ;;  %v6043_v4 = vpop.permute.xlu0 %1737 }
 0x23c   : > { %10624 = vst [vmem:[#allocation178_spill] sm:$0xff] %v6030_v40  ;;  %10626 = vst [vmem:[#allocation180_spill] sm:$0xff] %v6043_v4  ;;  %v671_v40 = vmul.f32 %v668_v60, %v665_v48  ;;  %v669_v4 = vmul.f32 %v668_v60, %v667_v13  ;;  %v689_v48 = vsel %vm686_vm2, %v5324_v5, %v5334_v8  ;;  %v6097_v8 = vstv %s5997_s30  ;;  %s6664_s30 = sld [smem:[#allocation3 + $0x11]] }
 0x23d   : > { %2073 = vrot.lane.b32.xlu1 %v5258_v63, %s5043_s13  ;;  %2071 = vrot.lane.b32.xlu0 %v5234_v51, %s5043_s13  ;;  %v693_v5 = vmul.f32 %v5959_v62, %v689_v48  ;;  %v709_v60 = vsel %vm686_vm2, %v5352_v14, %v5354_v15  ;;  %v716_v14 = vmul.f32 %v5963_v59, %v710_v39  ;;  %v6139_v48 = vstv %s6055_s14  ;;  %s6673_s14 = sld [smem:[#allocation3 + $0x91]] }
 0x23e   : > { %v675_v36 = vadd.f32 %v671_v40, %v649_v10  ;;  %v673_v37 = vadd.f32 %v669_v4, %v647_v6  ;;  %v692_v40 = vmul.f32 %v5959_v62, %v690_v38  ;;  %v734_v6 = vsel %vm731_vm3, %v5360_v17, %v5358_v16 }
 0x23f   : > { %v6077_v2 = vpop.permute.xlu1 %1758  ;;  %v6089_v13 = vpop.permute.xlu0 %1756  ;;  %v697_v47 = vadd.f32 %v693_v5, %v674_v45  ;;  %v717_v38 = vmul.f32 %v5963_v59, %v709_v60  ;;  %v732_v45 = vsel %vm731_vm3, %v5364_v18, %v5366_v19  ;;  %v6167_v39 = vstv %s6087_s15  ;;  %s6709_s15 = sld [smem:[#allocation3 + $0x12]] }
 0x240   : > { %10630 = vst [vmem:[#allocation184_spill] sm:$0xff] %v6077_v2  ;;  %v687_v2 = vsel %vm686_vm2, %v5310_v0, %v5336_v9  ;;  %v712_v0 = vsel %vm686_vm2, %v5354_v15, %v5342_v11  ;;  %v694_v9 = vmul.f32 %v5959_v62, %v688_v3  ;;  %v733_v11 = vsel %vm731_vm3, %v5358_v16, %v5364_v18 }
 0x241   : > { %2077 = vrot.lane.b32.xlu1 %v5252_v61, %s5043_s13  ;;  %2075 = vrot.lane.b32.xlu0 %v5240_v55, %s5043_s13  ;;  %v714_v15 = vmul.f32 %v5963_v59, %v712_v0  ;;  %v695_v43 = vmul.f32 %v5959_v62, %v687_v2  ;;  %v696_v3 = vadd.f32 %v692_v40, %v673_v37  ;;  %v6164_v37 = vstv %s6075_s12  ;;  %s5047_s12 = smov 86  }
 0x242   : > { %v698_v10 = vadd.f32 %v694_v9, %v675_v36  ;;  %v715_v16 = vmul.f32 %v5963_v59, %v711_v57  ;;  %v738_v36 = vmul.f32 %v5970_v53, %v734_v6  ;;  %v739_v44 = vmul.f32 %v5970_v53, %v733_v11 }
 0x243   : > { %v6124_v4 = vpop.permute.xlu1 %1762  ;;  %v6134_v12 = vpop.permute.xlu0 %1760  ;;  %v735_v62 = vsel %vm731_vm3, %v5366_v19, %v5360_v17  ;;  %v699_v2 = vadd.f32 %v695_v43, %v676_v7  ;;  %v718_v18 = vadd.f32 %v714_v15, %v696_v3  ;;  %v756_v17 = vsel %vm731_vm3, %v5372_v21, %v5370_v20 }
 0x244   : > { %v719_v5 = vadd.f32 %v715_v16, %v697_v47  ;;  %v720_v9 = vadd.f32 %v716_v14, %v698_v10  ;;  %v755_v19 = vsel %vm731_vm3, %v5370_v20, %v5376_v22  ;;  %v737_v40 = vmul.f32 %v5970_v53, %v735_v62 }
 0x245   : > { %2095 = vrot.lane.b32.xlu1 %v5242_v56, %s5044_s16  ;;  %2093 = vrot.lane.b32.xlu0 %v5222_v42, %s5044_s16  ;;  %v740_v57 = vmul.f32 %v5970_v53, %v732_v45  ;;  %v754_v60 = vsel %vm731_vm3, %v5376_v22, %v5378_v23  ;;  %v757_v7 = vsel %vm731_vm3, %v5378_v23, %v5372_v21  ;;  %v6194_v11 = vstv %s6122_s11  ;;  %s6743_s11 = sld [smem:[#allocation3 + $0x92]] }
 0x246   : > { %v721_v20 = vadd.f32 %v717_v38, %v699_v2  ;;  %v742_v47 = vadd.f32 %v738_v36, %v719_v5  ;;  %v743_v6 = vadd.f32 %v739_v44, %v720_v9  ;;  %v760_v22 = vmul.f32 %v5973_v52, %v756_v17 }
 0x247   : > { %v6161_v59 = vpop.permute.xlu1 %1780  ;;  %v6169_v0 = vpop.permute.xlu0 %1778  ;;  %v761_v10 = vmul.f32 %v5973_v52, %v755_v19  ;;  %v779_v21 = vsel %vm776_vm4, %v5384_v25, %v5382_v24  ;;  %v778_v23 = vsel %vm776_vm4, %v5382_v24, %v5388_v26  ;;  %v759_v15 = vmul.f32 %v5973_v52, %v757_v7 }
 0x248   : > { %v762_v43 = vmul.f32 %v5973_v52, %v754_v60  ;;  %v777_v3 = vsel %vm776_vm4, %v5388_v26, %v5390_v27  ;;  %v780_v16 = vsel %vm776_vm4, %v5390_v27, %v5384_v25  ;;  %v741_v24 = vadd.f32 %v737_v40, %v718_v18 }
 0x249   : > { %2099 = vrot.lane.b32.xlu1 %v5228_v46, %s5044_s16  ;;  %2097 = vrot.lane.b32.xlu0 %v5220_v41, %s5044_s16  ;;  %v744_v38 = vadd.f32 %v740_v57, %v721_v20  ;;  %v801_v52 = vsel %vm776_vm4, %v5396_v29, %v5394_v28  ;;  %v6232_v26 = vstv %s6146_s17  ;;  %v783_v25 = vmul.f32 %v5976_v50, %v779_v21  ;;  %s6771_s17 = sld [smem:[#allocation3 + $0x13]] }
 0x24a   : > { %v784_v27 = vmul.f32 %v5976_v50, %v778_v23  ;;  %v800_v36 = vsel %vm776_vm4, %v5394_v28, %v5400_v30  ;;  %v802_v44 = vsel %vm776_vm4, %v5402_v31, %v5396_v29  ;;  %v764_v62 = vadd.f32 %v760_v22, %v742_v47 }
 0x24b   : > { %v6198_v53 = vpop.permute.xlu1 %1784  ;;  %v6210_v14 = vpop.permute.xlu0 %1782  ;;  %v765_v2 = vadd.f32 %v761_v10, %v743_v6  ;;  %v782_v5 = vmul.f32 %v5976_v50, %v780_v16  ;;  %v785_v9 = vmul.f32 %v5976_v50, %v777_v3  ;;  %v763_v17 = vadd.f32 %v759_v15, %v741_v24  ;;  %v10635_v15 = vld [vmem:[#allocation13_spill] sm:$0xff] }
 0x24c   : > { %v766_v28 = vadd.f32 %v762_v43, %v744_v38  ;;  %v805_v19 = vmul.f32 %v5979_v49, %v801_v52  ;;  %v799_v29 = vsel %vm776_vm4, %v5400_v30, %v5402_v31  ;;  %v806_v40 = vmul.f32 %v5979_v49, %v800_v36  ;;  %v10636_v43 = vld [vmem:[#allocation14_spill] sm:$0xff]  ;;  %v10638_v52 = vld [vmem:[#allocation15_spill] sm:$0xff] }
 0x24d   : > { %2118 = vrot.lane.b32.xlu1 %v5258_v63, %s5044_s16  ;;  %2116 = vrot.lane.b32.xlu0 %v5234_v51, %s5044_s16  ;;  %v804_v50 = vmul.f32 %v5979_v49, %v802_v44  ;;  %v6267_v57 = vsel %vm821_vm5, %v5408_v33, %v5406_v32  ;;  %v6273_v60 = vsel %vm821_vm5, %v5406_v32, %v5412_v34  ;;  %v6285_v20 = vstv %s6196_s26  ;;  %s6793_s26 = sld [smem:[#allocation3 + $0x93]] }
 0x24e   : > { %10631 = vst [vmem:[#allocation185_spill] sm:$0xff] %v6267_v57  ;;  %10632 = vst [vmem:[#allocation186_spill] sm:$0xff] %v6273_v60  ;;  %v787_v30 = vadd.f32 %v783_v25, %v764_v62  ;;  %v788_v31 = vadd.f32 %v784_v27, %v765_v2  ;;  %v6281_v7 = vsel %vm821_vm5, %v5414_v35, %v5408_v33  ;;  %v10640_v27 = vld [vmem:[#allocation16_spill] sm:$0xff]  ;;  %vm1361_vm2 = vcmp.lt.s32.totalorder %v5933_v58, 23 }
 0x24f   : > { %v6246_v45 = vpop.permute.xlu1 %1803  ;;  %v6252_v18 = vpop.permute.xlu0 %1801  ;;  %10633 = vst [vmem:[#allocation187_spill] sm:$0xff] %v6281_v7  ;;  %v786_v47 = vadd.f32 %v782_v5, %v763_v17  ;;  %v789_v6 = vadd.f32 %v785_v9, %v766_v28  ;;  %v807_v22 = vmul.f32 %v5979_v49, %v799_v29  ;;  %v6296_v10 = vsel %vm821_vm5, %v5412_v34, %v5414_v35  ;;  %v10643_v2 = vld [vmem:[#allocation172_spill] sm:$0xff]  ;;  %v10644_v9 = vld [vmem:[#allocation17_spill] sm:$0xff]  ;;  %v10645_v17 = vld [vmem:[#allocation18_spill] sm:$0xff] }
 0x250   : > { %10634 = vst [vmem:[#allocation188_spill] sm:$0xff] %v6296_v10  ;;  %v828_v21 = vmul.f32 %v5989_v54, %v6267_v57  ;;  %v829_v23 = vmul.f32 %v5989_v54, %v6273_v60  ;;  %v6308_v3 = vsel %vm821_vm5, %v10636_v43, %v10635_v15  ;;  %v6311_v49 = vstv %s6223_s27  ;;  %s6838_s27 = sld [smem:[#allocation3 + $0x14]] }
 0x251   : > { %2122 = vrot.lane.b32.xlu1 %v5252_v61, %s5044_s16  ;;  %2120 = vrot.lane.b32.xlu0 %v5240_v55, %s5044_s16  ;;  %10637 = vst [vmem:[#allocation13_spill] sm:$0xff] %v6308_v3  ;;  %v809_v34 = vadd.f32 %v805_v19, %v787_v30  ;;  %v810_v35 = vadd.f32 %v806_v40, %v788_v31  ;;  %v6350_v19 = vstv %s6250_s2  ;;  %v10648_v30 = vld [vmem:[#allocation19_spill] sm:$0xff]  ;;  %s5048_s2 = smov 85   ;;  %vm1406_vm3 = vcmp.lt.s32.totalorder %v5933_v58, 22 }
 0x252   : > { %v808_v16 = vadd.f32 %v804_v50, %v786_v47  ;;  %v827_v24 = vmul.f32 %v5989_v54, %v6281_v7  ;;  %v830_v38 = vmul.f32 %v5989_v54, %v6296_v10  ;;  %v6325_v25 = vsel %vm821_vm5, %v10635_v15, %v10638_v52  ;;  %v10650_v47 = vld [vmem:[#allocation20_spill] sm:$0xff]  ;;  %v10668_v7 = vld [vmem:[#allocation27_spill] sm:$0xff] }
 0x253   : > { %v6289_v32 = vpop.permute.xlu1 %1807  ;;  %v6298_v33 = vpop.permute.xlu0 %1805  ;;  %10639 = vst [vmem:[#allocation14_spill] sm:$0xff] %v6325_v25  ;;  %v6331_v36 = vsel %vm821_vm5, %v10638_v52, %v10640_v27  ;;  %v6337_v44 = vsel %vm821_vm5, %v10640_v27, %v10636_v43  ;;  %v811_v54 = vadd.f32 %v807_v22, %v789_v6  ;;  %v850_v5 = vmul.f32 %v10643_v2, %v6308_v3 }
 0x254   : > { %10641 = vst [vmem:[#allocation15_spill] sm:$0xff] %v6331_v36  ;;  %10642 = vst [vmem:[#allocation16_spill] sm:$0xff] %v6337_v44  ;;  %v6347_v28 = vsel %vm866_vm6, %v10645_v17, %v10644_v9  ;;  %v832_v40 = vadd.f32 %v828_v21, %v809_v34  ;;  %v833_v50 = vadd.f32 %v829_v23, %v810_v35  ;;  %v10653_v35 = vld [vmem:[#allocation174_spill] sm:$0xff]  ;;  %v6388_v27 = vstv %s6287_s29  ;;  %s6870_s29 = sld [smem:[#allocation3 + $0x94]] }
 0x255   : > { %2140 = vrot.lane.b32.xlu1 %v5242_v56, %s5045_s18  ;;  %2138 = vrot.lane.b32.xlu0 %v5222_v42, %s5045_s18  ;;  %10646 = vst [vmem:[#allocation172_spill] sm:$0xff] %v6347_v28  ;;  %v6358_v31 = vsel %vm866_vm6, %v10644_v9, %v10648_v30  ;;  %v6364_v6 = vsel %vm866_vm6, %v10650_v47, %v10645_v17  ;;  %vm1451_vm4 = vcmp.lt.s32.totalorder %v5933_v58, 21  ;;  %vm1496_vm5 = vcmp.lt.s32.totalorder %v5933_v58, 20 }
 0x256   : > { %10649 = vst [vmem:[#allocation18_spill] sm:$0xff] %v6358_v31  ;;  %10651 = vst [vmem:[#allocation19_spill] sm:$0xff] %v6364_v6  ;;  %v851_v22 = vmul.f32 %v10643_v2, %v6325_v25  ;;  %v849_v21 = vmul.f32 %v10643_v2, %v6337_v44  ;;  %v852_v23 = vmul.f32 %v10643_v2, %v6331_v36  ;;  %v10656_v44 = vld [vmem:[#allocation22_spill] sm:$0xff] }
 0x257   : > { %v6339_v62 = vpop.permute.xlu1 %1825  ;;  %v6352_v29 = vpop.permute.xlu0 %1823  ;;  %v6378_v15 = vsel %vm866_vm6, %v10648_v30, %v10650_v47  ;;  %v831_v43 = vadd.f32 %v827_v24, %v808_v16  ;;  %v834_v34 = vadd.f32 %v830_v38, %v811_v54  ;;  %v873_v52 = vmul.f32 %v10653_v35, %v6347_v28  ;;  %v10655_v47 = vld [vmem:[#allocation21_spill] sm:$0xff]  ;;  %v10659_v54 = vld [vmem:[#allocation23_spill] sm:$0xff]  ;;  %v10665_v25 = vld [vmem:[#allocation26_spill] sm:$0xff] }
 0x258   : > { %10647 = vst [vmem:[#allocation17_spill] sm:$0xff] %v6352_v29  ;;  %10652 = vst [vmem:[#allocation20_spill] sm:$0xff] %v6378_v15  ;;  %v854_v9 = vadd.f32 %v850_v5, %v832_v40  ;;  %v874_v17 = vmul.f32 %v10653_v35, %v6358_v31  ;;  %v872_v30 = vmul.f32 %v10653_v35, %v6364_v6  ;;  %v10661_v40 = vld [vmem:[#allocation24_spill] sm:$0xff] }
 0x259   : > { %2144 = vrot.lane.b32.xlu1 %v5228_v46, %s5045_s18  ;;  %2142 = vrot.lane.b32.xlu0 %v5220_v41, %s5045_s18  ;;  %v6402_v16 = vsel %vm866_vm6, %v10656_v44, %v10655_v47  ;;  %v875_v38 = vmul.f32 %v10653_v35, %v6378_v15  ;;  %v6412_v5 = vsel %vm866_vm6, %v10655_v47, %v10659_v54  ;;  %v10664_v47 = vld [vmem:[#allocation25_spill] sm:$0xff] }
 0x25a   : > { %10657 = vst [vmem:[#allocation21_spill] sm:$0xff] %v6402_v16  ;;  %10660 = vst [vmem:[#allocation23_spill] sm:$0xff] %v6412_v5  ;;  %v6418_v6 = vsel %vm866_vm6, %v10659_v54, %v10661_v40  ;;  %v6424_v31 = vsel %vm866_vm6, %v10661_v40, %v10656_v44  ;;  %v855_v35 = vadd.f32 %v851_v22, %v833_v50  ;;  %v10667_v44 = vld [vmem:[#allocation176_spill] sm:$0xff]  ;;  %vm1541_vm6 = vcmp.lt.s32.totalorder %v5933_v58, 19 }
 0x25b   : > { %v6392_v2 = vpop.permute.xlu1 %1829  ;;  %v6404_v24 = vpop.permute.xlu0 %1827  ;;  %10662 = vst [vmem:[#allocation24_spill] sm:$0xff] %v6418_v6  ;;  %10663 = vst [vmem:[#allocation189_spill] sm:$0xff] %v6424_v31  ;;  %v853_v15 = vadd.f32 %v849_v21, %v831_v43  ;;  %v856_v36 = vadd.f32 %v852_v23, %v834_v34  ;;  %v6432_v28 = vsel %vm911_vm7, %v10665_v25, %v10664_v47  ;;  %v10670_v22 = vld [vmem:[#allocation28_spill] sm:$0xff] }
 0x25c   : > { %10654 = vst [vmem:[#allocation174_spill] sm:$0xff] %v6392_v2  ;;  %10658 = vst [vmem:[#allocation22_spill] sm:$0xff] %v6404_v24  ;;  %v877_v54 = vadd.f32 %v873_v52, %v854_v9  ;;  %v895_v40 = vmul.f32 %v10667_v44, %v6402_v16  ;;  %v6444_v50 = vsel %vm911_vm7, %v10664_v47, %v10668_v7  ;;  %v10701_v24 = vld [vmem:[#allocation43_spill] sm:$0xff]  ;;  %v10722_v2 = vld [vmem:[#allocation58_spill] sm:$0xff] }
 0x25d   : > { %2163 = vrot.lane.b32.xlu1 %v5258_v63, %s5045_s18  ;;  %10666 = vst [vmem:[#allocation25_spill] sm:$0xff] %v6432_v28  ;;  %2161 = vrot.lane.b32.xlu0 %v5234_v51, %s5045_s18  ;;  %10669 = vst [vmem:[#allocation26_spill] sm:$0xff] %v6444_v50  ;;  %v6450_v21 = vsel %vm911_vm7, %v10670_v22, %v10665_v25  ;;  %v896_v43 = vmul.f32 %v10667_v44, %v6412_v5 }
 0x25e   : > { %10671 = vst [vmem:[#allocation176_spill] sm:$0xff] %v6450_v21  ;;  %v894_v34 = vmul.f32 %v10667_v44, %v6424_v31  ;;  %v897_v52 = vmul.f32 %v10667_v44, %v6418_v6  ;;  %v6464_v9 = vsel %vm911_vm7, %v10668_v7, %v10670_v22  ;;  %v878_v47 = vadd.f32 %v874_v17, %v855_v35  ;;  %v10675_v31 = vld [vmem:[#allocation179_spill] sm:$0xff]  ;;  %v10676_v22 = vld [vmem:[#allocation29_spill] sm:$0xff]  ;;  %v10677_v6 = vld [vmem:[#allocation30_spill] sm:$0xff] }
 0x25f   : > { %v6452_v23 = vpop.permute.xlu1 %1848  ;;  %10673 = vst [vmem:[#allocation28_spill] sm:$0xff] %v6464_v9  ;;  %v6467_v25 = vpop.permute.xlu0 %1846  ;;  %v876_v5 = vadd.f32 %v872_v30, %v853_v15  ;;  %v879_v16 = vadd.f32 %v875_v38, %v856_v36  ;;  %v918_v10 = vmul.f32 %v10675_v31, %v6432_v28  ;;  %v919_v7 = vmul.f32 %v10675_v31, %v6444_v50  ;;  %v10679_v36 = vld [vmem:[#allocation31_spill] sm:$0xff] }
 0x260   : > { %10672 = vst [vmem:[#allocation27_spill] sm:$0xff] %v6452_v23  ;;  %10674 = vst [vmem:[#allocation190_spill] sm:$0xff] %v6467_v25  ;;  %v917_v44 = vmul.f32 %v10675_v31, %v6450_v21  ;;  %v6483_v15 = vsel %vm911_vm7, %v10677_v6, %v10676_v22  ;;  %v6489_v17 = vsel %vm911_vm7, %v10676_v22, %v10679_v36  ;;  %v6496_v35 = vstv %s6381_s19  ;;  %v10682_v22 = vld [vmem:[#allocation32_spill] sm:$0xff]  ;;  %s6934_s19 = sld [smem:[#allocation3 + $0x95]] }
 0x261   : > { %2167 = vrot.lane.b32.xlu1 %v5252_v61, %s5045_s18  ;;  %10678 = vst [vmem:[#allocation179_spill] sm:$0xff] %v6483_v15  ;;  %10680 = vst [vmem:[#allocation29_spill] sm:$0xff] %v6489_v17  ;;  %2165 = vrot.lane.b32.xlu0 %v5240_v55, %s5045_s18  ;;  %v899_v30 = vadd.f32 %v895_v40, %v877_v54  ;;  %v920_v38 = vmul.f32 %v10675_v31, %v6464_v9  ;;  %v6499_v21 = vstv %s6390_s20  ;;  %s6902_s18 = sld [smem:[#allocation3 + $0x15]] }
 0x262   : > { %v900_v28 = vadd.f32 %v896_v43, %v878_v47  ;;  %v898_v60 = vadd.f32 %v894_v34, %v876_v5  ;;  %v901_v3 = vadd.f32 %v897_v52, %v879_v16  ;;  %v6507_v57 = vsel %vm911_vm7, %v10682_v22, %v10677_v6  ;;  %v10686_v16 = vld [vmem:[#allocation33_spill] sm:$0xff]  ;;  %v10687_v43 = vld [vmem:[#allocation34_spill] sm:$0xff]  ;;  %s6962_s20 = sld [smem:[#allocation3 + $0x16]] }
 0x263   : > { %v6501_v50 = vpop.permute.xlu1 %1852  ;;  %10683 = vst [vmem:[#allocation31_spill] sm:$0xff] %v6507_v57  ;;  %v6509_v54 = vpop.permute.xlu0 %1850  ;;  %v940_v31 = vmul.f32 %v6053_v1, %v6483_v15  ;;  %v941_v40 = vmul.f32 %v6053_v1, %v6489_v17  ;;  %v6519_v5 = vsel %vm911_vm7, %v10679_v36, %v10682_v22  ;;  %v959_v6 = vsel %vm956_vm8, %v10687_v43, %v10686_v16  ;;  %v10688_v17 = vld [vmem:[#allocation35_spill] sm:$0xff] }
 0x264   : > { %10681 = vst [vmem:[#allocation30_spill] sm:$0xff] %v6501_v50  ;;  %10684 = vst [vmem:[#allocation32_spill] sm:$0xff] %v6509_v54  ;;  %v922_v34 = vadd.f32 %v918_v10, %v899_v30  ;;  %v923_v52 = vadd.f32 %v919_v7, %v900_v28  ;;  %v921_v47 = vadd.f32 %v917_v44, %v898_v60  ;;  %v6528_v9 = vstv %s6434_s25  ;;  %v10689_v10 = vld [vmem:[#allocation36_spill] sm:$0xff]  ;;  %v10691_v7 = vld [vmem:[#allocation182_spill] sm:$0xff]  ;;  %s6988_s25 = sld [smem:[#allocation3 + $0x96]] }
 0x265   : > { %10685 = vst [vmem:[#allocation191_spill] sm:$0xff] %v6519_v5  ;;  %2185 = vrot.lane.b32.xlu1 %v5242_v56, %s5046_s0  ;;  %2183 = vrot.lane.b32.xlu0 %v5222_v42, %s5046_s0  ;;  %v924_v36 = vadd.f32 %v920_v38, %v901_v3  ;;  %v939_v22 = vmul.f32 %v6053_v1, %v6507_v57  ;;  %v10692_v38 = vld [vmem:[#allocation37_spill] sm:$0xff]  ;;  %vm1586_vm7 = vcmp.lt.s32.totalorder %v5933_v58, 3 }
 0x266   : > { %v958_v15 = vsel %vm956_vm8, %v10686_v16, %v10688_v17  ;;  %v960_v60 = vsel %vm956_vm8, %v10689_v10, %v10687_v43  ;;  %v942_v3 = vmul.f32 %v6053_v1, %v6519_v5  ;;  %v963_v44 = vmul.f32 %v10691_v7, %v959_v6  ;;  %v10693_v16 = vld [vmem:[#allocation38_spill] sm:$0xff]  ;;  %v10696_v5 = vld [vmem:[#allocation40_spill] sm:$0xff] }
 0x267   : > { %v6547_v28 = vpop.permute.xlu1 %1870  ;;  %v957_v30 = vsel %vm956_vm8, %v10688_v17, %v10689_v10  ;;  %v981_v43 = vsel %vm956_vm8, %v10693_v16, %v10692_v38  ;;  %v6560_v57 = vpop.permute.xlu0 %1868  ;;  %v944_v54 = vadd.f32 %v940_v31, %v922_v34  ;;  %v945_v50 = vadd.f32 %v941_v40, %v923_v52  ;;  %v10697_v52 = vld [vmem:[#allocation183_spill] sm:$0xff] }
 0x268   : > { %10690 = vst [vmem:[#allocation33_spill] sm:$0xff] %v6547_v28  ;;  %10694 = vst [vmem:[#allocation34_spill] sm:$0xff] %v6560_v57  ;;  %v10695_v28 = vld [vmem:[#allocation39_spill] sm:$0xff]  ;;  %v6567_v6 = vstv %s6471_s28  ;;  %v964_v17 = vmul.f32 %v10691_v7, %v958_v15  ;;  %v962_v10 = vmul.f32 %v10691_v7, %v960_v60  ;;  %v982_v40 = vsel %vm956_vm8, %v10696_v5, %v10693_v16  ;;  %v10699_v57 = vld [vmem:[#allocation42_spill] sm:$0xff]  ;;  %s5049_s28 = smov 84  }
 0x269   : > { %v980_v1 = vsel %vm956_vm8, %v10692_v38, %v10695_v28  ;;  %2189 = vrot.lane.b32.xlu1 %v5228_v46, %s5046_s0  ;;  %v979_v31 = vsel %vm956_vm8, %v10695_v28, %v10696_v5  ;;  %2187 = vrot.lane.b32.xlu0 %v5220_v41, %s5046_s0  ;;  %v943_v34 = vadd.f32 %v939_v22, %v921_v47  ;;  %v10698_v38 = vld [vmem:[#allocation41_spill] sm:$0xff]  ;;  %vm1631_vm8 = vcmp.lt.s32.totalorder %v5933_v58, 2 }
 0x26a   : > { %v965_v15 = vmul.f32 %v10691_v7, %v957_v30  ;;  %v985_v60 = vmul.f32 %v10697_v52, %v981_v43  ;;  %v1004_v28 = vsel %vm1001_vm9, %v10699_v57, %v10698_v38  ;;  %v946_v23 = vadd.f32 %v942_v3, %v924_v36  ;;  %v10703_v43 = vld [vmem:[#allocation44_spill] sm:$0xff] }
 0x26b   : > { %v6591_v25 = vpop.permute.xlu1 %1874  ;;  %v967_v5 = vadd.f32 %v963_v44, %v944_v54  ;;  %v986_v16 = vmul.f32 %v10697_v52, %v980_v1  ;;  %v1003_v47 = vsel %vm1001_vm9, %v10698_v38, %v10701_v24  ;;  %v6598_v22 = vpop.permute.xlu0 %1872  ;;  %v984_v7 = vmul.f32 %v10697_v52, %v982_v40 }
 0x26c   : > { %10700 = vst [vmem:[#allocation35_spill] sm:$0xff] %v6591_v25  ;;  %10702 = vst [vmem:[#allocation36_spill] sm:$0xff] %v6598_v22  ;;  %v987_v30 = vmul.f32 %v10697_v52, %v979_v31  ;;  %v1002_v36 = vsel %vm1001_vm9, %v10701_v24, %v10703_v43  ;;  %v1005_v54 = vsel %vm1001_vm9, %v10703_v43, %v10699_v57  ;;  %v6617_v31 = vstv %s6530_s21  ;;  %v10711_v22 = vld [vmem:[#allocation50_spill] sm:$0xff]  ;;  %s7072_s21 = sld [smem:[#allocation3 + $0x97]] }
 0x26d   : > { %2208 = vrot.lane.b32.xlu1 %v5258_v63, %s5046_s0  ;;  %v968_v3 = vadd.f32 %v964_v17, %v945_v50  ;;  %v966_v44 = vadd.f32 %v962_v10, %v943_v34  ;;  %v1008_v1 = vmul.f32 %v6097_v8, %v1004_v28  ;;  %2206 = vrot.lane.b32.xlu0 %v5234_v51, %s5046_s0  ;;  %v6623_v52 = vstv %s6545_s1  ;;  %v10705_v17 = vld [vmem:[#allocation45_spill] sm:$0xff]  ;;  %v10706_v10 = vld [vmem:[#allocation46_spill] sm:$0xff]  ;;  %v10707_v28 = vld [vmem:[#allocation47_spill] sm:$0xff]  ;;  %s7086_s1 = sld [smem:[#allocation3 + $0x18]] }
 0x26e   : > { %v969_v24 = vadd.f32 %v965_v15, %v946_v23  ;;  %v989_v40 = vadd.f32 %v985_v60, %v967_v5  ;;  %v1009_v57 = vmul.f32 %v6097_v8, %v1003_v47  ;;  %v1007_v43 = vmul.f32 %v6097_v8, %v1005_v54 }
 0x26f   : > { %v6625_v38 = vpop.permute.xlu1 %1893  ;;  %v1010_v50 = vmul.f32 %v6097_v8, %v1002_v36  ;;  %v1026_v34 = vsel %vm1001_vm9, %v10706_v10, %v10705_v17  ;;  %v1025_v23 = vsel %vm1001_vm9, %v10705_v17, %v10707_v28  ;;  %v6637_v15 = vpop.permute.xlu0 %1891  ;;  %v990_v60 = vadd.f32 %v986_v16, %v968_v3  ;;  %v10710_v17 = vld [vmem:[#allocation49_spill] sm:$0xff] }
 0x270   : > { %10704 = vst [vmem:[#allocation182_spill] sm:$0xff] %v6625_v38  ;;  %10708 = vst [vmem:[#allocation37_spill] sm:$0xff] %v6637_v15  ;;  %v988_v5 = vadd.f32 %v984_v7, %v966_v44  ;;  %v991_v47 = vadd.f32 %v987_v30, %v969_v24  ;;  %v10709_v38 = vld [vmem:[#allocation48_spill] sm:$0xff]  ;;  %v1012_v36 = vadd.f32 %v1008_v1, %v989_v40  ;;  %v6654_v7 = vstv %s6581_s23  ;;  %v10712_v1 = vld [vmem:[#allocation51_spill] sm:$0xff]  ;;  %s5050_s23 = smov 83  }
 0x271   : > { %v1027_v8 = vsel %vm1001_vm9, %v10709_v38, %v10706_v10  ;;  %2212 = vrot.lane.b32.xlu1 %v5252_v61, %s5046_s0  ;;  %v1024_v54 = vsel %vm1001_vm9, %v10707_v28, %v10709_v38  ;;  %v1049_v16 = vsel %vm1046_vm10, %v10711_v22, %v10710_v17  ;;  %2210 = vrot.lane.b32.xlu0 %v5240_v55, %s5046_s0  ;;  %s7023_s0 = sld [smem:[#allocation3 + $0x17]]  ;;  %vm1676_vm9 = vcmp.lt.s32.totalorder %v5933_v58, 1 }
 0x272   : > { %v1013_v30 = vadd.f32 %v1009_v57, %v990_v60  ;;  %v1030_v3 = vmul.f32 %v6139_v48, %v1026_v34  ;;  %v1031_v44 = vmul.f32 %v6139_v48, %v1025_v23  ;;  %v1048_v24 = vsel %vm1046_vm10, %v10710_v17, %v10712_v1  ;;  %v10714_v57 = vld [vmem:[#allocation52_spill] sm:$0xff] }
 0x273   : > { %v6666_v40 = vpop.permute.xlu1 %1897  ;;  %v1011_v38 = vadd.f32 %v1007_v43, %v988_v5  ;;  %v1014_v10 = vadd.f32 %v1010_v50, %v991_v47  ;;  %v1029_v28 = vmul.f32 %v6139_v48, %v1027_v8  ;;  %v1050_v34 = vsel %vm1046_vm10, %v10714_v57, %v10711_v22  ;;  %v6675_v23 = vpop.permute.xlu0 %1895  ;;  %v10716_v5 = vld [vmem:[#allocation53_spill] sm:$0xff]  ;;  %v10717_v47 = vld [vmem:[#allocation54_spill] sm:$0xff]  ;;  %v10718_v8 = vld [vmem:[#allocation55_spill] sm:$0xff] }
 0x274   : > { %10713 = vst [vmem:[#allocation38_spill] sm:$0xff] %v6666_v40  ;;  %10715 = vst [vmem:[#allocation39_spill] sm:$0xff] %v6675_v23  ;;  %v1032_v60 = vmul.f32 %v6139_v48, %v1024_v54  ;;  %v1053_v17 = vmul.f32 %v6164_v37, %v1049_v16  ;;  %v1047_v43 = vsel %vm1046_vm10, %v10712_v1, %v10714_v57  ;;  %v6685_v50 = vstv %s6611_s24  ;;  %v10719_v16 = vld [vmem:[#allocation56_spill] sm:$0xff]  ;;  %s7288_s24 = sld [smem:[#allocation3 + $0x98]] }
 0x275   : > { %2230 = vrot.lane.b32.xlu1 %v5242_v56, %s5047_s12  ;;  %v1054_v22 = vmul.f32 %v6164_v37, %v1048_v24  ;;  %v1071_v48 = vsel %vm1046_vm10, %v10717_v47, %v10716_v5  ;;  %v1070_v54 = vsel %vm1046_vm10, %v10716_v5, %v10718_v8  ;;  %v1072_v1 = vsel %vm1046_vm10, %v10719_v16, %v10717_v47  ;;  %v10721_v47 = vld [vmem:[#allocation57_spill] sm:$0xff] }
 0x276   : > { %2228 = vrot.lane.b32.xlu0 %v5222_v42, %s5047_s12  ;;  %v1034_v57 = vadd.f32 %v1030_v3, %v1012_v36  ;;  %v1035_v24 = vadd.f32 %v1031_v44, %v1013_v30  ;;  %v1052_v23 = vmul.f32 %v6164_v37, %v1050_v34  ;;  %v1069_v40 = vsel %vm1046_vm10, %v10718_v8, %v10719_v16  ;;  %v10723_v30 = vld [vmem:[#allocation59_spill] sm:$0xff] }
 0x277   : > { %v6711_v5 = vpop.permute.xlu1 %1915  ;;  %v1033_v15 = vadd.f32 %v1029_v28, %v1011_v38  ;;  %v1055_v25 = vmul.f32 %v6164_v37, %v1047_v43  ;;  %v1094_v36 = vsel %vm1091_vm11, %v10722_v2, %v10721_v47  ;;  %v1093_v3 = vsel %vm1091_vm11, %v10721_v47, %v10723_v30  ;;  %v6722_v44 = vpop.permute.xlu0 %1913  ;;  %v10725_v37 = vld [vmem:[#allocation60_spill] sm:$0xff] }
 0x278   : > { %10720 = vst [vmem:[#allocation40_spill] sm:$0xff] %v6711_v5  ;;  %10724 = vst [vmem:[#allocation183_spill] sm:$0xff] %v6722_v44  ;;  %v1075_v34 = vmul.f32 %v6167_v39, %v1071_v48  ;;  %v1076_v8 = vmul.f32 %v6167_v39, %v1070_v54  ;;  %v1074_v38 = vmul.f32 %v6167_v39, %v1072_v1  ;;  %vm1741_vm10 = vcmp.lt.s32.totalorder %v5933_v58, 127 }
 0x279   : > { %v1095_v28 = vsel %vm1091_vm11, %v10725_v37, %v10722_v2  ;;  %2234 = vrot.lane.b32.xlu1 %v5228_v46, %s5047_s12  ;;  %v1036_v43 = vadd.f32 %v1032_v60, %v1014_v10  ;;  %v1057_v16 = vadd.f32 %v1053_v17, %v1034_v57  ;;  %v1058_v47 = vadd.f32 %v1054_v22, %v1035_v24  ;;  %v10728_v24 = vld [vmem:[#allocation61_spill] sm:$0xff] }
 0x27a   : > { %v1077_v44 = vmul.f32 %v6167_v39, %v1069_v40  ;;  %2232 = vrot.lane.b32.xlu0 %v5220_v41, %s5047_s12  ;;  %v1056_v48 = vadd.f32 %v1052_v23, %v1033_v15  ;;  %v1098_v54 = vmul.f32 %v6194_v11, %v1094_v36  ;;  %v1099_v1 = vmul.f32 %v6194_v11, %v1093_v3  ;;  %v10729_v36 = vld [vmem:[#allocation62_spill] sm:$0xff] }
 0x27b   : > { %v1092_v2 = vsel %vm1091_vm11, %v10723_v30, %v10725_v37  ;;  %v6745_v10 = vpop.permute.xlu1 %1919  ;;  %v1059_v39 = vadd.f32 %v1055_v25, %v1036_v43  ;;  %v1097_v40 = vmul.f32 %v6194_v11, %v1095_v28  ;;  %v6749_v60 = vstv %s6664_s30  ;;  %v6754_v23 = vpop.permute.xlu0 %1917  ;;  %v10730_v37 = vld [vmem:[#allocation63_spill] sm:$0xff]  ;;  %s5051_s30 = smov 82  }
 0x27c   : > { %10726 = vst [vmem:[#allocation41_spill] sm:$0xff] %v6745_v10  ;;  %v6752_v15 = vstv %s6673_s14  ;;  %10727 = vst [vmem:[#allocation42_spill] sm:$0xff] %v6754_v23  ;;  %v1079_v17 = vadd.f32 %v1075_v34, %v1057_v16  ;;  %v1080_v22 = vadd.f32 %v1076_v8, %v1058_v47  ;;  %v1078_v57 = vadd.f32 %v1074_v38, %v1056_v48  ;;  %v10731_v34 = vld [vmem:[#allocation64_spill] sm:$0xff]  ;;  %s7448_s14 = sld [smem:[#allocation3 + $0x19]] }
 0x27d   : > { %v1116_v30 = vsel %vm1091_vm11, %v10729_v36, %v10728_v24  ;;  %2253 = vrot.lane.b32.xlu1 %v5258_v63, %s5047_s12  ;;  %v1081_v25 = vadd.f32 %v1077_v44, %v1059_v39  ;;  %v1100_v3 = vmul.f32 %v6194_v11, %v1092_v2  ;;  %v1115_v28 = vsel %vm1091_vm11, %v10728_v24, %v10730_v37  ;;  %v10733_v2 = vld [vmem:[#allocation65_spill] sm:$0xff]  ;;  %v10734_v39 = vld [vmem:[#allocation66_spill] sm:$0xff] }
 0x27e   : > { %v1117_v8 = vsel %vm1091_vm11, %v10731_v34, %v10729_v36  ;;  %2251 = vrot.lane.b32.xlu0 %v5234_v51, %s5047_s12  ;;  %v1102_v38 = vadd.f32 %v1098_v54, %v1079_v17  ;;  %v1103_v43 = vadd.f32 %v1099_v1, %v1080_v22  ;;  %v1114_v11 = vsel %vm1091_vm11, %v10730_v37, %v10731_v34  ;;  %v10735_v36 = vld [vmem:[#allocation67_spill] sm:$0xff]  ;;  %v10737_v22 = vld [vmem:[#allocation68_spill] sm:$0xff]  ;;  %v10738_v34 = vld [vmem:[#allocation69_spill] sm:$0xff] }
 0x27f   : > { %v6780_v44 = vstv %s6709_s15  ;;  %v6782_v16 = vpop.permute.xlu1 %1938  ;;  %v1101_v47 = vadd.f32 %v1097_v40, %v1078_v57  ;;  %v1120_v48 = vmul.f32 %v6232_v26, %v1116_v30  ;;  %v1139_v24 = vsel %vm1136_vm12, %v10734_v39, %v10733_v2  ;;  %v6795_v1 = vpop.permute.xlu0 %1936  ;;  %s7462_s15 = sld [smem:[#allocation3 + $0x99]] }
 0x280   : > { %10732 = vst [vmem:[#allocation43_spill] sm:$0xff] %v6782_v16  ;;  %v1138_v54 = vsel %vm1136_vm12, %v10733_v2, %v10735_v36  ;;  %10736 = vst [vmem:[#allocation44_spill] sm:$0xff] %v6795_v1  ;;  %v1121_v17 = vmul.f32 %v6232_v26, %v1115_v28  ;;  %v1119_v40 = vmul.f32 %v6232_v26, %v1117_v8  ;;  %v10739_v8 = vld [vmem:[#allocation70_spill] sm:$0xff]  ;;  %v10740_v1 = vld [vmem:[#allocation71_spill] sm:$0xff]  ;;  %vm1786_vm11 = vcmp.lt.s32.totalorder %v5933_v58, 126 }
 0x281   : > { %v1137_v57 = vsel %vm1136_vm12, %v10735_v36, %v10737_v22  ;;  %v1140_v30 = vsel %vm1136_vm12, %v10737_v22, %v10734_v39  ;;  %2257 = vrot.lane.b32.xlu1 %v5252_v61, %s5047_s12  ;;  %v1104_v37 = vadd.f32 %v1100_v3, %v1081_v25  ;;  %v1122_v28 = vmul.f32 %v6232_v26, %v1114_v11  ;;  %v10741_v25 = vld [vmem:[#allocation72_spill] sm:$0xff] }
 0x282   : > { %v1161_v2 = vsel %vm1136_vm12, %v10739_v8, %v10738_v34  ;;  %v1160_v36 = vsel %vm1136_vm12, %v10738_v34, %v10740_v1  ;;  %2255 = vrot.lane.b32.xlu0 %v5240_v55, %s5047_s12  ;;  %v1143_v39 = vmul.f32 %v6285_v20, %v1139_v24  ;;  %v1144_v22 = vmul.f32 %v6285_v20, %v1138_v54  ;;  %s5052_s12 = smov 81  }
 0x283   : > { %v1162_v26 = vsel %vm1136_vm12, %v10741_v25, %v10739_v8  ;;  %v6828_v3 = vstv %s6743_s11  ;;  %v6830_v11 = vpop.permute.xlu1 %1942  ;;  %v1124_v16 = vadd.f32 %v1120_v48, %v1102_v38  ;;  %v1142_v34 = vmul.f32 %v6285_v20, %v1140_v30  ;;  %v6840_v54 = vpop.permute.xlu0 %1940  ;;  %v10744_v48 = vld [vmem:[#allocation73_spill] sm:$0xff]  ;;  %s7471_s11 = sld [smem:[#allocation3 + $0x1a]] }
 0x284   : > { %10742 = vst [vmem:[#allocation45_spill] sm:$0xff] %v6830_v11  ;;  %v1145_v23 = vmul.f32 %v6285_v20, %v1137_v57  ;;  %v1159_v24 = vsel %vm1136_vm12, %v10740_v1, %v10741_v25  ;;  %10743 = vst [vmem:[#allocation46_spill] sm:$0xff] %v6840_v54  ;;  %v1125_v8 = vadd.f32 %v1121_v17, %v1103_v43  ;;  %v10745_v1 = vld [vmem:[#allocation74_spill] sm:$0xff]  ;;  %v6852_v30 = vstv %s6771_s17  ;;  %v10748_v25 = vld [vmem:[#allocation76_spill] sm:$0xff]  ;;  %s7483_s17 = sld [smem:[#allocation3 + $0x9a]] }
 0x285   : > { %v1123_v10 = vadd.f32 %v1119_v40, %v1101_v47  ;;  %v1165_v5 = vmul.f32 %v6311_v49, %v1161_v2  ;;  %v1166_v11 = vmul.f32 %v6311_v49, %v1160_v36  ;;  %2275 = vrot.lane.b32.xlu1 %v5242_v56, %s5048_s2  ;;  %v1126_v20 = vadd.f32 %v1122_v28, %v1104_v37  ;;  %v10746_v40 = vld [vmem:[#allocation75_spill] sm:$0xff] }
 0x286   : > { %v1164_v38 = vmul.f32 %v6311_v49, %v1162_v26  ;;  %v1184_v57 = vsel %vm1181_vm13, %v10745_v1, %v10744_v48  ;;  %2273 = vrot.lane.b32.xlu0 %v5222_v42, %s5048_s2  ;;  %v1147_v43 = vadd.f32 %v1143_v39, %v1124_v16  ;;  %v1148_v47 = vadd.f32 %v1144_v22, %v1125_v8  ;;  %v10751_v8 = vld [vmem:[#allocation78_spill] sm:$0xff] }
 0x287   : > { %v1167_v17 = vmul.f32 %v6311_v49, %v1159_v24  ;;  %v1183_v37 = vsel %vm1181_vm13, %v10744_v48, %v10746_v40  ;;  %v6861_v28 = vpop.permute.xlu1 %1960  ;;  %v1146_v2 = vadd.f32 %v1142_v34, %v1123_v10  ;;  %v1149_v36 = vadd.f32 %v1145_v23, %v1126_v20  ;;  %v6872_v16 = vpop.permute.xlu0 %1958  ;;  %v10750_v24 = vld [vmem:[#allocation77_spill] sm:$0xff] }
 0x288   : > { %10747 = vst [vmem:[#allocation47_spill] sm:$0xff] %v6861_v28  ;;  %v1185_v26 = vsel %vm1181_vm13, %v10748_v25, %v10745_v1  ;;  %v6868_v54 = vstv %s6793_s26  ;;  %10749 = vst [vmem:[#allocation48_spill] sm:$0xff] %v6872_v16  ;;  %v1169_v49 = vadd.f32 %v1165_v5, %v1147_v43  ;;  %v1170_v39 = vadd.f32 %v1166_v11, %v1148_v47  ;;  %v10752_v11 = vld [vmem:[#allocation79_spill] sm:$0xff]  ;;  %v10765_v28 = vld [vmem:[#allocation88_spill] sm:$0xff]  ;;  %s7493_s26 = sld [smem:[#allocation3 + $0x1b]] }
 0x289   : > { %v1188_v22 = vmul.f32 %v6350_v19, %v1184_v57  ;;  %v1182_v10 = vsel %vm1181_vm13, %v10746_v40, %v10748_v25  ;;  %2279 = vrot.lane.b32.xlu1 %v5228_v46, %s5048_s2  ;;  %v1168_v23 = vadd.f32 %v1164_v38, %v1146_v2  ;;  %v1189_v34 = vmul.f32 %v6350_v19, %v1183_v37  ;;  %v10753_v57 = vld [vmem:[#allocation80_spill] sm:$0xff]  ;;  %v10755_v37 = vld [vmem:[#allocation81_spill] sm:$0xff] }
 0x28a   : > { %v1206_v5 = vsel %vm1181_vm13, %v10751_v8, %v10750_v24  ;;  %v1205_v20 = vsel %vm1181_vm13, %v10750_v24, %v10752_v11  ;;  %2277 = vrot.lane.b32.xlu0 %v5220_v41, %s5048_s2  ;;  %v1171_v48 = vadd.f32 %v1167_v17, %v1149_v36  ;;  %v1187_v1 = vmul.f32 %v6350_v19, %v1185_v26  ;;  %v10756_v17 = vld [vmem:[#allocation82_spill] sm:$0xff]  ;;  %v10757_v36 = vld [vmem:[#allocation83_spill] sm:$0xff] }
 0x28b   : > { %v1204_v38 = vsel %vm1181_vm13, %v10752_v11, %v10753_v57  ;;  %v1207_v43 = vsel %vm1181_vm13, %v10753_v57, %v10751_v8  ;;  %v6904_v47 = vpop.permute.xlu1 %1964  ;;  %v1190_v40 = vmul.f32 %v6350_v19, %v1182_v10  ;;  %v1229_v2 = vsel %vm1226_vm14, %v10756_v17, %v10755_v37  ;;  %v6918_v24 = vpop.permute.xlu0 %1962  ;;  %v10759_v19 = vld [vmem:[#allocation84_spill] sm:$0xff] }
 0x28c   : > { %10754 = vst [vmem:[#allocation49_spill] sm:$0xff] %v6904_v47  ;;  %v1228_v25 = vsel %vm1226_vm14, %v10755_v37, %v10757_v36  ;;  %v6916_v26 = vstv %s6838_s27  ;;  %10758 = vst [vmem:[#allocation50_spill] sm:$0xff] %v6918_v24  ;;  %v1192_v8 = vadd.f32 %v1188_v22, %v1169_v49  ;;  %v1210_v11 = vmul.f32 %v6388_v27, %v1206_v5  ;;  %s7501_s27 = sld [smem:[#allocation3 + $0x9b]] }
 0x28d   : > { %v1211_v57 = vmul.f32 %v6388_v27, %v1205_v20  ;;  %v1230_v10 = vsel %vm1226_vm14, %v10759_v19, %v10756_v17  ;;  %2298 = vrot.lane.b32.xlu1 %v5258_v63, %s5048_s2  ;;  %v1193_v47 = vadd.f32 %v1189_v34, %v1170_v39  ;;  %v1209_v37 = vmul.f32 %v6388_v27, %v1207_v43  ;;  %v10760_v39 = vld [vmem:[#allocation85_spill] sm:$0xff]  ;;  %v10761_v34 = vld [vmem:[#allocation86_spill] sm:$0xff] }
 0x28e   : > { %v1212_v16 = vmul.f32 %v6388_v27, %v1204_v38  ;;  %v1227_v49 = vsel %vm1226_vm14, %v10757_v36, %v10759_v19  ;;  %2296 = vrot.lane.b32.xlu0 %v5234_v51, %s5048_s2  ;;  %v1191_v22 = vadd.f32 %v1187_v1, %v1168_v23  ;;  %v1233_v5 = vmul.f32 %v6496_v35, %v1229_v2  ;;  %v10763_v36 = vld [vmem:[#allocation87_spill] sm:$0xff] }
 0x28f   : > { %v1234_v20 = vmul.f32 %v6496_v35, %v1228_v25  ;;  %v1251_v27 = vsel %vm1226_vm14, %v10761_v34, %v10760_v39  ;;  %v6945_v38 = vpop.permute.xlu1 %1983  ;;  %v1194_v43 = vadd.f32 %v1190_v40, %v1171_v48  ;;  %v1232_v17 = vmul.f32 %v6496_v35, %v1230_v10  ;;  %v6955_v2 = vpop.permute.xlu0 %1981 }
 0x290   : > { %10762 = vst [vmem:[#allocation51_spill] sm:$0xff] %v6945_v38  ;;  %v1250_v23 = vsel %vm1226_vm14, %v10760_v39, %v10763_v36  ;;  %v6953_v1 = vstv %s6870_s29  ;;  %10764 = vst [vmem:[#allocation52_spill] sm:$0xff] %v6955_v2  ;;  %v1214_v25 = vadd.f32 %v1210_v11, %v1192_v8  ;;  %v1215_v19 = vadd.f32 %v1211_v57, %v1193_v47  ;;  %v10782_v38 = vld [vmem:[#allocation101_spill] sm:$0xff]  ;;  %s7528_s29 = sld [smem:[#allocation3 + $0x9c]] }
 0x291   : > { %v1235_v24 = vmul.f32 %v6496_v35, %v1227_v49  ;;  %v1252_v48 = vsel %vm1226_vm14, %v10765_v28, %v10761_v34  ;;  %2302 = vrot.lane.b32.xlu1 %v5252_v61, %s5048_s2  ;;  %v1213_v40 = vadd.f32 %v1209_v37, %v1191_v22  ;;  %v1216_v10 = vadd.f32 %v1212_v16, %v1194_v43  ;;  %v10767_v22 = vld [vmem:[#allocation89_spill] sm:$0xff]  ;;  %v10768_v34 = vld [vmem:[#allocation90_spill] sm:$0xff] }
 0x292   : > { %v1255_v39 = vmul.f32 %v6499_v21, %v1251_v27  ;;  %v1249_v47 = vsel %vm1226_vm14, %v10763_v36, %v10765_v28  ;;  %2300 = vrot.lane.b32.xlu0 %v5240_v55, %s5048_s2  ;;  %v1237_v35 = vadd.f32 %v1233_v5, %v1214_v25  ;;  %v1238_v8 = vadd.f32 %v1234_v20, %v1215_v19  ;;  %v10769_v27 = vld [vmem:[#allocation91_spill] sm:$0xff]  ;;  %v10771_v36 = vld [vmem:[#allocation92_spill] sm:$0xff]  ;;  %s7511_s2 = sld [smem:[#allocation3 + $0x1c]] }
 0x293   : > { %v1256_v11 = vmul.f32 %v6499_v21, %v1250_v23  ;;  %v6975_v57 = vstv %s6902_s18  ;;  %v6977_v49 = vpop.permute.xlu1 %1987  ;;  %v1236_v37 = vadd.f32 %v1232_v17, %v1213_v40  ;;  %v1254_v16 = vmul.f32 %v6499_v21, %v1252_v48  ;;  %v6990_v20 = vpop.permute.xlu0 %1985  ;;  %v10773_v48 = vld [vmem:[#allocation94_spill] sm:$0xff]  ;;  %v10774_v40 = vld [vmem:[#allocation95_spill] sm:$0xff]  ;;  %s7537_s18 = sld [smem:[#allocation3 + $0x1d]] }
 0x294   : > { %10766 = vst [vmem:[#allocation53_spill] sm:$0xff] %v6977_v49  ;;  %v1274_v28 = vsel %vm1271_vm15, %v10768_v34, %v10767_v22  ;;  %v1273_v5 = vsel %vm1271_vm15, %v10767_v22, %v10769_v27  ;;  %10770 = vst [vmem:[#allocation54_spill] sm:$0xff] %v6990_v20  ;;  %v1239_v43 = vadd.f32 %v1235_v24, %v1216_v10  ;;  %v10772_v24 = vld [vmem:[#allocation93_spill] sm:$0xff]  ;;  %v7038_v2 = vstv %s6962_s20  ;;  %s7561_s20 = sld [smem:[#allocation3 + $0x1e]] }
 0x295   : > { %v1257_v17 = vmul.f32 %v6499_v21, %v1249_v47  ;;  %v1272_v23 = vsel %vm1271_vm15, %v10769_v27, %v10771_v36  ;;  %v1275_v25 = vsel %vm1271_vm15, %v10771_v36, %v10768_v34  ;;  %2320 = vrot.lane.b32.xlu1 %v5242_v56, %s5049_s28  ;;  %v1259_v19 = vadd.f32 %v1255_v39, %v1237_v35  ;;  %v10775_v35 = vld [vmem:[#allocation96_spill] sm:$0xff] }
 0x296   : > { %v1296_v21 = vsel %vm1271_vm15, %v10773_v48, %v10772_v24  ;;  %v1295_v10 = vsel %vm1271_vm15, %v10772_v24, %v10774_v40  ;;  %v7013_v47 = vstv %s6934_s19  ;;  %2318 = vrot.lane.b32.xlu0 %v5222_v42, %s5049_s28  ;;  %v1260_v22 = vadd.f32 %v1256_v11, %v1238_v8  ;;  %s7554_s19 = sld [smem:[#allocation3 + $0x9d]] }
 0x297   : > { %v1278_v34 = vmul.f32 %v6528_v9, %v1274_v28  ;;  %v1279_v39 = vmul.f32 %v6528_v9, %v1273_v5  ;;  %v1297_v27 = vsel %vm1271_vm15, %v10775_v35, %v10773_v48  ;;  %v7025_v36 = vpop.permute.xlu1 %2005  ;;  %v1258_v24 = vadd.f32 %v1254_v16, %v1236_v37  ;;  %v7033_v11 = vpop.permute.xlu0 %2003  ;;  %v10778_v37 = vld [vmem:[#allocation97_spill] sm:$0xff]  ;;  %v10779_v16 = vld [vmem:[#allocation98_spill] sm:$0xff] }
 0x298   : > { %10776 = vst [vmem:[#allocation55_spill] sm:$0xff] %v7025_v36  ;;  %v1277_v20 = vmul.f32 %v6528_v9, %v1275_v25  ;;  %v1280_v49 = vmul.f32 %v6528_v9, %v1272_v23  ;;  %v1294_v8 = vsel %vm1271_vm15, %v10774_v40, %v10775_v35  ;;  %10777 = vst [vmem:[#allocation56_spill] sm:$0xff] %v7033_v11  ;;  %v10780_v25 = vld [vmem:[#allocation99_spill] sm:$0xff]  ;;  %vm1831_vm12 = vcmp.lt.s32.totalorder %v5933_v58, 125 }
 0x299   : > { %v1261_v28 = vadd.f32 %v1257_v17, %v1239_v43  ;;  %v1300_v5 = vmul.f32 %v6567_v6, %v1296_v21  ;;  %v1301_v48 = vmul.f32 %v6567_v6, %v1295_v10  ;;  %2324 = vrot.lane.b32.xlu1 %v5228_v46, %s5049_s28  ;;  %v1299_v9 = vmul.f32 %v6567_v6, %v1297_v27  ;;  %v10781_v17 = vld [vmem:[#allocation100_spill] sm:$0xff] }
 0x29a   : > { %v1319_v23 = vsel %vm1316_vm1, %v10779_v16, %v10778_v37  ;;  %v1318_v43 = vsel %vm1316_vm1, %v10778_v37, %v10780_v25  ;;  %v1320_v21 = vsel %vm1316_vm1, %v10781_v17, %v10779_v16  ;;  %2322 = vrot.lane.b32.xlu0 %v5220_v41, %s5049_s28  ;;  %v1282_v40 = vadd.f32 %v1278_v34, %v1259_v19  ;;  %v10783_v16 = vld [vmem:[#allocation102_spill] sm:$0xff] }
 0x29b   : > { %v1283_v10 = vadd.f32 %v1279_v39, %v1260_v22  ;;  %v1302_v35 = vmul.f32 %v6567_v6, %v1294_v8  ;;  %v1317_v27 = vsel %vm1316_vm1, %v10780_v25, %v10781_v17  ;;  %v7063_v37 = vpop.permute.xlu1 %2009  ;;  %v1281_v11 = vadd.f32 %v1277_v20, %v1258_v24  ;;  %v7074_v6 = vpop.permute.xlu0 %2007  ;;  %v10785_v20 = vld [vmem:[#allocation103_spill] sm:$0xff]  ;;  %v10786_v17 = vld [vmem:[#allocation104_spill] sm:$0xff] }
 0x29c   : > { %v1284_v36 = vadd.f32 %v1280_v49, %v1261_v28  ;;  %v1341_v29 = vsel %vm1316_vm1, %v10783_v16, %v10782_v38  ;;  %v7070_v19 = vstv %s6988_s25  ;;  %10784 = vst [vmem:[#allocation57_spill] sm:$0xff] %v7074_v6  ;;  %v1323_v22 = vmul.f32 %v6617_v31, %v1319_v23  ;;  %s7570_s25 = sld [smem:[#allocation3 + $0x9e]] }
 0x29d   : > { %v1324_v34 = vmul.f32 %v6617_v31, %v1318_v43  ;;  %v1322_v39 = vmul.f32 %v6617_v31, %v1320_v21  ;;  %v1340_v49 = vsel %vm1316_vm1, %v10782_v38, %v10785_v20  ;;  %2343 = vrot.lane.b32.xlu1 %v5258_v63, %s5049_s28  ;;  %v1304_v24 = vadd.f32 %v1300_v5, %v1282_v40 }
 0x29e   : > { %v1305_v8 = vadd.f32 %v1301_v48, %v1283_v10  ;;  %v1303_v28 = vadd.f32 %v1299_v9, %v1281_v11  ;;  %v1325_v25 = vmul.f32 %v6617_v31, %v1317_v27  ;;  %2341 = vrot.lane.b32.xlu0 %v5234_v51, %s5049_s28  ;;  %v1306_v23 = vadd.f32 %v1302_v35, %v1284_v36  ;;  %v10788_v48 = vld [vmem:[#allocation105_spill] sm:$0xff]  ;;  %v10789_v36 = vld [vmem:[#allocation106_spill] sm:$0xff]  ;;  %v10790_v9 = vld [vmem:[#allocation107_spill] sm:$0xff] }
 0x29f   : > { %v1345_v43 = vmul.f32 %v6623_v52, %v1341_v29  ;;  %v1342_v38 = vsel %vm1316_vm1, %v10786_v17, %v10783_v16  ;;  %v7096_v21 = vstv %s7023_s0  ;;  %v7098_v5 = vpop.permute.xlu1 %2028  ;;  %v1346_v11 = vmul.f32 %v6623_v52, %v1340_v49  ;;  %v7113_v10 = vpop.permute.xlu0 %2026  ;;  %v10792_v49 = vld [vmem:[#allocation108_spill] sm:$0xff]  ;;  %s7577_s0 = sld [smem:[#allocation3 + $0x1f]] }
 0x2a0   : > { %10787 = vst [vmem:[#allocation58_spill] sm:$0xff] %v7098_v5  ;;  %v1339_v31 = vsel %vm1316_vm1, %v10785_v20, %v10786_v17  ;;  %v1364_v29 = vsel %vm1361_vm2, %v10789_v36, %v10788_v48  ;;  %v1363_v40 = vsel %vm1361_vm2, %v10788_v48, %v10790_v9  ;;  %10791 = vst [vmem:[#allocation59_spill] sm:$0xff] %v7113_v10  ;;  %v7144_v10 = vstv %s7072_s21  ;;  %s7589_s21 = sld [smem:[#allocation3 + $0x9f]] }
 0x2a1   : > { %v1327_v35 = vadd.f32 %v1323_v22, %v1304_v24  ;;  %v1328_v27 = vadd.f32 %v1324_v34, %v1305_v8  ;;  %v1326_v16 = vadd.f32 %v1322_v39, %v1303_v28  ;;  %v1365_v20 = vsel %vm1361_vm2, %v10792_v49, %v10789_v36  ;;  %2347 = vrot.lane.b32.xlu1 %v5252_v61, %s5049_s28  ;;  %v10793_v34 = vld [vmem:[#allocation109_spill] sm:$0xff]  ;;  %v10794_v39 = vld [vmem:[#allocation110_spill] sm:$0xff] }
 0x2a2   : > { %v1329_v17 = vadd.f32 %v1325_v25, %v1306_v23  ;;  %v1344_v5 = vmul.f32 %v6623_v52, %v1342_v38  ;;  %v1362_v22 = vsel %vm1361_vm2, %v10790_v9, %v10792_v49  ;;  %v1386_v24 = vsel %vm1361_vm2, %v10794_v39, %v10793_v34  ;;  %2345 = vrot.lane.b32.xlu0 %v5240_v55, %s5049_s28  ;;  %v10795_v23 = vld [vmem:[#allocation111_spill] sm:$0xff] }
 0x2a3   : > { %v1347_v8 = vmul.f32 %v6623_v52, %v1339_v31  ;;  %v1368_v28 = vmul.f32 %v6654_v7, %v1364_v29  ;;  %v1369_v25 = vmul.f32 %v6654_v7, %v1363_v40  ;;  %v1385_v38 = vsel %vm1361_vm2, %v10793_v34, %v10795_v23  ;;  %v7140_v48 = vpop.permute.xlu1 %2032  ;;  %v7146_v6 = vpop.permute.xlu0 %2030  ;;  %v10798_v29 = vld [vmem:[#allocation112_spill] sm:$0xff] }
 0x2a4   : > { %10796 = vst [vmem:[#allocation60_spill] sm:$0xff] %v7140_v48  ;;  %v1349_v36 = vadd.f32 %v1345_v43, %v1327_v35  ;;  %v1350_v9 = vadd.f32 %v1346_v11, %v1328_v27  ;;  %v1367_v49 = vmul.f32 %v6654_v7, %v1365_v20  ;;  %10797 = vst [vmem:[#allocation61_spill] sm:$0xff] %v7146_v6  ;;  %v10800_v27 = vld [vmem:[#allocation114_spill] sm:$0xff]  ;;  %v10803_v6 = vld [vmem:[#allocation116_spill] sm:$0xff]  ;;  %vm1876_vm13 = vcmp.lt.s32.totalorder %v5933_v58, 109 }
 0x2a5   : > { %v1370_v52 = vmul.f32 %v6654_v7, %v1362_v22  ;;  %v1390_v31 = vmul.f32 %v6685_v50, %v1386_v24  ;;  %v1384_v40 = vsel %vm1361_vm2, %v10795_v23, %v10798_v29  ;;  %v1387_v43 = vsel %vm1361_vm2, %v10798_v29, %v10794_v39  ;;  %2365 = vrot.lane.b32.xlu1 %v5242_v56, %s5050_s23  ;;  %v10799_v7 = vld [vmem:[#allocation113_spill] sm:$0xff]  ;;  %v10801_v23 = vld [vmem:[#allocation115_spill] sm:$0xff] }
 0x2a6   : > { %v1348_v11 = vadd.f32 %v1344_v5, %v1326_v16  ;;  %v1391_v35 = vmul.f32 %v6685_v50, %v1385_v38  ;;  %v1409_v20 = vsel %vm1406_vm3, %v10800_v27, %v10799_v7  ;;  %v7166_v22 = vstv %s7086_s1  ;;  %2363 = vrot.lane.b32.xlu0 %v5222_v42, %s5050_s23  ;;  %v10806_v48 = vld [vmem:[#allocation119_spill] sm:$0xff]  ;;  %s7594_s1 = sld [smem:[#allocation3 + $0x20]] }
 0x2a7   : > { %v1351_v34 = vadd.f32 %v1347_v8, %v1329_v17  ;;  %v1372_v24 = vadd.f32 %v1368_v28, %v1349_v36  ;;  %v1373_v39 = vadd.f32 %v1369_v25, %v1350_v9  ;;  %v1408_v5 = vsel %vm1406_vm3, %v10799_v7, %v10801_v23  ;;  %v7175_v16 = vpop.permute.xlu1 %2050  ;;  %v7187_v28 = vpop.permute.xlu0 %2048 }
 0x2a8   : > { %10802 = vst [vmem:[#allocation62_spill] sm:$0xff] %v7175_v16  ;;  %v1389_v38 = vmul.f32 %v6685_v50, %v1387_v43  ;;  %v1392_v29 = vmul.f32 %v6685_v50, %v1384_v40  ;;  %v1407_v17 = vsel %vm1406_vm3, %v10801_v23, %v10803_v6  ;;  %v1410_v8 = vsel %vm1406_vm3, %v10803_v6, %v10800_v27  ;;  %v10804_v43 = vld [vmem:[#allocation117_spill] sm:$0xff]  ;;  %v10805_v23 = vld [vmem:[#allocation118_spill] sm:$0xff] }
 0x2a9   : > { %v1371_v25 = vadd.f32 %v1367_v49, %v1348_v11  ;;  %v1374_v36 = vadd.f32 %v1370_v52, %v1351_v34  ;;  %v1394_v9 = vadd.f32 %v1390_v31, %v1372_v24  ;;  %v1413_v7 = vmul.f32 %v6749_v60, %v1409_v20  ;;  %2369 = vrot.lane.b32.xlu1 %v5228_v46, %s5050_s23  ;;  %v10807_v31 = vld [vmem:[#allocation120_spill] sm:$0xff]  ;;  %v10808_v24 = vld [vmem:[#allocation121_spill] sm:$0xff] }
 0x2aa   : > { %v1395_v50 = vadd.f32 %v1391_v35, %v1373_v39  ;;  %v1414_v40 = vmul.f32 %v6749_v60, %v1408_v5  ;;  %v1431_v16 = vsel %vm1406_vm3, %v10805_v23, %v10804_v43  ;;  %v1430_v6 = vsel %vm1406_vm3, %v10804_v43, %v10806_v48  ;;  %2367 = vrot.lane.b32.xlu0 %v5220_v41, %s5050_s23  ;;  %v10809_v39 = vld [vmem:[#allocation122_spill] sm:$0xff] }
 0x2ab   : > { %v1412_v49 = vmul.f32 %v6749_v60, %v1410_v8  ;;  %v1415_v52 = vmul.f32 %v6749_v60, %v1407_v17  ;;  %v1429_v11 = vsel %vm1406_vm3, %v10806_v48, %v10807_v31  ;;  %v1432_v35 = vsel %vm1406_vm3, %v10807_v31, %v10805_v23  ;;  %v7213_v27 = vpop.permute.xlu1 %2054  ;;  %v10810_v60 = vld [vmem:[#allocation123_spill] sm:$0xff]  ;;  %v7223_v48 = vpop.permute.xlu0 %2052 }
 0x2ac   : > { %v1393_v20 = vadd.f32 %v1389_v38, %v1371_v25  ;;  %v1396_v34 = vadd.f32 %v1392_v29, %v1374_v36  ;;  %v1454_v5 = vsel %vm1451_vm4, %v10809_v39, %v10808_v24  ;;  %v1453_v17 = vsel %vm1451_vm4, %v10808_v24, %v10810_v60  ;;  %10811 = vst [vmem:[#allocation63_spill] sm:$0xff] %v7223_v48  ;;  %v10812_v38 = vld [vmem:[#allocation124_spill] sm:$0xff]  ;;  %v10820_v48 = vld [vmem:[#allocation130_spill] sm:$0xff] }
 0x2ad   : > { %v1417_v8 = vadd.f32 %v1413_v7, %v1394_v9  ;;  %v1435_v43 = vmul.f32 %v6752_v15, %v1431_v16  ;;  %v1436_v23 = vmul.f32 %v6752_v15, %v1430_v6  ;;  %v1455_v29 = vsel %vm1451_vm4, %v10812_v38, %v10809_v39  ;;  %2388 = vrot.lane.b32.xlu1 %v5258_v63, %s5050_s23 }
 0x2ae   : > { %v1418_v25 = vadd.f32 %v1414_v40, %v1395_v50  ;;  %v1434_v36 = vmul.f32 %v6752_v15, %v1432_v35  ;;  %v1437_v31 = vmul.f32 %v6752_v15, %v1429_v11  ;;  %v1452_v16 = vsel %vm1451_vm4, %v10810_v60, %v10812_v38  ;;  %2386 = vrot.lane.b32.xlu0 %v5234_v51, %s5050_s23  ;;  %v10814_v40 = vld [vmem:[#allocation125_spill] sm:$0xff]  ;;  %v10815_v15 = vld [vmem:[#allocation126_spill] sm:$0xff]  ;;  %v10816_v35 = vld [vmem:[#allocation127_spill] sm:$0xff] }
 0x2af   : > { %v1416_v9 = vadd.f32 %v1412_v49, %v1393_v20  ;;  %v1419_v7 = vadd.f32 %v1415_v52, %v1396_v34  ;;  %v1458_v6 = vmul.f32 %v6780_v44, %v1454_v5  ;;  %v1459_v24 = vmul.f32 %v6780_v44, %v1453_v17  ;;  %v7244_v39 = vpop.permute.xlu1 %2073  ;;  %v10817_v49 = vld [vmem:[#allocation128_spill] sm:$0xff]  ;;  %v7259_v20 = vpop.permute.xlu0 %2071 }
 0x2b0   : > { %10813 = vst [vmem:[#allocation64_spill] sm:$0xff] %v7244_v39  ;;  %v1457_v50 = vmul.f32 %v6780_v44, %v1455_v29  ;;  %v1476_v11 = vsel %vm1451_vm4, %v10815_v15, %v10814_v40  ;;  %v1475_v60 = vsel %vm1451_vm4, %v10814_v40, %v10816_v35  ;;  %v1477_v52 = vsel %vm1451_vm4, %v10817_v49, %v10815_v15  ;;  %v10819_v39 = vld [vmem:[#allocation129_spill] sm:$0xff] }
 0x2b1   : > { %10818 = vst [vmem:[#allocation65_spill] sm:$0xff] %v7259_v20  ;;  %v1439_v34 = vadd.f32 %v1435_v43, %v1417_v8  ;;  %v1440_v5 = vadd.f32 %v1436_v23, %v1418_v25  ;;  %v1460_v17 = vmul.f32 %v6780_v44, %v1452_v16  ;;  %v1474_v38 = vsel %vm1451_vm4, %v10816_v35, %v10817_v49  ;;  %v10821_v20 = vld [vmem:[#allocation131_spill] sm:$0xff]  ;;  %v10822_v25 = vld [vmem:[#allocation132_spill] sm:$0xff] }
 0x2b2   : > { %2392 = vrot.lane.b32.xlu1 %v5252_v61, %s5050_s23  ;;  %v1438_v29 = vadd.f32 %v1434_v36, %v1416_v9  ;;  %v1441_v40 = vadd.f32 %v1437_v31, %v1419_v7  ;;  %v1499_v15 = vsel %vm1496_vm5, %v10820_v48, %v10819_v39  ;;  %v1498_v44 = vsel %vm1496_vm5, %v10819_v39, %v10821_v20 }
 0x2b3   : > { %2390 = vrot.lane.b32.xlu0 %v5240_v55, %s5050_s23  ;;  %v1480_v8 = vmul.f32 %v6828_v3, %v1476_v11  ;;  %v1481_v43 = vmul.f32 %v6828_v3, %v1475_v60  ;;  %v1479_v23 = vmul.f32 %v6828_v3, %v1477_v52  ;;  %v1500_v36 = vsel %vm1496_vm5, %v10822_v25, %v10820_v48  ;;  %v7285_v31 = vpop.permute.xlu1 %2077  ;;  %v7290_v35 = vpop.permute.xlu0 %2075  ;;  %v10826_v52 = vld [vmem:[#allocation135_spill] sm:$0xff] }
 0x2b4   : > { %v1462_v16 = vadd.f32 %v1458_v6, %v1439_v34  ;;  %v1463_v9 = vadd.f32 %v1459_v24, %v1440_v5  ;;  %v1461_v7 = vadd.f32 %v1457_v50, %v1438_v29  ;;  %v1482_v39 = vmul.f32 %v6828_v3, %v1474_v38  ;;  %10823 = vst [vmem:[#allocation66_spill] sm:$0xff] %v7290_v35  ;;  %v10824_v6 = vld [vmem:[#allocation133_spill] sm:$0xff]  ;;  %v10825_v24 = vld [vmem:[#allocation134_spill] sm:$0xff]  ;;  %v10830_v35 = vld [vmem:[#allocation139_spill] sm:$0xff] }
 0x2b5   : > { %v1464_v11 = vadd.f32 %v1460_v17, %v1441_v40  ;;  %v1503_v60 = vmul.f32 %v6852_v30, %v1499_v15  ;;  %v1504_v49 = vmul.f32 %v6852_v30, %v1498_v44  ;;  %v1497_v48 = vsel %vm1496_vm5, %v10821_v20, %v10822_v25  ;;  %v10827_v20 = vld [vmem:[#allocation136_spill] sm:$0xff] }
 0x2b6   : > { %2410 = vrot.lane.b32.xlu1 %v5242_v56, %s5051_s30  ;;  %v1502_v3 = vmul.f32 %v6852_v30, %v1500_v36  ;;  %v1521_v50 = vsel %vm1496_vm5, %v10825_v24, %v10824_v6  ;;  %v1520_v34 = vsel %vm1496_vm5, %v10824_v6, %v10826_v52  ;;  %v1522_v5 = vsel %vm1496_vm5, %v10827_v20, %v10825_v24  ;;  %v10828_v36 = vld [vmem:[#allocation137_spill] sm:$0xff]  ;;  %v10829_v6 = vld [vmem:[#allocation138_spill] sm:$0xff] }
 0x2b7   : > { %2408 = vrot.lane.b32.xlu0 %v5222_v42, %s5051_s30  ;;  %v1484_v17 = vadd.f32 %v1480_v8, %v1462_v16  ;;  %v1485_v38 = vadd.f32 %v1481_v43, %v1463_v9  ;;  %v1483_v29 = vadd.f32 %v1479_v23, %v1461_v7  ;;  %v1519_v40 = vsel %vm1496_vm5, %v10826_v52, %v10827_v20  ;;  %v7320_v15 = vpop.permute.xlu1 %2095  ;;  %v7331_v43 = vpop.permute.xlu0 %2093 }
 0x2b8   : > { %v1486_v44 = vadd.f32 %v1482_v39, %v1464_v11  ;;  %v1505_v25 = vmul.f32 %v6852_v30, %v1497_v48  ;;  %v1544_v24 = vsel %vm1541_vm6, %v10829_v6, %v10828_v36  ;;  %v1543_v8 = vsel %vm1541_vm6, %v10828_v36, %v10830_v35  ;;  %10831 = vst [vmem:[#allocation67_spill] sm:$0xff] %v7331_v43  ;;  %v10832_v30 = vld [vmem:[#allocation140_spill] sm:$0xff]  ;;  %v10834_v36 = vld [vmem:[#allocation142_spill] sm:$0xff] }
 0x2b9   : > { %v1525_v23 = vmul.f32 %v6868_v54, %v1521_v50  ;;  %v1526_v16 = vmul.f32 %v6868_v54, %v1520_v34  ;;  %v1524_v9 = vmul.f32 %v6868_v54, %v1522_v5  ;;  %v1545_v7 = vsel %vm1541_vm6, %v10832_v30, %v10829_v6  ;;  %v10833_v5 = vld [vmem:[#allocation141_spill] sm:$0xff] }
 0x2ba   : > { %2414 = vrot.lane.b32.xlu1 %v5228_v46, %s5051_s30  ;;  %v1507_v39 = vadd.f32 %v1503_v60, %v1484_v17  ;;  %v1508_v11 = vadd.f32 %v1504_v49, %v1485_v38  ;;  %v1506_v48 = vadd.f32 %v1502_v3, %v1483_v29  ;;  %v1527_v50 = vmul.f32 %v6868_v54, %v1519_v40 }
 0x2bb   : > { %2412 = vrot.lane.b32.xlu0 %v5220_v41, %s5051_s30  ;;  %v1548_v52 = vmul.f32 %v6916_v26, %v1544_v24  ;;  %v1549_v34 = vmul.f32 %v6916_v26, %v1543_v8  ;;  %v1542_v20 = vsel %vm1541_vm6, %v10830_v35, %v10832_v30  ;;  %v1566_v60 = vsel %vm1541_vm6, %v10834_v36, %v10833_v5  ;;  %v7356_v49 = vpop.permute.xlu1 %2099  ;;  %v7366_v29 = vpop.permute.xlu0 %2097  ;;  %v10837_v24 = vld [vmem:[#allocation143_spill] sm:$0xff]  ;;  %v10838_v30 = vld [vmem:[#allocation144_spill] sm:$0xff] }
 0x2bc   : > { %10835 = vst [vmem:[#allocation68_spill] sm:$0xff] %v7356_v49  ;;  %v1509_v54 = vadd.f32 %v1505_v25, %v1486_v44  ;;  %v1547_v3 = vmul.f32 %v6916_v26, %v1545_v7  ;;  %v7360_v17 = vstv %s7288_s24  ;;  %v7364_v38 = vmul.f32 %v7166_v22, %v5242_v56  ;;  %10836 = vst [vmem:[#allocation69_spill] sm:$0xff] %v7366_v29  ;;  %s7603_s24 = sld [smem:[#allocation3 + $0xa0]] }
 0x2bd   : > { %v1529_v40 = vadd.f32 %v1525_v23, %v1507_v39  ;;  %v1530_v35 = vadd.f32 %v1526_v16, %v1508_v11  ;;  %v1528_v6 = vadd.f32 %v1524_v9, %v1506_v48  ;;  %v1565_v8 = vsel %vm1541_vm6, %v10833_v5, %v10837_v24  ;;  %v10840_v5 = vld [vmem:[#allocation145_spill] sm:$0xff] }
 0x2be   : > { %2433 = vrot.lane.b32.xlu1 %v5258_v63, %s5051_s30  ;;  %v1550_v44 = vmul.f32 %v6916_v26, %v1542_v20  ;;  %v1570_v25 = vmul.f32 %v6953_v1, %v1566_v60  ;;  %v1564_v7 = vsel %vm1541_vm6, %v10837_v24, %v10838_v30  ;;  %v1567_v23 = vsel %vm1541_vm6, %v10838_v30, %v10834_v36  ;;  %v10841_v60 = vld [vmem:[#allocation146_spill] sm:$0xff]  ;;  %v10842_v24 = vld [vmem:[#allocation147_spill] sm:$0xff]  ;;  %v10845_v30 = vld [vmem:[#allocation149_spill] sm:$0xff] }
 0x2bf   : > { %2431 = vrot.lane.b32.xlu0 %v5234_v51, %s5051_s30  ;;  %v1531_v16 = vadd.f32 %v1527_v50, %v1509_v54  ;;  %v1552_v9 = vadd.f32 %v1548_v52, %v1529_v40  ;;  %v1553_v39 = vadd.f32 %v1549_v34, %v1530_v35  ;;  %v7388_v26 = vmul.f32 %v7360_v17, %v5258_v63  ;;  %v7390_v11 = vpop.permute.xlu1 %2118  ;;  %v7401_v52 = vpop.permute.xlu0 %2116  ;;  %v10844_v40 = vld [vmem:[#allocation148_spill] sm:$0xff] }
 0x2c0   : > { %10839 = vst [vmem:[#allocation70_spill] sm:$0xff] %v7390_v11  ;;  %v1551_v48 = vadd.f32 %v1547_v3, %v1528_v6  ;;  %v1571_v20 = vmul.f32 %v6953_v1, %v1565_v8  ;;  %v1589_v36 = vsel %vm1586_vm7, %v10841_v60, %v10840_v5  ;;  %v1588_v50 = vsel %vm1586_vm7, %v10840_v5, %v10842_v24  ;;  %v10850_v11 = vld [vmem:[#allocation154_spill] sm:$0xff] }
 0x2c1   : > { %10843 = vst [vmem:[#allocation71_spill] sm:$0xff] %v7401_v52  ;;  %v1569_v34 = vmul.f32 %v6953_v1, %v1567_v23  ;;  %v1572_v54 = vmul.f32 %v6953_v1, %v1564_v7  ;;  %v1587_v3 = vsel %vm1586_vm7, %v10842_v24, %v10844_v40  ;;  %v1590_v35 = vsel %vm1586_vm7, %v10844_v40, %v10841_v60  ;;  %v10846_v23 = vld [vmem:[#allocation150_spill] sm:$0xff]  ;;  %v10847_v7 = vld [vmem:[#allocation151_spill] sm:$0xff]  ;;  %v10848_v40 = vld [vmem:[#allocation152_spill] sm:$0xff] }
 0x2c2   : > { %2437 = vrot.lane.b32.xlu1 %v5252_v61, %s5051_s30  ;;  %v1554_v6 = vadd.f32 %v1550_v44, %v1531_v16  ;;  %v1574_v8 = vadd.f32 %v1570_v25, %v1552_v9  ;;  %v1611_v1 = vsel %vm1586_vm7, %v10846_v23, %v10845_v30  ;;  %v1610_v5 = vsel %vm1586_vm7, %v10845_v30, %v10847_v7 }
 0x2c3   : > { %2435 = vrot.lane.b32.xlu0 %v5240_v55, %s5051_s30  ;;  %v1593_v60 = vmul.f32 %v6975_v57, %v1589_v36  ;;  %v1594_v24 = vmul.f32 %v6975_v57, %v1588_v50  ;;  %v1609_v44 = vsel %vm1586_vm7, %v10847_v7, %v10848_v40  ;;  %v1612_v25 = vsel %vm1586_vm7, %v10848_v40, %v10846_v23  ;;  %v7436_v16 = vpop.permute.xlu1 %2122  ;;  %v10849_v36 = vld [vmem:[#allocation153_spill] sm:$0xff]  ;;  %v7444_v29 = vpop.permute.xlu0 %2120 }
 0x2c4   : > { %v1575_v9 = vadd.f32 %v1571_v20, %v1553_v39  ;;  %v1592_v30 = vmul.f32 %v6975_v57, %v1590_v35  ;;  %v1595_v52 = vmul.f32 %v6975_v57, %v1587_v3  ;;  %v1634_v50 = vsel %vm1631_vm8, %v10850_v11, %v10849_v36  ;;  %10851 = vst [vmem:[#allocation72_spill] sm:$0xff] %v7444_v29  ;;  %v10852_v20 = vld [vmem:[#allocation155_spill] sm:$0xff] }
 0x2c5   : > { %v1573_v7 = vadd.f32 %v1569_v34, %v1551_v48  ;;  %v1576_v49 = vadd.f32 %v1572_v54, %v1554_v6  ;;  %v1615_v43 = vmul.f32 %v7013_v47, %v1611_v1  ;;  %v1616_v23 = vmul.f32 %v7013_v47, %v1610_v5  ;;  %v10853_v34 = vld [vmem:[#allocation156_spill] sm:$0xff] }
 0x2c6   : > { %2455 = vrot.lane.b32.xlu1 %v5242_v56, %s5052_s12  ;;  %v1614_v57 = vmul.f32 %v7013_v47, %v1612_v25  ;;  %v1617_v39 = vmul.f32 %v7013_v47, %v1609_v44  ;;  %v1633_v48 = vsel %vm1631_vm8, %v10849_v36, %v10852_v20  ;;  %v1635_v54 = vsel %vm1631_vm8, %v10853_v34, %v10850_v11  ;;  %v10855_v44 = vld [vmem:[#allocation157_spill] sm:$0xff] }
 0x2c7   : > { %2453 = vrot.lane.b32.xlu0 %v5222_v42, %s5052_s12  ;;  %v1597_v3 = vadd.f32 %v1593_v60, %v1574_v8  ;;  %v1598_v35 = vadd.f32 %v1594_v24, %v1575_v9  ;;  %v1638_v6 = vmul.f32 %v7038_v2, %v1634_v50  ;;  %v7469_v47 = vmul.f32 %v7166_v22, %v5220_v41  ;;  %v7473_v1 = vpop.permute.xlu1 %2140  ;;  %v10856_v8 = vld [vmem:[#allocation158_spill] sm:$0xff]  ;;  %v7485_v24 = vpop.permute.xlu0 %2138 }
 0x2c8   : > { %10854 = vst [vmem:[#allocation73_spill] sm:$0xff] %v7473_v1  ;;  %v1596_v5 = vadd.f32 %v1592_v30, %v1573_v7  ;;  %v1599_v40 = vadd.f32 %v1595_v52, %v1576_v49  ;;  %v1632_v11 = vsel %vm1631_vm8, %v10852_v20, %v10853_v34  ;;  %v1656_v60 = vsel %vm1631_vm8, %v10856_v8, %v10855_v44  ;;  %v10858_v49 = vld [vmem:[#allocation160_spill] sm:$0xff]  ;;  %v10859_v20 = vld [vmem:[#allocation159_spill] sm:$0xff] }
 0x2c9   : > { %10857 = vst [vmem:[#allocation74_spill] sm:$0xff] %v7485_v24  ;;  %v1619_v25 = vadd.f32 %v1615_v43, %v1597_v3  ;;  %v1639_v9 = vmul.f32 %v7038_v2, %v1633_v48  ;;  %v1637_v30 = vmul.f32 %v7038_v2, %v1635_v54  ;;  %v1657_v52 = vsel %vm1631_vm8, %v10858_v49, %v10856_v8  ;;  %v10860_v3 = vld [vmem:[#allocation162_spill] sm:$0xff]  ;;  %v10861_v8 = vld [vmem:[#allocation164_spill] sm:$0xff] }
 0x2ca   : > { %2459 = vrot.lane.b32.xlu1 %v5228_v46, %s5052_s12  ;;  %v1620_v36 = vadd.f32 %v1616_v23, %v1598_v35  ;;  %v1618_v50 = vadd.f32 %v1614_v57, %v1596_v5  ;;  %v1621_v7 = vadd.f32 %v1617_v39, %v1599_v40  ;;  %v1654_v43 = vsel %vm1631_vm8, %v10859_v20, %v10858_v49  ;;  %v10864_v5 = vld [vmem:[#allocation163_spill] sm:$0xff]  ;;  %v10866_v49 = vld [vmem:[#allocation166_spill] sm:$0xff] }
 0x2cb   : > { %2457 = vrot.lane.b32.xlu0 %v5220_v41, %s5052_s12  ;;  %v1642_v48 = vadd.f32 %v1638_v6, %v1619_v25  ;;  %v1640_v34 = vmul.f32 %v7038_v2, %v1632_v11  ;;  %v1660_v54 = vmul.f32 %v7070_v19, %v1656_v60  ;;  %v1680_v23 = vsel %vm1676_vm9, %v10861_v8, %v10860_v3  ;;  %v7513_v57 = vpop.permute.xlu1 %2144  ;;  %v10863_v6 = vld [vmem:[#allocation161_spill] sm:$0xff]  ;;  %v7530_v11 = vpop.permute.xlu0 %2142 }
 0x2cc   : > { %10862 = vst [vmem:[#allocation75_spill] sm:$0xff] %v7513_v57  ;;  %v1655_v39 = vsel %vm1631_vm8, %v10855_v44, %v10859_v20  ;;  %v1659_v35 = vmul.f32 %v7070_v19, %v1657_v52  ;;  %v1679_v2 = vsel %vm1676_vm9, %v10860_v3, %v10863_v6  ;;  %v1677_v40 = vsel %vm1676_vm9, %v10864_v5, %v10861_v8  ;;  %v10867_v52 = vld [vmem:[#allocation168_spill] sm:$0xff] }
 0x2cd   : > { %10865 = vst [vmem:[#allocation76_spill] sm:$0xff] %v7530_v11  ;;  %v1643_v60 = vadd.f32 %v1639_v9, %v1620_v36  ;;  %v1641_v25 = vadd.f32 %v1637_v30, %v1618_v50  ;;  %v1662_v44 = vmul.f32 %v7070_v19, %v1654_v43  ;;  %v1702_v20 = vsel %vm1676_vm9, %v10867_v52, %v10866_v49  ;;  %v10868_v30 = vld [vmem:[#allocation165_spill] sm:$0xff]  ;;  %v10869_v50 = vld [vmem:[#allocation167_spill] sm:$0xff] }
 0x2ce   : > { %2478 = vrot.lane.b32.xlu1 %v5258_v63, %s5052_s12  ;;  %v1678_v3 = vsel %vm1676_vm9, %v10863_v6, %v10864_v5  ;;  %v1682_v9 = vmul.f32 %v7096_v21, %v1680_v23  ;;  %v1701_v36 = vsel %vm1676_vm9, %v10866_v49, %v10868_v30  ;;  %v1699_v43 = vsel %vm1676_vm9, %v10869_v50, %v10867_v52 }
 0x2cf   : > { %2476 = vrot.lane.b32.xlu0 %v5234_v51, %s5052_s12  ;;  %v1644_v8 = vadd.f32 %v1640_v34, %v1621_v7  ;;  %v1661_v6 = vmul.f32 %v7070_v19, %v1655_v39  ;;  %v1683_v23 = vmul.f32 %v7096_v21, %v1679_v2  ;;  %v1685_v5 = vmul.f32 %v7096_v21, %v1677_v40  ;;  %v7563_v49 = vpop.permute.xlu1 %2163  ;;  %v7572_v19 = vpop.permute.xlu0 %2161 }
 0x2d0   : > { %10870 = vst [vmem:[#allocation77_spill] sm:$0xff] %v7563_v49  ;;  %v1664_v11 = vadd.f32 %v1660_v54, %v1642_v48  ;;  %v1663_v57 = vadd.f32 %v1659_v35, %v1641_v25  ;;  %v1700_v52 = vsel %vm1676_vm9, %v10868_v30, %v10869_v50  ;;  %v1704_v24 = vmul.f32 %v7144_v10, %v1702_v20 }
 0x2d1   : > { %10871 = vst [vmem:[#allocation78_spill] sm:$0xff] %v7572_v19  ;;  %v1666_v7 = vadd.f32 %v1662_v44, %v1644_v8  ;;  %v1684_v34 = vmul.f32 %v7096_v21, %v1678_v3  ;;  %v1705_v39 = vmul.f32 %v7144_v10, %v1701_v36  ;;  %v1707_v2 = vmul.f32 %v7144_v10, %v1699_v43 }
 0x2d2   : > { %2482 = vrot.lane.b32.xlu1 %v5252_v61, %s5052_s12  ;;  %v1686_v48 = vadd.f32 %v1682_v9, %v1663_v57  ;;  %v7583_v54 = vmul.f32 %v7360_v17, %v5240_v55  ;;  %v1714_v35 = vmul.f32 %v7166_v22, %v5222_v42  ;;  %v1717_v21 = vmul.f32 %v7166_v22, %v5228_v46 }
 0x2d3   : > { %2480 = vrot.lane.b32.xlu0 %v5240_v55, %s5052_s12  ;;  %v1665_v40 = vadd.f32 %v1661_v6, %v1643_v60  ;;  %v1687_v25 = vadd.f32 %v1683_v23, %v1664_v11  ;;  %v1689_v44 = vadd.f32 %v1685_v5, %v1666_v7  ;;  %v1706_v57 = vmul.f32 %v7144_v10, %v1700_v52  ;;  %v7596_v20 = vpop.permute.xlu1 %2167  ;;  %v7605_v10 = vpop.permute.xlu0 %2165  ;;  %s5053_s12 = smov 62  }
 0x2d4   : > { %10872 = vst [vmem:[#allocation79_spill] sm:$0xff] %v7596_v20  ;;  %v1724_v22 = vmul.f32 %v7360_v17, %v5234_v51  ;;  %v1727_v3 = vmul.f32 %v7360_v17, %v5252_v61  ;;  %v1708_v9 = vadd.f32 %v1704_v24, %v1686_v48  ;;  %10873 = vst [vmem:[#allocation80_spill] sm:$0xff] %v7605_v10  ;;  %v1746_v36 = vstv %s7448_s14  ;;  %s7629_s14 = sld [smem:[#allocation3 + $0x21]] }
 0x2d5   : > { %v1688_v11 = vadd.f32 %v1684_v34, %v1665_v40  ;;  %v1709_v60 = vadd.f32 %v1705_v39, %v1687_v25  ;;  %v1711_v30 = vadd.f32 %v1707_v2, %v1689_v44  ;;  %v1768_v17 = vstv %s7462_s15  ;;  %v10876_v25 = vld [vmem:[#allocation170_spill] sm:$0xff]  ;;  %s7682_s15 = sld [smem:[#allocation3 + $0xa1]] }
 0x2d6   : > { %2560 = vrot.lane.b32.xlu1 %v5242_v56, %s5053_s12  ;;  %v7613_v24 = vstv %s7471_s11  ;;  %v7616_v50 = vstv %s7483_s17  ;;  %v7621_v8 = vstv %s7493_s26  ;;  %v1718_v52 = vadd.f32 %v1714_v35, %v1708_v9  ;;  %v10877_v44 = vld [vmem:[#allocation178_spill] sm:$0xff]  ;;  %v10878_v35 = vld [vmem:[#allocation169_spill] sm:$0xff]  ;;  %s7710_s11 = sld [smem:[#allocation3 + $0x22]] }
 0x2d7   : > { %2558 = vrot.lane.b32.xlu0 %v5222_v42, %s5053_s12  ;;  %v1710_v43 = vadd.f32 %v1706_v57, %v1688_v11  ;;  %v7624_v6 = vstv %s7501_s27  ;;  %v7627_v23 = vstv %s7511_s2  ;;  %v7631_v5 = vpop.permute.xlu1 %2185  ;;  %v7634_v7 = vstv %s7528_s29  ;;  %v7642_v2 = vpop.permute.xlu0 %2183  ;;  %s7739_s17 = sld [smem:[#allocation3 + $0xa2]]  ;;  %s5054_s27 = smov 61  }
 0x2d8   : > { %10874 = vst [vmem:[#allocation81_spill] sm:$0xff] %v7631_v5  ;;  %v7637_v34 = vstv %s7537_s18  ;;  %v7640_v39 = vstv %s7554_s19  ;;  %10875 = vst [vmem:[#allocation82_spill] sm:$0xff] %v7642_v2  ;;  %v1719_v48 = vadd.f32 %v7364_v38, %v1709_v60  ;;  %v1721_v40 = vadd.f32 %v1717_v21, %v1711_v30  ;;  %v10879_v30 = vld [vmem:[#allocation180_spill] sm:$0xff]  ;;  %s7773_s26 = sld [smem:[#allocation3 + $0x23]] }
 0x2d9   : > { %v1745_v57 = vsel %vm1741_vm10, %v10877_v44, %v10876_v25  ;;  %v7650_v11 = vstv %s7561_s20  ;;  %v1744_v9 = vsel %vm1741_vm10, %v10876_v25, %v10878_v35  ;;  %v7659_v2 = vstv %s7570_s25  ;;  %s7804_s2 = sld [smem:[#allocation3 + $0xa3]]  ;;  %s5055_s25 = smov 60  }
 0x2da   : > { %2564 = vrot.lane.b32.xlu1 %v5228_v46, %s5053_s12  ;;  %v7662_v38 = vstv %s7577_s0  ;;  %v7665_v21 = vstv %s7589_s21  ;;  %v1720_v60 = vadd.f32 %v7469_v47, %v1710_v43  ;;  %v1742_v5 = vsel %vm1741_vm10, %v10879_v30, %v10877_v44  ;;  %v10881_v43 = vld [vmem:[#allocation184_spill] sm:$0xff]  ;;  %s7873_s29 = sld [smem:[#allocation3 + $0x24]] }
 0x2db   : > { %2562 = vrot.lane.b32.xlu0 %v5220_v41, %s5053_s12  ;;  %v1743_v25 = vsel %vm1741_vm10, %v10878_v35, %v10879_v30  ;;  %v7680_v10 = vstv %s7594_s1  ;;  %v7684_v20 = vpop.permute.xlu1 %2189  ;;  %v1728_v19 = vadd.f32 %v1724_v22, %v1718_v52  ;;  %v1750_v47 = vmul.f32 %v1746_v36, %v1745_v57  ;;  %v7693_v1 = vpop.permute.xlu0 %2187  ;;  %s7881_s18 = sld [smem:[#allocation3 + $0xa4]] }
 0x2dc   : > { %10880 = vst [vmem:[#allocation83_spill] sm:$0xff] %v7684_v20  ;;  %v1766_v44 = vsel %vm1741_vm10, %v6089_v13, %v10881_v43  ;;  %v7691_v49 = vstv %s7603_s24  ;;  %v1729_v35 = vadd.f32 %v7388_v26, %v1719_v48  ;;  %v1731_v30 = vadd.f32 %v1727_v3, %v1721_v40  ;;  %s7913_s19 = sld [smem:[#allocation3 + $0x25]] }
 0x2dd   : > { %v1747_v29 = vmul.f32 %v1746_v36, %v1744_v9  ;;  %v1767_v22 = vsel %vm1741_vm10, %v6124_v4, %v6089_v13  ;;  %v1748_v52 = vmul.f32 %v1746_v36, %v1743_v25  ;;  %v1749_v57 = vmul.f32 %v1746_v36, %v1742_v5  ;;  %s7927_s20 = sld [smem:[#allocation3 + $0xa5]] }
 0x2de   : > { %2583 = vrot.lane.b32.xlu1 %v5258_v63, %s5053_s12  ;;  %v1764_v20 = vsel %vm1741_vm10, %v6134_v12, %v6124_v4  ;;  %v1765_v26 = vsel %vm1741_vm10, %v10881_v43, %v6134_v12  ;;  %v1730_v13 = vadd.f32 %v7583_v54, %v1720_v60  ;;  %v1769_v3 = vmul.f32 %v1768_v17, %v1766_v44  ;;  %s7966_s0 = sld [smem:[#allocation3 + $0x26]] }
 0x2df   : > { %2581 = vrot.lane.b32.xlu0 %v5234_v51, %s5053_s12  ;;  %v1789_v36 = vsel %vm1786_vm11, %v6169_v0, %v6161_v59  ;;  %v7720_v5 = vstv %s7629_s14  ;;  %v7722_v4 = vpop.permute.xlu1 %2208  ;;  %v1751_v48 = vadd.f32 %v1747_v29, %v1728_v19  ;;  %v1754_v40 = vadd.f32 %v1750_v47, %v1731_v30  ;;  %v7728_v25 = vpop.permute.xlu0 %2206  ;;  %s7988_s21 = sld [smem:[#allocation3 + $0xa6]]  ;;  %s5056_s14 = smov 59  }
 0x2e0   : > { %v1772_v12 = vmul.f32 %v1768_v17, %v1767_v22  ;;  %v1790_v9 = vsel %vm1786_vm11, %v6198_v53, %v6169_v0  ;;  %v1770_v54 = vmul.f32 %v1768_v17, %v1765_v26  ;;  %v1771_v60 = vmul.f32 %v1768_v17, %v1764_v20  ;;  %s8022_s1 = sld [smem:[#allocation3 + $0x27]] }
 0x2e1   : > { %v1787_v43 = vsel %vm1786_vm11, %v6210_v14, %v6198_v53  ;;  %v1788_v29 = vsel %vm1786_vm11, %v6161_v59, %v6210_v14  ;;  %v1752_v0 = vadd.f32 %v1748_v52, %v1729_v35  ;;  %v1753_v19 = vadd.f32 %v1749_v57, %v1730_v13  ;;  %s8054_s24 = sld [smem:[#allocation3 + $0xa7]] }
 0x2e2   : > { %2587 = vrot.lane.b32.xlu1 %v5252_v61, %s5053_s12  ;;  %v1792_v20 = vmul.f32 %v7613_v24, %v1789_v36  ;;  %v1811_v53 = vsel %vm1786_vm11, %v6252_v18, %v6246_v45  ;;  %v1773_v59 = vadd.f32 %v1769_v3, %v1751_v48  ;;  %v1795_v14 = vmul.f32 %v7613_v24, %v1790_v9  ;;  %v10882_v36 = vld [vmem:[#allocation17_spill] sm:$0xff] }
 0x2e3   : > { %2585 = vrot.lane.b32.xlu0 %v5240_v55, %s5053_s12  ;;  %v1812_v17 = vsel %vm1786_vm11, %v6289_v32, %v6252_v18  ;;  %v7756_v47 = vstv %s7682_s15  ;;  %v7758_v44 = vpop.permute.xlu1 %2212  ;;  %v1793_v35 = vmul.f32 %v7613_v24, %v1788_v29  ;;  %v1794_v30 = vmul.f32 %v7613_v24, %v1787_v43  ;;  %v7770_v18 = vpop.permute.xlu0 %2210  ;;  %s8082_s12 = sld [smem:[#allocation3 + $0x28]] }
 0x2e4   : > { %v1809_v22 = vsel %vm1786_vm11, %v6298_v33, %v6289_v32  ;;  %v1810_v52 = vsel %vm1786_vm11, %v6246_v45, %v6298_v33  ;;  %v1776_v57 = vadd.f32 %v1772_v12, %v1754_v40  ;;  %v1774_v26 = vadd.f32 %v1770_v54, %v1752_v0  ;;  %v10883_v12 = vld [vmem:[#allocation174_spill] sm:$0xff]  ;;  %s8261_s15 = sld [smem:[#allocation3 + $0xa8]] }
 0x2e5   : > { %v1775_v13 = vadd.f32 %v1771_v60, %v1753_v19  ;;  %v1814_v3 = vmul.f32 %v7616_v50, %v1811_v53  ;;  %v1796_v24 = vadd.f32 %v1792_v20, %v1773_v59  ;;  %v1817_v32 = vmul.f32 %v7616_v50, %v1812_v17  ;;  %v10884_v54 = vld [vmem:[#allocation22_spill] sm:$0xff] }
 0x2e6   : > { %2605 = vrot.lane.b32.xlu1 %v5242_v56, %s5054_s27  ;;  %v1834_v45 = vsel %vm1831_vm12, %v10882_v36, %v6339_v62  ;;  %v7783_v33 = vstv %s7710_s11  ;;  %v1815_v48 = vmul.f32 %v7616_v50, %v1810_v52  ;;  %v1816_v40 = vmul.f32 %v7616_v50, %v1809_v22  ;;  %v10886_v17 = vld [vmem:[#allocation190_spill] sm:$0xff]  ;;  %s8430_s11 = sld [smem:[#allocation3 + $0x29]] }
 0x2e7   : > { %2603 = vrot.lane.b32.xlu0 %v5222_v42, %s5054_s27  ;;  %v1835_v9 = vsel %vm1831_vm12, %v10883_v12, %v10882_v36  ;;  %v1833_v60 = vsel %vm1831_vm12, %v6339_v62, %v10884_v54  ;;  %vm1921_vm14 = vcmp.lt.s32.totalorder %v5933_v58, 108  ;;  %v7798_v43 = vpop.permute.xlu1 %2230  ;;  %v1799_v29 = vadd.f32 %v1795_v14, %v1776_v57  ;;  %v10885_v62 = vld [vmem:[#allocation27_spill] sm:$0xff]  ;;  %v10887_v52 = vld [vmem:[#allocation30_spill] sm:$0xff] }
 0x2e8   : > { %v1797_v0 = vadd.f32 %v1793_v35, %v1774_v26  ;;  %v1798_v19 = vadd.f32 %v1794_v30, %v1775_v13  ;;  %v1832_v50 = vsel %vm1831_vm12, %v10884_v54, %v10883_v12  ;;  %v7806_v20 = vpop.permute.xlu0 %2228  ;;  %v1818_v53 = vadd.f32 %v1814_v3, %v1796_v24  ;;  %v10888_v26 = vld [vmem:[#allocation32_spill] sm:$0xff] }
 0x2e9   : > { %v1837_v59 = vmul.f32 %v7621_v8, %v1834_v45  ;;  %v1856_v22 = vsel %vm1831_vm12, %v10886_v17, %v10885_v62  ;;  %v7814_v14 = vstv %s7739_s17  ;;  %v1840_v35 = vmul.f32 %v7621_v8, %v1835_v9  ;;  %s8437_s17 = sld [smem:[#allocation3 + $0xa9]] }
 0x2ea   : > { %2609 = vrot.lane.b32.xlu1 %v5228_v46, %s5054_s27  ;;  %v1838_v30 = vmul.f32 %v7621_v8, %v1833_v60  ;;  %v1857_v57 = vsel %vm1831_vm12, %v10887_v52, %v10886_v17  ;;  %v1855_v13 = vsel %vm1831_vm12, %v10885_v62, %v10888_v26  ;;  %v1821_v3 = vadd.f32 %v1817_v32, %v1799_v29  ;;  %v10890_v60 = vld [vmem:[#allocation33_spill] sm:$0xff]  ;;  %v10891_v17 = vld [vmem:[#allocation34_spill] sm:$0xff]  ;;  %v10892_v32 = vld [vmem:[#allocation35_spill] sm:$0xff] }
 0x2eb   : > { %2607 = vrot.lane.b32.xlu0 %v5220_v41, %s5054_s27  ;;  %v1819_v24 = vadd.f32 %v1815_v48, %v1797_v0  ;;  %v1820_v36 = vadd.f32 %v1816_v40, %v1798_v19  ;;  %v1839_v45 = vmul.f32 %v7621_v8, %v1832_v50  ;;  %v7831_v12 = vpop.permute.xlu1 %2234  ;;  %v1859_v9 = vmul.f32 %v7624_v6, %v1856_v22  ;;  %v10894_v0 = vld [vmem:[#allocation36_spill] sm:$0xff] }
 0x2ec   : > { %10889 = vst [vmem:[#allocation84_spill] sm:$0xff] %v7831_v12  ;;  %v1854_v54 = vsel %vm1831_vm12, %v10888_v26, %v10887_v52  ;;  %v1879_v62 = vsel %vm1876_vm13, %v10891_v17, %v10890_v60  ;;  %v1880_v48 = vsel %vm1876_vm13, %v10892_v32, %v10891_v17  ;;  %v7846_v8 = vpop.permute.xlu0 %2232  ;;  %v1862_v40 = vmul.f32 %v7624_v6, %v1857_v57  ;;  %v10896_v12 = vld [vmem:[#allocation37_spill] sm:$0xff] }
 0x2ed   : > { %10893 = vst [vmem:[#allocation85_spill] sm:$0xff] %v7846_v8  ;;  %v1860_v29 = vmul.f32 %v7624_v6, %v1855_v13  ;;  %v1878_v19 = vsel %vm1876_vm13, %v10890_v60, %v10894_v0  ;;  %v7855_v50 = vstv %s7773_s26  ;;  %v1841_v22 = vadd.f32 %v1837_v59, %v1818_v53  ;;  %v10895_v8 = vld [vmem:[#allocation182_spill] sm:$0xff]  ;;  %s8520_s26 = sld [smem:[#allocation3 + $0xac]] }
 0x2ee   : > { %2628 = vrot.lane.b32.xlu1 %v5258_v63, %s5054_s27  ;;  %v1844_v52 = vadd.f32 %v1840_v35, %v1821_v3  ;;  %v1842_v26 = vadd.f32 %v1838_v30, %v1819_v24  ;;  %v1877_v57 = vsel %vm1876_vm13, %v10894_v0, %v10892_v32  ;;  %v1861_v13 = vmul.f32 %v7624_v6, %v1854_v54 }
 0x2ef   : > { %2626 = vrot.lane.b32.xlu0 %v5234_v51, %s5054_s27  ;;  %v1882_v60 = vmul.f32 %v7627_v23, %v1879_v62  ;;  %v1885_v17 = vmul.f32 %v7627_v23, %v1880_v48  ;;  %v1901_v53 = vsel %vm1876_vm13, %v10896_v12, %v10895_v8  ;;  %vm1966_vm15 = vcmp.lt.s32.totalorder %v5933_v58, 107  ;;  %v7875_v59 = vpop.permute.xlu1 %2253  ;;  %v10898_v48 = vld [vmem:[#allocation38_spill] sm:$0xff] }
 0x2f0   : > { %v1843_v35 = vadd.f32 %v1839_v45, %v1820_v36  ;;  %v1863_v30 = vadd.f32 %v1859_v9, %v1841_v22  ;;  %v1883_v3 = vmul.f32 %v7627_v23, %v1878_v19  ;;  %v7879_v6 = vstv %s7804_s2  ;;  %v7883_v24 = vpop.permute.xlu0 %2251  ;;  %v10899_v45 = vld [vmem:[#allocation39_spill] sm:$0xff]  ;;  %s4774_s2 = sld [smem:[#allocation3 + $0xad]] }
 0x2f1   : > { %10897 = vst [vmem:[#allocation86_spill] sm:$0xff] %v7883_v24  ;;  %v1866_v54 = vadd.f32 %v1862_v40, %v1844_v52  ;;  %v1864_v62 = vadd.f32 %v1860_v29, %v1842_v26  ;;  %v1884_v32 = vmul.f32 %v7627_v23, %v1877_v57  ;;  %v1902_v0 = vsel %vm1876_vm13, %v10898_v48, %v10896_v12  ;;  %v10900_v40 = vld [vmem:[#allocation40_spill] sm:$0xff]  ;;  %v10901_v29 = vld [vmem:[#allocation183_spill] sm:$0xff]  ;;  %v10902_v26 = vld [vmem:[#allocation41_spill] sm:$0xff] }
 0x2f2   : > { %2632 = vrot.lane.b32.xlu1 %v5252_v61, %s5054_s27  ;;  %v1904_v36 = vmul.f32 %v7634_v7, %v1901_v53  ;;  %v1899_v9 = vsel %vm1876_vm13, %v10899_v45, %v10898_v48  ;;  %v1900_v23 = vsel %vm1876_vm13, %v10895_v8, %v10899_v45  ;;  %v1924_v12 = vsel %vm1921_vm14, %v10901_v29, %v10900_v40  ;;  %v10903_v45 = vld [vmem:[#allocation42_spill] sm:$0xff] }
 0x2f3   : > { %2630 = vrot.lane.b32.xlu0 %v5240_v55, %s5054_s27  ;;  %v1865_v19 = vadd.f32 %v1861_v13, %v1843_v35  ;;  %v1886_v22 = vadd.f32 %v1882_v60, %v1863_v30  ;;  %v1889_v52 = vadd.f32 %v1885_v17, %v1866_v54  ;;  %v1925_v57 = vsel %vm1921_vm14, %v10902_v26, %v10901_v29  ;;  %v7911_v53 = vpop.permute.xlu1 %2257  ;;  %v10906_v54 = vld [vmem:[#allocation44_spill] sm:$0xff]  ;;  %s4773_s27 = sld [smem:[#allocation3 + $0x2d]] }
 0x2f4   : > { %v1887_v8 = vadd.f32 %v1883_v3, %v1864_v62  ;;  %v1907_v48 = vmul.f32 %v7634_v7, %v1902_v0  ;;  %v1922_v24 = vsel %vm1921_vm14, %v10903_v45, %v10902_v26  ;;  %v1923_v13 = vsel %vm1921_vm14, %v10900_v40, %v10903_v45  ;;  %v7925_v60 = vpop.permute.xlu0 %2255  ;;  %v10905_v3 = vld [vmem:[#allocation43_spill] sm:$0xff]  ;;  %v10908_v26 = vld [vmem:[#allocation46_spill] sm:$0xff] }
 0x2f5   : > { %vm2011_vm1 = vcmp.lt.s32.totalorder %v5933_v58, 106  ;;  %10904 = vst [vmem:[#allocation87_spill] sm:$0xff] %v7925_v60  ;;  %v1905_v17 = vmul.f32 %v7634_v7, %v1900_v23  ;;  %v1906_v35 = vmul.f32 %v7634_v7, %v1899_v9  ;;  %v1927_v30 = vmul.f32 %v7637_v34, %v1924_v12  ;;  %v10907_v23 = vld [vmem:[#allocation45_spill] sm:$0xff] }
 0x2f6   : > { %v1946_v62 = vsel %vm1921_vm14, %v10906_v54, %v10905_v3  ;;  %2650 = vrot.lane.b32.xlu1 %v5242_v56, %s5055_s25  ;;  %v1888_v0 = vadd.f32 %v1884_v32, %v1865_v19  ;;  %v1908_v40 = vadd.f32 %v1904_v36, %v1886_v22  ;;  %v1930_v29 = vmul.f32 %v7637_v34, %v1925_v57 }
 0x2f7   : > { %v1947_v7 = vsel %vm1921_vm14, %v10907_v23, %v10906_v54  ;;  %2648 = vrot.lane.b32.xlu0 %v5222_v42, %s5055_s25  ;;  %v1928_v9 = vmul.f32 %v7637_v34, %v1923_v13  ;;  %v1929_v12 = vmul.f32 %v7637_v34, %v1922_v24  ;;  %v1944_v32 = vsel %vm1921_vm14, %v10908_v26, %v10907_v23  ;;  %v7955_v19 = vpop.permute.xlu1 %2275 }
 0x2f8   : > { %v1945_v36 = vsel %vm1921_vm14, %v10905_v3, %v10908_v26  ;;  %v1911_v22 = vadd.f32 %v1907_v48, %v1889_v52  ;;  %v1949_v57 = vmul.f32 %v7640_v39, %v1946_v62  ;;  %v7959_v45 = vstv %s7873_s29  ;;  %v7964_v34 = vpop.permute.xlu0 %2273  ;;  %v10910_v3 = vld [vmem:[#allocation47_spill] sm:$0xff]  ;;  %v10911_v62 = vld [vmem:[#allocation48_spill] sm:$0xff]  ;;  %s4775_s29 = sld [smem:[#allocation3 + $0x2e]] }
 0x2f9   : > { %v7962_v13 = vstv %s7881_s18  ;;  %10909 = vst [vmem:[#allocation88_spill] sm:$0xff] %v7964_v34  ;;  %v1909_v24 = vadd.f32 %v1905_v17, %v1887_v8  ;;  %v1910_v54 = vadd.f32 %v1906_v35, %v1888_v0  ;;  %v1931_v23 = vadd.f32 %v1927_v30, %v1908_v40  ;;  %v10912_v34 = vld [vmem:[#allocation49_spill] sm:$0xff]  ;;  %s4776_s18 = sld [smem:[#allocation3 + $0xae]] }
 0x2fa   : > { %v1952_v60 = vmul.f32 %v7640_v39, %v1947_v7  ;;  %2654 = vrot.lane.b32.xlu1 %v5228_v46, %s5055_s25  ;;  %v1950_v52 = vmul.f32 %v7640_v39, %v1945_v36  ;;  %v1951_v48 = vmul.f32 %v7640_v39, %v1944_v32  ;;  %v1969_v26 = vsel %vm1966_vm15, %v10911_v62, %v10910_v3  ;;  %v10915_v7 = vld [vmem:[#allocation50_spill] sm:$0xff] }
 0x2fb   : > { %v1970_v8 = vsel %vm1966_vm15, %v10912_v34, %v10911_v62  ;;  %2652 = vrot.lane.b32.xlu0 %v5220_v41, %s5055_s25  ;;  %v1934_v17 = vadd.f32 %v1930_v29, %v1911_v22  ;;  %v1932_v35 = vadd.f32 %v1928_v9, %v1909_v24  ;;  %v1933_v30 = vadd.f32 %v1929_v12, %v1910_v54  ;;  %v7986_v40 = vpop.permute.xlu1 %2279  ;;  %v10919_v24 = vld [vmem:[#allocation52_spill] sm:$0xff]  ;;  %v10920_v54 = vld [vmem:[#allocation53_spill] sm:$0xff] }
 0x2fc   : > { %v7984_v0 = vstv %s7913_s19  ;;  %10914 = vst [vmem:[#allocation90_spill] sm:$0xff] %v7986_v40  ;;  %v1953_v39 = vadd.f32 %v1949_v57, %v1931_v23  ;;  %v1967_v32 = vsel %vm1966_vm15, %v10915_v7, %v10912_v34  ;;  %v1968_v36 = vsel %vm1966_vm15, %v10910_v3, %v10915_v7  ;;  %v7999_v29 = vpop.permute.xlu0 %2277  ;;  %v10918_v57 = vld [vmem:[#allocation51_spill] sm:$0xff]  ;;  %s8627_s19 = sld [smem:[#allocation3 + $0x2f]] }
 0x2fd   : > { %10913 = vst [vmem:[#allocation89_spill] sm:$0xff] %v7984_v0  ;;  %vm2056_vm2 = vcmp.lt.s32.totalorder %v5933_v58, 105  ;;  %10916 = vst [vmem:[#allocation91_spill] sm:$0xff] %v7999_v29  ;;  %v8002_v9 = vstv %s7927_s20  ;;  %v1972_v12 = vmul.f32 %v7650_v11, %v1969_v26  ;;  %v1975_v22 = vmul.f32 %v7650_v11, %v1970_v8  ;;  %v10921_v26 = vld [vmem:[#allocation54_spill] sm:$0xff]  ;;  %v10927_v29 = vld [vmem:[#allocation57_spill] sm:$0xff]  ;;  %s8641_s20 = sld [smem:[#allocation3 + $0xaf]] }
 0x2fe   : > { %10917 = vst [vmem:[#allocation92_spill] sm:$0xff] %v8002_v9  ;;  %v1991_v34 = vsel %vm1966_vm15, %v10919_v24, %v10918_v57  ;;  %v1992_v23 = vsel %vm1966_vm15, %v10920_v54, %v10919_v24  ;;  %2673 = vrot.lane.b32.xlu1 %v5258_v63, %s5055_s25  ;;  %v1956_v3 = vadd.f32 %v1952_v60, %v1934_v17  ;;  %vm2101_vm3 = vcmp.lt.s32.totalorder %v5933_v58, 104 }
 0x2ff   : > { %v1954_v62 = vadd.f32 %v1950_v52, %v1932_v35  ;;  %v1955_v7 = vadd.f32 %v1951_v48, %v1933_v30  ;;  %v1990_v8 = vsel %vm1966_vm15, %v10918_v57, %v10921_v26  ;;  %2671 = vrot.lane.b32.xlu0 %v5234_v51, %s5055_s25  ;;  %v1973_v9 = vmul.f32 %v7650_v11, %v1968_v36  ;;  %v10922_v52 = vld [vmem:[#allocation55_spill] sm:$0xff]  ;;  %v10923_v48 = vld [vmem:[#allocation56_spill] sm:$0xff]  ;;  %v8034_v35 = vpop.permute.xlu1 %2298 }
 0x300   : > { %v1974_v24 = vmul.f32 %v7650_v11, %v1967_v32  ;;  %v1989_v60 = vsel %vm1966_vm15, %v10921_v26, %v10920_v54  ;;  %v2014_v17 = vsel %vm2011_vm1, %v10923_v48, %v10922_v52  ;;  %10924 = vst [vmem:[#allocation93_spill] sm:$0xff] %v8034_v35  ;;  %v1994_v30 = vmul.f32 %v7659_v2, %v1991_v34  ;;  %v8042_v32 = vpop.permute.xlu0 %2296 }
 0x301   : > { %v1997_v57 = vmul.f32 %v7659_v2, %v1992_v23  ;;  %v2015_v11 = vsel %vm2011_vm1, %v7063_v37, %v10923_v48  ;;  %10925 = vst [vmem:[#allocation94_spill] sm:$0xff] %v8042_v32  ;;  %v8045_v36 = vstv %s7966_s0  ;;  %v1976_v54 = vadd.f32 %v1972_v12, %v1953_v39  ;;  %v10928_v12 = vld [vmem:[#allocation58_spill] sm:$0xff]  ;;  %v10930_v32 = vld [vmem:[#allocation60_spill] sm:$0xff]  ;;  %s8650_s0 = sld [smem:[#allocation3 + $0xb0]] }
 0x302   : > { %10926 = vst [vmem:[#allocation95_spill] sm:$0xff] %v8045_v36  ;;  %v1979_v26 = vadd.f32 %v1975_v22, %v1956_v3  ;;  %v1995_v0 = vmul.f32 %v7659_v2, %v1990_v8  ;;  %v2013_v34 = vsel %vm2011_vm1, %v10922_v52, %v10927_v29  ;;  %2677 = vrot.lane.b32.xlu1 %v5252_v61, %s5055_s25  ;;  %v10929_v22 = vld [vmem:[#allocation59_spill] sm:$0xff]  ;;  %vm2146_vm4 = vcmp.lt.s32.totalorder %v5933_v58, 103 }
 0x303   : > { %v1996_v23 = vmul.f32 %v7659_v2, %v1989_v60  ;;  %v2017_v48 = vmul.f32 %v7662_v38, %v2014_v17  ;;  %v2012_v39 = vsel %vm2011_vm1, %v10927_v29, %v7063_v37  ;;  %v2036_v3 = vsel %vm2011_vm1, %v10929_v22, %v10928_v12  ;;  %2675 = vrot.lane.b32.xlu0 %v5240_v55, %s5055_s25  ;;  %v8070_v60 = vpop.permute.xlu1 %2302  ;;  %s8644_s25 = sld [smem:[#allocation3 + $0x30]] }
 0x304   : > { %v1977_v8 = vadd.f32 %v1973_v9, %v1954_v62  ;;  %v1978_v52 = vadd.f32 %v1974_v24, %v1955_v7  ;;  %v2020_v2 = vmul.f32 %v7662_v38, %v2015_v11  ;;  %v8073_v17 = vstv %s7988_s21  ;;  %v8080_v40 = vpop.permute.xlu0 %2300  ;;  %v10931_v7 = vld [vmem:[#allocation61_spill] sm:$0xff]  ;;  %s8708_s21 = sld [smem:[#allocation2]] }
 0x305   : > { %v1998_v36 = vadd.f32 %v1994_v30, %v1976_v54  ;;  %v2001_v37 = vadd.f32 %v1997_v57, %v1979_v26  ;;  %v2018_v29 = vmul.f32 %v7662_v38, %v2013_v34  ;;  %v2037_v35 = vsel %vm2011_vm1, %v10930_v32, %v10929_v22  ;;  %v10932_v34 = vld [vmem:[#allocation62_spill] sm:$0xff] }
 0x306   : > { %v2019_v9 = vmul.f32 %v7662_v38, %v2012_v39  ;;  %v2039_v62 = vmul.f32 %v7665_v21, %v2036_v3  ;;  %v2034_v24 = vsel %vm2011_vm1, %v10931_v7, %v10930_v32  ;;  %v2035_v30 = vsel %vm2011_vm1, %v10928_v12, %v10931_v7  ;;  %2695 = vrot.lane.b32.xlu1 %v5242_v56, %s5056_s14 }
 0x307   : > { %v1999_v57 = vadd.f32 %v1995_v0, %v1977_v8  ;;  %v2000_v11 = vadd.f32 %v1996_v23, %v1978_v52  ;;  %v2021_v54 = vadd.f32 %v2017_v48, %v1998_v36  ;;  %2693 = vrot.lane.b32.xlu0 %v5222_v42, %s5056_s14  ;;  %v8099_v38 = vstv %s8022_s1  ;;  %v8110_v0 = vpop.permute.xlu1 %2320  ;;  %v10933_v23 = vld [vmem:[#allocation63_spill] sm:$0xff]  ;;  %v10934_v52 = vld [vmem:[#allocation64_spill] sm:$0xff]  ;;  %s10997_s1 = smov 127  }
 0x308   : > { %v2024_v26 = vadd.f32 %v2020_v2, %v2001_v37  ;;  %v2042_v32 = vmul.f32 %v7665_v21, %v2037_v35  ;;  %v2059_v39 = vsel %vm2056_vm2, %v7187_v28, %v10932_v34  ;;  %v2060_v56 = vsel %vm2056_vm2, %v7213_v27, %v7187_v28  ;;  %v8123_v12 = vpop.permute.xlu0 %2318  ;;  %v10935_v2 = vld [vmem:[#allocation65_spill] sm:$0xff] }
 0x309   : > { %v2040_v42 = vmul.f32 %v7665_v21, %v2035_v30  ;;  %v2041_v36 = vmul.f32 %v7665_v21, %v2034_v24  ;;  %v2057_v35 = vsel %vm2056_vm2, %v10933_v23, %v7213_v27  ;;  %v2058_v48 = vsel %vm2056_vm2, %v10932_v34, %v10933_v23  ;;  %v10938_v23 = vld [vmem:[#allocation68_spill] sm:$0xff] }
 0x30a   : > { %v2022_v28 = vadd.f32 %v2018_v29, %v1999_v57  ;;  %v2023_v22 = vadd.f32 %v2019_v9, %v2000_v11  ;;  %v2043_v3 = vadd.f32 %v2039_v62, %v2021_v54  ;;  %2699 = vrot.lane.b32.xlu1 %v5228_v46, %s5056_s14  ;;  %v8128_v21 = vstv %s8054_s24  ;;  %v10936_v62 = vld [vmem:[#allocation66_spill] sm:$0xff]  ;;  %s10998_s24 = smov 126  }
 0x30b   : > { %v2062_v27 = vmul.f32 %v7680_v10, %v2059_v39  ;;  %v2065_v8 = vmul.f32 %v7680_v10, %v2060_v56  ;;  %v2081_v37 = vsel %vm2056_vm2, %v10935_v2, %v10934_v52  ;;  %v2082_v29 = vsel %vm2056_vm2, %v7285_v31, %v10935_v2  ;;  %2697 = vrot.lane.b32.xlu0 %v5220_v41, %s5056_s14  ;;  %v8152_v30 = vpop.permute.xlu1 %2324 }
 0x30c   : > { %v2063_v46 = vmul.f32 %v7680_v10, %v2058_v48  ;;  %v2064_v9 = vmul.f32 %v7680_v10, %v2057_v35  ;;  %v2079_v7 = vsel %vm2056_vm2, %v10936_v62, %v7285_v31  ;;  %v2080_v24 = vsel %vm2056_vm2, %v10934_v52, %v10936_v62  ;;  %v8154_v41 = vpop.permute.xlu0 %2322  ;;  %v10937_v31 = vld [vmem:[#allocation67_spill] sm:$0xff] }
 0x30d   : > { %v2046_v57 = vadd.f32 %v2042_v32, %v2024_v26  ;;  %v2044_v11 = vadd.f32 %v2040_v42, %v2022_v28  ;;  %v2045_v54 = vadd.f32 %v2041_v36, %v2023_v22  ;;  %v8157_v34 = vstv %s8082_s12  ;;  %v10939_v36 = vld [vmem:[#allocation69_spill] sm:$0xff]  ;;  %v10941_v62 = vld [vmem:[#allocation71_spill] sm:$0xff] }
 0x30e   : > { %v2084_v10 = vmul.f32 %v7691_v49, %v2081_v37  ;;  %v2087_v39 = vmul.f32 %v7691_v49, %v2082_v29  ;;  %v2104_v56 = vsel %vm2101_vm3, %v10937_v31, %v7320_v15  ;;  %v2105_v26 = vsel %vm2101_vm3, %v10938_v23, %v10937_v31  ;;  %2718 = vrot.lane.b32.xlu1 %v5258_v63, %s5056_s14  ;;  %v10940_v29 = vld [vmem:[#allocation70_spill] sm:$0xff] }
 0x30f   : > { %v2085_v32 = vmul.f32 %v7691_v49, %v2080_v24  ;;  %v2086_v42 = vmul.f32 %v7691_v49, %v2079_v7  ;;  %v2102_v35 = vsel %vm2101_vm3, %v10939_v36, %v10938_v23  ;;  %v2103_v48 = vsel %vm2101_vm3, %v7320_v15, %v10939_v36  ;;  %2716 = vrot.lane.b32.xlu0 %v5234_v51, %s5056_s14  ;;  %v8184_v49 = vpop.permute.xlu1 %2343 }
 0x310   : > { %vm2191_vm5 = vcmp.lt.s32.totalorder %v5933_v58, 87  ;;  %v2066_v63 = vadd.f32 %v2062_v27, %v2043_v3  ;;  %v2069_v28 = vadd.f32 %v2065_v8, %v2046_v57  ;;  %v2067_v22 = vadd.f32 %v2063_v46, %v2044_v11  ;;  %v8196_v3 = vpop.permute.xlu0 %2341  ;;  %v10942_v46 = vld [vmem:[#allocation72_spill] sm:$0xff] }
 0x311   : > { %v2068_v52 = vadd.f32 %v2064_v9, %v2045_v54  ;;  %v2107_v2 = vmul.f32 %v7720_v5, %v2104_v56  ;;  %v2110_v37 = vmul.f32 %v7720_v5, %v2105_v26  ;;  %v2126_v15 = vsel %vm2101_vm3, %v10941_v62, %v10940_v29  ;;  %v10944_v56 = vld [vmem:[#allocation74_spill] sm:$0xff]  ;;  %v10945_v26 = vld [vmem:[#allocation75_spill] sm:$0xff] }
 0x312   : > { %v2127_v51 = vsel %vm2101_vm3, %v7436_v16, %v10941_v62  ;;  %v2108_v27 = vmul.f32 %v7720_v5, %v2103_v48  ;;  %v2109_v8 = vmul.f32 %v7720_v5, %v2102_v35  ;;  %v2124_v9 = vsel %vm2101_vm3, %v10942_v46, %v7436_v16  ;;  %2722 = vrot.lane.b32.xlu1 %v5252_v61, %s5056_s14  ;;  %v10943_v16 = vld [vmem:[#allocation73_spill] sm:$0xff] }
 0x313   : > { %v2125_v7 = vsel %vm2101_vm3, %v10940_v29, %v10942_v46  ;;  %v2088_v24 = vadd.f32 %v2084_v10, %v2066_v63  ;;  %v2091_v57 = vadd.f32 %v2087_v39, %v2069_v28  ;;  %v2089_v11 = vadd.f32 %v2085_v32, %v2067_v22  ;;  %2720 = vrot.lane.b32.xlu0 %v5240_v55, %s5056_s14  ;;  %v8222_v10 = vpop.permute.xlu1 %2347  ;;  %v10948_v29 = vld [vmem:[#allocation78_spill] sm:$0xff]  ;;  %v10950_v46 = vld [vmem:[#allocation80_spill] sm:$0xff] }
 0x314   : > { %v2090_v54 = vadd.f32 %v2086_v42, %v2068_v52  ;;  %v2129_v5 = vmul.f32 %v7756_v47, %v2126_v15  ;;  %v2132_v31 = vmul.f32 %v7756_v47, %v2127_v51  ;;  %v2149_v23 = vsel %vm2146_vm4, %v10944_v56, %v10943_v16  ;;  %v10946_v42 = vld [vmem:[#allocation76_spill] sm:$0xff]  ;;  %v8231_v35 = vpop.permute.xlu0 %2345  ;;  %v10949_v15 = vld [vmem:[#allocation79_spill] sm:$0xff] }
 0x315   : > { %v2150_v61 = vsel %vm2146_vm4, %v10945_v26, %v10944_v56  ;;  %v2111_v39 = vadd.f32 %v2107_v2, %v2088_v24  ;;  %v2130_v32 = vmul.f32 %v7756_v47, %v2125_v7  ;;  %v2131_v55 = vmul.f32 %v7756_v47, %v2124_v9  ;;  %v10947_v2 = vld [vmem:[#allocation77_spill] sm:$0xff] }
 0x316   : > { %v2148_v36 = vsel %vm2146_vm4, %v10943_v16, %v10946_v42  ;;  %vm2236_vm6 = vcmp.lt.s32.totalorder %v5933_v58, 86  ;;  %v2114_v48 = vadd.f32 %v2110_v37, %v2091_v57  ;;  %v2112_v63 = vadd.f32 %v2108_v27, %v2089_v11  ;;  %v10951_v56 = vld [vmem:[#allocation81_spill] sm:$0xff] }
 0x317   : > { %v2113_v28 = vadd.f32 %v2109_v8, %v2090_v54  ;;  %v2147_v22 = vsel %vm2146_vm4, %v10946_v42, %v10945_v26  ;;  %v2152_v52 = vmul.f32 %v7783_v33, %v2149_v23  ;;  %v2155_v47 = vmul.f32 %v7783_v33, %v2150_v61  ;;  %v8252_v7 = vpop.permute.xlu1 %2365  ;;  %v10952_v23 = vld [vmem:[#allocation82_spill] sm:$0xff] }
 0x318   : > { %v2171_v62 = vsel %vm2146_vm4, %v10948_v29, %v10947_v2  ;;  %v2172_v37 = vsel %vm2146_vm4, %v10949_v15, %v10948_v29  ;;  %v2133_v51 = vadd.f32 %v2129_v5, %v2111_v39  ;;  %v2136_v27 = vadd.f32 %v2132_v31, %v2114_v48  ;;  %v8259_v5 = vpop.permute.xlu0 %2363 }
 0x319   : > { %v2153_v8 = vmul.f32 %v7783_v33, %v2148_v36  ;;  %v2170_v9 = vsel %vm2146_vm4, %v10947_v2, %v10950_v46  ;;  %v2134_v24 = vadd.f32 %v2130_v32, %v2112_v63  ;;  %v2135_v57 = vadd.f32 %v2131_v55, %v2113_v28 }
 0x31a   : > { %v2154_v11 = vmul.f32 %v7783_v33, %v2147_v22  ;;  %v2169_v54 = vsel %vm2146_vm4, %v10950_v46, %v10949_v15  ;;  %v2174_v31 = vmul.f32 %v7814_v14, %v2171_v62  ;;  %v2177_v16 = vmul.f32 %v7814_v14, %v2172_v37  ;;  %v10953_v33 = vld [vmem:[#allocation83_spill] sm:$0xff] }
 0x31b   : > { %v2194_v26 = vsel %vm2191_vm5, %v10952_v23, %v10951_v56  ;;  %v2195_v61 = vsel %vm2191_vm5, %v10953_v33, %v10952_v23  ;;  %v2156_v39 = vadd.f32 %v2152_v52, %v2133_v51  ;;  %v2159_v32 = vadd.f32 %v2155_v47, %v2136_v27  ;;  %v8288_v22 = vpop.permute.xlu1 %2369  ;;  %v10955_v23 = vld [vmem:[#allocation85_spill] sm:$0xff] }
 0x31c   : > { %v2175_v55 = vmul.f32 %v7814_v14, %v2170_v9  ;;  %v2193_v42 = vsel %vm2191_vm5, %v10951_v56, %v7693_v1  ;;  %vm2281_vm7 = vcmp.lt.s32.totalorder %v5933_v58, 85  ;;  %v2157_v36 = vadd.f32 %v2153_v8, %v2134_v24  ;;  %v8300_v2 = vpop.permute.xlu0 %2367  ;;  %v10954_v24 = vld [vmem:[#allocation84_spill] sm:$0xff] }
 0x31d   : > { %v2176_v48 = vmul.f32 %v7814_v14, %v2169_v54  ;;  %v2192_v63 = vsel %vm2191_vm5, %v7693_v1, %v10953_v33  ;;  %v2216_v28 = vsel %vm2191_vm5, %v7728_v25, %v7722_v4  ;;  %v2197_v52 = vmul.f32 %v7855_v50, %v2194_v26 }
 0x31e   : > { %v2200_v47 = vmul.f32 %v7855_v50, %v2195_v61  ;;  %v2217_v14 = vsel %vm2191_vm5, %v7758_v44, %v7728_v25  ;;  %v2215_v1 = vsel %vm2191_vm5, %v7722_v4, %v7770_v18  ;;  %v2158_v29 = vadd.f32 %v2154_v11, %v2135_v57 }
 0x31f   : > { %v2178_v62 = vadd.f32 %v2174_v31, %v2156_v39  ;;  %v2181_v15 = vadd.f32 %v2177_v16, %v2159_v32  ;;  %v2198_v37 = vmul.f32 %v7855_v50, %v2193_v42  ;;  %v2179_v51 = vadd.f32 %v2175_v55, %v2157_v36  ;;  %v8319_v57 = vpop.permute.xlu1 %2388  ;;  %v10956_v39 = vld [vmem:[#allocation86_spill] sm:$0xff] }
 0x320   : > { %v2199_v27 = vmul.f32 %v7855_v50, %v2192_v63  ;;  %v2219_v8 = vmul.f32 %v7879_v6, %v2216_v28  ;;  %v2214_v25 = vsel %vm2191_vm5, %v7770_v18, %v7758_v44  ;;  %v2222_v4 = vmul.f32 %v7879_v6, %v2217_v14  ;;  %v8322_v44 = vpop.permute.xlu0 %2386 }
 0x321   : > { %v2220_v46 = vmul.f32 %v7879_v6, %v2215_v1  ;;  %v2239_v9 = vsel %vm2236_vm6, %v7806_v20, %v7798_v43  ;;  %v2240_v50 = vsel %vm2236_vm6, %v10954_v24, %v7806_v20  ;;  %v2180_v11 = vadd.f32 %v2176_v48, %v2158_v29 }
 0x322   : > { %v2201_v54 = vadd.f32 %v2197_v52, %v2178_v62  ;;  %v2204_v31 = vadd.f32 %v2200_v47, %v2181_v15  ;;  %vm2326_vm8 = vcmp.lt.s32.totalorder %v5933_v58, 84  ;;  %v8325_v18 = vstv %s8261_s15  ;;  %v10957_v52 = vld [vmem:[#allocation87_spill] sm:$0xff]  ;;  %v10958_v15 = vld [vmem:[#allocation88_spill] sm:$0xff] }
 0x323   : > { %v2202_v16 = vadd.f32 %v2198_v37, %v2179_v51  ;;  %v2221_v56 = vmul.f32 %v7879_v6, %v2214_v25  ;;  %v2237_v26 = vsel %vm2236_vm6, %v10955_v23, %v10954_v24  ;;  %v2238_v20 = vsel %vm2236_vm6, %v7798_v43, %v10955_v23  ;;  %v10959_v37 = vld [vmem:[#allocation90_spill] sm:$0xff]  ;;  %v10961_v24 = vld [vmem:[#allocation93_spill] sm:$0xff] }
 0x324   : > { %v2242_v33 = vmul.f32 %v7959_v45, %v2239_v9  ;;  %v2245_v61 = vmul.f32 %v7959_v45, %v2240_v50  ;;  %v2261_v32 = vsel %vm2236_vm6, %v10956_v39, %v7875_v59  ;;  %v2262_v6 = vsel %vm2236_vm6, %v7911_v53, %v10956_v39  ;;  %v8346_v63 = vpop.permute.xlu1 %2392  ;;  %v10962_v50 = vld [vmem:[#allocation94_spill] sm:$0xff] }
 0x325   : > { %v2203_v55 = vadd.f32 %v2199_v27, %v2180_v11  ;;  %v2223_v42 = vadd.f32 %v2219_v8, %v2201_v54  ;;  %v2226_v36 = vadd.f32 %v2222_v4, %v2204_v31  ;;  %v2224_v48 = vadd.f32 %v2220_v46, %v2202_v16  ;;  %v8358_v1 = vpop.permute.xlu0 %2390  ;;  %v10960_v8 = vld [vmem:[#allocation91_spill] sm:$0xff]  ;;  %v10963_v16 = vld [vmem:[#allocation89_spill] sm:$0xff] }
 0x326   : > { %v2243_v43 = vmul.f32 %v7959_v45, %v2238_v20  ;;  %v2244_v28 = vmul.f32 %v7959_v45, %v2237_v26  ;;  %v2259_v47 = vsel %vm2236_vm6, %v10957_v52, %v7911_v53  ;;  %v2260_v14 = vsel %vm2236_vm6, %v7875_v59, %v10957_v52 }
 0x327   : > { %v2264_v29 = vmul.f32 %v7962_v13, %v2261_v32  ;;  %v2267_v62 = vmul.f32 %v7962_v13, %v2262_v6  ;;  %v2284_v45 = vsel %vm2281_vm7, %v10958_v15, %v7955_v19  ;;  %v2285_v53 = vsel %vm2281_vm7, %v10959_v37, %v10958_v15  ;;  %v10964_v32 = vld [vmem:[#allocation92_spill] sm:$0xff] }
 0x328   : > { %vm2371_vm9 = vcmp.lt.s32.totalorder %v5933_v58, 83  ;;  %v2225_v51 = vadd.f32 %v2221_v56, %v2203_v55  ;;  %v2246_v59 = vadd.f32 %v2242_v33, %v2223_v42  ;;  %v2249_v27 = vadd.f32 %v2245_v61, %v2226_v36  ;;  %v8385_v54 = vpop.permute.xlu1 %2410 }
 0x329   : > { %v2283_v25 = vsel %vm2281_vm7, %v7955_v19, %v10960_v8  ;;  %v2265_v4 = vmul.f32 %v7962_v13, %v2260_v14  ;;  %v2266_v46 = vmul.f32 %v7962_v13, %v2259_v47  ;;  %v2282_v9 = vsel %vm2281_vm7, %v10960_v8, %v10959_v37  ;;  %v8393_v23 = vpop.permute.xlu0 %2408 }
 0x32a   : > { %v2306_v11 = vsel %vm2281_vm7, %v10962_v50, %v10961_v24  ;;  %v2247_v31 = vadd.f32 %v2243_v43, %v2224_v48  ;;  %v2287_v56 = vmul.f32 %v10963_v16, %v2284_v45  ;;  %v2290_v19 = vmul.f32 %v10963_v16, %v2285_v53 }
 0x32b   : > { %v2307_v13 = vsel %vm2281_vm7, %v8070_v60, %v10962_v50  ;;  %v2248_v26 = vadd.f32 %v2244_v28, %v2225_v51  ;;  %v2268_v20 = vadd.f32 %v2264_v29, %v2246_v59  ;;  %v2271_v33 = vadd.f32 %v2267_v62, %v2249_v27  ;;  %v10965_v51 = vld [vmem:[#allocation95_spill] sm:$0xff] }
 0x32c   : > { %v2288_v61 = vmul.f32 %v10963_v16, %v2283_v25  ;;  %v2289_v39 = vmul.f32 %v10963_v16, %v2282_v9  ;;  %v2309_v6 = vmul.f32 %v10964_v32, %v2306_v11  ;;  %v2304_v55 = vsel %vm2281_vm7, %v8080_v40, %v8070_v60  ;;  %v8411_v52 = vpop.permute.xlu1 %2414 }
 0x32d   : > { %v2305_v42 = vsel %vm2281_vm7, %v10961_v24, %v8080_v40  ;;  %v2269_v36 = vadd.f32 %v2265_v4, %v2247_v31  ;;  %v2270_v48 = vadd.f32 %v2266_v46, %v2248_v26  ;;  %v2312_v43 = vmul.f32 %v10964_v32, %v2307_v13  ;;  %v8422_v29 = vpop.permute.xlu0 %2412 }
 0x32e   : > { %v2329_v28 = vsel %vm2326_vm8, %v8123_v12, %v8110_v0  ;;  %v2291_v47 = vadd.f32 %v2287_v56, %v2268_v20  ;;  %v2294_v14 = vadd.f32 %v2290_v19, %v2271_v33  ;;  %v2330_v60 = vsel %vm2326_vm8, %v8152_v30, %v8123_v12 }
 0x32f   : > { %v2328_v40 = vsel %vm2326_vm8, %v8110_v0, %v8154_v41  ;;  %vm2416_vm12 = vcmp.lt.s32.totalorder %v5933_v58, 82  ;;  %v2292_v62 = vadd.f32 %v2288_v61, %v2269_v36  ;;  %v2310_v15 = vmul.f32 %v10964_v32, %v2305_v42 }
 0x330   : > { %v2311_v45 = vmul.f32 %v10964_v32, %v2304_v55  ;;  %v2327_v37 = vsel %vm2326_vm8, %v8154_v41, %v8152_v30  ;;  %v2293_v12 = vadd.f32 %v2289_v39, %v2270_v48  ;;  %v2313_v53 = vadd.f32 %v2309_v6, %v2291_v47  ;;  %v2434_v41 = vpop.permute.xlu1 %2433 }
 0x331   : > { %v2332_v0 = vmul.f32 %v10965_v51, %v2329_v28  ;;  %v2351_v59 = vsel %vm2326_vm8, %v8196_v3, %v8184_v49  ;;  %v2316_v27 = vadd.f32 %v2312_v43, %v2294_v14  ;;  %v2335_v8 = vmul.f32 %v10965_v51, %v2330_v60  ;;  %v2432_v50 = vpop.permute.xlu0 %2431 }
 0x332   : > { %v2333_v25 = vmul.f32 %v10965_v51, %v2328_v40  ;;  %v2352_v30 = vsel %vm2326_vm8, %v8222_v10, %v8196_v3  ;;  %v2334_v4 = vmul.f32 %v10965_v51, %v2327_v37  ;;  %v2349_v46 = vsel %vm2326_vm8, %v8231_v35, %v8222_v10 }
 0x333   : > { %v2350_v9 = vsel %vm2326_vm8, %v8184_v49, %v8231_v35  ;;  %v2374_v24 = vsel %vm2371_vm9, %v8259_v5, %v8252_v7  ;;  %vm2461_vm13 = vcmp.lt.s32.totalorder %v5933_v58, 81  ;;  %v2314_v3 = vadd.f32 %v2310_v15, %v2292_v62 }
 0x334   : > { %v2315_v11 = vadd.f32 %v2311_v45, %v2293_v12  ;;  %v2354_v31 = vmul.f32 %v8073_v17, %v2351_v59  ;;  %v2375_v10 = vsel %vm2371_vm9, %v8288_v22, %v8259_v5  ;;  %v2336_v16 = vadd.f32 %v2332_v0, %v2313_v53  ;;  %v2438_v20 = vpop.permute.xlu1 %2437 }
 0x335   : > { %v2357_v49 = vmul.f32 %v8073_v17, %v2352_v30  ;;  %v2372_v35 = vsel %vm2371_vm9, %v8300_v2, %v8288_v22  ;;  %v2373_v56 = vsel %vm2371_vm9, %v8252_v7, %v8300_v2  ;;  %v2355_v19 = vmul.f32 %v8073_v17, %v2350_v9  ;;  %v2436_v7 = vpop.permute.xlu0 %2435 }
 0x336   : > { %v2356_v13 = vmul.f32 %v8073_v17, %v2349_v46  ;;  %v2377_v5 = vmul.f32 %v8099_v38, %v2374_v24  ;;  %v2396_v26 = vsel %vm2371_vm9, %v8322_v44, %v8319_v57  ;;  %v2339_v22 = vadd.f32 %v2335_v8, %v2316_v27 }
 0x337   : > { %v2337_v33 = vadd.f32 %v2333_v25, %v2314_v3  ;;  %v2338_v61 = vadd.f32 %v2334_v4, %v2315_v11  ;;  %v2380_v39 = vmul.f32 %v8099_v38, %v2375_v10  ;;  %v2358_v2 = vadd.f32 %v2354_v31, %v2336_v16 }
 0x338   : > { %v2378_v32 = vmul.f32 %v8099_v38, %v2373_v56  ;;  %v2379_v17 = vmul.f32 %v8099_v38, %v2372_v35  ;;  %v2397_v6 = vsel %vm2371_vm9, %v8346_v63, %v8322_v44  ;;  %v2361_v55 = vadd.f32 %v2357_v49, %v2339_v22  ;;  %v2456_v38 = vpop.permute.xlu1 %2455 }
 0x339   : > { %v2399_v42 = vmul.f32 %v8128_v21, %v2396_v26  ;;  %v2466_v36 = vstv %s8430_s11  ;;  %v8490_v48 = vstv %s8437_s17  ;;  %v2359_v43 = vadd.f32 %v2355_v19, %v2337_v33  ;;  %v2454_v15 = vpop.permute.xlu0 %2453  ;;  %s11000_s11 = sld [smem:[#allocation196_spill]] }
 0x33a   : > { %v2360_v28 = vadd.f32 %v2356_v13, %v2338_v61  ;;  %v2381_v47 = vadd.f32 %v2377_v5, %v2358_v2  ;;  %v2419_v14 = vsel %vm2416_vm12, %v8393_v23, %v8385_v54  ;;  %v2384_v60 = vadd.f32 %v2380_v39, %v2361_v55  ;;  %v10966_v2 = vld [vmem:[#allocation185_spill] sm:$0xff] }
 0x33b   : > { %v2402_v40 = vmul.f32 %v8128_v21, %v2397_v6  ;;  %v2394_v44 = vsel %vm2371_vm9, %v8358_v1, %v8346_v63  ;;  %v2395_v62 = vsel %vm2371_vm9, %v8319_v57, %v8358_v1  ;;  %v2382_v45 = vadd.f32 %v2378_v32, %v2359_v43  ;;  %v10967_v32 = vld [vmem:[#allocation171_spill] sm:$0xff]  ;;  %v10968_v6 = vld [vmem:[#allocation13_spill] sm:$0xff] }
 0x33c   : > { %v2383_v37 = vadd.f32 %v2379_v17, %v2360_v28  ;;  %v2420_v12 = vsel %vm2416_vm12, %v8411_v52, %v8393_v23  ;;  %v2441_v53 = vsel %vm2416_vm12, %v2432_v50, %v2434_v41  ;;  %v2403_v51 = vadd.f32 %v2399_v42, %v2381_v47  ;;  %v2460_v8 = vpop.permute.xlu1 %2459  ;;  %v10969_v55 = vld [vmem:[#allocation173_spill] sm:$0xff] }
 0x33d   : > { %v2422_v0 = vmul.f32 %v8157_v34, %v2419_v14  ;;  %v2417_v63 = vsel %vm2416_vm12, %v8422_v29, %v8411_v52  ;;  %v2418_v57 = vsel %vm2416_vm12, %v8385_v54, %v8422_v29  ;;  %v2400_v1 = vmul.f32 %v8128_v21, %v2395_v62  ;;  %v2458_v29 = vpop.permute.xlu0 %2457 }
 0x33e   : > { %v2401_v23 = vmul.f32 %v8128_v21, %v2394_v44  ;;  %v2442_v59 = vsel %vm2416_vm12, %v2438_v20, %v2432_v50  ;;  %v2464_v27 = vsel %vm2461_vm13, %v2454_v15, %v2456_v38  ;;  %v2406_v25 = vadd.f32 %v2402_v40, %v2384_v60 }
 0x33f   : > { %v2425_v52 = vmul.f32 %v8157_v34, %v2420_v12  ;;  %v2444_v30 = vmul.f32 %v8325_v18, %v2441_v53  ;;  %v2440_v54 = vsel %vm2416_vm12, %v2434_v41, %v2436_v7  ;;  %v2423_v4 = vmul.f32 %v8157_v34, %v2418_v57 }
 0x340   : > { %v2424_v21 = vmul.f32 %v8157_v34, %v2417_v63  ;;  %v2439_v46 = vsel %vm2416_vm12, %v2436_v7, %v2438_v20  ;;  %v2465_v9 = vsel %vm2461_vm13, %v2460_v8, %v2454_v15  ;;  %v2426_v24 = vadd.f32 %v2422_v0, %v2403_v51  ;;  %v2479_v16 = vpop.permute.xlu1 %2478  ;;  %v10970_v51 = vld [vmem:[#allocation186_spill] sm:$0xff]  ;;  %v10971_v63 = vld [vmem:[#allocation188_spill] sm:$0xff] }
 0x341   : > { %v2447_v50 = vmul.f32 %v8325_v18, %v2442_v59  ;;  %v2467_v3 = vmul.f32 %v2466_v36, %v2464_v27  ;;  %v2463_v11 = vsel %vm2461_vm13, %v2456_v38, %v2458_v29  ;;  %v2404_v31 = vadd.f32 %v2400_v1, %v2382_v45  ;;  %v2477_v13 = vpop.permute.xlu0 %2476  ;;  %v10972_v1 = vld [vmem:[#allocation187_spill] sm:$0xff] }
 0x342   : > { %v2405_v41 = vadd.f32 %v2401_v23, %v2383_v37  ;;  %v2445_v10 = vmul.f32 %v8325_v18, %v2440_v54  ;;  %v2462_v34 = vsel %vm2461_vm13, %v2458_v29, %v2460_v8  ;;  %v2429_v49 = vadd.f32 %v2425_v52, %v2406_v25  ;;  %v10973_v8 = vld [vmem:[#allocation172_spill] sm:$0xff]  ;;  %v10974_v25 = vld [vmem:[#allocation175_spill] sm:$0xff] }
 0x343   : > { %v2448_v35 = vadd.f32 %v2444_v30, %v2426_v24  ;;  %v2446_v56 = vmul.f32 %v8325_v18, %v2439_v46  ;;  %v2470_v19 = vmul.f32 %v2466_v36, %v2465_v9  ;;  %v2427_v5 = vadd.f32 %v2423_v4, %v2404_v31  ;;  %v10976_v46 = vld [vmem:[#allocation15_spill] sm:$0xff]  ;;  %v10977_v24 = vld [vmem:[#allocation16_spill] sm:$0xff]  ;;  %v10979_v31 = vld [vmem:[#allocation177_spill] sm:$0xff] }
 0x344   : > { %v2428_v26 = vadd.f32 %v2424_v21, %v2405_v41  ;;  %v2468_v20 = vmul.f32 %v2466_v36, %v2463_v11  ;;  %v2486_v22 = vsel %vm2461_vm13, %v2477_v13, %v2479_v16  ;;  %v2451_v33 = vadd.f32 %v2447_v50, %v2429_v49  ;;  %v2483_v28 = vpop.permute.xlu1 %2482  ;;  %v10978_v11 = vld [vmem:[#allocation21_spill] sm:$0xff]  ;;  %v10980_v49 = vld [vmem:[#allocation18_spill] sm:$0xff] }
 0x345   : > { %v2471_v61 = vadd.f32 %v2467_v3, %v2448_v35  ;;  %v2469_v39 = vmul.f32 %v2466_v36, %v2462_v34  ;;  %v2489_v7 = vmul.f32 %v8490_v48, %v2486_v22  ;;  %v2499_v17 = vmul.f32 %v10967_v32, %v10966_v2  ;;  %v2481_v40 = vpop.permute.xlu0 %2480  ;;  %v10983_v22 = vld [vmem:[#allocation25_spill] sm:$0xff] }
 0x346   : > { %v2509_v42 = vmul.f32 %v10969_v55, %v10968_v6  ;;  %v8553_v18 = vstv %s8520_s26  ;;  %v2449_v43 = vadd.f32 %v2445_v10, %v2427_v5  ;;  %v2450_v47 = vadd.f32 %v2446_v56, %v2428_v26  ;;  %v10981_v56 = vld [vmem:[#allocation20_spill] sm:$0xff]  ;;  %s5062_s26 = smov 124  }
 0x347   : > { %v2474_v14 = vadd.f32 %v2470_v19, %v2451_v33  ;;  %v2493_v38 = vadd.f32 %v2489_v7, %v2471_v61  ;;  %v2487_v60 = vsel %vm2461_vm13, %v2483_v28, %v2477_v13  ;;  %v2484_v62 = vsel %vm2461_vm13, %v2481_v40, %v2483_v28  ;;  %v10982_v13 = vld [vmem:[#allocation19_spill] sm:$0xff]  ;;  %v10984_v33 = vld [vmem:[#allocation181_spill] sm:$0xff] }
 0x348   : > { %v2472_v36 = vadd.f32 %v2468_v20, %v2449_v43  ;;  %v2492_v44 = vmul.f32 %v8490_v48, %v2487_v60  ;;  %v2485_v15 = vsel %vm2461_vm13, %v2479_v16, %v2481_v40  ;;  %v2473_v45 = vadd.f32 %v2469_v39, %v2450_v47  ;;  %v8570_v27 = vpop.permute.xlu1 %2560  ;;  %v10987_v43 = vld [vmem:[#allocation189_spill] sm:$0xff] }
 0x349   : > { %v2503_v37 = vadd.f32 %v2499_v17, %v2493_v38  ;;  %v2490_v12 = vmul.f32 %v8490_v48, %v2485_v15  ;;  %v2491_v53 = vmul.f32 %v8490_v48, %v2484_v62  ;;  %v2500_v0 = vmul.f32 %v10967_v32, %v10970_v51  ;;  %v8574_v4 = vpop.permute.xlu0 %2558  ;;  %v10975_v48 = vld [vmem:[#allocation14_spill] sm:$0xff]  ;;  %v10985_v17 = vld [vmem:[#allocation23_spill] sm:$0xff]  ;;  %v10990_v15 = vld [vmem:[#allocation176_spill] sm:$0xff] }
 0x34a   : > { %v2501_v57 = vmul.f32 %v10967_v32, %v10971_v63  ;;  %v2502_v23 = vmul.f32 %v10967_v32, %v10972_v1  ;;  %v2496_v59 = vadd.f32 %v2492_v44, %v2474_v14  ;;  %v2519_v52 = vmul.f32 %v10974_v25, %v10973_v8  ;;  %v10988_v14 = vld [vmem:[#allocation179_spill] sm:$0xff]  ;;  %v10989_v44 = vld [vmem:[#allocation26_spill] sm:$0xff] }
 0x34b   : > { %v2513_v30 = vadd.f32 %v2509_v42, %v2503_v37  ;;  %v2494_v54 = vadd.f32 %v2490_v12, %v2472_v36  ;;  %v2495_v29 = vadd.f32 %v2491_v53, %v2473_v45  ;;  %v2510_v21 = vmul.f32 %v10969_v55, %v10975_v48  ;;  %v10991_v53 = vld [vmem:[#allocation28_spill] sm:$0xff] }
 0x34c   : > { %v2511_v9 = vmul.f32 %v10969_v55, %v10976_v46  ;;  %v2512_v50 = vmul.f32 %v10969_v55, %v10977_v24  ;;  %v2506_v3 = vadd.f32 %v2502_v23, %v2496_v59  ;;  %v2529_v41 = vmul.f32 %v10979_v31, %v10978_v11  ;;  %v2565_v20 = vpop.permute.xlu1 %2564  ;;  %v10986_v55 = vld [vmem:[#allocation24_spill] sm:$0xff]  ;;  %v10992_v23 = vld [vmem:[#allocation31_spill] sm:$0xff] }
 0x34d   : > { %v2523_v10 = vadd.f32 %v2519_v52, %v2513_v30  ;;  %v2504_v34 = vadd.f32 %v2500_v0, %v2494_v54  ;;  %v2505_v16 = vadd.f32 %v2501_v57, %v2495_v29  ;;  %v2520_v35 = vmul.f32 %v10974_v25, %v10980_v49  ;;  %v2563_v32 = vpop.permute.xlu0 %2562  ;;  %v10994_v30 = vld [vmem:[#allocation191_spill] sm:$0xff] }
 0x34e   : > { %v2521_v19 = vmul.f32 %v10974_v25, %v10981_v56  ;;  %v2522_v5 = vmul.f32 %v10974_v25, %v10982_v13  ;;  %v2516_v26 = vadd.f32 %v2512_v50, %v2506_v3  ;;  %v2539_v61 = vmul.f32 %v10984_v33, %v10983_v22  ;;  %v10993_v25 = vld [vmem:[#allocation29_spill] sm:$0xff] }
 0x34f   : > { %v2514_v39 = vadd.f32 %v2510_v21, %v2504_v34  ;;  %v2515_v7 = vadd.f32 %v2511_v9, %v2505_v16  ;;  %v2533_v2 = vadd.f32 %v2529_v41, %v2523_v10  ;;  %v2530_v6 = vmul.f32 %v10979_v31, %v10985_v17 }
 0x350   : > { %v2531_v42 = vmul.f32 %v10979_v31, %v10986_v55  ;;  %v2532_v28 = vmul.f32 %v10979_v31, %v10987_v43  ;;  %v2526_v47 = vadd.f32 %v2522_v5, %v2516_v26  ;;  %v2549_v38 = vmul.f32 %v8553_v18, %v10988_v14  ;;  %v2584_v12 = vpop.permute.xlu1 %2583 }
 0x351   : > { %v2524_v60 = vadd.f32 %v2520_v35, %v2514_v39  ;;  %v2525_v40 = vadd.f32 %v2521_v19, %v2515_v7  ;;  %v2543_v36 = vadd.f32 %v2539_v61, %v2533_v2  ;;  %v2540_v62 = vmul.f32 %v10984_v33, %v10989_v44  ;;  %v2582_v1 = vpop.permute.xlu0 %2581 }
 0x352   : > { %v2542_v45 = vmul.f32 %v10984_v33, %v10990_v15  ;;  %v2536_v37 = vadd.f32 %v2532_v28, %v2526_v47  ;;  %v2541_v51 = vmul.f32 %v10984_v33, %v10991_v53  ;;  %v2552_v59 = vmul.f32 %v8553_v18, %v10992_v23 }
 0x353   : > { %v2553_v0 = vadd.f32 %v2549_v38, %v2543_v36  ;;  %v2535_v63 = vadd.f32 %v2531_v42, %v2525_v40  ;;  %v2534_v57 = vadd.f32 %v2530_v6, %v2524_v60  ;;  %v2550_v52 = vmul.f32 %v8553_v18, %v10993_v25 }
 0x354   : > { %v2546_v8 = vadd.f32 %v2542_v45, %v2536_v37  ;;  %v2551_v54 = vmul.f32 %v8553_v18, %v10994_v30  ;;  %v2588_v46 = vpop.permute.xlu1 %2587  ;;  %vm2566_vm14 = vcmp.lt.s32.totalorder %v5933_v58, 62  ;;  %v2571_v56 = vstv %s4773_s27  ;;  %s5063_s27 = smov 36  }
 0x355   : > { %v2545_v29 = vadd.f32 %v2541_v51, %v2535_v63  ;;  %v2544_v48 = vadd.f32 %v2540_v62, %v2534_v57  ;;  %v2586_v50 = vpop.permute.xlu0 %2585  ;;  %v2569_v19 = vsel %vm2566_vm14, %v8574_v4, %v8570_v27  ;;  %v2570_v5 = vsel %vm2566_vm14, %v2565_v20, %v8574_v4 }
 0x356   : > { %v2556_v21 = vadd.f32 %v2552_v59, %v2546_v8  ;;  %v2567_v26 = vsel %vm2566_vm14, %v2563_v32, %v2565_v20  ;;  %v2568_v22 = vsel %vm2566_vm14, %v8570_v27, %v2563_v32  ;;  %v2593_v61 = vstv %s4774_s2  ;;  %s11005_s2 = sld [smem:[#allocation199_spill]] }
 0x357   : > { %v2555_v9 = vadd.f32 %v2551_v54, %v2545_v29  ;;  %v2554_v24 = vadd.f32 %v2550_v52, %v2544_v48  ;;  %vm2611_vm15 = vcmp.lt.s32.totalorder %v5933_v58, 61  ;;  %v2616_v39 = vstv %s4775_s29 }
 0x358   : > { %v2606_v3 = vpop.permute.xlu1 %2605  ;;  %v2572_v7 = vmul.f32 %v2571_v56, %v2569_v19  ;;  %v2591_v4 = vsel %vm2566_vm14, %v2582_v1, %v2584_v12  ;;  %v2592_v20 = vsel %vm2566_vm14, %v2588_v46, %v2582_v1  ;;  %v2638_v2 = vstv %s4776_s18 }
 0x359   : > { %v2604_v11 = vpop.permute.xlu0 %2603  ;;  %v2575_v27 = vmul.f32 %v2571_v56, %v2570_v5  ;;  %v2573_v32 = vmul.f32 %v2571_v56, %v2568_v22  ;;  %v2574_v17 = vmul.f32 %v2571_v56, %v2567_v26  ;;  %vm2656_vm4 = vcmp.lt.s32.totalorder %v5933_v58, 60 }
 0x35a   : > { %v2576_v55 = vadd.f32 %v2572_v7, %v2553_v0  ;;  %v2589_v42 = vsel %vm2566_vm14, %v2586_v50, %v2588_v46  ;;  %v2590_v43 = vsel %vm2566_vm14, %v2584_v12, %v2586_v50  ;;  %v2614_v28 = vsel %vm2611_vm15, %v2604_v11, %v2606_v3 }
 0x35b   : > { %v2579_v14 = vadd.f32 %v2575_v27, %v2556_v21  ;;  %v2594_v38 = vmul.f32 %v2593_v61, %v2591_v4  ;;  %v2597_v60 = vmul.f32 %v2593_v61, %v2592_v20  ;;  %v2577_v36 = vadd.f32 %v2573_v32, %v2554_v24 }
 0x35c   : > { %v2610_v31 = vpop.permute.xlu1 %2609  ;;  %v2578_v44 = vadd.f32 %v2574_v17, %v2555_v9  ;;  %v2595_v45 = vmul.f32 %v2593_v61, %v2590_v43  ;;  %v2596_v37 = vmul.f32 %v2593_v61, %v2589_v42  ;;  %v2617_v12 = vmul.f32 %v2616_v39, %v2614_v28 }
 0x35d   : > { %v2608_v41 = vpop.permute.xlu0 %2607  ;;  %v2615_v40 = vsel %vm2611_vm15, %v2610_v31, %v2604_v11  ;;  %v2661_v63 = vstv %s8627_s19  ;;  %v2683_v57 = vstv %s8641_s20  ;;  %vm2701_vm5 = vcmp.lt.s32.totalorder %v5933_v58, 59  ;;  %s10999_s19 = sld [smem:[#allocation194_spill]] }
 0x35e   : > { %v2612_v62 = vsel %vm2611_vm15, %v2608_v41, %v2610_v31  ;;  %v2613_v15 = vsel %vm2611_vm15, %v2606_v3, %v2608_v41  ;;  %v2620_v0 = vmul.f32 %v2616_v39, %v2615_v40  ;;  %v2598_v23 = vadd.f32 %v2594_v38, %v2576_v55  ;;  %s11003_s20 = sld [smem:[#allocation7_spill]] }
 0x35f   : > { %v2618_v59 = vmul.f32 %v2616_v39, %v2613_v15  ;;  %v2619_v8 = vmul.f32 %v2616_v39, %v2612_v62  ;;  %v2601_v52 = vadd.f32 %v2597_v60, %v2579_v14  ;;  %v2706_v54 = vstv %s8644_s25 }
 0x360   : > { %v8612_v10 = vpop.permute.xlu1 %2628  ;;  %v8676_v29 = vstv %s8650_s0  ;;  %v2599_v48 = vadd.f32 %v2595_v45, %v2577_v36  ;;  %v2600_v21 = vadd.f32 %v2596_v37, %v2578_v44  ;;  %v2621_v46 = vadd.f32 %v2617_v12, %v2598_v23  ;;  %s11008_s0 = sld [smem:[#allocation200_spill]] (%p5182_p4) }
 0x361   : > { %v2627_v34 = vpop.permute.xlu0 %2626  ;;  %v2624_v50 = vadd.f32 %v2620_v0, %v2601_v52  ;;  %vm2973_vm6 = vcmask 293888   ;;  %vm3815_vm7 = vcmp.lt.s32.totalorder %v5933_v58, 36 }
 0x362   : > { %v2636_v53 = vsel %vm2611_vm15, %v2627_v34, %v8612_v10  ;;  %v2623_v56 = vadd.f32 %v2619_v8, %v2600_v21 }
 0x363   : > { %v2639_v30 = vmul.f32 %v2638_v2, %v2636_v53 }
 0x364   : > { %v8614_v16 = vpop.permute.xlu1 %2632 }
 0x365   : > { %v8616_v49 = vpop.permute.xlu0 %2630  ;;  %v2637_v25 = vsel %vm2611_vm15, %v8614_v16, %v2627_v34  ;;  %v2622_v34 = vadd.f32 %v2618_v59, %v2599_v48  ;;  %v2643_v26 = vadd.f32 %v2639_v30, %v2621_v46  ;;  %v2738_v59 = vstv %s8708_s21  ;;  %s11004_s21 = sld [smem:[#allocation197_spill]] }
 0x366   : > { %v2642_v3 = vmul.f32 %v2638_v2, %v2637_v25  ;;  %v2634_v11 = vsel %vm2611_vm15, %v8616_v49, %v8614_v16  ;;  %v2635_v31 = vsel %vm2611_vm15, %v8612_v10, %v8616_v49 }
 0x367   : > { %v2640_v49 = vmul.f32 %v2638_v2, %v2635_v31  ;;  %v2641_v61 = vmul.f32 %v2638_v2, %v2634_v11 }
 0x368   : > { %v8618_v18 = vpop.permute.xlu1 %2650  ;;  %v2646_v4 = vadd.f32 %v2642_v3, %v2624_v50 }
 0x369   : > { %v8621_v35 = vpop.permute.xlu0 %2648  ;;  %v2645_v14 = vadd.f32 %v2641_v61, %v2623_v56 }
 0x36a   : > { %v2659_v9 = vsel %vm2656_vm4, %v8621_v35, %v8618_v18 }
 0x36b   : > { %v2662_v22 = vmul.f32 %v2661_v63, %v2659_v9 }
 0x36c   : > { %v8629_v13 = vpop.permute.xlu1 %2654 }
 0x36d   : > { %v8639_v33 = vpop.permute.xlu0 %2652  ;;  %v2660_v19 = vsel %vm2656_vm4, %v8629_v13, %v8621_v35  ;;  %v2666_v55 = vadd.f32 %v2662_v22, %v2643_v26 }
 0x36e   : > { %v2657_v16 = vsel %vm2656_vm4, %v8639_v33, %v8629_v13  ;;  %v2658_v10 = vsel %vm2656_vm4, %v8618_v18, %v8639_v33  ;;  %v2665_v20 = vmul.f32 %v2661_v63, %v2660_v19 }
 0x36f   : > { %v2663_v17 = vmul.f32 %v2661_v63, %v2658_v10  ;;  %v2664_v18 = vmul.f32 %v2661_v63, %v2657_v16 }
 0x370   : > { %v2674_v6 = vpop.permute.xlu1 %2673  ;;  %v2669_v40 = vadd.f32 %v2665_v20, %v2646_v4 }
 0x371   : > { %v2672_v47 = vpop.permute.xlu0 %2671  ;;  %v2668_v37 = vadd.f32 %v2664_v18, %v2645_v14 }
 0x372   : > { %v2681_v5 = vsel %vm2656_vm4, %v2672_v47, %v2674_v6 }
 0x373   : > { %v2684_v27 = vmul.f32 %v2683_v57, %v2681_v5 }
 0x374   : > { %v2678_v51 = vpop.permute.xlu1 %2677 }
 0x375   : > { %v2676_v1 = vpop.permute.xlu0 %2675  ;;  %v2682_v35 = vsel %vm2656_vm4, %v2678_v51, %v2672_v47  ;;  %v2644_v47 = vadd.f32 %v2640_v49, %v2622_v34  ;;  %v2688_v36 = vadd.f32 %v2684_v27, %v2666_v55  ;;  %v10995_v27 = vlaneseq }
 0x376   : > { %v2680_v13 = vsel %vm2656_vm4, %v2674_v6, %v2676_v1  ;;  %v2679_v33 = vsel %vm2656_vm4, %v2676_v1, %v2678_v51  ;;  %v2687_v42 = vmul.f32 %v2683_v57, %v2682_v35 }
 0x377   : > { %v2685_v38 = vmul.f32 %v2683_v57, %v2680_v13  ;;  %v2686_v44 = vmul.f32 %v2683_v57, %v2679_v33  ;;  %v2667_v45 = vadd.f32 %v2663_v17, %v2644_v47  ;;  %v2768_v13 = vshrl.u32 %v10995_v27, 7 }
 0x378   : > { %v2696_v24 = vpop.permute.xlu1 %2695  ;;  %v2691_v51 = vadd.f32 %v2687_v42, %v2669_v40 }
 0x379   : > { %v2694_v41 = vpop.permute.xlu0 %2693  ;;  %v2689_v23 = vadd.f32 %v2685_v38, %v2667_v45  ;;  %v2690_v25 = vadd.f32 %v2686_v44, %v2668_v37  ;;  %v4966_v38 = vld [vmem:[%s5208_s22] sm:$0xff]  ;;  %v5057_v44 = vmov 0.0   ;;  %v2962_v37 = vld [vmem:[%s10139_s4 + $0x8] sm:$0xff] }
 0x37a   : > { %v2704_v39 = vsel %vm2701_vm5, %v2694_v41, %v2696_v24  ;;  %3056 = vmatprep.mubr.f32.mxu1 %v5057_v44  ;;  %v2961_v45 = vld [vmem:[%s10139_s4] sm:$0xff] }
 0x37b   : > { %v2707_v43 = vmul.f32 %v2706_v54, %v2704_v39 }
 0x37c   : > { %v2700_v7 = vpop.permute.xlu1 %2699 }
 0x37d   : > { %v2698_v32 = vpop.permute.xlu0 %2697  ;;  %v2705_v2 = vsel %vm2701_vm5, %v2700_v7, %v2694_v41  ;;  %v2711_v0 = vadd.f32 %v2707_v43, %v2688_v36 }
 0x37e   : > { %v2703_v28 = vsel %vm2701_vm5, %v2696_v24, %v2698_v32  ;;  %v2702_v6 = vsel %vm2701_vm5, %v2698_v32, %v2700_v7  ;;  %v2710_v62 = vmul.f32 %v2706_v54, %v2705_v2  ;;  %v2769_v32 = vsub.s32 0, %v2768_v13 }
 0x37f   : > { %v2708_v12 = vmul.f32 %v2706_v54, %v2703_v28  ;;  %v2709_v63 = vmul.f32 %v2706_v54, %v2702_v6 }
 0x380   : > { %v2719_v60 = vpop.permute.xlu1 %2718  ;;  %v2714_v52 = vadd.f32 %v2710_v62, %v2691_v51 }
 0x381   : > { %v2717_v15 = vpop.permute.xlu0 %2716  ;;  %v2712_v21 = vadd.f32 %v2708_v12, %v2689_v23  ;;  %v2713_v24 = vadd.f32 %v2709_v63, %v2690_v25 }
 0x382   : > { %v2726_v53 = vsel %vm2701_vm5, %v2717_v15, %v2719_v60 }
 0x383   : > { %v2729_v1 = vmul.f32 %v8676_v29, %v2726_v53 }
 0x384   : > { %v2723_v8 = vpop.permute.xlu1 %2722 }
 0x385   : > { %v2733_v30 = vadd.f32 %v2729_v1, %v2711_v0  ;;  %v2727_v57 = vsel %vm2701_vm5, %v2723_v8, %v2717_v15  ;;  %v2721_v48 = vpop.permute.xlu0 %2720  ;;  %v5058_v15 = vmov 0  }
 0x386   : > { %v2732_v46 = vmul.f32 %v8676_v29, %v2727_v57  ;;  %v2724_v9 = vsel %vm2701_vm5, %v2721_v48, %v2723_v8  ;;  %v2725_v54 = vsel %vm2701_vm5, %v2719_v60, %v2721_v48  ;;  %v4967_v60 = vld [vmem:[%s5208_s22 + $0x8] sm:$0xff]  ;;  %s10996_s22 = smov 106   ;;  %4947 = vset.pattern.permute.xlu1 %v5058_v15  ;;  %4946 = vset.pattern.permute.xlu0 %v5058_v15 }
 0x387   : > { %v2739_v50 = vadd.f32 %v2738_v59, %v2733_v30  ;;  %v2730_v3 = vmul.f32 %v8676_v29, %v2725_v54  ;;  %v2731_v11 = vmul.f32 %v8676_v29, %v2724_v9 }
 0x388   : > { %v2736_v31 = vadd.f32 %v2732_v46, %v2714_v52 }
 0x389   : > { %v4781_v41 = vmul.f32 -1.442695, %v2739_v50  ;;  %v2734_v34 = vadd.f32 %v2730_v3, %v2712_v21  ;;  %v2735_v56 = vadd.f32 %v2731_v11, %v2713_v24 }
 0x38a   : > { %v2742_v19 = vadd.f32 %v2738_v59, %v2736_v31 }
 0x38b   : > { %4950 = vpow2.f32 %v4781_v41  ;;  %v2740_v5 = vadd.f32 %v2738_v59, %v2734_v34  ;;  %v2741_v26 = vadd.f32 %v2738_v59, %v2735_v56 }
 0x38c   : > { %v4784_v22 = vmul.f32 -1.442695, %v2742_v19 }
 0x38d   : > { %v4782_v16 = vmul.f32 -1.442695, %v2740_v5  ;;  %v4783_v10 = vmul.f32 -1.442695, %v2741_v26 }
 0x38e   : > { %4952 = vpow2.f32 %v4784_v22 }
 0x38f   : > { %4954 = vpow2.f32 %v4782_v16 }
 0x390   : > { %4956 = vpow2.f32 %v4783_v10 }
 0x398   : > { %v4951_v49 = vpop.eup %4950 }
 0x399   : > { %v2755_v61 = vadd.f32 1.0, %v4951_v49 }
 0x39b   : > { %v4953_v35 = vpop.eup %4952  ;;  %4958 = vrcp.f32 %v2755_v61 }
 0x39c   : > { %v4955_v39 = vpop.eup %4954  ;;  %v2758_v7 = vadd.f32 1.0, %v4953_v35 }
 0x39d   : > { %v4957_v29 = vpop.eup %4956  ;;  %v2756_v4 = vadd.f32 1.0, %v4955_v39 }
 0x39e   : > { %4960 = vrcp.f32 %v2758_v7  ;;  %v2757_v20 = vadd.f32 1.0, %v4957_v29 }
 0x39f   : > { %4962 = vrcp.f32 %v2756_v4 }
 0x3a0   : > { %4964 = vrcp.f32 %v2757_v20 }
 0x3a8   : > { %v4959_v17 = vpop.eup %4958 }
 0x3a9   : > { %v2770_v42 = vrot.slane %v4959_v17, %v2769_v32 }
 0x3ab   : > { %v4961_v18 = vpop.eup %4960 }
 0x3ac   : > { %v4963_v33 = vpop.eup %4962  ;;  %v2782_v2 = vrot.slane %v4961_v18, %v2769_v32 }
 0x3ad   : > { %v4965_v55 = vpop.eup %4964  ;;  %v2774_v43 = vrot.slane %v4963_v33, %v2769_v32 }
 0x3ae   : > { %v2778_v28 = vrot.slane %v4965_v55, %v2769_v32 }
 0x3af   : > { %v2787_v47 = vcombine.low %v2770_v42, %v2774_v43 }
 0x3b0   : > { %v2788_v14 = vcombine.low %v2778_v28, %v2782_v2 }
 0x3b1   : > { %v8735_v6 = vmul.f32 %v4966_v38, %v2787_v47 }
 0x3b2   : > { %v8738_v40 = vmul.f32 %v4967_v60, %v2788_v14 }
 0x3b3   : > { %v8742_v36 = vcombine.high %v8735_v6, %v8735_v6 }
 0x3b4   : > { %2875 = vrot.lane.b32.xlu1 %v8738_v40, %s5050_s23  ;;  %v8795_v62 = vcombine.high %v8738_v40, %v8738_v40 }
 0x3b5   : > { %2873 = vrot.lane.b32.xlu0 %v8742_v36, %s5050_s23 }
 0x3b8   : > { %2885 = vrot.lane.b32.xlu1 %v8742_v36, %s5051_s30 }
 0x3b9   : > { %2871 = vrot.lane.b32.xlu0 %v8735_v6, %s5050_s23 }
 0x3bc   : > { %2849 = vrot.lane.b32.xlu1 %v8742_v36, %s5044_s16 }
 0x3bd   : > { %2887 = vrot.lane.b32.xlu0 %v8738_v40, %s5051_s30 }
 0x3c0   : > { %2861 = vrot.lane.b32.xlu1 %v8742_v36, %s5049_s28 }
 0x3c1   : > { %2851 = vrot.lane.b32.xlu0 %v8738_v40, %s5044_s16 }
 0x3c4   : > { %2883 = vrot.lane.b32.xlu1 %v8735_v6, %s5051_s30 }
 0x3c5   : > { %2863 = vrot.lane.b32.xlu0 %v8738_v40, %s5049_s28 }
 0x3c8   : > { %2859 = vrot.lane.b32.xlu1 %v8735_v6, %s5049_s28 }
 0x3c9   : > { %2847 = vrot.lane.b32.xlu0 %v8735_v6, %s5044_s16 }
 0x3cc   : > { %2827 = vrot.lane.b32.xlu1 %v8738_v40, %s10996_s22 }
 0x3cd   : > { %2825 = vrot.lane.b32.xlu0 %v8742_v36, %s10996_s22 }
 0x3d0   : > { %2839 = vrot.lane.b32.xlu1 %v8738_v40, %s5043_s13 }
 0x3d1   : > { %2837 = vrot.lane.b32.xlu0 %v8742_v36, %s5043_s13 }
 0x3d4   : > { %2835 = vrot.lane.b32.xlu1 %v8735_v6, %s5043_s13 }
 0x3d5   : > { %2823 = vrot.lane.b32.xlu0 %v8735_v6, %s10996_s22 }
 0x3d8   : > { %2803 = vrot.lane.b32.xlu1 %v8738_v40, %s10997_s1 }
 0x3d9   : > { %2801 = vrot.lane.b32.xlu0 %v8742_v36, %s10997_s1 }
 0x3dc   : > { %2815 = vrot.lane.b32.xlu1 %v8738_v40, %s10998_s24 }
 0x3dd   : > { %2813 = vrot.lane.b32.xlu0 %v8742_v36, %s10998_s24 }
 0x3e0   : > { %2811 = vrot.lane.b32.xlu1 %v8735_v6, %s10998_s24 }
 0x3e1   : > { %2799 = vrot.lane.b32.xlu0 %v8735_v6, %s10997_s1 }
 0x3e4   : > { %2889 = vrot.lane.b32.xlu1 %v8795_v62, %s5051_s30 }
 0x3e5   : > { %2877 = vrot.lane.b32.xlu0 %v8795_v62, %s5050_s23 }
 0x3e8   : > { %2865 = vrot.lane.b32.xlu1 %v8795_v62, %s5049_s28 }
 0x3e9   : > { %2853 = vrot.lane.b32.xlu0 %v8795_v62, %s5044_s16 }
 0x3ec   : > { %2841 = vrot.lane.b32.xlu1 %v8795_v62, %s5043_s13 }
 0x3ed   : > { %2829 = vrot.lane.b32.xlu0 %v8795_v62, %s10996_s22 }
 0x3f0   : > { %2817 = vrot.lane.b32.xlu1 %v8795_v62, %s10998_s24 }
 0x3f1   : > { %2805 = vrot.lane.b32.xlu0 %v8795_v62, %s10997_s1 }
 0x3f4   : > { %2965 = vperm.xlu1 %4947, %v2961_v45   ;;  %v2959_v45 = vld [vmem:[%s10138_s3] sm:$0xff] }
 0x3f5   : > { %2970 = vperm.xlu0 %4946, %v2962_v37  }
 0x426   : > { %v8819_v12 = vpop.permute.xlu1 %2875 }
 0x427   : > { %v2874_v53 = vpop.permute.xlu0 %2873 }
 0x428   : > { %v2880_v25 = vsel %vm2371_vm9, %v2874_v53, %v8819_v12 }
 0x429   : > { %v2936_v30 = vrot.slane %v2880_v25, 4 }
 0x42a   : > { %v2886_v51 = vpop.permute.xlu1 %2885 }
 0x42b   : > { %v8821_v0 = vpop.permute.xlu0 %2871 }
 0x42c   : > { %v2881_v57 = vsel %vm2371_vm9, %v8821_v0, %v2874_v53 }
 0x42d   : > { %v2935_v54 = vrot.slane %v2881_v57, 4 }
 0x42e   : > { %v2850_v63 = vpop.permute.xlu1 %2849 }
 0x42f   : > { %v8823_v1 = vpop.permute.xlu0 %2887 }
 0x430   : > { %v2892_v23 = vsel %vm2416_vm12, %v2886_v51, %v8823_v1 }
 0x431   : > { %4785 = vmatprep.subr.msk.mxu1 %vm568_vm0, %v2892_v23 }
 0x432   : > { %v2862_v59 = vpop.permute.xlu1 %2861 }
 0x433   : > { %v8829_v8 = vpop.permute.xlu0 %2851 }
 0x434   : > { %v2856_v34 = vsel %vm2101_vm3, %v2850_v63, %v8829_v8 }
 0x435   : > { %v2924_v19 = vrot.slane %v2856_v34, 4 }
 0x436   : > { %v2884_v52 = vpop.permute.xlu1 %2883 }
 0x437   : > { %v2893_v48 = vsel %vm2416_vm12, %v2884_v52, %v2886_v51  ;;  %v8839_v21 = vpop.permute.xlu0 %2863 }
 0x438   : > { %4786 = vmatpush1.msk.msra.mxu1 %vm568_vm0, %v2893_v48  ;;  %v2868_v46 = vsel %vm2326_vm8, %v2862_v59, %v8839_v21 }
 0x439   : > { %v2956_v9 = vsel %vm568_vm0, %v2868_v46, %v2936_v30 }
 0x43a   : > { %v8846_v24 = vpop.permute.xlu1 %2859  ;;  %3016 = vmatprep.subr.mxu1 %v2956_v9 }
 0x43b   : > { %v2869_v50 = vsel %vm2326_vm8, %v8846_v24, %v2862_v59  ;;  %v8851_v3 = vpop.permute.xlu0 %2847 }
 0x43c   : > { %v2955_v11 = vsel %vm568_vm0, %v2869_v50, %v2935_v54  ;;  %v2857_v5 = vsel %vm2101_vm3, %v8851_v3, %v2850_v63 }
 0x43d   : > { %3017 = vmatpush1.msra.mxu1 %v2955_v11  ;;  %v2923_v10 = vrot.slane %v2857_v5, 4 }
 0x43e   : > { %v8854_v31 = vpop.permute.xlu1 %2827 }
 0x43f   : > { %v2826_v41 = vpop.permute.xlu0 %2825 }
 0x440   : > { %v2832_v4 = vsel %vm2011_vm1, %v2826_v41, %v8854_v31 }
 0x441   : > { %v2912_v13 = vrot.slane %v2832_v4, 4 }
 0x442   : > { %v8859_v56 = vpop.permute.xlu1 %2839 }
 0x443   : > { %v2838_v26 = vpop.permute.xlu0 %2837 }
 0x444   : > { %v2844_v22 = vsel %vm2056_vm2, %v2838_v26, %v8859_v56 }
 0x445   : > { %v2952_v16 = vsel %vm568_vm0, %v2844_v22, %v2924_v19 }
 0x446   : > { %v2836_v49 = vpop.permute.xlu1 %2835  ;;  %3018 = vmatprep.subr.mxu1 %v2952_v16 }
 0x447   : > { %v2845_v61 = vsel %vm2056_vm2, %v2836_v49, %v2838_v26  ;;  %v2824_v35 = vpop.permute.xlu0 %2823 }
 0x448   : > { %v2951_v39 = vsel %vm568_vm0, %v2845_v61, %v2923_v10  ;;  %v2833_v32 = vsel %vm2011_vm1, %v2824_v35, %v2826_v41 }
 0x449   : > { %3019 = vmatpush1.msra.mxu1 %v2951_v39  ;;  %v2911_v55 = vrot.slane %v2833_v32, 4 }
 0x44a   : > { %v8871_v7 = vpop.permute.xlu1 %2803 }
 0x44b   : > { %v2802_v29 = vpop.permute.xlu0 %2801 }
 0x44c   : > { %v2808_v20 = vsel %vm1741_vm10, %v2802_v29, %v8871_v7 }
 0x44d   : > { %v2900_v33 = vrot.slane %v2808_v20, 4 }
 0x44e   : > { %v8879_v27 = vpop.permute.xlu1 %2815 }
 0x44f   : > { %v2814_v17 = vpop.permute.xlu0 %2813  ;;  %v2944_v60 = vsel %vm568_vm0, %v8742_v36, %v2900_v33 }
 0x450   : > { %v2820_v18 = vsel %vm1786_vm11, %v2814_v17, %v8879_v27 }
 0x451   : > { %v2948_v2 = vsel %vm568_vm0, %v2820_v18, %v2912_v13 }
 0x452   : > { %v2812_v42 = vpop.permute.xlu1 %2811  ;;  %3020 = vmatprep.subr.mxu1 %v2948_v2 }
 0x453   : > { %v2821_v43 = vsel %vm1786_vm11, %v2812_v42, %v2814_v17  ;;  %v2800_v28 = vpop.permute.xlu0 %2799 }
 0x454   : > { %v2809_v47 = vsel %vm1741_vm10, %v2800_v28, %v2802_v29  ;;  %v2947_v14 = vsel %vm568_vm0, %v2821_v43, %v2911_v55 }
 0x455   : > { %v2899_v38 = vrot.slane %v2809_v47, 4  ;;  %3021 = vmatpush1.msra.mxu1 %v2947_v14 }
 0x456   : > { %v2890_v15 = vpop.permute.xlu1 %2889  ;;  %3022 = vmatprep.subr.mxu1 %v2944_v60 }
 0x457   : > { %v2878_v37 = vpop.permute.xlu0 %2877  ;;  %v2943_v53 = vsel %vm568_vm0, %v8735_v6, %v2899_v38  ;;  %v2894_v36 = vsel %vm2416_vm12, %v2890_v15, %v2884_v52  ;;  %v2891_v23 = vsel %vm2416_vm12, %v8823_v1, %v2890_v15 }
 0x458   : > { %v2879_v51 = vsel %vm2371_vm9, %v8819_v12, %v2878_v37  ;;  %v2882_v63 = vsel %vm2371_vm9, %v2878_v37, %v8821_v0  ;;  %3023 = vmatpush1.msra.mxu1 %v2943_v53  ;;  %v2960_v12 = vld [vmem:[%s10138_s3 + $0x8] sm:$0xff] }
 0x459   : > { %v2937_v59 = vrot.slane %v2879_v51, 4  ;;  %v2938_v25 = vrot.slane %v2882_v63, 4  ;;  %4789 = vmatprep.subr.msk.mxu1 %vm568_vm0, %v2894_v36  ;;  %4787 = vmatmul.mubr.msk.f32.vlgmr.msra.gmra.mxu1 %vm2973_vm6, %v2959_v45  ;;  %v3347_v36 = vld [vmem:[%s10140_s5 + $0x8] sm:$0xff] }
 0x45a   : > { %v2866_v6 = vpop.permute.xlu1 %2865  ;;  %4790 = vmatpush1.msk.msra.mxu1 %vm568_vm0, %v2891_v23  ;;  %3062 = vmatprep.mubr.f32.mxu1 %v5057_v44 }
 0x45b   : > { %v2867_v0 = vsel %vm2326_vm8, %v8839_v21, %v2866_v6  ;;  %v2870_v1 = vsel %vm2326_vm8, %v2866_v6, %v8846_v24  ;;  %v2854_v52 = vpop.permute.xlu0 %2853 }
 0x45c   : > { %v2855_v30 = vsel %vm2101_vm3, %v8829_v8, %v2854_v52  ;;  %v2858_v57 = vsel %vm2101_vm3, %v2854_v52, %v8851_v3  ;;  %v2958_v48 = vsel %vm568_vm0, %v2870_v1, %v2938_v25  ;;  %v2957_v46 = vsel %vm568_vm0, %v2867_v0, %v2937_v59 }
 0x45d   : > { %v2925_v9 = vrot.slane %v2855_v30, 4  ;;  %v2926_v54 = vrot.slane %v2858_v57, 4  ;;  %3093 = vmatprep.subr.mxu1 %v2958_v48  ;;  %4788 = vmatmul.mubr.msk.f32.gmra.mxu1 %vm2973_vm6, %v2960_v12  ;;  %v3351_v48 = vld [vmem:[%s10141_s6 + $0x8] sm:$0xff] }
 0x45e   : > { %v2842_v21 = vpop.permute.xlu1 %2841  ;;  %3094 = vmatpush1.msra.mxu1 %v2957_v46  ;;  %3133 = vmatprep.mubr.f32.mxu1 %v5057_v44 }
 0x45f   : > { %v2843_v8 = vsel %vm2056_vm2, %v8859_v56, %v2842_v21  ;;  %v2846_v24 = vsel %vm2056_vm2, %v2842_v21, %v2836_v49  ;;  %v2830_v50 = vpop.permute.xlu0 %2829 }
 0x460   : > { %v2831_v3 = vsel %vm2011_vm1, %v8854_v31, %v2830_v50  ;;  %v2834_v11 = vsel %vm2011_vm1, %v2830_v50, %v2824_v35  ;;  %v2954_v41 = vsel %vm568_vm0, %v2846_v24, %v2926_v54  ;;  %v2953_v34 = vsel %vm568_vm0, %v2843_v8, %v2925_v9  ;;  %v3350_v54 = vld [vmem:[%s10141_s6] sm:$0xff] }
 0x461   : > { %v2913_v19 = vrot.slane %v2831_v3, 4  ;;  %v2914_v5 = vrot.slane %v2834_v11, 4  ;;  %3095 = vmatprep.subr.mxu1 %v2954_v41 }
 0x462   : > { %v2818_v26 = vpop.permute.xlu1 %2817  ;;  %3096 = vmatpush1.msra.mxu1 %v2953_v34 }
 0x463   : > { %v2819_v56 = vsel %vm1786_vm11, %v8879_v27, %v2818_v26  ;;  %v2822_v22 = vsel %vm1786_vm11, %v2818_v26, %v2812_v42  ;;  %v2806_v31 = vpop.permute.xlu0 %2805 }
 0x464   : > { %v2807_v16 = vsel %vm1741_vm10, %v8871_v7, %v2806_v31  ;;  %v2810_v10 = vsel %vm1741_vm10, %v2806_v31, %v2800_v28  ;;  %v2950_v49 = vsel %vm568_vm0, %v2822_v22, %v2914_v5  ;;  %v2949_v61 = vsel %vm568_vm0, %v2819_v56, %v2913_v19 }
 0x465   : > { %v2901_v35 = vrot.slane %v2807_v16, 4  ;;  %v2902_v39 = vrot.slane %v2810_v10, 4  ;;  %3097 = vmatprep.subr.mxu1 %v2950_v49 }
 0x466   : > { %3098 = vmatpush1.msra.mxu1 %v2949_v61 }
 0x467   : > { %v2946_v29 = vsel %vm568_vm0, %v8795_v62, %v2902_v39  ;;  %v2945_v4 = vsel %vm568_vm0, %v8738_v40, %v2901_v35  ;;  %vm3362_vm0 = vcmask 130048  }
 0x468   : > { %3099 = vmatprep.subr.mxu1 %v2946_v29  ;;  %4793 = vmatprep.mubr.msk.f32.mxu0 %vm3362_vm0, %v3347_v36 }
 0x469   : > { %3100 = vmatpush1.msra.mxu1 %v2945_v4 }
 0x46a   : > { %4791 = vmatmul.mubr.msk.f32.vlgmr.msra.gmra.mxu1 %vm2973_vm6, %v2959_v45 }
 0x46b   : > { %3139 = vmatprep.mubr.f32.mxu1 %v5057_v44 }
 0x46e   : > { %4792 = vmatmul.mubr.msk.f32.gmra.mxu1 %vm2973_vm6, %v2960_v12 }
 0x46f   : > { %v2966_v2 = vpop.permute.xlu1 %2965  ;;  %4795 = vmatprep.mubr.msk.f32.mxu1 %vm3362_vm0, %v3347_v36 }
 0x470   : > { %v2971_v27 = vpop.permute.xlu0 %2970 }
 0x519   : > { %v3058_v7 = vpop.f32.mrf.mxu1 }
 0x51a   : > { %v3059_v28 = vadd.f32 %v3058_v7, %v2966_v2 }
 0x51b   : > { %v3060_v20 = vpop.f32.mrf.mxu1 }
 0x51c   : > { %v3061_v38 = vadd.f32 %v3060_v20, %v2966_v2  ;;  %v8978_v15 = vmax.f32 %v3059_v28, 0.0 }
 0x51d   : > { %v3064_v13 = vpop.f32.mrf.mxu1 }
 0x51e   : > { %v3065_v32 = vadd.f32 %v3064_v13, %v2971_v27  ;;  %v8982_v37 = vmax.f32 %v3061_v38, 0.0 }
 0x51f   : > { %v3066_v17 = vpop.f32.mrf.mxu1 }
 0x520   : > { %v3067_v18 = vadd.f32 %v3066_v17, %v2971_v27  ;;  %v8964_v33 = vmax.f32 %v3065_v32, 0.0 }
 0x522   : > { %v8966_v62 = vmax.f32 %v3067_v18, 0.0  ;;  %3300 = vrot.lane.b32.xlu1 %v8964_v33, %s5050_s23 }
 0x524   : > { %3304 = vrot.lane.b32.xlu0 %v8966_v62, %s5050_s23 }
 0x52a   : > { %v3135_v40 = vpop.f32.mrf.mxu1 }
 0x52b   : > { %v3136_v45 = vadd.f32 %v3135_v40, %v2966_v2 }
 0x52c   : > { %v3137_v44 = vpop.f32.mrf.mxu1 }
 0x52d   : > { %v3138_v53 = vadd.f32 %v3137_v44, %v2966_v2  ;;  %v8986_v51 = vmax.f32 %v3136_v45, 0.0 }
 0x52e   : > { %v3141_v55 = vpop.f32.mrf.mxu1 }
 0x52f   : > { %v3142_v42 = vadd.f32 %v3141_v55, %v2971_v27  ;;  %v8990_v63 = vmax.f32 %v3138_v53, 0.0 }
 0x530   : > { %v3143_v43 = vpop.f32.mrf.mxu1 }
 0x531   : > { %v8972_v47 = vmax.f32 %v3142_v42, 0.0  ;;  %v3144_v14 = vadd.f32 %v3143_v43, %v2971_v27 }
 0x533   : > { %v8974_v60 = vmax.f32 %v3144_v14, 0.0  ;;  %3308 = vrot.lane.b32.xlu1 %v8972_v47, %s5050_s23 }
 0x535   : > { %3312 = vrot.lane.b32.xlu0 %v8974_v60, %s5050_s23 }
 0x537   : > { %3298 = vrot.lane.b32.xlu1 %v8978_v15, %s5050_s23 }
 0x539   : > { %3302 = vrot.lane.b32.xlu0 %v8982_v37, %s5050_s23 }
 0x53b   : > { %3306 = vrot.lane.b32.xlu1 %v8986_v51, %s5050_s23 }
 0x53d   : > { %3310 = vrot.lane.b32.xlu0 %v8990_v63, %s5050_s23 }
 0x53f   : > { %3276 = vrot.lane.b32.xlu1 %v8964_v33, %s5049_s28 }
 0x541   : > { %3280 = vrot.lane.b32.xlu0 %v8966_v62, %s5049_s28 }
 0x543   : > { %3284 = vrot.lane.b32.xlu1 %v8972_v47, %s5049_s28 }
 0x545   : > { %3288 = vrot.lane.b32.xlu0 %v8974_v60, %s5049_s28 }
 0x547   : > { %3274 = vrot.lane.b32.xlu1 %v8978_v15, %s5049_s28 }
 0x549   : > { %3278 = vrot.lane.b32.xlu0 %v8982_v37, %s5049_s28 }
 0x54b   : > { %3282 = vrot.lane.b32.xlu1 %v8986_v51, %s5049_s28 }
 0x54d   : > { %3286 = vrot.lane.b32.xlu0 %v8990_v63, %s5049_s28 }
 0x54f   : > { %3252 = vrot.lane.b32.xlu1 %v8964_v33, %s5044_s16 }
 0x551   : > { %3256 = vrot.lane.b32.xlu0 %v8966_v62, %s5044_s16 }
 0x553   : > { %3260 = vrot.lane.b32.xlu1 %v8972_v47, %s5044_s16 }
 0x555   : > { %3264 = vrot.lane.b32.xlu0 %v8974_v60, %s5044_s16 }
 0x557   : > { %3250 = vrot.lane.b32.xlu1 %v8978_v15, %s5044_s16 }
 0x559   : > { %3254 = vrot.lane.b32.xlu0 %v8982_v37, %s5044_s16 }
 0x55b   : > { %3258 = vrot.lane.b32.xlu1 %v8986_v51, %s5044_s16 }
 0x55d   : > { %3262 = vrot.lane.b32.xlu0 %v8990_v63, %s5044_s16 }
 0x55f   : > { %3228 = vrot.lane.b32.xlu1 %v8964_v33, %s5043_s13 }
 0x561   : > { %3232 = vrot.lane.b32.xlu0 %v8966_v62, %s5043_s13 }
 0x563   : > { %3236 = vrot.lane.b32.xlu1 %v8972_v47, %s5043_s13 }
 0x565   : > { %3240 = vrot.lane.b32.xlu0 %v8974_v60, %s5043_s13 }
 0x567   : > { %3226 = vrot.lane.b32.xlu1 %v8978_v15, %s5043_s13 }
 0x569   : > { %3230 = vrot.lane.b32.xlu0 %v8982_v37, %s5043_s13 }
 0x56b   : > { %3234 = vrot.lane.b32.xlu1 %v8986_v51, %s5043_s13 }
 0x56d   : > { %3238 = vrot.lane.b32.xlu0 %v8990_v63, %s5043_s13 }
 0x56f   : > { %3204 = vrot.lane.b32.xlu1 %v8964_v33, %s10996_s22 }
 0x571   : > { %3208 = vrot.lane.b32.xlu0 %v8966_v62, %s10996_s22 }
 0x573   : > { %3212 = vrot.lane.b32.xlu1 %v8972_v47, %s10996_s22 }
 0x575   : > { %3216 = vrot.lane.b32.xlu0 %v8974_v60, %s10996_s22 }
 0x577   : > { %3202 = vrot.lane.b32.xlu1 %v8978_v15, %s10996_s22 }
 0x579   : > { %3206 = vrot.lane.b32.xlu0 %v8982_v37, %s10996_s22 }
 0x57b   : > { %3210 = vrot.lane.b32.xlu1 %v8986_v51, %s10996_s22 }
 0x57d   : > { %3214 = vrot.lane.b32.xlu0 %v8990_v63, %s10996_s22 }
 0x57f   : > { %3180 = vrot.lane.b32.xlu1 %v8964_v33, %s10998_s24 }
 0x581   : > { %3184 = vrot.lane.b32.xlu0 %v8966_v62, %s10998_s24 }
 0x583   : > { %3188 = vrot.lane.b32.xlu1 %v8972_v47, %s10998_s24 }
 0x585   : > { %3192 = vrot.lane.b32.xlu0 %v8974_v60, %s10998_s24 }
 0x587   : > { %3178 = vrot.lane.b32.xlu1 %v8978_v15, %s10998_s24 }
 0x589   : > { %3182 = vrot.lane.b32.xlu0 %v8982_v37, %s10998_s24 }
 0x58b   : > { %3186 = vrot.lane.b32.xlu1 %v8986_v51, %s10998_s24 }
 0x58d   : > { %3190 = vrot.lane.b32.xlu0 %v8990_v63, %s10998_s24 }
 0x58f   : > { %3156 = vrot.lane.b32.xlu1 %v8964_v33, %s10997_s1 }
 0x591   : > { %3160 = vrot.lane.b32.xlu0 %v8966_v62, %s10997_s1 }
 0x593   : > { %3164 = vrot.lane.b32.xlu1 %v8972_v47, %s10997_s1 }
 0x594   : > { %v3301_v23 = vpop.permute.xlu1 %3300 }
 0x595   : > { %3168 = vrot.lane.b32.xlu0 %v8974_v60, %s10997_s1 }
 0x596   : > { %v3305_v59 = vpop.permute.xlu0 %3304 }
 0x597   : > { %3154 = vrot.lane.b32.xlu1 %v8978_v15, %s10997_s1  ;;  %v3319_v0 = vsel %vm2371_vm9, %v3301_v23, %v3305_v59 }
 0x599   : > { %3158 = vrot.lane.b32.xlu0 %v8982_v37, %s10997_s1 }
 0x59b   : > { %3162 = vrot.lane.b32.xlu1 %v8986_v51, %s10997_s1 }
 0x59d   : > { %3166 = vrot.lane.b32.xlu0 %v8990_v63, %s10997_s1 }
 0x59f   : > { %3324 = vrot.lane.b32.xlu1 %v8964_v33, %s5051_s30 }
 0x5a1   : > { %3328 = vrot.lane.b32.xlu0 %v8966_v62, %s5051_s30 }
 0x5a3   : > { %3332 = vrot.lane.b32.xlu1 %v8972_v47, %s5051_s30 }
 0x5a5   : > { %3336 = vrot.lane.b32.xlu0 %v8974_v60, %s5051_s30  ;;  %v3309_v25 = vpop.permute.xlu1 %3308 }
 0x5a6   : > { %v3317_v6 = vsel %vm2371_vm9, %v3305_v59, %v3309_v25 }
 0x5a7   : > { %v3313_v12 = vpop.permute.xlu0 %3312  ;;  %3322 = vrot.lane.b32.xlu1 %v8978_v15, %s5051_s30  ;;  %3369 = vmatprep.subr.mxu0 %v3317_v6 }
 0x5a8   : > { %3370 = vmatpush1.msra.mxu0 %v3319_v0  ;;  %v3321_v1 = vsel %vm2371_vm9, %v3313_v12, %v3301_v23  ;;  %v3315_v52 = vsel %vm2371_vm9, %v3309_v25, %v3313_v12 }
 0x5a9   : > { %3326 = vrot.lane.b32.xlu0 %v8982_v37, %s5051_s30  ;;  %3446 = vmatprep.subr.mxu1 %v3321_v1  ;;  %v3299_v30 = vpop.permute.xlu1 %3298 }
 0x5aa   : > { %3447 = vmatpush1.msra.mxu1 %v3315_v52 }
 0x5ab   : > { %v3303_v57 = vpop.permute.xlu0 %3302  ;;  %3330 = vrot.lane.b32.xlu1 %v8986_v51, %s5051_s30 }
 0x5ac   : > { %v3318_v8 = vsel %vm2371_vm9, %v3299_v30, %v3303_v57 }
 0x5ad   : > { %3334 = vrot.lane.b32.xlu0 %v8990_v63, %s5051_s30  ;;  %v3307_v46 = vpop.permute.xlu1 %3306 }
 0x5ae   : > { %v3316_v9 = vsel %vm2371_vm9, %v3303_v57, %v3307_v46 }
 0x5af   : > { %v3311_v21 = vpop.permute.xlu0 %3310  ;;  %3359 = vperm.xlu1 %4947, %v3351_v48   ;;  %3371 = vmatprep.subr.mxu0 %v3316_v9 }
 0x5b0   : > { %3372 = vmatpush1.msra.mxu0 %v3318_v8  ;;  %v3320_v24 = vsel %vm2371_vm9, %v3311_v21, %v3299_v30  ;;  %v3314_v50 = vsel %vm2371_vm9, %v3307_v46, %v3311_v21 }
 0x5b1   : > { %3354 = vperm.xlu0 %4946, %v3350_v54   ;;  %3448 = vmatprep.subr.mxu1 %v3320_v24  ;;  %v3277_v3 = vpop.permute.xlu1 %3276 }
 0x5b2   : > { %3449 = vmatpush1.msra.mxu1 %v3314_v50 }
 0x5b3   : > { %v3281_v11 = vpop.permute.xlu0 %3280 }
 0x5b4   : > { %v3295_v5 = vsel %vm2326_vm8, %v3277_v3, %v3281_v11 }
 0x5b5   : > { %v3285_v41 = vpop.permute.xlu1 %3284 }
 0x5b6   : > { %v3293_v34 = vsel %vm2326_vm8, %v3281_v11, %v3285_v41 }
 0x5b7   : > { %v3289_v19 = vpop.permute.xlu0 %3288  ;;  %3373 = vmatprep.subr.mxu0 %v3293_v34 }
 0x5b8   : > { %3374 = vmatpush1.msra.mxu0 %v3295_v5  ;;  %v3297_v26 = vsel %vm2326_vm8, %v3289_v19, %v3277_v3  ;;  %v3291_v56 = vsel %vm2326_vm8, %v3285_v41, %v3289_v19 }
 0x5b9   : > { %3450 = vmatprep.subr.mxu1 %v3297_v26  ;;  %v3275_v22 = vpop.permute.xlu1 %3274 }
 0x5ba   : > { %3451 = vmatpush1.msra.mxu1 %v3291_v56 }
 0x5bb   : > { %v3279_v31 = vpop.permute.xlu0 %3278 }
 0x5bc   : > { %v3294_v61 = vsel %vm2326_vm8, %v3275_v22, %v3279_v31 }
 0x5bd   : > { %v3283_v16 = vpop.permute.xlu1 %3282 }
 0x5be   : > { %v3292_v10 = vsel %vm2326_vm8, %v3279_v31, %v3283_v16 }
 0x5bf   : > { %v3287_v49 = vpop.permute.xlu0 %3286  ;;  %3375 = vmatprep.subr.mxu0 %v3292_v10 }
 0x5c0   : > { %3376 = vmatpush1.msra.mxu0 %v3294_v61  ;;  %v3296_v35 = vsel %vm2326_vm8, %v3287_v49, %v3275_v22  ;;  %v3290_v39 = vsel %vm2326_vm8, %v3283_v16, %v3287_v49 }
 0x5c1   : > { %3452 = vmatprep.subr.mxu1 %v3296_v35  ;;  %v3253_v29 = vpop.permute.xlu1 %3252 }
 0x5c2   : > { %3453 = vmatpush1.msra.mxu1 %v3290_v39 }
 0x5c3   : > { %v3257_v4 = vpop.permute.xlu0 %3256 }
 0x5c4   : > { %v3271_v13 = vsel %vm2101_vm3, %v3253_v29, %v3257_v4 }
 0x5c5   : > { %v3261_v7 = vpop.permute.xlu1 %3260 }
 0x5c6   : > { %v3269_v20 = vsel %vm2101_vm3, %v3257_v4, %v3261_v7 }
 0x5c7   : > { %v3265_v27 = vpop.permute.xlu0 %3264  ;;  %3377 = vmatprep.subr.mxu0 %v3269_v20 }
 0x5c8   : > { %3378 = vmatpush1.msra.mxu0 %v3271_v13  ;;  %v3273_v32 = vsel %vm2101_vm3, %v3265_v27, %v3253_v29  ;;  %v3267_v17 = vsel %vm2101_vm3, %v3261_v7, %v3265_v27 }
 0x5c9   : > { %3454 = vmatprep.subr.mxu1 %v3273_v32  ;;  %v3251_v18 = vpop.permute.xlu1 %3250 }
 0x5ca   : > { %3455 = vmatpush1.msra.mxu1 %v3267_v17 }
 0x5cb   : > { %v3255_v40 = vpop.permute.xlu0 %3254 }
 0x5cc   : > { %v3270_v42 = vsel %vm2101_vm3, %v3251_v18, %v3255_v40 }
 0x5cd   : > { %v3259_v44 = vpop.permute.xlu1 %3258 }
 0x5ce   : > { %v3268_v2 = vsel %vm2101_vm3, %v3255_v40, %v3259_v44 }
 0x5cf   : > { %v3263_v55 = vpop.permute.xlu0 %3262  ;;  %3379 = vmatprep.subr.mxu0 %v3268_v2 }
 0x5d0   : > { %3380 = vmatpush1.msra.mxu0 %v3270_v42  ;;  %v3272_v43 = vsel %vm2101_vm3, %v3263_v55, %v3251_v18  ;;  %v3266_v28 = vsel %vm2101_vm3, %v3259_v44, %v3263_v55  ;;  %vm3667_vm3 = vcmp.lt.s32.totalorder %v5933_v58, 124 }
 0x5d1   : > { %3456 = vmatprep.subr.mxu1 %v3272_v43  ;;  %v3229_v14 = vpop.permute.xlu1 %3228 }
 0x5d2   : > { %3457 = vmatpush1.msra.mxu1 %v3266_v28 }
 0x5d3   : > { %v3233_v38 = vpop.permute.xlu0 %3232 }
 0x5d4   : > { %v3247_v23 = vsel %vm2056_vm2, %v3229_v14, %v3233_v38 }
 0x5d5   : > { %v3237_v45 = vpop.permute.xlu1 %3236 }
 0x5d6   : > { %v3245_v53 = vsel %vm2056_vm2, %v3233_v38, %v3237_v45 }
 0x5d7   : > { %v3241_v36 = vpop.permute.xlu0 %3240  ;;  %3381 = vmatprep.subr.mxu0 %v3245_v53 }
 0x5d8   : > { %3382 = vmatpush1.msra.mxu0 %v3247_v23  ;;  %v3249_v59 = vsel %vm2056_vm2, %v3241_v36, %v3229_v14  ;;  %v3243_v25 = vsel %vm2056_vm2, %v3237_v45, %v3241_v36 }
 0x5d9   : > { %3458 = vmatprep.subr.mxu1 %v3249_v59  ;;  %v3227_v6 = vpop.permute.xlu1 %3226 }
 0x5da   : > { %3459 = vmatpush1.msra.mxu1 %v3243_v25 }
 0x5db   : > { %v3231_v12 = vpop.permute.xlu0 %3230 }
 0x5dc   : > { %v3246_v30 = vsel %vm2056_vm2, %v3227_v6, %v3231_v12 }
 0x5dd   : > { %v3235_v0 = vpop.permute.xlu1 %3234 }
 0x5de   : > { %v3244_v1 = vsel %vm2056_vm2, %v3231_v12, %v3235_v0 }
 0x5df   : > { %v3239_v52 = vpop.permute.xlu0 %3238  ;;  %3383 = vmatprep.subr.mxu0 %v3244_v1 }
 0x5e0   : > { %3384 = vmatpush1.msra.mxu0 %v3246_v30  ;;  %v3248_v57 = vsel %vm2056_vm2, %v3239_v52, %v3227_v6  ;;  %v3242_v48 = vsel %vm2056_vm2, %v3235_v0, %v3239_v52  ;;  %v3346_v30 = vld [vmem:[%s10140_s5] sm:$0xff] }
 0x5e1   : > { %3460 = vmatprep.subr.mxu1 %v3248_v57  ;;  %v3205_v46 = vpop.permute.xlu1 %3204 }
 0x5e2   : > { %3461 = vmatpush1.msra.mxu1 %v3242_v48 }
 0x5e3   : > { %v3209_v9 = vpop.permute.xlu0 %3208 }
 0x5e4   : > { %v3223_v24 = vsel %vm2011_vm1, %v3205_v46, %v3209_v9 }
 0x5e5   : > { %v3213_v54 = vpop.permute.xlu1 %3212 }
 0x5e6   : > { %v3221_v21 = vsel %vm2011_vm1, %v3209_v9, %v3213_v54 }
 0x5e7   : > { %v3217_v8 = vpop.permute.xlu0 %3216  ;;  %3385 = vmatprep.subr.mxu0 %v3221_v21  ;;  %v3348_v21 = vld [vmem:[%s10140_s5 + $0x10] sm:$0xff] }
 0x5e8   : > { %3386 = vmatpush1.msra.mxu0 %v3223_v24  ;;  %v3225_v50 = vsel %vm2011_vm1, %v3217_v8, %v3205_v46  ;;  %v3219_v3 = vsel %vm2011_vm1, %v3213_v54, %v3217_v8  ;;  %v3349_v46 = vld [vmem:[%s10140_s5 + $0x18] sm:$0xff] }
 0x5e9   : > { %3462 = vmatprep.subr.mxu1 %v3225_v50  ;;  %v3203_v11 = vpop.permute.xlu1 %3202 }
 0x5ea   : > { %3463 = vmatpush1.msra.mxu1 %v3219_v3 }
 0x5eb   : > { %v3207_v41 = vpop.permute.xlu0 %3206 }
 0x5ec   : > { %v3222_v26 = vsel %vm2011_vm1, %v3203_v11, %v3207_v41 }
 0x5ed   : > { %v3211_v34 = vpop.permute.xlu1 %3210 }
 0x5ee   : > { %v3220_v19 = vsel %vm2011_vm1, %v3207_v41, %v3211_v34 }
 0x5ef   : > { %v3215_v5 = vpop.permute.xlu0 %3214  ;;  %3387 = vmatprep.subr.mxu0 %v3220_v19 }
 0x5f0   : > { %3388 = vmatpush1.msra.mxu0 %v3222_v26  ;;  %v3224_v56 = vsel %vm2011_vm1, %v3215_v5, %v3203_v11  ;;  %v3218_v22 = vsel %vm2011_vm1, %v3211_v34, %v3215_v5 }
 0x5f1   : > { %3464 = vmatprep.subr.mxu1 %v3224_v56  ;;  %v3181_v31 = vpop.permute.xlu1 %3180 }
 0x5f2   : > { %3465 = vmatpush1.msra.mxu1 %v3218_v22 }
 0x5f3   : > { %v3185_v16 = vpop.permute.xlu0 %3184 }
 0x5f4   : > { %v3199_v35 = vsel %vm1786_vm11, %v3181_v31, %v3185_v16 }
 0x5f5   : > { %v3189_v10 = vpop.permute.xlu1 %3188 }
 0x5f6   : > { %v3197_v49 = vsel %vm1786_vm11, %v3185_v16, %v3189_v10 }
 0x5f7   : > { %v3193_v61 = vpop.permute.xlu0 %3192  ;;  %3389 = vmatprep.subr.mxu0 %v3197_v49 }
 0x5f8   : > { %3390 = vmatpush1.msra.mxu0 %v3199_v35  ;;  %v3201_v39 = vsel %vm1786_vm11, %v3193_v61, %v3181_v31  ;;  %v3195_v29 = vsel %vm1786_vm11, %v3189_v10, %v3193_v61 }
 0x5f9   : > { %3466 = vmatprep.subr.mxu1 %v3201_v39  ;;  %v3179_v4 = vpop.permute.xlu1 %3178 }
 0x5fa   : > { %3467 = vmatpush1.msra.mxu1 %v3195_v29 }
 0x5fb   : > { %v3183_v7 = vpop.permute.xlu0 %3182 }
 0x5fc   : > { %v3198_v32 = vsel %vm1786_vm11, %v3179_v4, %v3183_v7 }
 0x5fd   : > { %v3187_v20 = vpop.permute.xlu1 %3186 }
 0x5fe   : > { %v3196_v27 = vsel %vm1786_vm11, %v3183_v7, %v3187_v20 }
 0x5ff   : > { %v3191_v13 = vpop.permute.xlu0 %3190  ;;  %3391 = vmatprep.subr.mxu0 %v3196_v27 }
 0x600   : > { %3392 = vmatpush1.msra.mxu0 %v3198_v32  ;;  %v3200_v17 = vsel %vm1786_vm11, %v3191_v13, %v3179_v4  ;;  %v3194_v18 = vsel %vm1786_vm11, %v3187_v20, %v3191_v13 }
 0x601   : > { %3468 = vmatprep.subr.mxu1 %v3200_v17  ;;  %v3157_v40 = vpop.permute.xlu1 %3156 }
 0x602   : > { %3469 = vmatpush1.msra.mxu1 %v3194_v18 }
 0x603   : > { %v3161_v44 = vpop.permute.xlu0 %3160 }
 0x604   : > { %v3175_v43 = vsel %vm1741_vm10, %v3157_v40, %v3161_v44 }
 0x605   : > { %v3165_v2 = vpop.permute.xlu1 %3164 }
 0x606   : > { %v3173_v55 = vsel %vm1741_vm10, %v3161_v44, %v3165_v2 }
 0x607   : > { %v3169_v42 = vpop.permute.xlu0 %3168  ;;  %3393 = vmatprep.subr.mxu0 %v3173_v55 }
 0x608   : > { %3394 = vmatpush1.msra.mxu0 %v3175_v43  ;;  %v3177_v28 = vsel %vm1741_vm10, %v3169_v42, %v3157_v40  ;;  %v3171_v14 = vsel %vm1741_vm10, %v3165_v2, %v3169_v42 }
 0x609   : > { %3470 = vmatprep.subr.mxu1 %v3177_v28  ;;  %v3155_v38 = vpop.permute.xlu1 %3154 }
 0x60a   : > { %3471 = vmatpush1.msra.mxu1 %v3171_v14 }
 0x60b   : > { %v3159_v45 = vpop.permute.xlu0 %3158 }
 0x60c   : > { %v3174_v59 = vsel %vm1741_vm10, %v3155_v38, %v3159_v45 }
 0x60d   : > { %v3163_v53 = vpop.permute.xlu1 %3162 }
 0x60e   : > { %v3172_v36 = vsel %vm1741_vm10, %v3159_v45, %v3163_v53 }
 0x60f   : > { %v3167_v23 = vpop.permute.xlu0 %3166  ;;  %3395 = vmatprep.subr.mxu0 %v3172_v36 }
 0x610   : > { %3396 = vmatpush1.msra.mxu0 %v3174_v59  ;;  %v3176_v25 = vsel %vm1741_vm10, %v3167_v23, %v3155_v38  ;;  %v3170_v6 = vsel %vm1741_vm10, %v3163_v53, %v3167_v23 }
 0x611   : > { %3397 = vmatprep.subr.mxu0 %v8966_v62  ;;  %3472 = vmatprep.subr.mxu1 %v3176_v25  ;;  %v3325_v12 = vpop.permute.xlu1 %3324 }
 0x612   : > { %3398 = vmatpush1.msra.mxu0 %v8964_v33  ;;  %3473 = vmatpush1.msra.mxu1 %v3170_v6 }
 0x613   : > { %v3329_v0 = vpop.permute.xlu0 %3328  ;;  %3399 = vmatprep.subr.mxu0 %v8982_v37  ;;  %3474 = vmatprep.subr.mxu1 %v8974_v60 }
 0x614   : > { %3400 = vmatpush1.msra.mxu0 %v8978_v15  ;;  %3475 = vmatpush1.msra.mxu1 %v8972_v47  ;;  %v3343_v33 = vsel %vm2416_vm12, %v3325_v12, %v3329_v0 }
 0x615   : > { %3476 = vmatprep.subr.mxu1 %v8990_v63  ;;  %v3333_v1 = vpop.permute.xlu1 %3332 }
 0x616   : > { %3477 = vmatpush1.msra.mxu1 %v8986_v51  ;;  %v3341_v62 = vsel %vm2416_vm12, %v3329_v0, %v3333_v1 }
 0x617   : > { %v3337_v52 = vpop.permute.xlu0 %3336  ;;  %3429 = vmatprep.subr.mxu0 %v3341_v62 }
 0x618   : > { %3430 = vmatpush2.msra.mxu0 %v3343_v33  ;;  %v3345_v60 = vsel %vm2416_vm12, %v3337_v52, %v3325_v12  ;;  %v3339_v47 = vsel %vm2416_vm12, %v3333_v1, %v3337_v52 }
 0x619   : > { %3506 = vmatprep.subr.mxu1 %v3345_v60  ;;  %v3323_v15 = vpop.permute.xlu1 %3322 }
 0x61a   : > { %3507 = vmatpush2.msra.mxu1 %v3339_v47 }
 0x61b   : > { %v3327_v37 = vpop.permute.xlu0 %3326 }
 0x61c   : > { %v3342_v48 = vsel %vm2416_vm12, %v3323_v15, %v3327_v37 }
 0x61d   : > { %v3331_v51 = vpop.permute.xlu1 %3330 }
 0x61e   : > { %v3340_v63 = vsel %vm2416_vm12, %v3327_v37, %v3331_v51 }
 0x61f   : > { %v3335_v57 = vpop.permute.xlu0 %3334  ;;  %3431 = vmatprep.subr.mxu0 %v3340_v63 }
 0x620   : > { %3432 = vmatpush2.msra.mxu0 %v3342_v48  ;;  %v3344_v9 = vsel %vm2416_vm12, %v3335_v57, %v3323_v15  ;;  %v3338_v54 = vsel %vm2416_vm12, %v3331_v51, %v3335_v57 }
 0x621   : > { %3434 = vmatmul.mubr.f32.vlgmr.msra.gmra.mxu0 %v3346_v30  ;;  %3508 = vmatprep.subr.mxu1 %v3344_v9 }
 0x622   : > { %3509 = vmatpush2.msra.mxu1 %v3338_v54  ;;  %4794 = vmatprep.mubr.msk.f32.mxu0 %vm3362_vm0, %v3349_v46 }
 0x623   : > { %3511 = vmatmul.mubr.f32.vlgmr.msra.gmra.mxu1 %v3346_v30 }
 0x624   : > { %4796 = vmatprep.mubr.msk.f32.mxu1 %vm3362_vm0, %v3349_v46 }
 0x625   : > { %3440 = vmatmul.mubr.f32.gmra.mxu0 %v3348_v21 }
 0x627   : > { %3517 = vmatmul.mubr.f32.gmra.mxu1 %v3348_v21 }
 0x62a   : > { %v3360_v22 = vpop.permute.xlu1 %3359 }
 0x62c   : > { %v3355_v8 = vpop.permute.xlu0 %3354 }
 0x6e1   : > { %v3435_v24 = vpop.f32.mrf.mxu0 }
 0x6e2   : > { %v3436_v50 = vadd.f32 %v3435_v24, %v3355_v8 }
 0x6e3   : > { %v3512_v3 = vpop.f32.mrf.mxu1  ;;  %v3437_v34 = vpop.f32.mrf.mxu0 }
 0x6e4   : > { %v3523_v11 = vmax.f32 %v3436_v50, 0.0  ;;  %v3513_v41 = vadd.f32 %v3512_v3, %v3355_v8  ;;  %v3438_v19 = vadd.f32 %v3437_v34, %v3355_v8 }
 0x6e5   : > { %v3441_v56 = vpop.f32.mrf.mxu0  ;;  %v3514_v16 = vpop.f32.mrf.mxu1 }
 0x6e6   : > { %3595 = vrot.lane.b32.xlu0 %v3523_v11, %s5043_s13  ;;  %3531 = vrot.lane.b32.xlu1 %v3523_v11, %s10997_s1  ;;  %v9268_v5 = vmax.f32 %v3513_v41, 0.0  ;;  %v3524_v26 = vmax.f32 %v3438_v19, 0.0  ;;  %v3442_v31 = vadd.f32 %v3441_v56, %v3360_v22  ;;  %v3515_v49 = vadd.f32 %v3514_v16, %v3355_v8 }
 0x6e7   : > { %v3518_v35 = vpop.f32.mrf.mxu1  ;;  %v3443_v29 = vpop.f32.mrf.mxu0 }
 0x6e8   : > { %v9279_v10 = vmax.f32 %v3442_v31, 0.0  ;;  %v9284_v61 = vmax.f32 %v3515_v49, 0.0  ;;  %v3519_v39 = vadd.f32 %v3518_v35, %v3360_v22  ;;  %v3444_v4 = vadd.f32 %v3443_v29, %v3360_v22 }
 0x6e9   : > { %v3520_v27 = vpop.f32.mrf.mxu1 }
 0x6ea   : > { %3563 = vrot.lane.b32.xlu1 %v3523_v11, %s10996_s22  ;;  %3539 = vrot.lane.b32.xlu0 %v9268_v5, %s10997_s1  ;;  %v9294_v7 = vmax.f32 %v3519_v39, 0.0  ;;  %v9300_v20 = vmax.f32 %v3444_v4, 0.0  ;;  %v3521_v13 = vadd.f32 %v3520_v27, %v3360_v22 }
 0x6ec   : > { %v9310_v32 = vmax.f32 %v3521_v13, 0.0 }
 0x6ee   : > { %3535 = vrot.lane.b32.xlu1 %v3524_v26, %s10997_s1  ;;  %3571 = vrot.lane.b32.xlu0 %v9268_v5, %s10996_s22 }
 0x6f2   : > { %3567 = vrot.lane.b32.xlu1 %v3524_v26, %s10996_s22  ;;  %3603 = vrot.lane.b32.xlu0 %v9268_v5, %s5043_s13 }
 0x6f6   : > { %3599 = vrot.lane.b32.xlu1 %v3524_v26, %s5043_s13  ;;  %3533 = vrot.lane.b32.xlu0 %v9279_v10, %s10997_s1 }
 0x6fa   : > { %3543 = vrot.lane.b32.xlu1 %v9284_v61, %s10997_s1  ;;  %3565 = vrot.lane.b32.xlu0 %v9279_v10, %s10996_s22 }
 0x6fe   : > { %3575 = vrot.lane.b32.xlu1 %v9284_v61, %s10996_s22  ;;  %3597 = vrot.lane.b32.xlu0 %v9279_v10, %s5043_s13 }
 0x702   : > { %3607 = vrot.lane.b32.xlu1 %v9284_v61, %s5043_s13  ;;  %3541 = vrot.lane.b32.xlu0 %v9294_v7, %s10997_s1 }
 0x706   : > { %3537 = vrot.lane.b32.xlu1 %v9300_v20, %s10997_s1  ;;  %3569 = vrot.lane.b32.xlu0 %v9300_v20, %s10996_s22 }
 0x70a   : > { %3573 = vrot.lane.b32.xlu1 %v9294_v7, %s10996_s22  ;;  %3601 = vrot.lane.b32.xlu0 %v9300_v20, %s5043_s13 }
 0x70e   : > { %3605 = vrot.lane.b32.xlu1 %v9294_v7, %s5043_s13  ;;  %3577 = vrot.lane.b32.xlu0 %v9310_v32, %s10996_s22  ;;  %s5060_s22 = smov 40  }
 0x712   : > { %3545 = vrot.lane.b32.xlu1 %v9310_v32, %s10997_s1  ;;  %3609 = vrot.lane.b32.xlu0 %v9310_v32, %s5043_s13  ;;  %s5059_s13 = smov 38   ;;  %s5061_s1 = smov 80  }
 0x758   : > { %v3596_v17 = vpop.permute.xlu0 %3595  ;;  %v3532_v18 = vpop.permute.xlu1 %3531 }
 0x75c   : > { %v3540_v40 = vpop.permute.xlu0 %3539  ;;  %v3564_v44 = vpop.permute.xlu1 %3563 }
 0x760   : > { %v3536_v2 = vpop.permute.xlu1 %3535  ;;  %v3572_v55 = vpop.permute.xlu0 %3571 }
 0x761   : > { %v3549_v42 = vsel %vm1741_vm10, %v3536_v2, %v3540_v40  ;;  %v3551_v43 = vsel %vm1741_vm10, %v3532_v18, %v3536_v2 }
 0x762   : > { %v3555_v45 = vmax.f32 %v3523_v11, %v3551_v43  ;;  %v3556_v53 = vmax.f32 %v3524_v26, %v3549_v42 }
 0x764   : > { %v3568_v28 = vpop.permute.xlu1 %3567  ;;  %v3604_v36 = vpop.permute.xlu0 %3603 }
 0x765   : > { %v3581_v14 = vsel %vm2011_vm1, %v3568_v28, %v3572_v55  ;;  %v3583_v38 = vsel %vm2011_vm1, %v3564_v44, %v3568_v28 }
 0x766   : > { %v3587_v23 = vmax.f32 %v3555_v45, %v3583_v38  ;;  %v3588_v59 = vmax.f32 %v3556_v53, %v3581_v14  ;;  %v3825_v14 = vld [vmem:[%s10142_s7 + $0x8] sm:$0xff] }
 0x767   : > { %4797 = vmatprep.mubr.msk.f32.mxu0 %vm3362_vm0, %v3825_v14  ;;  %4799 = vmatprep.mubr.msk.f32.mxu1 %vm3362_vm0, %v3825_v14 }
 0x768   : > { %v3600_v25 = vpop.permute.xlu1 %3599  ;;  %v9360_v47 = vpop.permute.xlu0 %3533 }
 0x769   : > { %v3613_v6 = vsel %vm2056_vm2, %v3600_v25, %v3604_v36  ;;  %v3615_v12 = vsel %vm2056_vm2, %v3596_v17, %v3600_v25  ;;  %v3829_v25 = vld [vmem:[%s10143_s8 + $0x8] sm:$0xff] }
 0x76a   : > { %v9332_v0 = vmax.f32 %v3587_v23, %v3615_v12  ;;  %v9334_v1 = vmax.f32 %v3588_v59, %v3613_v6  ;;  %v3828_v6 = vld [vmem:[%s10143_s8] sm:$0xff] }
 0x76c   : > { %3774 = vrot.lane.b32.xlu1 %v9332_v0, %s5059_s13  ;;  %3778 = vrot.lane.b32.xlu0 %v9334_v1, %s5059_s13  ;;  %v3544_v62 = vpop.permute.xlu1 %3543  ;;  %v3566_v54 = vpop.permute.xlu0 %3565 }
 0x76d   : > { %v3547_v33 = vsel %vm1741_vm10, %v3540_v40, %v3544_v62  ;;  %v3553_v60 = vsel %vm1741_vm10, %v3544_v62, %v3532_v18 }
 0x76e   : > { %v3557_v63 = vmax.f32 %v9268_v5, %v3547_v33  ;;  %v3558_v30 = vmax.f32 %v9284_v61, %v3553_v60 }
 0x770   : > { %3749 = vrot.lane.b32.xlu1 %v9332_v0, %s5060_s22  ;;  %3753 = vrot.lane.b32.xlu0 %v9334_v1, %s5060_s22  ;;  %v3576_v52 = vpop.permute.xlu1 %3575  ;;  %v3598_v24 = vpop.permute.xlu0 %3597 }
 0x771   : > { %v3579_v37 = vsel %vm2011_vm1, %v3572_v55, %v3576_v52  ;;  %v3585_v51 = vsel %vm2011_vm1, %v3576_v52, %v3564_v44 }
 0x772   : > { %v3589_v46 = vmax.f32 %v3557_v63, %v3579_v37  ;;  %v3590_v9 = vmax.f32 %v3558_v30, %v3585_v51 }
 0x774   : > { %3724 = vrot.lane.b32.xlu1 %v9332_v0, %s5061_s1  ;;  %3728 = vrot.lane.b32.xlu0 %v9334_v1, %s5061_s1  ;;  %v3608_v15 = vpop.permute.xlu1 %3607  ;;  %v3542_v3 = vpop.permute.xlu0 %3541 }
 0x775   : > { %v3611_v57 = vsel %vm2056_vm2, %v3604_v36, %v3608_v15  ;;  %v3617_v48 = vsel %vm2056_vm2, %v3608_v15, %v3596_v17 }
 0x776   : > { %v9380_v21 = vmax.f32 %v3589_v46, %v3611_v57  ;;  %v9382_v8 = vmax.f32 %v3590_v9, %v3617_v48 }
 0x778   : > { %3700 = vrot.lane.b32.xlu1 %v9332_v0, %s5051_s30  ;;  %3704 = vrot.lane.b32.xlu0 %v9334_v1, %s5051_s30  ;;  %v3538_v50 = vpop.permute.xlu1 %3537  ;;  %v3570_v41 = vpop.permute.xlu0 %3569 }
 0x779   : > { %v3550_v34 = vsel %vm1741_vm10, %v3538_v50, %v3542_v3  ;;  %v3552_v19 = vsel %vm1741_vm10, %v9360_v47, %v3538_v50  ;;  %v3584_v61 = vsel %vm2011_vm1, %v3566_v54, %v3570_v41 }
 0x77a   : > { %v3559_v56 = vmax.f32 %v9279_v10, %v3552_v19  ;;  %v3560_v22 = vmax.f32 %v9300_v20, %v3550_v34 }
 0x77c   : > { %3676 = vrot.lane.b32.xlu1 %v9332_v0, %s5049_s28  ;;  %3680 = vrot.lane.b32.xlu0 %v9334_v1, %s5049_s28  ;;  %v3574_v11 = vpop.permute.xlu1 %3573  ;;  %v3602_v31 = vpop.permute.xlu0 %3601  ;;  %v3591_v35 = vmax.f32 %v3559_v56, %v3584_v61 }
 0x77d   : > { %v3582_v26 = vsel %vm2011_vm1, %v3570_v41, %v3574_v11  ;;  %v3616_v10 = vsel %vm2056_vm2, %v3598_v24, %v3602_v31 }
 0x77e   : > { %v3592_v49 = vmax.f32 %v3560_v22, %v3582_v26  ;;  %v9433_v29 = vmax.f32 %v3591_v35, %v3616_v10 }
 0x780   : > { %3651 = vrot.lane.b32.xlu1 %v9332_v0, %s5062_s26  ;;  %3655 = vrot.lane.b32.xlu0 %v9334_v1, %s5062_s26  ;;  %v3606_v5 = vpop.permute.xlu1 %3605  ;;  %v3578_v27 = vpop.permute.xlu0 %3577 }
 0x781   : > { %v3614_v16 = vsel %vm2056_vm2, %v3602_v31, %v3606_v5  ;;  %v3580_v18 = vsel %vm2011_vm1, %v3574_v11, %v3578_v27 }
 0x782   : > { %v9425_v39 = vmax.f32 %v3592_v49, %v3614_v16 }
 0x784   : > { %3627 = vrot.lane.b32.xlu1 %v9332_v0, %s10998_s24  ;;  %3631 = vrot.lane.b32.xlu0 %v9334_v1, %s10998_s24  ;;  %v3546_v4 = vpop.permute.xlu1 %3545  ;;  %v3610_v40 = vpop.permute.xlu0 %3609 }
 0x785   : > { %v3548_v20 = vsel %vm1741_vm10, %v3542_v3, %v3546_v4  ;;  %v3554_v17 = vsel %vm1741_vm10, %v3546_v4, %v9360_v47  ;;  %v3612_v55 = vsel %vm2056_vm2, %v3606_v5, %v3610_v40  ;;  %vm3790_vm10 = vcmp.lt.s32.totalorder %v5933_v58, 38 }
 0x786   : > { %v3561_v13 = vmax.f32 %v9294_v7, %v3548_v20  ;;  %v3562_v44 = vmax.f32 %v9310_v32, %v3554_v17  ;;  %v3586_v7 = vsel %vm2011_vm1, %v3578_v27, %v3566_v54  ;;  %v3618_v32 = vsel %vm2056_vm2, %v3610_v40, %v3598_v24 }
 0x787   : > { %vm3765_vm1 = vcmp.lt.s32.totalorder %v5933_v58, 40  ;;  %vm3740_vm2 = vcmp.lt.s32.totalorder %v5933_v58, 80  ;;  %v4274_v58 = vld [vmem:[%s10999_s19 + $0x18] sm:$0xff] }
 0x788   : > { %3786 = vrot.lane.b32.xlu0 %v9382_v8, %s5059_s13  ;;  %3782 = vrot.lane.b32.xlu1 %v9380_v21, %s5059_s13  ;;  %v3593_v2 = vmax.f32 %v3561_v13, %v3580_v18  ;;  %v3594_v42 = vmax.f32 %v3562_v44, %v3586_v7 }
 0x78a   : > { %v9468_v43 = vmax.f32 %v3593_v2, %v3612_v55  ;;  %v9476_v28 = vmax.f32 %v3594_v42, %v3618_v32 }
 0x78c   : > { %3761 = vrot.lane.b32.xlu0 %v9382_v8, %s5060_s22  ;;  %3757 = vrot.lane.b32.xlu1 %v9380_v21, %s5060_s22 }
 0x790   : > { %3736 = vrot.lane.b32.xlu0 %v9382_v8, %s5061_s1  ;;  %3732 = vrot.lane.b32.xlu1 %v9380_v21, %s5061_s1 }
 0x794   : > { %3712 = vrot.lane.b32.xlu0 %v9382_v8, %s5051_s30  ;;  %3708 = vrot.lane.b32.xlu1 %v9380_v21, %s5051_s30 }
 0x798   : > { %3688 = vrot.lane.b32.xlu0 %v9382_v8, %s5049_s28  ;;  %3684 = vrot.lane.b32.xlu1 %v9380_v21, %s5049_s28 }
 0x79c   : > { %3663 = vrot.lane.b32.xlu0 %v9382_v8, %s5062_s26  ;;  %3659 = vrot.lane.b32.xlu1 %v9380_v21, %s5062_s26 }
 0x7a0   : > { %3639 = vrot.lane.b32.xlu0 %v9382_v8, %s10998_s24  ;;  %3635 = vrot.lane.b32.xlu1 %v9380_v21, %s10998_s24 }
 0x7a4   : > { %3755 = vrot.lane.b32.xlu0 %v9425_v39, %s5060_s22  ;;  %3780 = vrot.lane.b32.xlu1 %v9425_v39, %s5059_s13 }
 0x7a8   : > { %3730 = vrot.lane.b32.xlu0 %v9425_v39, %s5061_s1  ;;  %3776 = vrot.lane.b32.xlu1 %v9433_v29, %s5059_s13 }
 0x7ac   : > { %3706 = vrot.lane.b32.xlu0 %v9425_v39, %s5051_s30  ;;  %3751 = vrot.lane.b32.xlu1 %v9433_v29, %s5060_s22 }
 0x7b0   : > { %3682 = vrot.lane.b32.xlu0 %v9425_v39, %s5049_s28  ;;  %3726 = vrot.lane.b32.xlu1 %v9433_v29, %s5061_s1 }
 0x7b4   : > { %3657 = vrot.lane.b32.xlu0 %v9425_v39, %s5062_s26  ;;  %3702 = vrot.lane.b32.xlu1 %v9433_v29, %s5051_s30 }
 0x7b8   : > { %3633 = vrot.lane.b32.xlu0 %v9425_v39, %s10998_s24  ;;  %3678 = vrot.lane.b32.xlu1 %v9433_v29, %s5049_s28 }
 0x7bc   : > { %3653 = vrot.lane.b32.xlu1 %v9433_v29, %s5062_s26  ;;  %3784 = vrot.lane.b32.xlu0 %v9468_v43, %s5059_s13 }
 0x7c0   : > { %3629 = vrot.lane.b32.xlu1 %v9433_v29, %s10998_s24  ;;  %3788 = vrot.lane.b32.xlu0 %v9476_v28, %s5059_s13 }
 0x7c4   : > { %3805 = vrot.lane.b32.xlu1 %v9425_v39, %s5063_s27  ;;  %3763 = vrot.lane.b32.xlu0 %v9476_v28, %s5060_s22 }
 0x7c8   : > { %3759 = vrot.lane.b32.xlu1 %v9468_v43, %s5060_s22  ;;  %3738 = vrot.lane.b32.xlu0 %v9476_v28, %s5061_s1 }
 0x7cc   : > { %3734 = vrot.lane.b32.xlu1 %v9468_v43, %s5061_s1  ;;  %3714 = vrot.lane.b32.xlu0 %v9476_v28, %s5051_s30 }
 0x7d0   : > { %3710 = vrot.lane.b32.xlu1 %v9468_v43, %s5051_s30  ;;  %3690 = vrot.lane.b32.xlu0 %v9476_v28, %s5049_s28 }
 0x7d4   : > { %3686 = vrot.lane.b32.xlu1 %v9468_v43, %s5049_s28  ;;  %3665 = vrot.lane.b32.xlu0 %v9476_v28, %s5062_s26 }
 0x7d8   : > { %3661 = vrot.lane.b32.xlu1 %v9468_v43, %s5062_s26  ;;  %3803 = vrot.lane.b32.xlu0 %v9334_v1, %s5063_s27 }
 0x7dc   : > { %3637 = vrot.lane.b32.xlu1 %v9468_v43, %s10998_s24  ;;  %3641 = vrot.lane.b32.xlu0 %v9476_v28, %s10998_s24 }
 0x7de   : > { %v3779_v38 = vpop.permute.xlu0 %3778  ;;  %v9515_v45 = vpop.permute.xlu1 %3774 }
 0x7df   : > { %v3795_v2 = vsel %vm3790_vm10, %v9515_v45, %v3779_v38 }
 0x7e0   : > { %3801 = vrot.lane.b32.xlu1 %v9433_v29, %s5063_s27  ;;  %3809 = vrot.lane.b32.xlu0 %v9468_v43, %s5063_s27 }
 0x7e2   : > { %v9521_v53 = vpop.permute.xlu0 %3753  ;;  %v9523_v36 = vpop.permute.xlu1 %3749 }
 0x7e4   : > { %3807 = vrot.lane.b32.xlu1 %v9380_v21, %s5063_s27  ;;  %3813 = vrot.lane.b32.xlu0 %v9476_v28, %s5063_s27 }
 0x7e6   : > { %v9529_v23 = vpop.permute.xlu0 %3728  ;;  %v9531_v59 = vpop.permute.xlu1 %3724 }
 0x7e8   : > { %3799 = vrot.lane.b32.xlu1 %v9332_v0, %s5063_s27  ;;  %3811 = vrot.lane.b32.xlu0 %v9382_v8, %s5063_s27 }
 0x7ea   : > { %v9543_v12 = vpop.permute.xlu0 %3704  ;;  %v9545_v62 = vpop.permute.xlu1 %3700 }
 0x7ec   : > { %3837 = vperm.xlu1 %4947, %v3829_v25   ;;  %3832 = vperm.xlu0 %4946, %v3828_v6  }
 0x7ee   : > { %v9547_v52 = vpop.permute.xlu0 %3680  ;;  %v9549_v33 = vpop.permute.xlu1 %3676 }
 0x7f2   : > { %v9551_v60 = vpop.permute.xlu0 %3655  ;;  %v9553_v47 = vpop.permute.xlu1 %3651 }
 0x7f6   : > { %v9555_v15 = vpop.permute.xlu0 %3631  ;;  %v9557_v37 = vpop.permute.xlu1 %3627 }
 0x7fa   : > { %v3787_v51 = vpop.permute.xlu0 %3786  ;;  %v3783_v63 = vpop.permute.xlu1 %3782 }
 0x7fb   : > { %v3793_v18 = vsel %vm3790_vm10, %v3779_v38, %v3783_v63  ;;  %v3797_v42 = vsel %vm3790_vm10, %v3787_v51, %v9515_v45  ;;  %v3791_v38 = vsel %vm3790_vm10, %v3783_v63, %v3787_v51 }
 0x7fe   : > { %v9559_v30 = vpop.permute.xlu0 %3761  ;;  %v3758_v57 = vpop.permute.xlu1 %3757 }
 0x7ff   : > { %v3772_v51 = vsel %vm3765_vm1, %v9559_v30, %v9523_v36  ;;  %v3768_v63 = vsel %vm3765_vm1, %v9521_v53, %v3758_v57 }
 0x802   : > { %v9561_v48 = vpop.permute.xlu0 %3736  ;;  %v9563_v46 = vpop.permute.xlu1 %3732 }
 0x806   : > { %v9565_v9 = vpop.permute.xlu0 %3712  ;;  %v9567_v54 = vpop.permute.xlu1 %3708 }
 0x80a   : > { %v9569_v24 = vpop.permute.xlu0 %3688  ;;  %v9571_v50 = vpop.permute.xlu1 %3684 }
 0x80e   : > { %v9573_v3 = vpop.permute.xlu0 %3663  ;;  %v9575_v11 = vpop.permute.xlu1 %3659 }
 0x812   : > { %v9577_v41 = vpop.permute.xlu0 %3639  ;;  %v9579_v34 = vpop.permute.xlu1 %3635 }
 0x816   : > { %v3756_v19 = vpop.permute.xlu0 %3755  ;;  %v3781_v5 = vpop.permute.xlu1 %3780 }
 0x81a   : > { %v3731_v26 = vpop.permute.xlu0 %3730  ;;  %v3777_v56 = vpop.permute.xlu1 %3776 }
 0x81b   : > { %v3796_v17 = vsel %vm3790_vm10, %v3777_v56, %v3781_v5 }
 0x81e   : > { %v9581_v22 = vpop.permute.xlu0 %3706  ;;  %v3752_v31 = vpop.permute.xlu1 %3751 }
 0x822   : > { %v9583_v16 = vpop.permute.xlu0 %3682  ;;  %v3727_v49 = vpop.permute.xlu1 %3726 }
 0x826   : > { %v9585_v61 = vpop.permute.xlu0 %3657  ;;  %v9587_v35 = vpop.permute.xlu1 %3702 }
 0x82a   : > { %v9589_v10 = vpop.permute.xlu0 %3633  ;;  %v9591_v4 = vpop.permute.xlu1 %3678 }
 0x82e   : > { %v3785_v20 = vpop.permute.xlu0 %3784  ;;  %v9593_v27 = vpop.permute.xlu1 %3653 }
 0x82f   : > { %v3794_v13 = vsel %vm3790_vm10, %v3781_v5, %v3785_v20 }
 0x830   : > { %3846 = vmatprep.subr.mxu0 %v3794_v13  ;;  %v3766_v13 = vsel %vm3765_vm1, %v3758_v57, %v9559_v30  ;;  %v3746_v57 = vsel %vm3740_vm2, %v3727_v49, %v3731_v26 }
 0x831   : > { %3847 = vmatpush1.msra.mxu0 %v3796_v17  ;;  %v3770_v17 = vsel %vm3765_vm1, %v9523_v36, %v9521_v53  ;;  %v3747_v53 = vsel %vm3740_vm2, %v9561_v48, %v9531_v59  ;;  %v3743_v36 = vsel %vm3740_vm2, %v9529_v23, %v9563_v46 }
 0x832   : > { %v3789_v40 = vpop.permute.xlu0 %3788  ;;  %3848 = vmatprep.subr.mxu0 %v3793_v18  ;;  %v9602_v44 = vpop.permute.xlu1 %3629 }
 0x833   : > { %v3792_v7 = vsel %vm3790_vm10, %v3785_v20, %v3789_v40  ;;  %3849 = vmatpush1.msra.mxu0 %v3795_v2  ;;  %v3798_v55 = vsel %vm3790_vm10, %v3789_v40, %v3777_v56  ;;  %v3771_v20 = vsel %vm3765_vm1, %v3752_v31, %v3756_v19  ;;  %v3741_v2 = vsel %vm3740_vm2, %v9563_v46, %v9561_v48 }
 0x834   : > { %3923 = vmatprep.subr.mxu1 %v3798_v55  ;;  %v3721_v46 = vsel %vm2416_vm12, %v9587_v35, %v9581_v22 }
 0x835   : > { %3924 = vmatpush1.msra.mxu1 %v3792_v7  ;;  %v3745_v7 = vsel %vm3740_vm2, %v9531_v59, %v9529_v23  ;;  %v3722_v23 = vsel %vm2416_vm12, %v9565_v9, %v9545_v62  ;;  %v3718_v59 = vsel %vm2416_vm12, %v9543_v12, %v9567_v54 }
 0x836   : > { %v3764_v32 = vpop.permute.xlu0 %3763  ;;  %3925 = vmatprep.subr.mxu1 %v3797_v42  ;;  %v9615_v14 = vpop.permute.xlu1 %3805 }
 0x837   : > { %3926 = vmatpush1.msra.mxu1 %v3791_v38  ;;  %v3773_v25 = vsel %vm3765_vm1, %v3764_v32, %v3752_v31  ;;  %v3720_v38 = vsel %vm2416_vm12, %v9545_v62, %v9543_v12  ;;  %v3698_v12 = vsel %vm2326_vm8, %v9569_v24, %v9549_v33  ;;  %v3694_v62 = vsel %vm2326_vm8, %v9547_v52, %v9571_v50 }
 0x838   : > { %3927 = vmatprep.subr.mxu1 %v3773_v25 }
 0x83a   : > { %v3739_v6 = vpop.permute.xlu0 %3738  ;;  %v3760_v5 = vpop.permute.xlu1 %3759 }
 0x83b   : > { %v3767_v56 = vsel %vm3765_vm1, %v3760_v5, %v3764_v32  ;;  %v3769_v45 = vsel %vm3765_vm1, %v3756_v19, %v3760_v5  ;;  %v3748_v18 = vsel %vm3740_vm2, %v3739_v6, %v3727_v49  ;;  %v3716_v32 = vsel %vm2416_vm12, %v9567_v54, %v9565_v9 }
 0x83c   : > { %3850 = vmatprep.subr.mxu0 %v3769_v45  ;;  %3928 = vmatpush1.msra.mxu1 %v3767_v56  ;;  %v3697_v54 = vsel %vm2326_vm8, %v9591_v4, %v9583_v16  ;;  %v3696_v56 = vsel %vm2326_vm8, %v9549_v33, %v9547_v52  ;;  %v3674_v52 = vsel %vm3667_vm3, %v9573_v3, %v9553_v47 }
 0x83d   : > { %3851 = vmatpush1.msra.mxu0 %v3771_v20  ;;  %3929 = vmatprep.subr.mxu1 %v3772_v51  ;;  %v3670_v33 = vsel %vm3667_vm3, %v9551_v60, %v9575_v11  ;;  %v3668_v51 = vsel %vm3667_vm3, %v9575_v11, %v9573_v3  ;;  %v3648_v11 = vsel %vm1786_vm11, %v9602_v44, %v9589_v10 }
 0x83e   : > { %v3715_v19 = vpop.permute.xlu0 %3714  ;;  %3852 = vmatprep.subr.mxu0 %v3768_v63  ;;  %3930 = vmatpush1.msra.mxu1 %v3766_v13  ;;  %v3735_v31 = vpop.permute.xlu1 %3734  ;;  %v3672_v63 = vsel %vm3667_vm3, %v9553_v47, %v9551_v60  ;;  %v3645_v60 = vsel %vm1786_vm11, %v9555_v15, %v9579_v34  ;;  %v3649_v47 = vsel %vm1786_vm11, %v9577_v41, %v9557_v37 }
 0x83f   : > { %v3742_v40 = vsel %vm3740_vm2, %v3735_v31, %v3739_v6  ;;  %3853 = vmatpush1.msra.mxu0 %v3770_v17  ;;  %3931 = vmatprep.subr.mxu1 %v3748_v18  ;;  %v3744_v30 = vsel %vm3740_vm2, %v3731_v26, %v3735_v31  ;;  %v3723_v55 = vsel %vm2416_vm12, %v3715_v19, %v9587_v35 }
 0x840   : > { %3854 = vmatprep.subr.mxu0 %v3744_v30  ;;  %3932 = vmatpush1.msra.mxu1 %v3742_v40  ;;  %v3826_v40 = vld [vmem:[%s10142_s7 + $0x10] sm:$0xff] }
 0x841   : > { %3855 = vmatpush1.msra.mxu0 %v3746_v57  ;;  %3933 = vmatprep.subr.mxu1 %v3747_v53 }
 0x842   : > { %v3691_v26 = vpop.permute.xlu0 %3690  ;;  %3856 = vmatprep.subr.mxu0 %v3743_v36  ;;  %3934 = vmatpush1.msra.mxu1 %v3741_v2  ;;  %v3711_v49 = vpop.permute.xlu1 %3710 }
 0x843   : > { %v3717_v42 = vsel %vm2416_vm12, %v3711_v49, %v3715_v19  ;;  %3857 = vmatpush1.msra.mxu0 %v3745_v7  ;;  %3935 = vmatprep.subr.mxu1 %v3723_v55  ;;  %v3719_v48 = vsel %vm2416_vm12, %v9581_v22, %v3711_v49  ;;  %v3699_v25 = vsel %vm2326_vm8, %v3691_v26, %v9591_v4 }
 0x844   : > { %3858 = vmatprep.subr.mxu0 %v3719_v48  ;;  %3936 = vmatpush1.msra.mxu1 %v3717_v42 }
 0x845   : > { %3859 = vmatpush1.msra.mxu0 %v3721_v46  ;;  %3937 = vmatprep.subr.mxu1 %v3722_v23 }
 0x846   : > { %v3666_v22 = vpop.permute.xlu0 %3665  ;;  %3860 = vmatprep.subr.mxu0 %v3718_v59  ;;  %3938 = vmatpush1.msra.mxu1 %v3716_v32  ;;  %v3687_v35 = vpop.permute.xlu1 %3686 }
 0x847   : > { %v3693_v6 = vsel %vm2326_vm8, %v3687_v35, %v3691_v26  ;;  %3861 = vmatpush1.msra.mxu0 %v3720_v38  ;;  %3939 = vmatprep.subr.mxu1 %v3699_v25  ;;  %v3695_v9 = vsel %vm2326_vm8, %v9583_v16, %v3687_v35  ;;  %v3692_v16 = vsel %vm2326_vm8, %v9571_v50, %v9569_v24 }
 0x848   : > { %3862 = vmatprep.subr.mxu0 %v3695_v9  ;;  %3940 = vmatpush1.msra.mxu1 %v3693_v6  ;;  %v3675_v45 = vsel %vm3667_vm3, %v3666_v22, %v9593_v27  ;;  %v3673_v50 = vsel %vm3667_vm3, %v9593_v27, %v9585_v61 }
 0x849   : > { %3863 = vmatpush1.msra.mxu0 %v3697_v54  ;;  %3941 = vmatprep.subr.mxu1 %v3698_v12  ;;  %v4133_v12 = vld [vmem:[%s10144_s9 + $0x8] sm:$0xff] }
 0x84a   : > { %v9719_v4 = vpop.permute.xlu0 %3803  ;;  %3864 = vmatprep.subr.mxu0 %v3694_v62  ;;  %3942 = vmatpush1.msra.mxu1 %v3692_v16  ;;  %v3662_v5 = vpop.permute.xlu1 %3661  ;;  %v4136_v62 = vld [vmem:[%s10145_s10] sm:$0xff]  ;;  %v4137_v16 = vld [vmem:[%s10145_s10 + $0x8] sm:$0xff] }
 0x84b   : > { %v3669_v20 = vsel %vm3667_vm3, %v3662_v5, %v3666_v22  ;;  %3865 = vmatpush1.msra.mxu0 %v3696_v56  ;;  %3943 = vmatprep.subr.mxu1 %v3675_v45  ;;  %v3671_v24 = vsel %vm3667_vm3, %v9585_v61, %v3662_v5 }
 0x84c   : > { %3866 = vmatprep.subr.mxu0 %v3671_v24  ;;  %3944 = vmatpush1.msra.mxu1 %v3669_v20 }
 0x84d   : > { %3867 = vmatpush1.msra.mxu0 %v3673_v50  ;;  %3945 = vmatprep.subr.mxu1 %v3674_v52 }
 0x84e   : > { %v3642_v61 = vpop.permute.xlu0 %3641  ;;  %3868 = vmatprep.subr.mxu0 %v3670_v33  ;;  %3946 = vmatpush1.msra.mxu1 %v3668_v51  ;;  %v3638_v27 = vpop.permute.xlu1 %3637 }
 0x84f   : > { %v3644_v13 = vsel %vm1786_vm11, %v3638_v27, %v3642_v61  ;;  %3869 = vmatpush1.msra.mxu0 %v3672_v63  ;;  %v3646_v19 = vsel %vm1786_vm11, %v9589_v10, %v3638_v27  ;;  %v3650_v3 = vsel %vm1786_vm11, %v3642_v61, %v9602_v44  ;;  %v3647_v10 = vsel %vm1786_vm11, %v9557_v37, %v9555_v15 }
 0x850   : > { %3870 = vmatprep.subr.mxu0 %v3646_v19  ;;  %3947 = vmatprep.subr.mxu1 %v3650_v3  ;;  %v3643_v44 = vsel %vm1786_vm11, %v9579_v34, %v9577_v41 }
 0x851   : > { %3871 = vmatpush1.msra.mxu0 %v3648_v11  ;;  %3948 = vmatpush1.msra.mxu1 %v3644_v13 }
 0x852   : > { %v3810_v31 = vpop.permute.xlu0 %3809  ;;  %3872 = vmatprep.subr.mxu0 %v3645_v60  ;;  %3949 = vmatprep.subr.mxu1 %v3649_v47  ;;  %v3802_v17 = vpop.permute.xlu1 %3801 }
 0x853   : > { %3873 = vmatpush1.msra.mxu0 %v3647_v10  ;;  %3950 = vmatpush1.msra.mxu1 %v3643_v44 }
 0x854   : > { %3874 = vmatprep.subr.mxu0 %v9425_v39  ;;  %3951 = vmatprep.subr.mxu1 %v9476_v28  ;;  %v3819_v39 = vsel %vm3815_vm7, %v9615_v14, %v3810_v31 }
 0x855   : > { %3875 = vmatpush1.msra.mxu0 %v9433_v29  ;;  %3952 = vmatpush1.msra.mxu1 %v9468_v43  ;;  %v3824_v43 = vld [vmem:[%s10142_s7] sm:$0xff] }
 0x856   : > { %v3814_v18 = vpop.permute.xlu0 %3813  ;;  %3876 = vmatprep.subr.mxu0 %v9334_v1  ;;  %3953 = vmatprep.subr.mxu1 %v9382_v8  ;;  %v3808_v15 = vpop.permute.xlu1 %3807  ;;  %v3821_v1 = vsel %vm3815_vm7, %v3802_v17, %v9615_v14  ;;  %v3827_v14 = vld [vmem:[%s10142_s7 + $0x18] sm:$0xff] }
 0x857   : > { %v3817_v37 = vsel %vm3815_vm7, %v3810_v31, %v3814_v18  ;;  %3877 = vmatpush1.msra.mxu0 %v9332_v0  ;;  %3954 = vmatpush1.msra.mxu1 %v9380_v21  ;;  %v3823_v29 = vsel %vm3815_vm7, %v3814_v18, %v3802_v17  ;;  %v3818_v0 = vsel %vm3815_vm7, %v9719_v4, %v3808_v15 }
 0x858   : > { %3906 = vmatprep.subr.mxu0 %v3819_v39  ;;  %3983 = vmatprep.subr.mxu1 %v3823_v29 }
 0x859   : > { %3907 = vmatpush2.msra.mxu0 %v3821_v1  ;;  %3984 = vmatpush2.msra.mxu1 %v3817_v37 }
 0x85a   : > { %v3812_v21 = vpop.permute.xlu0 %3811  ;;  %3908 = vmatprep.subr.mxu0 %v3818_v0  ;;  %v3800_v8 = vpop.permute.xlu1 %3799 }
 0x85b   : > { %v3816_v28 = vsel %vm3815_vm7, %v3808_v15, %v3812_v21  ;;  %v3820_v41 = vsel %vm3815_vm7, %v3800_v8, %v9719_v4  ;;  %v3822_v34 = vsel %vm3815_vm7, %v3812_v21, %v3800_v8 }
 0x85c   : > { %3909 = vmatpush2.msra.mxu0 %v3820_v41  ;;  %3985 = vmatprep.subr.mxu1 %v3822_v34 }
 0x85d   : > { %3911 = vmatmul.mubr.f32.vlgmr.msra.gmra.mxu0 %v3824_v43  ;;  %3986 = vmatpush2.msra.mxu1 %v3816_v28 }
 0x85e   : > { %3988 = vmatmul.mubr.f32.vlgmr.msra.gmra.mxu1 %v3824_v43  ;;  %4798 = vmatprep.mubr.msk.f32.mxu0 %vm3362_vm0, %v3827_v14 }
 0x85f   : > { %4800 = vmatprep.mubr.msk.f32.mxu1 %vm3362_vm0, %v3827_v14 }
 0x861   : > { %3917 = vmatmul.mubr.f32.gmra.mxu0 %v3826_v40 }
 0x862   : > { %3993 = vmatmul.mubr.f32.gmra.mxu1 %v3826_v40  ;;  %4801 = vmatprep.mubr.msk.f32.mxu0 %vm3362_vm0, %v4133_v12 }
 0x867   : > { %v3833_v30 = vpop.permute.xlu0 %3832  ;;  %v3838_v23 = vpop.permute.xlu1 %3837 }
 0x91d   : > { %v3912_v57 = vpop.f32.mrf.mxu0 }
 0x91e   : > { %v3913_v53 = vadd.f32 %v3912_v57, %v3833_v30  ;;  %v3989_v36 = vpop.f32.mrf.mxu1 }
 0x91f   : > { %v3990_v2 = vadd.f32 %v3989_v36, %v3833_v30  ;;  %v3914_v48 = vpop.f32.mrf.mxu0 }
 0x920   : > { %v9821_v26 = vmax.f32 %v3913_v53, 0.0  ;;  %v3991_v49 = vpop.f32.mrf.mxu1  ;;  %v3915_v59 = vadd.f32 %v3914_v48, %v3833_v30 }
 0x921   : > { %v9823_v7 = vmax.f32 %v3990_v2, 0.0  ;;  %v3918_v46 = vpop.f32.mrf.mxu0 }
 0x922   : > { %v3994_v55 = vpop.f32.mrf.mxu1  ;;  %4100 = vrot.lane.b32.xlu0 %v9821_v26, %s5059_s13  ;;  %v3919_v32 = vadd.f32 %v3918_v46, %v3838_v23  ;;  %v9853_v22 = vmax.f32 %v3915_v59, 0.0 }
 0x923   : > { %4108 = vrot.lane.b32.xlu1 %v9823_v7, %s5059_s13  ;;  %v3920_v38 = vpop.f32.mrf.mxu0  ;;  %v3995_v25 = vadd.f32 %v3994_v55, %v3838_v23 }
 0x924   : > { %v3996_v42 = vpop.f32.mrf.mxu1  ;;  %v9855_v35 = vmax.f32 %v3919_v32, 0.0  ;;  %v3921_v6 = vadd.f32 %v3920_v38, %v3838_v23 }
 0x925   : > { %v4003_v9 = vmax.f32 %v3995_v25, 0.0 }
 0x926   : > { %4084 = vrot.lane.b32.xlu0 %v9821_v26, %s5060_s22  ;;  %v9885_v54 = vmax.f32 %v3921_v6, 0.0 }
 0x927   : > { %4092 = vrot.lane.b32.xlu1 %v9823_v7, %s5060_s22 }
 0x92a   : > { %4068 = vrot.lane.b32.xlu0 %v9821_v26, %s5061_s1 }
 0x92b   : > { %4076 = vrot.lane.b32.xlu1 %v9823_v7, %s5061_s1 }
 0x92e   : > { %4052 = vrot.lane.b32.xlu0 %v9821_v26, %s5051_s30 }
 0x92f   : > { %4060 = vrot.lane.b32.xlu1 %v9823_v7, %s5051_s30 }
 0x932   : > { %4036 = vrot.lane.b32.xlu0 %v9821_v26, %s5049_s28 }
 0x933   : > { %4044 = vrot.lane.b32.xlu1 %v9823_v7, %s5049_s28 }
 0x936   : > { %4020 = vrot.lane.b32.xlu0 %v9821_v26, %s5062_s26 }
 0x937   : > { %4028 = vrot.lane.b32.xlu1 %v9823_v7, %s5062_s26 }
 0x93a   : > { %4004 = vrot.lane.b32.xlu0 %v9821_v26, %s10998_s24 }
 0x93b   : > { %4012 = vrot.lane.b32.xlu1 %v9823_v7, %s10998_s24 }
 0x93e   : > { %4104 = vrot.lane.b32.xlu0 %v9853_v22, %s5059_s13 }
 0x93f   : > { %4102 = vrot.lane.b32.xlu1 %v9855_v35, %s5059_s13 }
 0x942   : > { %4088 = vrot.lane.b32.xlu0 %v9853_v22, %s5060_s22 }
 0x943   : > { %4086 = vrot.lane.b32.xlu1 %v9855_v35, %s5060_s22 }
 0x946   : > { %4072 = vrot.lane.b32.xlu0 %v9853_v22, %s5061_s1 }
 0x947   : > { %4070 = vrot.lane.b32.xlu1 %v9855_v35, %s5061_s1 }
 0x94a   : > { %4056 = vrot.lane.b32.xlu0 %v9853_v22, %s5051_s30 }
 0x94b   : > { %4054 = vrot.lane.b32.xlu1 %v9855_v35, %s5051_s30 }
 0x94e   : > { %4040 = vrot.lane.b32.xlu0 %v9853_v22, %s5049_s28 }
 0x94f   : > { %4038 = vrot.lane.b32.xlu1 %v9855_v35, %s5049_s28 }
 0x952   : > { %4024 = vrot.lane.b32.xlu0 %v9853_v22, %s5062_s26 }
 0x953   : > { %4022 = vrot.lane.b32.xlu1 %v9855_v35, %s5062_s26 }
 0x956   : > { %4008 = vrot.lane.b32.xlu0 %v9853_v22, %s10998_s24 }
 0x957   : > { %4006 = vrot.lane.b32.xlu1 %v9855_v35, %s10998_s24 }
 0x95a   : > { %4110 = vrot.lane.b32.xlu0 %v4003_v9, %s5059_s13 }
 0x95b   : > { %4106 = vrot.lane.b32.xlu1 %v9885_v54, %s5059_s13  ;;  %s551_s13 = sand.u32 1, %s11003_s20  }
 0x95e   : > { %4094 = vrot.lane.b32.xlu0 %v4003_v9, %s5060_s22 }
 0x95f   : > { %4090 = vrot.lane.b32.xlu1 %v9885_v54, %s5060_s22  ;;  %s11001_s22 = sld [smem:[#allocation195_spill]] }
 0x962   : > { %4078 = vrot.lane.b32.xlu0 %v4003_v9, %s5061_s1 }
 0x963   : > { %4074 = vrot.lane.b32.xlu1 %v9885_v54, %s5061_s1  ;;  %s4681_s1 = sshll.u32 %s551_s13, 4 }
 0x964   : > { %s553_s23 = scalar_lea.vmem [#allocation5], %s4681_s1 }
 0x966   : > { %4062 = vrot.lane.b32.xlu0 %v4003_v9, %s5051_s30 }
 0x967   : > { %4058 = vrot.lane.b32.xlu1 %v9885_v54, %s5051_s30 }
 0x96a   : > { %4046 = vrot.lane.b32.xlu0 %v4003_v9, %s5049_s28 }
 0x96b   : > { %4042 = vrot.lane.b32.xlu1 %v9885_v54, %s5049_s28 }
 0x96e   : > { %4030 = vrot.lane.b32.xlu0 %v4003_v9, %s5062_s26 }
 0x96f   : > { %4026 = vrot.lane.b32.xlu1 %v9885_v54, %s5062_s26 }
 0x972   : > { %4014 = vrot.lane.b32.xlu0 %v4003_v9, %s10998_s24 }
 0x973   : > { %4010 = vrot.lane.b32.xlu1 %v9885_v54, %s10998_s24 }
 0x976   : > { %4126 = vrot.lane.b32.xlu0 %v4003_v9, %s5063_s27 }
 0x977   : > { %4118 = vrot.lane.b32.xlu1 %v9855_v35, %s5063_s27 }
 0x97a   : > { %4120 = vrot.lane.b32.xlu0 %v9853_v22, %s5063_s27 }
 0x97b   : > { %4122 = vrot.lane.b32.xlu1 %v9885_v54, %s5063_s27 }
 0x97e   : > { %4116 = vrot.lane.b32.xlu0 %v9821_v26, %s5063_s27 }
 0x97f   : > { %4124 = vrot.lane.b32.xlu1 %v9823_v7, %s5063_s27 }
 0x982   : > { %4140 = vperm.xlu0 %4946, %v4136_v62  }
 0x983   : > { %4145 = vperm.xlu1 %4947, %v4137_v16  }
 0x994   : > { %v4101_v4 = vpop.permute.xlu0 %4100 }
 0x995   : > { %v4109_v5 = vpop.permute.xlu1 %4108 }
 0x998   : > { %v4085_v56 = vpop.permute.xlu0 %4084 }
 0x999   : > { %v4093_v45 = vpop.permute.xlu1 %4092 }
 0x99c   : > { %v4069_v20 = vpop.permute.xlu0 %4068 }
 0x99d   : > { %v4077_v24 = vpop.permute.xlu1 %4076 }
 0x9a0   : > { %v4053_v50 = vpop.permute.xlu0 %4052 }
 0x9a1   : > { %v4061_v52 = vpop.permute.xlu1 %4060 }
 0x9a4   : > { %v9929_v33 = vpop.permute.xlu0 %4036 }
 0x9a5   : > { %v9931_v51 = vpop.permute.xlu1 %4044 }
 0x9a8   : > { %v9933_v61 = vpop.permute.xlu0 %4020 }
 0x9a9   : > { %v9935_v27 = vpop.permute.xlu1 %4028 }
 0x9ac   : > { %v9937_v63 = vpop.permute.xlu0 %4004 }
 0x9ad   : > { %v9939_v13 = vpop.permute.xlu1 %4012 }
 0x9b0   : > { %v4105_v19 = vpop.permute.xlu0 %4104 }
 0x9b1   : > { %v4103_v3 = vpop.permute.xlu1 %4102  ;;  %v4112_v28 = vsel %vm3790_vm10, %v4105_v19, %v4109_v5  ;;  %v4114_v41 = vsel %vm3790_vm10, %v4101_v4, %v4105_v19 }
 0x9b4   : > { %v4089_v11 = vpop.permute.xlu0 %4088 }
 0x9b5   : > { %v4087_v60 = vpop.permute.xlu1 %4086  ;;  %v4096_v57 = vsel %vm3765_vm1, %v4089_v11, %v4093_v45  ;;  %v4098_v53 = vsel %vm3765_vm1, %v4085_v56, %v4089_v11 }
 0x9b8   : > { %v4073_v47 = vpop.permute.xlu0 %4072 }
 0x9b9   : > { %v4071_v31 = vpop.permute.xlu1 %4070  ;;  %v4080_v55 = vsel %vm3740_vm2, %v4073_v47, %v4077_v24  ;;  %v4082_v42 = vsel %vm3740_vm2, %v4069_v20, %v4073_v47 }
 0x9bc   : > { %v4057_v17 = vpop.permute.xlu0 %4056 }
 0x9bd   : > { %v4055_v10 = vpop.permute.xlu1 %4054  ;;  %v4064_v32 = vsel %vm2416_vm12, %v4057_v17, %v4061_v52  ;;  %v4066_v38 = vsel %vm2416_vm12, %v4053_v50, %v4057_v17 }
 0x9c0   : > { %v4041_v44 = vpop.permute.xlu0 %4040 }
 0x9c1   : > { %v4039_v18 = vpop.permute.xlu1 %4038  ;;  %v4048_v62 = vsel %vm2326_vm8, %v4041_v44, %v9931_v51  ;;  %v4050_v16 = vsel %vm2326_vm8, %v9929_v33, %v4041_v44 }
 0x9c4   : > { %v9941_v15 = vpop.permute.xlu0 %4024 }
 0x9c5   : > { %v4023_v37 = vpop.permute.xlu1 %4022  ;;  %v4032_v20 = vsel %vm3667_vm3, %v9941_v15, %v9935_v27  ;;  %v4034_v24 = vsel %vm3667_vm3, %v9933_v61, %v9941_v15 }
 0x9c8   : > { %v9943_v39 = vpop.permute.xlu0 %4008 }
 0x9c9   : > { %v9945_v29 = vpop.permute.xlu1 %4006  ;;  %v4016_v27 = vsel %vm1786_vm11, %v9943_v39, %v9939_v13  ;;  %v4018_v61 = vsel %vm1786_vm11, %v9937_v63, %v9943_v39 }
 0x9cc   : > { %v4111_v1 = vpop.permute.xlu0 %4110 }
 0x9cd   : > { %v4107_v0 = vpop.permute.xlu1 %4106 }
 0x9ce   : > { %v4115_v21 = vsel %vm3790_vm10, %v4103_v3, %v4107_v0  ;;  %v4113_v8 = vsel %vm3790_vm10, %v4107_v0, %v4111_v1 }
 0x9cf   : > { %4154 = vmatprep.subr.mxu0 %v4113_v8 }
 0x9d0   : > { %v4095_v43 = vpop.permute.xlu0 %4094  ;;  %4155 = vmatpush1.msra.mxu0 %v4115_v21 }
 0x9d1   : > { %4156 = vmatprep.subr.mxu0 %v4112_v28  ;;  %v4091_v34 = vpop.permute.xlu1 %4090 }
 0x9d2   : > { %v4099_v14 = vsel %vm3765_vm1, %v4087_v60, %v4091_v34  ;;  %4157 = vmatpush1.msra.mxu0 %v4114_v41  ;;  %v4097_v40 = vsel %vm3765_vm1, %v4091_v34, %v4095_v43 }
 0x9d3   : > { %4158 = vmatprep.subr.mxu0 %v4097_v40 }
 0x9d4   : > { %v4079_v30 = vpop.permute.xlu0 %4078  ;;  %4159 = vmatpush1.msra.mxu0 %v4099_v14 }
 0x9d5   : > { %4160 = vmatprep.subr.mxu0 %v4096_v57  ;;  %v4075_v36 = vpop.permute.xlu1 %4074 }
 0x9d6   : > { %v4083_v2 = vsel %vm3740_vm2, %v4071_v31, %v4075_v36  ;;  %4161 = vmatpush1.msra.mxu0 %v4098_v53  ;;  %v4081_v49 = vsel %vm3740_vm2, %v4075_v36, %v4079_v30  ;;  %v4134_v31 = vld [vmem:[%s10144_s9 + $0x10] sm:$0xff] }
 0x9d7   : > { %4162 = vmatprep.subr.mxu0 %v4081_v49  ;;  %v4271_v49 = vld [vmem:[%s10999_s19] sm:$0xff] }
 0x9d8   : > { %v4063_v7 = vpop.permute.xlu0 %4062  ;;  %4163 = vmatpush1.msra.mxu0 %v4083_v2  ;;  %4835 = vmatprep.mubr.msk.f32.mxu1 %vm3362_vm0, %v4271_v49 }
 0x9d9   : > { %4164 = vmatprep.subr.mxu0 %v4080_v55  ;;  %v4059_v48 = vpop.permute.xlu1 %4058 }
 0x9da   : > { %v4067_v46 = vsel %vm2416_vm12, %v4055_v10, %v4059_v48  ;;  %4165 = vmatpush1.msra.mxu0 %v4082_v42  ;;  %v4065_v23 = vsel %vm2416_vm12, %v4059_v48, %v4063_v7 }
 0x9db   : > { %4166 = vmatprep.subr.mxu0 %v4065_v23 }
 0x9dc   : > { %v4047_v59 = vpop.permute.xlu0 %4046  ;;  %4167 = vmatpush1.msra.mxu0 %v4067_v46 }
 0x9dd   : > { %4168 = vmatprep.subr.mxu0 %v4064_v32  ;;  %v4043_v25 = vpop.permute.xlu1 %4042 }
 0x9de   : > { %v4051_v6 = vsel %vm2326_vm8, %v4039_v18, %v4043_v25  ;;  %4169 = vmatpush1.msra.mxu0 %v4066_v38  ;;  %v4049_v9 = vsel %vm2326_vm8, %v4043_v25, %v4047_v59 }
 0x9df   : > { %4170 = vmatprep.subr.mxu0 %v4049_v9 }
 0x9e0   : > { %v4031_v12 = vpop.permute.xlu0 %4030  ;;  %4171 = vmatpush1.msra.mxu0 %v4051_v6 }
 0x9e1   : > { %4172 = vmatprep.subr.mxu0 %v4048_v62  ;;  %v4027_v4 = vpop.permute.xlu1 %4026 }
 0x9e2   : > { %v4035_v5 = vsel %vm3667_vm3, %v4023_v37, %v4027_v4  ;;  %4173 = vmatpush1.msra.mxu0 %v4050_v16  ;;  %v4033_v56 = vsel %vm3667_vm3, %v4027_v4, %v4031_v12 }
 0x9e3   : > { %4174 = vmatprep.subr.mxu0 %v4033_v56  ;;  %v4272_v56 = vld [vmem:[%s10999_s19 + $0x8] sm:$0xff] }
 0x9e4   : > { %v4015_v45 = vpop.permute.xlu0 %4014  ;;  %4175 = vmatpush1.msra.mxu0 %v4035_v5 }
 0x9e5   : > { %4176 = vmatprep.subr.mxu0 %v4032_v20  ;;  %v4011_v50 = vpop.permute.xlu1 %4010  ;;  %v4388_v20 = vld [vmem:[%s11000_s11] sm:$0xff] }
 0x9e6   : > { %v4019_v52 = vsel %vm1786_vm11, %v9945_v29, %v4011_v50  ;;  %4177 = vmatpush1.msra.mxu0 %v4034_v24  ;;  %v4017_v33 = vsel %vm1786_vm11, %v4011_v50, %v4015_v45  ;;  %v4273_v45 = vld [vmem:[%s10999_s19 + $0x10] sm:$0xff] }
 0x9e7   : > { %4178 = vmatprep.subr.mxu0 %v4017_v33  ;;  %v4276_v33 = vld [vmem:[%s11001_s22 + $0x8] sm:$0xff] }
 0x9e8   : > { %v4127_v51 = vpop.permute.xlu0 %4126  ;;  %4179 = vmatpush1.msra.mxu0 %v4019_v52  ;;  %v4278_v52 = vld [vmem:[%s11001_s22 + $0x18] sm:$0xff] }
 0x9e9   : > { %4180 = vmatprep.subr.mxu0 %v4016_v27  ;;  %v4119_v19 = vpop.permute.xlu1 %4118  ;;  %v4277_v27 = vld [vmem:[%s11001_s22 + $0x10] sm:$0xff] }
 0x9ea   : > { %4181 = vmatpush1.msra.mxu0 %v4018_v61 }
 0x9eb   : > { %4182 = vmatprep.subr.mxu0 %v9885_v54 }
 0x9ec   : > { %v4121_v3 = vpop.permute.xlu0 %4120  ;;  %4183 = vmatpush1.msra.mxu0 %v9855_v35 }
 0x9ed   : > { %4184 = vmatprep.subr.mxu0 %v9853_v22  ;;  %v4123_v11 = vpop.permute.xlu1 %4122  ;;  %v4132_v22 = vld [vmem:[%s10144_s9] sm:$0xff] }
 0x9ee   : > { %v4131_v60 = vsel %vm3815_vm7, %v4119_v19, %v4123_v11  ;;  %4185 = vmatpush1.msra.mxu0 %v9821_v26  ;;  %v4129_v13 = vsel %vm3815_vm7, %v4123_v11, %v4127_v51  ;;  %v4135_v26 = vld [vmem:[%s10144_s9 + $0x18] sm:$0xff]  ;;  %v4275_v19 = vld [vmem:[%s11001_s22] sm:$0xff] }
 0x9ef   : > { %4214 = vmatprep.subr.mxu0 %v4129_v13 }
 0x9f0   : > { %v4117_v63 = vpop.permute.xlu0 %4116  ;;  %4215 = vmatpush2.msra.mxu0 %v4131_v60 }
 0x9f1   : > { %v4125_v47 = vpop.permute.xlu1 %4124  ;;  %v4130_v35 = vsel %vm3815_vm7, %v4117_v63, %v4121_v3 }
 0x9f2   : > { %v4128_v54 = vsel %vm3815_vm7, %v4121_v3, %v4125_v47 }
 0x9f3   : > { %4216 = vmatprep.subr.mxu0 %v4128_v54 }
 0x9f4   : > { %4217 = vmatpush2.msra.mxu0 %v4130_v35  ;;  %v4389_v35 = vld [vmem:[%s11000_s11 + $0x8] sm:$0xff] }
 0x9f5   : > { %4219 = vmatmul.mubr.f32.vlgmr.msra.gmra.mxu0 %v4132_v22 }
 0x9f6   : > { %4802 = vmatprep.mubr.msk.f32.mxu0 %vm3362_vm0, %v4135_v26 }
 0x9f9   : > { %4225 = vmatmul.mubr.f32.gmra.mxu0 %v4134_v31  ;;  %v4391_v31 = vld [vmem:[%s11004_s21 + $0x8] sm:$0xff] }
 0x9fd   : > { %v4141_v17 = vpop.permute.xlu0 %4140 }
 0x9fe   : > { %v4146_v1 = vpop.permute.xlu1 %4145 }
 0xab5   : > { %v4220_v10 = vpop.f32.mrf.mxu0 }
 0xab6   : > { %v4221_v44 = vadd.f32 %v4220_v10, %v4141_v17  ;;  %v4390_v10 = vld [vmem:[%s11004_s21] sm:$0xff] }
 0xab7   : > { %v4222_v18 = vpop.f32.mrf.mxu0 }
 0xab8   : > { %v4231_v15 = vmax.f32 %v4221_v44, 0.0  ;;  %v4223_v37 = vadd.f32 %v4222_v18, %v4141_v17 }
 0xab9   : > { %v4226_v39 = vpop.f32.mrf.mxu0 }
 0xaba   : > { %v4232_v29 = vmax.f32 %v4223_v37, 0.0  ;;  %4235 = vrot.lane.b32.xlu1 %v4231_v15, %s10998_s24  ;;  %v4227_v21 = vadd.f32 %v4226_v39, %v4146_v1 }
 0xabb   : > { %v4228_v0 = vpop.f32.mrf.mxu0 }
 0xabc   : > { %4239 = vrot.lane.b32.xlu0 %v4232_v29, %s10998_s24  ;;  %v4229_v8 = vadd.f32 %v4228_v0, %v4146_v1  ;;  %v4233_v43 = vmax.f32 %v4227_v21, 0.0  ;;  %v4479_v1 = vld [vmem:[%s11005_s2 + $0x8] sm:$0x3]  ;;  %v4478_v21 = vld [vmem:[%s11005_s2] sm:$0xff] }
 0xabe   : > { %4247 = vrot.lane.b32.xlu1 %v4231_v15, %s5049_s28  ;;  %v4234_v28 = vmax.f32 %v4229_v8, 0.0 }
 0xac0   : > { %4251 = vrot.lane.b32.xlu0 %v4232_v29, %s5049_s28 }
 0xac2   : > { %4237 = vrot.lane.b32.xlu1 %v4233_v43, %s10998_s24 }
 0xac4   : > { %4241 = vrot.lane.b32.xlu0 %v4234_v28, %s10998_s24 }
 0xac6   : > { %4249 = vrot.lane.b32.xlu1 %v4233_v43, %s5049_s28 }
 0xac8   : > { %4253 = vrot.lane.b32.xlu0 %v4234_v28, %s5049_s28  ;;  %s11007_s28 = sld [smem:[#allocation9_spill]] (%p5182_p4) }
 0xaca   : > { %4261 = vrot.lane.b32.xlu1 %v4233_v43, %s5051_s30 }
 0xacc   : > { %4265 = vrot.lane.b32.xlu0 %v4234_v28, %s5051_s30 }
 0xace   : > { %4259 = vrot.lane.b32.xlu1 %v4231_v15, %s5051_s30  ;;  %s4812_s24 = sshll.u32 (%p5182_p4), %s11007_s28, 3 }
 0xad0   : > { %4263 = vrot.lane.b32.xlu0 %v4232_v29, %s5051_s30  ;;  %s11002_s30 = sld [smem:[#allocation198_spill]] }
 0xad6   : > { %v4476_v26 = vld [vmem:[%s11002_s30] sm:$0xff]  ;;  %v4477_v29 = vld [vmem:[%s11002_s30 + $0x8] sm:$0x3] }
 0xb2c   : > { %v4236_v41 = vpop.permute.xlu1 %4235 }
 0xb2e   : > { %v4240_v34 = vpop.permute.xlu0 %4239 }
 0xb2f   : > { %v4243_v48 = vsel %vm1786_vm11, %v4236_v41, %v4240_v34 }
 0xb30   : > { %v4248_v14 = vpop.permute.xlu1 %4247  ;;  %v4245_v38 = vmax.f32 %v4231_v15, %v4243_v48 }
 0xb32   : > { %v4252_v40 = vpop.permute.xlu0 %4251 }
 0xb33   : > { %v4255_v59 = vsel %vm2326_vm8, %v4248_v14, %v4252_v40 }
 0xb34   : > { %v4238_v30 = vpop.permute.xlu1 %4237  ;;  %v4257_v6 = vmax.f32 %v4245_v38, %v4255_v59 }
 0xb36   : > { %v4242_v57 = vpop.permute.xlu0 %4241 }
 0xb37   : > { %v4244_v36 = vsel %vm1786_vm11, %v4238_v30, %v4242_v57  ;;  %vm4392_vm11 = vcmask 261120  }
 0xb38   : > { %v4250_v53 = vpop.permute.xlu1 %4249  ;;  %v4246_v55 = vmax.f32 %v4233_v43, %v4244_v36 }
 0xb3a   : > { %v4254_v2 = vpop.permute.xlu0 %4253 }
 0xb3b   : > { %v4256_v7 = vsel %vm2326_vm8, %v4250_v53, %v4254_v2  ;;  %vm4561_vm8 = vcmask 7168  }
 0xb3c   : > { %v4262_v42 = vpop.permute.xlu1 %4261  ;;  %v4258_v46 = vmax.f32 %v4246_v55, %v4256_v7 }
 0xb3e   : > { %v4266_v23 = vpop.permute.xlu0 %4265 }
 0xb3f   : > { %v4268_v32 = vsel %vm2416_vm12, %v4262_v42, %v4266_v23 }
 0xb40   : > { %v4270_v25 = vmax.f32 %v4258_v46, %v4268_v32  ;;  %v4260_v9 = vpop.permute.xlu1 %4259 }
 0xb42   : > { %v4264_v12 = vpop.permute.xlu0 %4263  ;;  %4283 = vrot.lane.b32.xlu1 %v4270_v25, %s5056_s14 }
 0xb43   : > { %v4267_v62 = vsel %vm2416_vm12, %v4260_v9, %v4264_v12 }
 0xb44   : > { %v4269_v16 = vmax.f32 %v4257_v6, %v4267_v62 }
 0xb46   : > { %4281 = vrot.lane.b32.xlu0 %v4269_v16, %s5056_s14  ;;  %s4574_s14 = scalar_lea.vmem (%p5182_p4), %s11008_s0, %s4812_s24 }
 0xbb4   : > { %v4284_v4 = vpop.permute.xlu1 %4283 }
 0xbb5   : > { %4831 = vmatprep.subr.mxu1 %v4284_v4 }
 0xbb6   : > { %4832 = vmatpush3.msra.mxu1 %v4284_v4 }
 0xbb8   : > { %v4282_v5 = vpop.permute.xlu0 %4281 }
 0xbb9   : > { %4833 = vmatprep.subr.mxu1 %v4282_v5 }
 0xbba   : > { %4834 = vmatpush3.msra.mxu1 %v4282_v5 }
 0xbbb   : > { %4836 = vmatmul.mubr.msk.f32.vlgmr.msra.gmra.mxu1 %vm3362_vm0, %v4272_v56 }
 0xbbc   : > { %4838 = vmatprep.mubr.msk.f32.mxu1 %vm3362_vm0, %v4273_v45 }
 0xbbf   : > { %4839 = vmatmul.mubr.msk.f32.gmra.mxu1 %vm3362_vm0, %v4274_v58 }
 0xbc0   : > { %4849 = vmatprep.mubr.msk.f32.mxu1 %vm4392_vm11, %v4388_v20 }
 0xc7b   : > { %v4837_v24 = vpop.f32.mrf.mxu1 }
 0xc7c   : > { %v4371_v11 = vadd.f32 %v4837_v24, %v4276_v33 }
 0xc7d   : > { %v4365_v50 = vpop.f32.mrf.mxu1 }
 0xc7e   : > { %v4366_v63 = vadd.f32 %v4365_v50, %v4275_v19  ;;  %v4385_v54 = vmax.f32 %v4371_v11, 0.0 }
 0xc7f   : > { %v4840_v51 = vpop.f32.mrf.mxu1 }
 0xc80   : > { %v4381_v61 = vadd.f32 %v4840_v51, %v4278_v52  ;;  %v4384_v22 = vmax.f32 %v4366_v63, 0.0 }
 0xc81   : > { %v4375_v3 = vpop.f32.mrf.mxu1 }
 0xc82   : > { %v4387_v60 = vmax.f32 %v4381_v61, 0.0  ;;  %v4376_v13 = vadd.f32 %v4375_v3, %v4277_v27 }
 0xc84   : > { %v4386_v47 = vmax.f32 %v4376_v13, 0.0  ;;  %4841 = vmatprep.subr.mxu1 %v4387_v60 }
 0xc85   : > { %4842 = vmatpush3.msra.mxu1 %v4387_v60 }
 0xc86   : > { %4843 = vmatprep.subr.mxu1 %v4386_v47 }
 0xc87   : > { %4844 = vmatpush3.msra.mxu1 %v4386_v47 }
 0xc88   : > { %4845 = vmatprep.subr.mxu1 %v4385_v54 }
 0xc89   : > { %4846 = vmatpush3.msra.mxu1 %v4385_v54 }
 0xc8a   : > { %4847 = vmatprep.subr.mxu1 %v4384_v22 }
 0xc8b   : > { %4848 = vmatpush3.msra.mxu1 %v4384_v22 }
 0xc8c   : > { %4850 = vmatmul.mubr.msk.f32.vlgmr.msra.gmra.mxu1 %vm4392_vm11, %v4389_v35 }
 0xc8d   : > { %4856 = vmatprep.mubr.msk.f32.mxu1 %vm3362_vm0, %v4476_v26 }
 0xd4c   : > { %v4851_v17 = vpop.f32.mrf.mxu1 }
 0xd4d   : > { %v4471_v44 = vadd.f32 %v4851_v17, %v4391_v31 }
 0xd4e   : > { %v4465_v18 = vpop.f32.mrf.mxu1 }
 0xd4f   : > { %v4475_v15 = vmax.f32 %v4471_v44, 0.0  ;;  %v4466_v37 = vadd.f32 %v4465_v18, %v4390_v10 }
 0xd51   : > { %v4474_v39 = vmax.f32 %v4466_v37, 0.0  ;;  %4852 = vmatprep.subr.mxu1 %v4475_v15 }
 0xd52   : > { %4853 = vmatpush3.msra.mxu1 %v4475_v15 }
 0xd53   : > { %4854 = vmatprep.subr.mxu1 %v4474_v39 }
 0xd54   : > { %4855 = vmatpush3.msra.mxu1 %v4474_v39 }
 0xd55   : > { %4857 = vmatmul.mubr.msk.f32.vlgmr.msra.gmra.mxu1 %vm3362_vm0, %v4477_v29 }
 0xe15   : > { %v4858_v0 = vpop.f32.mrf.mxu1 }
 0xe16   : > { %v4558_v8 = vadd.f32 %v4858_v0, %v4479_v1 }
 0xe17   : > { %v4552_v43 = vpop.f32.mrf.mxu1  ;;  %4572 = sbr.rel (!%p5182_p4) target bundleno = 3620 (0xe24), region = 96 }
 0xe18   : > { %v4563_v28 = vsel %vm4561_vm8, %v4558_v8, 0.0  ;;  %v4553_v41 = vadd.f32 %v4552_v43, %v4478_v21 }
 0xe19   : > { %4565 = vst [vmem:[%s553_s23 + $0x8] sm:$0x3] %v4563_v28 }
 0xe1a   : > { %v4562_v34 = vsel %vm4561_vm8, %v4553_v41, 0.0 }
 0xe1b   : > { %4564 = vst [vmem:[%s553_s23] sm:$0xff] %v4562_v34 }
 0xe20   : > { %v4607_v40 = vld [vmem:[%s553_s23 + $0x8] sm:$0xff] }
 0xe21   : > { %4608 = vst [vmem:[%s4574_s14 + $0x10] sm:$0xff] %v4607_v40 }
 0xe22   : > { %v4605_v14 = vld [vmem:[%s553_s23] sm:$0xff] }
 0xe23   : > { %4606 = vst [vmem:[%s4574_s14] sm:$0xff] %v4605_v14 }
 0xe24 PF: > { %s11009_s28 = sld [smem:[#allocation10_spill]] }
 0xe25   : > { %s11010_s26 = sld [smem:[#allocation8_spill]] }
 0xe26   : > { %s11011_s27 = sld [smem:[#allocation11_spill]] }
 0xe2a   : > { %p26_p6 = scmp.ge.s32.totalorder %s11009_s28, 4  }
 0xe2c   :  { %28 = sbr.rel (!%p26_p6) target bundleno = 13 (0xd), region = 161 }
 0xe31   :  { %4624 = vsyncpa [#allocation4], 1 }
 0xe32   :  { %4626 = vsyncpa [#allocation4 + $0x1], 1 }

</bundles_post_ra>
